<compile_context>
chip_gen: v5e
topology: v5e:2x2
jax: 0.10.0
libtpu: 0.0.40
codegen_flags: <defaults>
</compile_context>

<pallas_src>
import functools

import jax
import jax.numpy as jnp
from jax.experimental import pallas as pl
from jax.experimental.pallas import tpu as pltpu


# ----------------------------------------------------------------------------
# Fused kernel: all ConvBlocks + dense head for one batch element per grid step
# ----------------------------------------------------------------------------
def _fused_kernel(num_blocks, *refs):
    # refs layout:
    #   [0]                      x_ref      (1, H, W, Cin0)      NHWC input tile
    #   [1 + 2*i]                wb_ref_i   (9*Cin_i, 2*Cout_i)  packed conv weights
    #   [2 + 2*i]                prm_ref_i  (4, Cout_i)          rows: b3, b1, bn_scale, bn_shift
    #   [1 + 2*nb .. 4 + 2*nb]   w1h, b1h, w2t, b2c              dense head params
    #   [5 + 2*nb]               o_ref      (1, 3, 1)            output tile
    #   [6 + 2*nb ..]            pad_ref_i  (H+2, W+2, Cin_i)    VMEM padded-activation scratch
    x_ref = refs[0]
    blk_refs = refs[1:1 + 2 * num_blocks]
    w1h_ref, b1h_ref, w2t_ref, b2c_ref = refs[1 + 2 * num_blocks:5 + 2 * num_blocks]
    o_ref = refs[5 + 2 * num_blocks]
    pad_refs = refs[6 + 2 * num_blocks:]

    H = x_ref.shape[1]
    W = x_ref.shape[2]

    def conv_block(pad_ref, w_ref, prm_ref):
        cin = pad_ref.shape[2]
        cout = prm_ref.shape[1]
        xp = pad_ref[...]                               # (H+2, W+2, Cin)
        # 3x3 conv (+ center-tap 1x1 conv packed as extra output columns) on the MXU.
        acc = jnp.zeros((H * W, 2 * cout), jnp.float32)
        for dh in range(3):
            for dw in range(3):
                tap = xp[dh:dh + H, dw:dw + W, :].reshape(H * W, cin)
                wslab = w_ref[(dh * 3 + dw) * cin:(dh * 3 + dw + 1) * cin, :]
                acc = acc + jnp.dot(tap, wslab, preferred_element_type=jnp.float32)
        y3 = acc[:, :cout]                              # 3x3 branch (pre-bias)
        y1 = acc[:, cout:]                              # 1x1 branch (pre-bias)
        b3 = prm_ref[0:1, :]
        b1 = prm_ref[1:2, :]
        scale = prm_ref[2:3, :]
        shift = prm_ref[3:4, :]
        # dropout == identity (eval); BatchNorm folded to a per-channel affine.
        y = jnp.maximum(y3 + b3, 0.0) + (y1 + b1)
        return y * scale + shift                        # (H*W, Cout)

    cur = x_ref[0]                                      # (H, W, Cin0)
    feat = None
    for i in range(num_blocks):
        pad_ref = pad_refs[i]
        pad_ref[...] = jnp.zeros_like(pad_ref)          # padding=1 zero border (in-kernel)
        pad_ref[1:H + 1, 1:W + 1, :] = cur
        feat = conv_block(pad_ref, blk_refs[2 * i], blk_refs[2 * i + 1])
        cur = feat.reshape(H, W, feat.shape[1])

    # Dense head.  torch flattens NCHW (feature index = c*H*W + h*W + w); lw1 was
    # pre-arranged host-side as w1h[c] = (Dh, H*W), so contracting channel-by-channel
    # reproduces that ordering with no in-kernel transpose/reshape of `feat`.
    c_last = feat.shape[1]
    d_hidden = b1h_ref.shape[0]
    hcol = jnp.zeros((d_hidden, 1), jnp.float32)
    for c in range(c_last):
        hcol = hcol + jnp.dot(w1h_ref[c], feat[:, c:c + 1],
                              preferred_element_type=jnp.float32)
    hcol = jnp.maximum(hcol + b1h_ref[...], 0.0)        # dropout1 == identity (eval)
    ocol = jnp.dot(w2t_ref[...], hcol,
                   preferred_element_type=jnp.float32) + b2c_ref[...]
    o_ref[0] = ocol                                     # (3, 1)


# ----------------------------------------------------------------------------
# Wrapper: one pallas_call for the whole network
# ----------------------------------------------------------------------------
@jax.jit
def oakd3d_forward(x_nchw, packed_blocks, packed_head):
    """x_nchw: (N, 3, H, W) float32 -> (N, 3) float32 (eval-mode forward)."""
    x = jnp.transpose(x_nchw, (0, 2, 3, 1)).astype(jnp.float32)   # NCHW -> NHWC
    N, H, W, C0 = x.shape
    num_blocks = len(packed_blocks)
    w1h, b1h, w2t, b2c = packed_head

    flat_params = []
    in_specs = [pl.BlockSpec((1, H, W, C0), lambda n: (n, 0, 0, 0))]
    pad_channels = []
    cin = C0
    for wb, prm in packed_blocks:
        pad_channels.append(cin)
        flat_params += [wb, prm]
        in_specs.append(pl.BlockSpec(wb.shape, lambda n: (0, 0)))
        in_specs.append(pl.BlockSpec(prm.shape, lambda n: (0, 0)))
        cin = prm.shape[1]
    in_specs += [
        pl.BlockSpec(w1h.shape, lambda n: (0, 0, 0)),
        pl.BlockSpec(b1h.shape, lambda n: (0, 0)),
        pl.BlockSpec(w2t.shape, lambda n: (0, 0)),
        pl.BlockSpec(b2c.shape, lambda n: (0, 0)),
    ]
    scratch_shapes = [pltpu.VMEM((H + 2, W + 2, c), jnp.float32)
                      for c in pad_channels]

    out = pl.pallas_call(
        functools.partial(_fused_kernel, num_blocks),
        out_shape=jax.ShapeDtypeStruct((N, 3, 1), jnp.float32),
        grid=(N,),
        in_specs=in_specs,
        out_specs=pl.BlockSpec((1, 3, 1), lambda n: (n, 0, 0)),
        scratch_shapes=scratch_shapes,
        compiler_params=pltpu.CompilerParams(
            dimension_semantics=("parallel",)),
    )(x, *flat_params, w1h, b1h, w2t, b2c)
    return out.reshape(N, 3)


# ----------------------------------------------------------------------------
# Parameter construction (deterministic, synthetic, PyTorch layouts) + packing
# ----------------------------------------------------------------------------
def init_params(key, img_size, conv_sizes, dense_hidden_size):
    H, W = img_size
    cin = 3
    eps = 1e-5
    blocks = []
    for cout in conv_sizes:
        key, k1, k2, k3, k4, k5, k6, k7, k8 = jax.random.split(key, 9)
        w3 = jax.random.normal(k1, (cout, cin, 3, 3), jnp.float32) * 0.1     # OIHW
        b3 = jax.random.normal(k2, (cout,), jnp.float32) * 0.1
        w1 = jax.random.normal(k3, (cout, cin, 1, 1), jnp.float32) * 0.1     # OIHW
        b1 = jax.random.normal(k4, (cout,), jnp.float32) * 0.1
        gamma = 1.0 + 0.1 * jax.random.normal(k5, (cout,), jnp.float32)
        beta = 0.1 * jax.random.normal(k6, (cout,), jnp.float32)
        running_mean = 0.1 * jax.random.normal(k7, (cout,), jnp.float32)
        running_var = 0.5 + jnp.abs(jax.random.normal(k8, (cout,), jnp.float32))
        # TODO(synk): BatchNorm/Dropout implemented in eval mode only (running
        # stats folded to a per-channel affine; dropout == identity).
        scale = gamma / jnp.sqrt(running_var + eps)
        shift = beta - running_mean * scale
        blocks.append(dict(w3=w3, b3=b3, w1=w1, b1=b1, scale=scale, shift=shift))
        cin = cout
    n_features = H * W * cin          # conv k=3, s=1, p=1 keeps the spatial size
    key, k1, k2, k3, k4 = jax.random.split(key, 5)
    head = dict(
        lw1=jax.random.normal(k1, (dense_hidden_size, n_features), jnp.float32) * 0.02,
        lb1=jax.random.normal(k2, (dense_hidden_size,), jnp.float32) * 0.02,
        lw2=jax.random.normal(k3, (3, dense_hidden_size), jnp.float32) * 0.02,
        lb2=jax.random.normal(k4, (3,), jnp.float32) * 0.02,
    )
    return blocks, head


def pack_params(img_size, blocks, head):
    """Rearrange torch-layout weights into the fused kernel's operand layout."""
    H, W = img_size
    packed_blocks = []
    for blk in blocks:
        w3, w1 = blk["w3"], blk["w1"]                  # (O, I, 3, 3), (O, I, 1, 1)
        cout, cin = w3.shape[0], w3.shape[1]
        # rows ordered tap-major ((dh*3+dw)*Cin + ci), matching the kernel's taps
        w3_r = jnp.transpose(w3, (2, 3, 1, 0)).reshape(9 * cin, cout)
        # 1x1 conv as extra output columns, non-zero on the center tap only
        w1_r = jnp.zeros((9 * cin, cout), jnp.float32)
        w1_r = w1_r.at[4 * cin:5 * cin, :].set(w1[:, :, 0, 0].T)
        wb = jnp.concatenate([w3_r, w1_r], axis=1)                         # (9*Cin, 2*Cout)
        prm = jnp.stack([blk["b3"], blk["b1"], blk["scale"], blk["shift"]], axis=0)
        packed_blocks.append((wb, prm))

    c_last = blocks[-1]["w3"].shape[0]
    d_hidden = head["lw1"].shape[0]
    # torch flatten on NCHW: feature index = c*H*W + p  ->  w1h[c, d, p]
    w1h = head["lw1"].reshape(d_hidden, c_last, H * W).transpose(1, 0, 2)  # (C, Dh, H*W)
    b1h = head["lb1"].reshape(d_hidden, 1)
    w2t = head["lw2"]                                                      # (3, Dh)
    b2c = head["lb2"].reshape(3, 1)
    return packed_blocks, (w1h, b1h, w2t, b2c)


# ----------------------------------------------------------------------------
# Pure-JAX (non-Pallas) reference of the PyTorch module, for a self-check
# ----------------------------------------------------------------------------
def reference_forward(x_nchw, blocks, head):
    prec = jax.lax.Precision.HIGHEST
    y = x_nchw.astype(jnp.float32)
    for blk in blocks:
        y1 = jax.lax.conv_general_dilated(
            y, blk["w3"], window_strides=(1, 1), padding=((1, 1), (1, 1)),
            dimension_numbers=("NCHW", "OIHW", "NCHW"), precision=prec)
        y1 = jnp.maximum(y1 + blk["b3"][None, :, None, None], 0.0)
        y2 = jax.lax.conv_general_dilated(
            y, blk["w1"], window_strides=(1, 1), padding=((0, 0), (0, 0)),
            dimension_numbers=("NCHW", "OIHW", "NCHW"), precision=prec)
        y2 = y2 + blk["b1"][None, :, None, None]
        y = (y1 + y2) * blk["scale"][None, :, None, None] + blk["shift"][None, :, None, None]
    f = y.reshape(y.shape[0], -1)                       # torch.nn.Flatten on NCHW
    h = jnp.maximum(jnp.dot(f, head["lw1"].T, precision=prec) + head["lb1"], 0.0)
    return jnp.dot(h, head["lw2"].T, precision=prec) + head["lb2"]


if __name__ == "__main__":
    img_size = (16, 16)
    conv_sizes = [8, 16]
    dense_hidden = 32
    batch = 2

    key = jax.random.PRNGKey(0)
    key, xkey = jax.random.split(key)
    x = jax.random.normal(xkey, (batch, 3, img_size[0], img_size[1]), jnp.float32)

    blocks, head = init_params(key, img_size, conv_sizes, dense_hidden)
    packed_blocks, packed_head = pack_params(img_size, blocks, head)

    out = oakd3d_forward(x, packed_blocks, packed_head)
    out = jax.block_until_ready(out)
    assert out.shape == (batch, 3), out.shape
    assert out.dtype == jnp.float32

    ref = reference_forward(x, blocks, head)
    max_err = float(jnp.max(jnp.abs(out - ref)))
    assert max_err < 5e-3, f"kernel/reference mismatch: max abs err {max_err}"

    print("KERNEL_OK")
</pallas_src>

<mosaic_0001>
module attributes {stable_mosaic.version = 11 : i64} {
  func.func @_fused_kernel(%arg0: i32, %arg1: memref<1x16x16x3xf32, #tpu.memory_space<vmem>>, %arg2: memref<27x16xf32, #tpu.memory_space<vmem>>, %arg3: memref<4x8xf32, #tpu.memory_space<vmem>>, %arg4: memref<72x32xf32, #tpu.memory_space<vmem>>, %arg5: memref<4x16xf32, #tpu.memory_space<vmem>>, %arg6: memref<16x32x256xf32, #tpu.memory_space<vmem>>, %arg7: memref<32x1xf32, #tpu.memory_space<vmem>>, %arg8: memref<3x32xf32, #tpu.memory_space<vmem>>, %arg9: memref<3x1xf32, #tpu.memory_space<vmem>>, %arg10: memref<1x3x1xf32, #tpu.memory_space<vmem>>, %arg11: memref<18x18x3xf32, #tpu.memory_space<vmem>>, %arg12: memref<18x18x8xf32, #tpu.memory_space<vmem>>) attributes {dimension_semantics = [#tpu.dimension_semantics<parallel>], iteration_bounds = array<i64: 2>, scalar_prefetch = 0 : i64, scratch_operands = 2 : i64, tpu.core_type = #tpu.core_type<tc>, window_params = [{transform_indices = @transform_0, window_bounds = array<i64: 1, 16, 16, 3>}, {pipeline_mode = #tpu.pipeline_mode<synchronous>, transform_indices = @transform_1, window_bounds = array<i64: 27, 16>}, {pipeline_mode = #tpu.pipeline_mode<synchronous>, transform_indices = @transform_2, window_bounds = array<i64: 4, 8>}, {pipeline_mode = #tpu.pipeline_mode<synchronous>, transform_indices = @transform_3, window_bounds = array<i64: 72, 32>}, {pipeline_mode = #tpu.pipeline_mode<synchronous>, transform_indices = @transform_4, window_bounds = array<i64: 4, 16>}, {pipeline_mode = #tpu.pipeline_mode<synchronous>, transform_indices = @transform_5, window_bounds = array<i64: 16, 32, 256>}, {pipeline_mode = #tpu.pipeline_mode<synchronous>, transform_indices = @transform_6, window_bounds = array<i64: 32, 1>}, {pipeline_mode = #tpu.pipeline_mode<synchronous>, transform_indices = @transform_7, window_bounds = array<i64: 3, 32>}, {pipeline_mode = #tpu.pipeline_mode<synchronous>, transform_indices = @transform_8, window_bounds = array<i64: 3, 1>}, {transform_indices = @transform_9, window_bounds = array<i64: 1, 3, 1>}]} {
    %c0 = arith.constant 0 : index
    %c0_0 = arith.constant 0 : index
    %c0_1 = arith.constant 0 : index
    %c0_2 = arith.constant 0 : index
    %0 = vector.load %arg1[%c0, %c0_0, %c0_1, %c0_2] : memref<1x16x16x3xf32, #tpu.memory_space<vmem>>, vector<1x16x16x3xf32>
    %1 = vector.shape_cast %0 : vector<1x16x16x3xf32> to vector<16x16x3xf32>
    %cst = arith.constant 0.000000e+00 : f32
    %2 = vector.broadcast %cst : f32 to vector<18x18x3xf32>
    %c0_3 = arith.constant 0 : index
    %c0_4 = arith.constant 0 : index
    %c0_5 = arith.constant 0 : index
    %3 = vector.load %arg11[%c0_3, %c0_4, %c0_5] : memref<18x18x3xf32, #tpu.memory_space<vmem>>, vector<18x18x3xf32>
    tpu.vector_store %arg11[%c0_3, %c0_4, %c0_5], %2 {strides = array<i32>} : memref<18x18x3xf32, #tpu.memory_space<vmem>>, vector<18x18x3xf32>,
    %c1 = arith.constant 1 : index
    %c1_6 = arith.constant 1 : index
    %c0_7 = arith.constant 0 : index
    %4 = vector.load %arg11[%c1, %c1_6, %c0_7] : memref<18x18x3xf32, #tpu.memory_space<vmem>>, vector<16x16x3xf32>
    tpu.vector_store %arg11[%c1, %c1_6, %c0_7], %1 {strides = array<i32>} : memref<18x18x3xf32, #tpu.memory_space<vmem>>, vector<16x16x3xf32>,
    %c0_8 = arith.constant 0 : index
    %c0_9 = arith.constant 0 : index
    %c0_10 = arith.constant 0 : index
    %5 = vector.load %arg11[%c0_8, %c0_9, %c0_10] : memref<18x18x3xf32, #tpu.memory_space<vmem>>, vector<18x18x3xf32>
    %cst_11 = arith.constant 0.000000e+00 : f32
    %6 = vector.broadcast %cst_11 : f32 to vector<256x16xf32>
    %7 = vector.extract_strided_slice %5 {offsets = [0, 0, 0], sizes = [16, 16, 3], strides = [1, 1, 1]} : vector<18x18x3xf32> to vector<16x16x3xf32>
    %8 = vector.shape_cast %7 : vector<16x16x3xf32> to vector<256x3xf32>
    %c0_12 = arith.constant 0 : index
    %c0_13 = arith.constant 0 : index
    %9 = vector.load %arg2[%c0_12, %c0_13] : memref<27x16xf32, #tpu.memory_space<vmem>>, vector<3x16xf32>
    %cst_14 = arith.constant dense<0.000000e+00> : vector<256x16xf32>
    %10 = tpu.matmul %8, %9, %cst_14 {dimension_numbers = #tpu.dot_dimension_numbers<[1], [0], [0], [1], [0, 0, 1, 1], [], []>} : vector<256x3xf32>, vector<3x16xf32>, vector<256x16xf32> -> vector<256x16xf32>
    %11 = arith.addf %6, %10 : vector<256x16xf32>
    %12 = vector.extract_strided_slice %5 {offsets = [0, 1, 0], sizes = [16, 16, 3], strides = [1, 1, 1]} : vector<18x18x3xf32> to vector<16x16x3xf32>
    %13 = vector.shape_cast %12 : vector<16x16x3xf32> to vector<256x3xf32>
    %c3 = arith.constant 3 : index
    %c0_15 = arith.constant 0 : index
    %14 = vector.load %arg2[%c3, %c0_15] : memref<27x16xf32, #tpu.memory_space<vmem>>, vector<3x16xf32>
    %cst_16 = arith.constant dense<0.000000e+00> : vector<256x16xf32>
    %15 = tpu.matmul %13, %14, %cst_16 {dimension_numbers = #tpu.dot_dimension_numbers<[1], [0], [0], [1], [0, 0, 1, 1], [], []>} : vector<256x3xf32>, vector<3x16xf32>, vector<256x16xf32> -> vector<256x16xf32>
    %16 = arith.addf %11, %15 : vector<256x16xf32>
    %17 = vector.extract_strided_slice %5 {offsets = [0, 2, 0], sizes = [16, 16, 3], strides = [1, 1, 1]} : vector<18x18x3xf32> to vector<16x16x3xf32>
    %18 = vector.shape_cast %17 : vector<16x16x3xf32> to vector<256x3xf32>
    %c6 = arith.constant 6 : index
    %c0_17 = arith.constant 0 : index
    %19 = vector.load %arg2[%c6, %c0_17] : memref<27x16xf32, #tpu.memory_space<vmem>>, vector<3x16xf32>
    %cst_18 = arith.constant dense<0.000000e+00> : vector<256x16xf32>
    %20 = tpu.matmul %18, %19, %cst_18 {dimension_numbers = #tpu.dot_dimension_numbers<[1], [0], [0], [1], [0, 0, 1, 1], [], []>} : vector<256x3xf32>, vector<3x16xf32>, vector<256x16xf32> -> vector<256x16xf32>
    %21 = arith.addf %16, %20 : vector<256x16xf32>
    %22 = vector.extract_strided_slice %5 {offsets = [1, 0, 0], sizes = [16, 16, 3], strides = [1, 1, 1]} : vector<18x18x3xf32> to vector<16x16x3xf32>
    %23 = vector.shape_cast %22 : vector<16x16x3xf32> to vector<256x3xf32>
    %c9 = arith.constant 9 : index
    %c0_19 = arith.constant 0 : index
    %24 = vector.load %arg2[%c9, %c0_19] : memref<27x16xf32, #tpu.memory_space<vmem>>, vector<3x16xf32>
    %cst_20 = arith.constant dense<0.000000e+00> : vector<256x16xf32>
    %25 = tpu.matmul %23, %24, %cst_20 {dimension_numbers = #tpu.dot_dimension_numbers<[1], [0], [0], [1], [0, 0, 1, 1], [], []>} : vector<256x3xf32>, vector<3x16xf32>, vector<256x16xf32> -> vector<256x16xf32>
    %26 = arith.addf %21, %25 : vector<256x16xf32>
    %27 = vector.extract_strided_slice %5 {offsets = [1, 1, 0], sizes = [16, 16, 3], strides = [1, 1, 1]} : vector<18x18x3xf32> to vector<16x16x3xf32>
    %28 = vector.shape_cast %27 : vector<16x16x3xf32> to vector<256x3xf32>
    %c12 = arith.constant 12 : index
    %c0_21 = arith.constant 0 : index
    %29 = vector.load %arg2[%c12, %c0_21] : memref<27x16xf32, #tpu.memory_space<vmem>>, vector<3x16xf32>
    %cst_22 = arith.constant dense<0.000000e+00> : vector<256x16xf32>
    %30 = tpu.matmul %28, %29, %cst_22 {dimension_numbers = #tpu.dot_dimension_numbers<[1], [0], [0], [1], [0, 0, 1, 1], [], []>} : vector<256x3xf32>, vector<3x16xf32>, vector<256x16xf32> -> vector<256x16xf32>
    %31 = arith.addf %26, %30 : vector<256x16xf32>
    %32 = vector.extract_strided_slice %5 {offsets = [1, 2, 0], sizes = [16, 16, 3], strides = [1, 1, 1]} : vector<18x18x3xf32> to vector<16x16x3xf32>
    %33 = vector.shape_cast %32 : vector<16x16x3xf32> to vector<256x3xf32>
    %c15 = arith.constant 15 : index
    %c0_23 = arith.constant 0 : index
    %34 = vector.load %arg2[%c15, %c0_23] : memref<27x16xf32, #tpu.memory_space<vmem>>, vector<3x16xf32>
    %cst_24 = arith.constant dense<0.000000e+00> : vector<256x16xf32>
    %35 = tpu.matmul %33, %34, %cst_24 {dimension_numbers = #tpu.dot_dimension_numbers<[1], [0], [0], [1], [0, 0, 1, 1], [], []>} : vector<256x3xf32>, vector<3x16xf32>, vector<256x16xf32> -> vector<256x16xf32>
    %36 = arith.addf %31, %35 : vector<256x16xf32>
    %37 = vector.extract_strided_slice %5 {offsets = [2, 0, 0], sizes = [16, 16, 3], strides = [1, 1, 1]} : vector<18x18x3xf32> to vector<16x16x3xf32>
    %38 = vector.shape_cast %37 : vector<16x16x3xf32> to vector<256x3xf32>
    %c18 = arith.constant 18 : index
    %c0_25 = arith.constant 0 : index
    %39 = vector.load %arg2[%c18, %c0_25] : memref<27x16xf32, #tpu.memory_space<vmem>>, vector<3x16xf32>
    %cst_26 = arith.constant dense<0.000000e+00> : vector<256x16xf32>
    %40 = tpu.matmul %38, %39, %cst_26 {dimension_numbers = #tpu.dot_dimension_numbers<[1], [0], [0], [1], [0, 0, 1, 1], [], []>} : vector<256x3xf32>, vector<3x16xf32>, vector<256x16xf32> -> vector<256x16xf32>
    %41 = arith.addf %36, %40 : vector<256x16xf32>
    %42 = vector.extract_strided_slice %5 {offsets = [2, 1, 0], sizes = [16, 16, 3], strides = [1, 1, 1]} : vector<18x18x3xf32> to vector<16x16x3xf32>
    %43 = vector.shape_cast %42 : vector<16x16x3xf32> to vector<256x3xf32>
    %c21 = arith.constant 21 : index
    %c0_27 = arith.constant 0 : index
    %44 = vector.load %arg2[%c21, %c0_27] : memref<27x16xf32, #tpu.memory_space<vmem>>, vector<3x16xf32>
    %cst_28 = arith.constant dense<0.000000e+00> : vector<256x16xf32>
    %45 = tpu.matmul %43, %44, %cst_28 {dimension_numbers = #tpu.dot_dimension_numbers<[1], [0], [0], [1], [0, 0, 1, 1], [], []>} : vector<256x3xf32>, vector<3x16xf32>, vector<256x16xf32> -> vector<256x16xf32>
    %46 = arith.addf %41, %45 : vector<256x16xf32>
    %47 = vector.extract_strided_slice %5 {offsets = [2, 2, 0], sizes = [16, 16, 3], strides = [1, 1, 1]} : vector<18x18x3xf32> to vector<16x16x3xf32>
    %48 = vector.shape_cast %47 : vector<16x16x3xf32> to vector<256x3xf32>
    %c24 = arith.constant 24 : index
    %c0_29 = arith.constant 0 : index
    %49 = vector.load %arg2[%c24, %c0_29] : memref<27x16xf32, #tpu.memory_space<vmem>>, vector<3x16xf32>
    %cst_30 = arith.constant dense<0.000000e+00> : vector<256x16xf32>
    %50 = tpu.matmul %48, %49, %cst_30 {dimension_numbers = #tpu.dot_dimension_numbers<[1], [0], [0], [1], [0, 0, 1, 1], [], []>} : vector<256x3xf32>, vector<3x16xf32>, vector<256x16xf32> -> vector<256x16xf32>
    %51 = arith.addf %46, %50 : vector<256x16xf32>
    %52 = vector.extract_strided_slice %51 {offsets = [0, 0], sizes = [256, 8], strides = [1, 1]} : vector<256x16xf32> to vector<256x8xf32>
    %53 = vector.extract_strided_slice %51 {offsets = [0, 8], sizes = [256, 8], strides = [1, 1]} : vector<256x16xf32> to vector<256x8xf32>
    %c0_31 = arith.constant 0 : index
    %c0_32 = arith.constant 0 : index
    %54 = vector.load %arg3[%c0_31, %c0_32] : memref<4x8xf32, #tpu.memory_space<vmem>>, vector<1x8xf32>
    %c1_33 = arith.constant 1 : index
    %c0_34 = arith.constant 0 : index
    %55 = vector.load %arg3[%c1_33, %c0_34] : memref<4x8xf32, #tpu.memory_space<vmem>>, vector<1x8xf32>
    %c2 = arith.constant 2 : index
    %c0_35 = arith.constant 0 : index
    %56 = vector.load %arg3[%c2, %c0_35] : memref<4x8xf32, #tpu.memory_space<vmem>>, vector<1x8xf32>
    %c3_36 = arith.constant 3 : index
    %c0_37 = arith.constant 0 : index
    %57 = vector.load %arg3[%c3_36, %c0_37] : memref<4x8xf32, #tpu.memory_space<vmem>>, vector<1x8xf32>
    %58 = vector.broadcast %54 : vector<1x8xf32> to vector<256x8xf32>
    %59 = arith.addf %52, %58 : vector<256x8xf32>
    %cst_38 = arith.constant 0.000000e+00 : f32
    %60 = vector.broadcast %cst_38 : f32 to vector<256x8xf32>
    %61 = arith.maximumf %59, %60 : vector<256x8xf32>
    %62 = vector.broadcast %55 : vector<1x8xf32> to vector<256x8xf32>
    %63 = arith.addf %53, %62 : vector<256x8xf32>
    %64 = arith.addf %61, %63 : vector<256x8xf32>
    %65 = vector.broadcast %56 : vector<1x8xf32> to vector<256x8xf32>
    %66 = arith.mulf %64, %65 : vector<256x8xf32>
    %67 = vector.broadcast %57 : vector<1x8xf32> to vector<256x8xf32>
    %68 = arith.addf %66, %67 : vector<256x8xf32>
    %69 = vector.shape_cast %68 : vector<256x8xf32> to vector<16x16x8xf32>
    %cst_39 = arith.constant 0.000000e+00 : f32
    %70 = vector.broadcast %cst_39 : f32 to vector<18x18x8xf32>
    %c0_40 = arith.constant 0 : index
    %c0_41 = arith.constant 0 : index
    %c0_42 = arith.constant 0 : index
    %71 = vector.load %arg12[%c0_40, %c0_41, %c0_42] : memref<18x18x8xf32, #tpu.memory_space<vmem>>, vector<18x18x8xf32>
    tpu.vector_store %arg12[%c0_40, %c0_41, %c0_42], %70 {strides = array<i32>} : memref<18x18x8xf32, #tpu.memory_space<vmem>>, vector<18x18x8xf32>,
    %c1_43 = arith.constant 1 : index
    %c1_44 = arith.constant 1 : index
    %c0_45 = arith.constant 0 : index
    %72 = vector.load %arg12[%c1_43, %c1_44, %c0_45] : memref<18x18x8xf32, #tpu.memory_space<vmem>>, vector<16x16x8xf32>
    tpu.vector_store %arg12[%c1_43, %c1_44, %c0_45], %69 {strides = array<i32>} : memref<18x18x8xf32, #tpu.memory_space<vmem>>, vector<16x16x8xf32>,
    %c0_46 = arith.constant 0 : index
    %c0_47 = arith.constant 0 : index
    %c0_48 = arith.constant 0 : index
    %73 = vector.load %arg12[%c0_46, %c0_47, %c0_48] : memref<18x18x8xf32, #tpu.memory_space<vmem>>, vector<18x18x8xf32>
    %cst_49 = arith.constant 0.000000e+00 : f32
    %74 = vector.broadcast %cst_49 : f32 to vector<256x32xf32>
    %75 = vector.extract_strided_slice %73 {offsets = [0, 0, 0], sizes = [16, 16, 8], strides = [1, 1, 1]} : vector<18x18x8xf32> to vector<16x16x8xf32>
    %76 = vector.shape_cast %75 : vector<16x16x8xf32> to vector<256x8xf32>
    %c0_50 = arith.constant 0 : index
    %c0_51 = arith.constant 0 : index
    %77 = vector.load %arg4[%c0_50, %c0_51] : memref<72x32xf32, #tpu.memory_space<vmem>>, vector<8x32xf32>
    %cst_52 = arith.constant dense<0.000000e+00> : vector<256x32xf32>
    %78 = tpu.matmul %76, %77, %cst_52 {dimension_numbers = #tpu.dot_dimension_numbers<[1], [0], [0], [1], [0, 0, 1, 1], [], []>} : vector<256x8xf32>, vector<8x32xf32>, vector<256x32xf32> -> vector<256x32xf32>
    %79 = arith.addf %74, %78 : vector<256x32xf32>
    %80 = vector.extract_strided_slice %73 {offsets = [0, 1, 0], sizes = [16, 16, 8], strides = [1, 1, 1]} : vector<18x18x8xf32> to vector<16x16x8xf32>
    %81 = vector.shape_cast %80 : vector<16x16x8xf32> to vector<256x8xf32>
    %c8 = arith.constant 8 : index
    %c0_53 = arith.constant 0 : index
    %82 = vector.load %arg4[%c8, %c0_53] : memref<72x32xf32, #tpu.memory_space<vmem>>, vector<8x32xf32>
    %cst_54 = arith.constant dense<0.000000e+00> : vector<256x32xf32>
    %83 = tpu.matmul %81, %82, %cst_54 {dimension_numbers = #tpu.dot_dimension_numbers<[1], [0], [0], [1], [0, 0, 1, 1], [], []>} : vector<256x8xf32>, vector<8x32xf32>, vector<256x32xf32> -> vector<256x32xf32>
    %84 = arith.addf %79, %83 : vector<256x32xf32>
    %85 = vector.extract_strided_slice %73 {offsets = [0, 2, 0], sizes = [16, 16, 8], strides = [1, 1, 1]} : vector<18x18x8xf32> to vector<16x16x8xf32>
    %86 = vector.shape_cast %85 : vector<16x16x8xf32> to vector<256x8xf32>
    %c16 = arith.constant 16 : index
    %c0_55 = arith.constant 0 : index
    %87 = vector.load %arg4[%c16, %c0_55] : memref<72x32xf32, #tpu.memory_space<vmem>>, vector<8x32xf32>
    %cst_56 = arith.constant dense<0.000000e+00> : vector<256x32xf32>
    %88 = tpu.matmul %86, %87, %cst_56 {dimension_numbers = #tpu.dot_dimension_numbers<[1], [0], [0], [1], [0, 0, 1, 1], [], []>} : vector<256x8xf32>, vector<8x32xf32>, vector<256x32xf32> -> vector<256x32xf32>
    %89 = arith.addf %84, %88 : vector<256x32xf32>
    %90 = vector.extract_strided_slice %73 {offsets = [1, 0, 0], sizes = [16, 16, 8], strides = [1, 1, 1]} : vector<18x18x8xf32> to vector<16x16x8xf32>
    %91 = vector.shape_cast %90 : vector<16x16x8xf32> to vector<256x8xf32>
    %c24_57 = arith.constant 24 : index
    %c0_58 = arith.constant 0 : index
    %92 = vector.load %arg4[%c24_57, %c0_58] : memref<72x32xf32, #tpu.memory_space<vmem>>, vector<8x32xf32>
    %cst_59 = arith.constant dense<0.000000e+00> : vector<256x32xf32>
    %93 = tpu.matmul %91, %92, %cst_59 {dimension_numbers = #tpu.dot_dimension_numbers<[1], [0], [0], [1], [0, 0, 1, 1], [], []>} : vector<256x8xf32>, vector<8x32xf32>, vector<256x32xf32> -> vector<256x32xf32>
    %94 = arith.addf %89, %93 : vector<256x32xf32>
    %95 = vector.extract_strided_slice %73 {offsets = [1, 1, 0], sizes = [16, 16, 8], strides = [1, 1, 1]} : vector<18x18x8xf32> to vector<16x16x8xf32>
    %96 = vector.shape_cast %95 : vector<16x16x8xf32> to vector<256x8xf32>
    %c32 = arith.constant 32 : index
    %c0_60 = arith.constant 0 : index
    %97 = vector.load %arg4[%c32, %c0_60] : memref<72x32xf32, #tpu.memory_space<vmem>>, vector<8x32xf32>
    %cst_61 = arith.constant dense<0.000000e+00> : vector<256x32xf32>
    %98 = tpu.matmul %96, %97, %cst_61 {dimension_numbers = #tpu.dot_dimension_numbers<[1], [0], [0], [1], [0, 0, 1, 1], [], []>} : vector<256x8xf32>, vector<8x32xf32>, vector<256x32xf32> -> vector<256x32xf32>
    %99 = arith.addf %94, %98 : vector<256x32xf32>
    %100 = vector.extract_strided_slice %73 {offsets = [1, 2, 0], sizes = [16, 16, 8], strides = [1, 1, 1]} : vector<18x18x8xf32> to vector<16x16x8xf32>
    %101 = vector.shape_cast %100 : vector<16x16x8xf32> to vector<256x8xf32>
    %c40 = arith.constant 40 : index
    %c0_62 = arith.constant 0 : index
    %102 = vector.load %arg4[%c40, %c0_62] : memref<72x32xf32, #tpu.memory_space<vmem>>, vector<8x32xf32>
    %cst_63 = arith.constant dense<0.000000e+00> : vector<256x32xf32>
    %103 = tpu.matmul %101, %102, %cst_63 {dimension_numbers = #tpu.dot_dimension_numbers<[1], [0], [0], [1], [0, 0, 1, 1], [], []>} : vector<256x8xf32>, vector<8x32xf32>, vector<256x32xf32> -> vector<256x32xf32>
    %104 = arith.addf %99, %103 : vector<256x32xf32>
    %105 = vector.extract_strided_slice %73 {offsets = [2, 0, 0], sizes = [16, 16, 8], strides = [1, 1, 1]} : vector<18x18x8xf32> to vector<16x16x8xf32>
    %106 = vector.shape_cast %105 : vector<16x16x8xf32> to vector<256x8xf32>
    %c48 = arith.constant 48 : index
    %c0_64 = arith.constant 0 : index
    %107 = vector.load %arg4[%c48, %c0_64] : memref<72x32xf32, #tpu.memory_space<vmem>>, vector<8x32xf32>
    %cst_65 = arith.constant dense<0.000000e+00> : vector<256x32xf32>
    %108 = tpu.matmul %106, %107, %cst_65 {dimension_numbers = #tpu.dot_dimension_numbers<[1], [0], [0], [1], [0, 0, 1, 1], [], []>} : vector<256x8xf32>, vector<8x32xf32>, vector<256x32xf32> -> vector<256x32xf32>
    %109 = arith.addf %104, %108 : vector<256x32xf32>
    %110 = vector.extract_strided_slice %73 {offsets = [2, 1, 0], sizes = [16, 16, 8], strides = [1, 1, 1]} : vector<18x18x8xf32> to vector<16x16x8xf32>
    %111 = vector.shape_cast %110 : vector<16x16x8xf32> to vector<256x8xf32>
    %c56 = arith.constant 56 : index
    %c0_66 = arith.constant 0 : index
    %112 = vector.load %arg4[%c56, %c0_66] : memref<72x32xf32, #tpu.memory_space<vmem>>, vector<8x32xf32>
    %cst_67 = arith.constant dense<0.000000e+00> : vector<256x32xf32>
    %113 = tpu.matmul %111, %112, %cst_67 {dimension_numbers = #tpu.dot_dimension_numbers<[1], [0], [0], [1], [0, 0, 1, 1], [], []>} : vector<256x8xf32>, vector<8x32xf32>, vector<256x32xf32> -> vector<256x32xf32>
    %114 = arith.addf %109, %113 : vector<256x32xf32>
    %115 = vector.extract_strided_slice %73 {offsets = [2, 2, 0], sizes = [16, 16, 8], strides = [1, 1, 1]} : vector<18x18x8xf32> to vector<16x16x8xf32>
    %116 = vector.shape_cast %115 : vector<16x16x8xf32> to vector<256x8xf32>
    %c64 = arith.constant 64 : index
    %c0_68 = arith.constant 0 : index
    %117 = vector.load %arg4[%c64, %c0_68] : memref<72x32xf32, #tpu.memory_space<vmem>>, vector<8x32xf32>
    %cst_69 = arith.constant dense<0.000000e+00> : vector<256x32xf32>
    %118 = tpu.matmul %116, %117, %cst_69 {dimension_numbers = #tpu.dot_dimension_numbers<[1], [0], [0], [1], [0, 0, 1, 1], [], []>} : vector<256x8xf32>, vector<8x32xf32>, vector<256x32xf32> -> vector<256x32xf32>
    %119 = arith.addf %114, %118 : vector<256x32xf32>
    %120 = vector.extract_strided_slice %119 {offsets = [0, 0], sizes = [256, 16], strides = [1, 1]} : vector<256x32xf32> to vector<256x16xf32>
    %121 = vector.extract_strided_slice %119 {offsets = [0, 16], sizes = [256, 16], strides = [1, 1]} : vector<256x32xf32> to vector<256x16xf32>
    %c0_70 = arith.constant 0 : index
    %c0_71 = arith.constant 0 : index
    %122 = vector.load %arg5[%c0_70, %c0_71] : memref<4x16xf32, #tpu.memory_space<vmem>>, vector<1x16xf32>
    %c1_72 = arith.constant 1 : index
    %c0_73 = arith.constant 0 : index
    %123 = vector.load %arg5[%c1_72, %c0_73] : memref<4x16xf32, #tpu.memory_space<vmem>>, vector<1x16xf32>
    %c2_74 = arith.constant 2 : index
    %c0_75 = arith.constant 0 : index
    %124 = vector.load %arg5[%c2_74, %c0_75] : memref<4x16xf32, #tpu.memory_space<vmem>>, vector<1x16xf32>
    %c3_76 = arith.constant 3 : index
    %c0_77 = arith.constant 0 : index
    %125 = vector.load %arg5[%c3_76, %c0_77] : memref<4x16xf32, #tpu.memory_space<vmem>>, vector<1x16xf32>
    %126 = vector.broadcast %122 : vector<1x16xf32> to vector<256x16xf32>
    %127 = arith.addf %120, %126 : vector<256x16xf32>
    %cst_78 = arith.constant 0.000000e+00 : f32
    %128 = vector.broadcast %cst_78 : f32 to vector<256x16xf32>
    %129 = arith.maximumf %127, %128 : vector<256x16xf32>
    %130 = vector.broadcast %123 : vector<1x16xf32> to vector<256x16xf32>
    %131 = arith.addf %121, %130 : vector<256x16xf32>
    %132 = arith.addf %129, %131 : vector<256x16xf32>
    %133 = vector.broadcast %124 : vector<1x16xf32> to vector<256x16xf32>
    %134 = arith.mulf %132, %133 : vector<256x16xf32>
    %135 = vector.broadcast %125 : vector<1x16xf32> to vector<256x16xf32>
    %136 = arith.addf %134, %135 : vector<256x16xf32>
    %cst_79 = arith.constant 0.000000e+00 : f32
    %137 = vector.broadcast %cst_79 : f32 to vector<32x1xf32>
    %c0_80 = arith.constant 0 : index
    %c0_81 = arith.constant 0 : index
    %c0_82 = arith.constant 0 : index
    %138 = vector.load %arg6[%c0_80, %c0_81, %c0_82] : memref<16x32x256xf32, #tpu.memory_space<vmem>>, vector<1x32x256xf32>
    %139 = vector.shape_cast %138 : vector<1x32x256xf32> to vector<32x256xf32>
    %140 = vector.extract_strided_slice %136 {offsets = [0, 0], sizes = [256, 1], strides = [1, 1]} : vector<256x16xf32> to vector<256x1xf32>
    %cst_83 = arith.constant dense<0.000000e+00> : vector<32x1xf32>
    %141 = tpu.matmul %139, %140, %cst_83 {dimension_numbers = #tpu.dot_dimension_numbers<[1], [0], [0], [1], [0, 0, 1, 1], [], []>} : vector<32x256xf32>, vector<256x1xf32>, vector<32x1xf32> -> vector<32x1xf32>
    %142 = arith.addf %137, %141 : vector<32x1xf32>
    %c1_84 = arith.constant 1 : index
    %c0_85 = arith.constant 0 : index
    %c0_86 = arith.constant 0 : index
    %143 = vector.load %arg6[%c1_84, %c0_85, %c0_86] : memref<16x32x256xf32, #tpu.memory_space<vmem>>, vector<1x32x256xf32>
    %144 = vector.shape_cast %143 : vector<1x32x256xf32> to vector<32x256xf32>
    %145 = vector.extract_strided_slice %136 {offsets = [0, 1], sizes = [256, 1], strides = [1, 1]} : vector<256x16xf32> to vector<256x1xf32>
    %cst_87 = arith.constant dense<0.000000e+00> : vector<32x1xf32>
    %146 = tpu.matmul %144, %145, %cst_87 {dimension_numbers = #tpu.dot_dimension_numbers<[1], [0], [0], [1], [0, 0, 1, 1], [], []>} : vector<32x256xf32>, vector<256x1xf32>, vector<32x1xf32> -> vector<32x1xf32>
    %147 = arith.addf %142, %146 : vector<32x1xf32>
    %c2_88 = arith.constant 2 : index
    %c0_89 = arith.constant 0 : index
    %c0_90 = arith.constant 0 : index
    %148 = vector.load %arg6[%c2_88, %c0_89, %c0_90] : memref<16x32x256xf32, #tpu.memory_space<vmem>>, vector<1x32x256xf32>
    %149 = vector.shape_cast %148 : vector<1x32x256xf32> to vector<32x256xf32>
    %150 = vector.extract_strided_slice %136 {offsets = [0, 2], sizes = [256, 1], strides = [1, 1]} : vector<256x16xf32> to vector<256x1xf32>
    %cst_91 = arith.constant dense<0.000000e+00> : vector<32x1xf32>
    %151 = tpu.matmul %149, %150, %cst_91 {dimension_numbers = #tpu.dot_dimension_numbers<[1], [0], [0], [1], [0, 0, 1, 1], [], []>} : vector<32x256xf32>, vector<256x1xf32>, vector<32x1xf32> -> vector<32x1xf32>
    %152 = arith.addf %147, %151 : vector<32x1xf32>
    %c3_92 = arith.constant 3 : index
    %c0_93 = arith.constant 0 : index
    %c0_94 = arith.constant 0 : index
    %153 = vector.load %arg6[%c3_92, %c0_93, %c0_94] : memref<16x32x256xf32, #tpu.memory_space<vmem>>, vector<1x32x256xf32>
    %154 = vector.shape_cast %153 : vector<1x32x256xf32> to vector<32x256xf32>
    %155 = vector.extract_strided_slice %136 {offsets = [0, 3], sizes = [256, 1], strides = [1, 1]} : vector<256x16xf32> to vector<256x1xf32>
    %cst_95 = arith.constant dense<0.000000e+00> : vector<32x1xf32>
    %156 = tpu.matmul %154, %155, %cst_95 {dimension_numbers = #tpu.dot_dimension_numbers<[1], [0], [0], [1], [0, 0, 1, 1], [], []>} : vector<32x256xf32>, vector<256x1xf32>, vector<32x1xf32> -> vector<32x1xf32>
    %157 = arith.addf %152, %156 : vector<32x1xf32>
    %c4 = arith.constant 4 : index
    %c0_96 = arith.constant 0 : index
    %c0_97 = arith.constant 0 : index
    %158 = vector.load %arg6[%c4, %c0_96, %c0_97] : memref<16x32x256xf32, #tpu.memory_space<vmem>>, vector<1x32x256xf32>
    %159 = vector.shape_cast %158 : vector<1x32x256xf32> to vector<32x256xf32>
    %160 = vector.extract_strided_slice %136 {offsets = [0, 4], sizes = [256, 1], strides = [1, 1]} : vector<256x16xf32> to vector<256x1xf32>
    %cst_98 = arith.constant dense<0.000000e+00> : vector<32x1xf32>
    %161 = tpu.matmul %159, %160, %cst_98 {dimension_numbers = #tpu.dot_dimension_numbers<[1], [0], [0], [1], [0, 0, 1, 1], [], []>} : vector<32x256xf32>, vector<256x1xf32>, vector<32x1xf32> -> vector<32x1xf32>
    %162 = arith.addf %157, %161 : vector<32x1xf32>
    %c5 = arith.constant 5 : index
    %c0_99 = arith.constant 0 : index
    %c0_100 = arith.constant 0 : index
    %163 = vector.load %arg6[%c5, %c0_99, %c0_100] : memref<16x32x256xf32, #tpu.memory_space<vmem>>, vector<1x32x256xf32>
    %164 = vector.shape_cast %163 : vector<1x32x256xf32> to vector<32x256xf32>
    %165 = vector.extract_strided_slice %136 {offsets = [0, 5], sizes = [256, 1], strides = [1, 1]} : vector<256x16xf32> to vector<256x1xf32>
    %cst_101 = arith.constant dense<0.000000e+00> : vector<32x1xf32>
    %166 = tpu.matmul %164, %165, %cst_101 {dimension_numbers = #tpu.dot_dimension_numbers<[1], [0], [0], [1], [0, 0, 1, 1], [], []>} : vector<32x256xf32>, vector<256x1xf32>, vector<32x1xf32> -> vector<32x1xf32>
    %167 = arith.addf %162, %166 : vector<32x1xf32>
    %c6_102 = arith.constant 6 : index
    %c0_103 = arith.constant 0 : index
    %c0_104 = arith.constant 0 : index
    %168 = vector.load %arg6[%c6_102, %c0_103, %c0_104] : memref<16x32x256xf32, #tpu.memory_space<vmem>>, vector<1x32x256xf32>
    %169 = vector.shape_cast %168 : vector<1x32x256xf32> to vector<32x256xf32>
    %170 = vector.extract_strided_slice %136 {offsets = [0, 6], sizes = [256, 1], strides = [1, 1]} : vector<256x16xf32> to vector<256x1xf32>
    %cst_105 = arith.constant dense<0.000000e+00> : vector<32x1xf32>
    %171 = tpu.matmul %169, %170, %cst_105 {dimension_numbers = #tpu.dot_dimension_numbers<[1], [0], [0], [1], [0, 0, 1, 1], [], []>} : vector<32x256xf32>, vector<256x1xf32>, vector<32x1xf32> -> vector<32x1xf32>
    %172 = arith.addf %167, %171 : vector<32x1xf32>
    %c7 = arith.constant 7 : index
    %c0_106 = arith.constant 0 : index
    %c0_107 = arith.constant 0 : index
    %173 = vector.load %arg6[%c7, %c0_106, %c0_107] : memref<16x32x256xf32, #tpu.memory_space<vmem>>, vector<1x32x256xf32>
    %174 = vector.shape_cast %173 : vector<1x32x256xf32> to vector<32x256xf32>
    %175 = vector.extract_strided_slice %136 {offsets = [0, 7], sizes = [256, 1], strides = [1, 1]} : vector<256x16xf32> to vector<256x1xf32>
    %cst_108 = arith.constant dense<0.000000e+00> : vector<32x1xf32>
    %176 = tpu.matmul %174, %175, %cst_108 {dimension_numbers = #tpu.dot_dimension_numbers<[1], [0], [0], [1], [0, 0, 1, 1], [], []>} : vector<32x256xf32>, vector<256x1xf32>, vector<32x1xf32> -> vector<32x1xf32>
    %177 = arith.addf %172, %176 : vector<32x1xf32>
    %c8_109 = arith.constant 8 : index
    %c0_110 = arith.constant 0 : index
    %c0_111 = arith.constant 0 : index
    %178 = vector.load %arg6[%c8_109, %c0_110, %c0_111] : memref<16x32x256xf32, #tpu.memory_space<vmem>>, vector<1x32x256xf32>
    %179 = vector.shape_cast %178 : vector<1x32x256xf32> to vector<32x256xf32>
    %180 = vector.extract_strided_slice %136 {offsets = [0, 8], sizes = [256, 1], strides = [1, 1]} : vector<256x16xf32> to vector<256x1xf32>
    %cst_112 = arith.constant dense<0.000000e+00> : vector<32x1xf32>
    %181 = tpu.matmul %179, %180, %cst_112 {dimension_numbers = #tpu.dot_dimension_numbers<[1], [0], [0], [1], [0, 0, 1, 1], [], []>} : vector<32x256xf32>, vector<256x1xf32>, vector<32x1xf32> -> vector<32x1xf32>
    %182 = arith.addf %177, %181 : vector<32x1xf32>
    %c9_113 = arith.constant 9 : index
    %c0_114 = arith.constant 0 : index
    %c0_115 = arith.constant 0 : index
    %183 = vector.load %arg6[%c9_113, %c0_114, %c0_115] : memref<16x32x256xf32, #tpu.memory_space<vmem>>, vector<1x32x256xf32>
    %184 = vector.shape_cast %183 : vector<1x32x256xf32> to vector<32x256xf32>
    %185 = vector.extract_strided_slice %136 {offsets = [0, 9], sizes = [256, 1], strides = [1, 1]} : vector<256x16xf32> to vector<256x1xf32>
    %cst_116 = arith.constant dense<0.000000e+00> : vector<32x1xf32>
    %186 = tpu.matmul %184, %185, %cst_116 {dimension_numbers = #tpu.dot_dimension_numbers<[1], [0], [0], [1], [0, 0, 1, 1], [], []>} : vector<32x256xf32>, vector<256x1xf32>, vector<32x1xf32> -> vector<32x1xf32>
    %187 = arith.addf %182, %186 : vector<32x1xf32>
    %c10 = arith.constant 10 : index
    %c0_117 = arith.constant 0 : index
    %c0_118 = arith.constant 0 : index
    %188 = vector.load %arg6[%c10, %c0_117, %c0_118] : memref<16x32x256xf32, #tpu.memory_space<vmem>>, vector<1x32x256xf32>
    %189 = vector.shape_cast %188 : vector<1x32x256xf32> to vector<32x256xf32>
    %190 = vector.extract_strided_slice %136 {offsets = [0, 10], sizes = [256, 1], strides = [1, 1]} : vector<256x16xf32> to vector<256x1xf32>
    %cst_119 = arith.constant dense<0.000000e+00> : vector<32x1xf32>
    %191 = tpu.matmul %189, %190, %cst_119 {dimension_numbers = #tpu.dot_dimension_numbers<[1], [0], [0], [1], [0, 0, 1, 1], [], []>} : vector<32x256xf32>, vector<256x1xf32>, vector<32x1xf32> -> vector<32x1xf32>
    %192 = arith.addf %187, %191 : vector<32x1xf32>
    %c11 = arith.constant 11 : index
    %c0_120 = arith.constant 0 : index
    %c0_121 = arith.constant 0 : index
    %193 = vector.load %arg6[%c11, %c0_120, %c0_121] : memref<16x32x256xf32, #tpu.memory_space<vmem>>, vector<1x32x256xf32>
    %194 = vector.shape_cast %193 : vector<1x32x256xf32> to vector<32x256xf32>
    %195 = vector.extract_strided_slice %136 {offsets = [0, 11], sizes = [256, 1], strides = [1, 1]} : vector<256x16xf32> to vector<256x1xf32>
    %cst_122 = arith.constant dense<0.000000e+00> : vector<32x1xf32>
    %196 = tpu.matmul %194, %195, %cst_122 {dimension_numbers = #tpu.dot_dimension_numbers<[1], [0], [0], [1], [0, 0, 1, 1], [], []>} : vector<32x256xf32>, vector<256x1xf32>, vector<32x1xf32> -> vector<32x1xf32>
    %197 = arith.addf %192, %196 : vector<32x1xf32>
    %c12_123 = arith.constant 12 : index
    %c0_124 = arith.constant 0 : index
    %c0_125 = arith.constant 0 : index
    %198 = vector.load %arg6[%c12_123, %c0_124, %c0_125] : memref<16x32x256xf32, #tpu.memory_space<vmem>>, vector<1x32x256xf32>
    %199 = vector.shape_cast %198 : vector<1x32x256xf32> to vector<32x256xf32>
    %200 = vector.extract_strided_slice %136 {offsets = [0, 12], sizes = [256, 1], strides = [1, 1]} : vector<256x16xf32> to vector<256x1xf32>
    %cst_126 = arith.constant dense<0.000000e+00> : vector<32x1xf32>
    %201 = tpu.matmul %199, %200, %cst_126 {dimension_numbers = #tpu.dot_dimension_numbers<[1], [0], [0], [1], [0, 0, 1, 1], [], []>} : vector<32x256xf32>, vector<256x1xf32>, vector<32x1xf32> -> vector<32x1xf32>
    %202 = arith.addf %197, %201 : vector<32x1xf32>
    %c13 = arith.constant 13 : index
    %c0_127 = arith.constant 0 : index
    %c0_128 = arith.constant 0 : index
    %203 = vector.load %arg6[%c13, %c0_127, %c0_128] : memref<16x32x256xf32, #tpu.memory_space<vmem>>, vector<1x32x256xf32>
    %204 = vector.shape_cast %203 : vector<1x32x256xf32> to vector<32x256xf32>
    %205 = vector.extract_strided_slice %136 {offsets = [0, 13], sizes = [256, 1], strides = [1, 1]} : vector<256x16xf32> to vector<256x1xf32>
    %cst_129 = arith.constant dense<0.000000e+00> : vector<32x1xf32>
    %206 = tpu.matmul %204, %205, %cst_129 {dimension_numbers = #tpu.dot_dimension_numbers<[1], [0], [0], [1], [0, 0, 1, 1], [], []>} : vector<32x256xf32>, vector<256x1xf32>, vector<32x1xf32> -> vector<32x1xf32>
    %207 = arith.addf %202, %206 : vector<32x1xf32>
    %c14 = arith.constant 14 : index
    %c0_130 = arith.constant 0 : index
    %c0_131 = arith.constant 0 : index
    %208 = vector.load %arg6[%c14, %c0_130, %c0_131] : memref<16x32x256xf32, #tpu.memory_space<vmem>>, vector<1x32x256xf32>
    %209 = vector.shape_cast %208 : vector<1x32x256xf32> to vector<32x256xf32>
    %210 = vector.extract_strided_slice %136 {offsets = [0, 14], sizes = [256, 1], strides = [1, 1]} : vector<256x16xf32> to vector<256x1xf32>
    %cst_132 = arith.constant dense<0.000000e+00> : vector<32x1xf32>
    %211 = tpu.matmul %209, %210, %cst_132 {dimension_numbers = #tpu.dot_dimension_numbers<[1], [0], [0], [1], [0, 0, 1, 1], [], []>} : vector<32x256xf32>, vector<256x1xf32>, vector<32x1xf32> -> vector<32x1xf32>
    %212 = arith.addf %207, %211 : vector<32x1xf32>
    %c15_133 = arith.constant 15 : index
    %c0_134 = arith.constant 0 : index
    %c0_135 = arith.constant 0 : index
    %213 = vector.load %arg6[%c15_133, %c0_134, %c0_135] : memref<16x32x256xf32, #tpu.memory_space<vmem>>, vector<1x32x256xf32>
    %214 = vector.shape_cast %213 : vector<1x32x256xf32> to vector<32x256xf32>
    %215 = vector.extract_strided_slice %136 {offsets = [0, 15], sizes = [256, 1], strides = [1, 1]} : vector<256x16xf32> to vector<256x1xf32>
    %cst_136 = arith.constant dense<0.000000e+00> : vector<32x1xf32>
    %216 = tpu.matmul %214, %215, %cst_136 {dimension_numbers = #tpu.dot_dimension_numbers<[1], [0], [0], [1], [0, 0, 1, 1], [], []>} : vector<32x256xf32>, vector<256x1xf32>, vector<32x1xf32> -> vector<32x1xf32>
    %217 = arith.addf %212, %216 : vector<32x1xf32>
    %c0_137 = arith.constant 0 : index
    %c0_138 = arith.constant 0 : index
    %218 = vector.load %arg7[%c0_137, %c0_138] : memref<32x1xf32, #tpu.memory_space<vmem>>, vector<32x1xf32>
    %219 = arith.addf %217, %218 : vector<32x1xf32>
    %cst_139 = arith.constant 0.000000e+00 : f32
    %220 = vector.broadcast %cst_139 : f32 to vector<32x1xf32>
    %221 = arith.maximumf %219, %220 : vector<32x1xf32>
    %c0_140 = arith.constant 0 : index
    %c0_141 = arith.constant 0 : index
    %222 = vector.load %arg8[%c0_140, %c0_141] : memref<3x32xf32, #tpu.memory_space<vmem>>, vector<3x32xf32>
    %cst_142 = arith.constant dense<0.000000e+00> : vector<3x1xf32>
    %223 = tpu.matmul %222, %221, %cst_142 {dimension_numbers = #tpu.dot_dimension_numbers<[1], [0], [0], [1], [0, 0, 1, 1], [], []>} : vector<3x32xf32>, vector<32x1xf32>, vector<3x1xf32> -> vector<3x1xf32>
    %c0_143 = arith.constant 0 : index
    %c0_144 = arith.constant 0 : index
    %224 = vector.load %arg9[%c0_143, %c0_144] : memref<3x1xf32, #tpu.memory_space<vmem>>, vector<3x1xf32>
    %225 = arith.addf %223, %224 : vector<3x1xf32>
    %c0_145 = arith.constant 0 : index
    %c0_146 = arith.constant 0 : index
    %c0_147 = arith.constant 0 : index
    %226 = vector.load %arg10[%c0_145, %c0_146, %c0_147] : memref<1x3x1xf32, #tpu.memory_space<vmem>>, vector<1x3x1xf32>
    %227 = vector.shape_cast %226 : vector<1x3x1xf32> to vector<3x1xf32>
    %228 = vector.shape_cast %225 : vector<3x1xf32> to vector<1x3x1xf32>
    tpu.vector_store %arg10[%c0_145, %c0_146, %c0_147], %228 {strides = array<i32>} : memref<1x3x1xf32, #tpu.memory_space<vmem>>, vector<1x3x1xf32>,
    return
  }
  func.func @transform_0(%arg0: i32) -> (i32, i32, i32, i32) {
    %c0_i32 = arith.constant 0 : i32
    %c0_i32_0 = arith.constant 0 : i32
    %c0_i32_1 = arith.constant 0 : i32
    %c0_i32_2 = arith.constant 0 : i32
    return %arg0, %c0_i32, %c0_i32_0, %c0_i32_1 : i32, i32, i32, i32
  }
  func.func @transform_1(%arg0: i32) -> (i32, i32) {
    %c0_i32 = arith.constant 0 : i32
    %c0_i32_0 = arith.constant 0 : i32
    %c0_i32_1 = arith.constant 0 : i32
    return %c0_i32, %c0_i32_0 : i32, i32
  }
  func.func @transform_2(%arg0: i32) -> (i32, i32) {
    %c0_i32 = arith.constant 0 : i32
    %c0_i32_0 = arith.constant 0 : i32
    %c0_i32_1 = arith.constant 0 : i32
    return %c0_i32, %c0_i32_0 : i32, i32
  }
  func.func @transform_3(%arg0: i32) -> (i32, i32) {
    %c0_i32 = arith.constant 0 : i32
    %c0_i32_0 = arith.constant 0 : i32
    %c0_i32_1 = arith.constant 0 : i32
    return %c0_i32, %c0_i32_0 : i32, i32
  }
  func.func @transform_4(%arg0: i32) -> (i32, i32) {
    %c0_i32 = arith.constant 0 : i32
    %c0_i32_0 = arith.constant 0 : i32
    %c0_i32_1 = arith.constant 0 : i32
    return %c0_i32, %c0_i32_0 : i32, i32
  }
  func.func @transform_5(%arg0: i32) -> (i32, i32, i32) {
    %c0_i32 = arith.constant 0 : i32
    %c0_i32_0 = arith.constant 0 : i32
    %c0_i32_1 = arith.constant 0 : i32
    %c0_i32_2 = arith.constant 0 : i32
    return %c0_i32, %c0_i32_0, %c0_i32_1 : i32, i32, i32
  }
  func.func @transform_6(%arg0: i32) -> (i32, i32) {
    %c0_i32 = arith.constant 0 : i32
    %c0_i32_0 = arith.constant 0 : i32
    %c0_i32_1 = arith.constant 0 : i32
    return %c0_i32, %c0_i32_0 : i32, i32
  }
  func.func @transform_7(%arg0: i32) -> (i32, i32) {
    %c0_i32 = arith.constant 0 : i32
    %c0_i32_0 = arith.constant 0 : i32
    %c0_i32_1 = arith.constant 0 : i32
    return %c0_i32, %c0_i32_0 : i32, i32
  }
  func.func @transform_8(%arg0: i32) -> (i32, i32) {
    %c0_i32 = arith.constant 0 : i32
    %c0_i32_0 = arith.constant 0 : i32
    %c0_i32_1 = arith.constant 0 : i32
    return %c0_i32, %c0_i32_0 : i32, i32
  }
  func.func @transform_9(%arg0: i32) -> (i32, i32, i32) {
    %c0_i32 = arith.constant 0 : i32
    %c0_i32_0 = arith.constant 0 : i32
    %c0_i32_1 = arith.constant 0 : i32
    return %arg0, %c0_i32, %c0_i32_0 : i32, i32, i32
  }
}

</mosaic_0001>

<bundles_post_ra>
// kernel: oakd3d_forward.1
= control target key start
LH: loop header
LB: loop body
LE: loop exit
PB: predicated region body
PF: predicated region fallthrough
CT: control target
= control target key end

     0   :  { %14 = vsyncpa [#allocation5], 0  ;;  %s9446_s30 = smov 0   ;;  %s14516_s0 = inlined_call_operand.vmem [shape: f32[2,16,16,3], index: 0, kind: input, shape index: {}]   ;;  %s14517_s1 = inlined_call_operand.vmem [shape: f32[27,16], index: 1, kind: input, shape index: {}]   ;;  %s14518_s2 = inlined_call_operand.vmem [shape: f32[4,8], index: 2, kind: input, shape index: {}]   ;;  %s14519_s3 = inlined_call_operand.vmem [shape: f32[72,32], index: 3, kind: input, shape index: {}]   ;;  %s14520_s4 = inlined_call_operand.vmem [shape: f32[4,16], index: 4, kind: input, shape index: {}]   ;;  %s14521_s5 = inlined_call_operand.hbm [shape: f32[16,32,256], index: 5, kind: input, shape index: {}]   ;;  %s14522_s6 = inlined_call_operand.vmem [shape: f32[32,1], index: 6, kind: input, shape index: {}]   ;;  %s14523_s7 = inlined_call_operand.vmem [shape: f32[3,32], index: 7, kind: input, shape index: {}]   ;;  %s14524_s8 = inlined_call_operand.vmem [shape: f32[3,1], index: 8, kind: input, shape index: {}]   ;;  %s14525_s9 = inlined_call_operand.vmem [shape: f32[2,3,1], index: 9, kind: output, shape index: {}]  }
   0x1 LB: > { %s268_s12 = sshll.u32 %s14521_s5, 4  ;;  %s9455_s13 = sadd.s32 4294967295, %s9372_s30   ;;  %s9372_s30 = sphi %s9446_s30, %s20_s30   ;;  %s269_s12 = int_to_ptr.hbm [resolvable:$true] %s268_s12 }
   0x2   : > { %p7466_p0 = scmp.ge.s32.totalorder %s9372_s30, 1  ;;  %p245_p1 = scmp.lt.s32.totalorder %s9372_s30, 3 }
   0x3   : > { %p8071_p2 = scmp.eq.s32.totalorder %s9455_s13, 0  ;;  %s9374_s14 = smov [#allocation4]  }
   0x4   : > { %p246_p3 = pnand %p7466_p0, %p245_p1  ;;  %s270_s15 = sshll.u32 %s9374_s14, 4  ;;  %s271_s15 = int_to_ptr.vmem [resolvable:$true] %s270_s15 }
   0x5   : > { %s9375_s16 = smov 256   ;;  %s9376_s17 = smov 16  }
   0x6   : > { %p8067_p4 = pneg %p246_p3  ;;  %303 = sbr.rel (%p246_p3) target bundleno = 2704 (0xa90), region = 56 }
   0x8   : > { %p8068_p5 = pnand %p8071_p2, %p8067_p4 }
   0xa   : > { %8070 = dma.hbm_to_vmem [thread:$0]  (!%p8068_p5), %s269_s12, 16384, %s271_s15, [#allocation5], %s9375_s16, %s9375_s16, %s9376_s17  }
   0xb   : > { %9367 = dma.done.wait (%p8071_p2), [#allocation5], 16384  }
   0xc   : > { %9369 = vsyncadd (%p8071_p2), [#allocation5], 4294950912  ;;  %vm380_vm0 = vcmask 23552   ;;  %v14526_v0 = vmov 0.0   ;;  %vm718_vm1 = vcmask 1042432   ;;  %vm572_vm2 = vcmask 1046528  }
   0xd   : > { %381 = vst.msk [vmem:[#allocation2] sm:$0xff] %vm380_vm0, %v14526_v0  ;;  %v653_v1 = vld [vmem:[%s14517_s1 + $0x3] sm:$0x7]  ;;  %v523_v2 = vld [vmem:[%s14517_s1] sm:$0x7]  ;;  %vm1015_vm3 = vcmask 1045504  }
   0xe   : > { %382 = vst.msk [vmem:[#allocation2 + $0x8] sm:$0xff] %vm380_vm0, %v14526_v0  ;;  %v1096_v3 = vld [vmem:[%s14517_s1 + $0x6] sm:$0x7]  ;;  %7474 = vmatpush.msk.msra.mxu0 %vm718_vm1, %v653_v1  ;;  %7507 = vmatpush.msk.msra.mxu1 %vm718_vm1, %v523_v2  ;;  %v1309_v5 = vld [vmem:[%s14517_s1 + $0x9] sm:$0x7]  ;;  %p339_p6 = scmp.lt.s32.totalorder %s9455_s13, 1 }
   0xf   : > { %385 = vst.msk [vmem:[#allocation2 + $0x18] sm:$0xff] %vm380_vm0, %v14526_v0  ;;  %7540 = vmatpush.msk.msra.mxu2 %vm718_vm1, %v1096_v3  ;;  %7573 = vmatpush.msk.msra.mxu3 %vm718_vm1, %v1309_v5  ;;  %vm383_vm4 = vcmask 17408   ;;  %s9378_s23 = smov 8   ;;  %s9379_s24 = smov 120   ;;  %vm2585_vm5 = vcmask 64512   ;;  %vm2588_vm6 = vcmask 58368  }
  0x10   : > { %386 = vst.msk [vmem:[#allocation2 + $0x20] sm:$0xff] %vm380_vm0, %v14526_v0  ;;  %s15216_s13 = smov (!%p339_p6, %s9455_s13), 1  ;;  %s9380_s20 = smov 16   ;;  %vm7373_vm7 = vcmask 261120   ;;  %vm7397_vm8 = vcmask 2048  }
  0x11   : > { %388 = vst.msk [vmem:[#allocation2 + $0x30] sm:$0xff] %vm380_vm0, %v14526_v0  ;;  %s8062_s26 = sshll.u32 %s15216_s13, 8  ;;  %s9381_s21 = smov 112  }
  0x12   : > { %389 = vst.msk [vmem:[#allocation2 + $0x38] sm:$0xff] %vm380_vm0, %v14526_v0  ;;  %s9557_s29 = scalar_lea.vmem %s14516_s0, %s8062_s26  ;;  %s9383_s10 = smov 126  }
  0x13   : > { %391 = vst.msk [vmem:[#allocation2 + $0x48] sm:$0xff] %vm380_vm0, %v14526_v0  ;;  %v348_v13 = vld [vmem:[%s9557_s29] sm:$0xff]  ;;  %v349_v20 = vld [vmem:[%s9557_s29 + $0x8] sm:$0xff]  ;;  %v350_v21 = vld [vmem:[%s9557_s29 + $0x10] sm:$0xff]  ;;  %s9384_s11 = smov 124   ;;  %s9385_s12 = smov 123  }
  0x14   : > { %v469_v4 = vld [vmem:[#allocation2] sm:$0xff]  ;;  %392 = vst.msk [vmem:[#allocation2 + $0x50] sm:$0xff] %vm380_vm0, %v14526_v0  ;;  %v351_v22 = vld [vmem:[%s9557_s29 + $0x18] sm:$0xff]  ;;  %v353_v24 = vld [vmem:[%s9557_s29 + $0x28] sm:$0xff]  ;;  %s9386_s14 = smov 125   ;;  %s9387_s15 = smov 121  }
  0x15   : > { %v9489_v6 = vld [vmem:[#allocation2 + $0x8] sm:$0xff]  ;;  %v573_v7 = vrot.slane %v469_v4, 1  ;;  %7508 = vmatmul.msk.f32.vlgmr.msra.gmra.mxu1 %vm380_vm0, %v469_v4  ;;  %v1016_v8 = vrot.slane %v469_v4, 2  ;;  %394 = vst.msk [vmem:[#allocation2 + $0x60] sm:$0xff] %vm380_vm0, %v14526_v0  ;;  %v352_v23 = vld [vmem:[%s9557_s29 + $0x20] sm:$0xff]  ;;  %v354_v28 = vld [vmem:[%s9557_s29 + $0x30] sm:$0xff] }
  0x16   : > { %v574_v9 = vrot.slane %v9489_v6, 1  ;;  %v1017_v10 = vrot.slane %v9489_v6, 2  ;;  %395 = vst.msk [vmem:[#allocation2 + $0x68] sm:$0xff] %vm380_vm0, %v14526_v0  ;;  %v355_v37 = vld [vmem:[%s9557_s29 + $0x38] sm:$0xff]  ;;  %v356_v45 = vld [vmem:[%s9557_s29 + $0x40] sm:$0xff]  ;;  %v357_v52 = vld [vmem:[%s9557_s29 + $0x48] sm:$0xff] }
  0x17   : > { %397 = vst.msk [vmem:[#allocation2 + $0x78] sm:$0xff] %vm380_vm0, %v14526_v0  ;;  %v358_v60 = vld [vmem:[%s9557_s29 + $0x50] sm:$0xff]  ;;  %v359_v4 = vld [vmem:[%s9557_s29 + $0x58] sm:$0xff]  ;;  %s9388_s16 = smov 122   ;;  %s9390_s25 = smov 118  }
  0x18   : > { %v575_v11 = vsel %vm572_vm2, %v573_v7, %v574_v9  ;;  %v1018_v12 = vsel %vm1015_vm3, %v1016_v8, %v1017_v10  ;;  %398 = vst.msk [vmem:[#allocation2 + $0x80] sm:$0xff] %vm380_vm0, %v14526_v0  ;;  %s9391_s26 = smov 117   ;;  %s9392_s27 = smov 115  }
  0x19   : > { %7475 = vmatmul.msk.f32.vlgmr.msra.gmra.mxu0 %vm380_vm0, %v575_v11  ;;  %7541 = vmatmul.msk.f32.vlgmr.msra.gmra.mxu2 %vm380_vm0, %v1018_v12  ;;  %400 = vst.msk [vmem:[#allocation2 + $0x90] sm:$0xff] %vm380_vm0, %v14526_v0  ;;  %v360_v12 = vld [vmem:[%s9557_s29 + $0x60] sm:$0xff]  ;;  %s9393_s28 = smov 116  }
  0x1a   : > { %401 = vst.msk [vmem:[#allocation2 + $0x98] sm:$0xff] %vm380_vm0, %v14526_v0 }
  0x1b   : > { %403 = vst.msk [vmem:[#allocation2 + $0xa8] sm:$0xff] %vm380_vm0, %v14526_v0 }
  0x1c   : > { %404 = vst.msk [vmem:[#allocation2 + $0xb0] sm:$0xff] %vm380_vm0, %v14526_v0 }
  0x1d   : > { %7509 = vmatmul.msk.f32.gmra.mxu1 %vm380_vm0, %v9489_v6  ;;  %406 = vst.msk [vmem:[#allocation2 + $0xc0] sm:$0xff] %vm380_vm0, %v14526_v0 }
  0x1e   : > { %407 = vst.msk [vmem:[#allocation2 + $0xc8] sm:$0xff] %vm380_vm0, %v14526_v0 }
  0x1f   : > { %409 = vst.msk [vmem:[#allocation2 + $0xd8] sm:$0xff] %vm380_vm0, %v14526_v0 }
  0x20   : > { %410 = vst.msk [vmem:[#allocation2 + $0xe0] sm:$0xff] %vm380_vm0, %v14526_v0 }
  0x21   : > { %412 = vst.msk [vmem:[#allocation2 + $0xf0] sm:$0xff] %vm380_vm0, %v14526_v0 }
  0x22   : > { %413 = vst.msk [vmem:[#allocation2 + $0xf8] sm:$0xff] %vm380_vm0, %v14526_v0 }
  0x23   : > { %415 = vst.msk [vmem:[#allocation2 + $0x108] sm:$0xff] %vm380_vm0, %v14526_v0 }
  0x24   : > { %416 = vst.msk [vmem:[#allocation2 + $0x110] sm:$0xff] %vm380_vm0, %v14526_v0 }
  0x25   : > { %418 = vst.msk [vmem:[#allocation2 + $0x120] sm:$0xff] %vm380_vm0, %v14526_v0 }
  0x26   : > { %419 = vst.msk [vmem:[#allocation2 + $0x128] sm:$0xff] %vm380_vm0, %v14526_v0 }
  0x27   : > { %421 = vst.msk [vmem:[#allocation2 + $0x138] sm:$0xff] %vm380_vm0, %v14526_v0 }
  0x28   : > { %422 = vst.msk [vmem:[#allocation2 + $0x140] sm:$0xff] %vm380_vm0, %v14526_v0 }
  0x29   : > { %424 = vst.msk [vmem:[#allocation2 + $0x150] sm:$0xff] %vm380_vm0, %v14526_v0 }
  0x2a   : > { %425 = vst.msk [vmem:[#allocation2 + $0x158] sm:$0xff] %vm380_vm0, %v14526_v0 }
  0x2b   : > { %427 = vst.msk [vmem:[#allocation2 + $0x168] sm:$0xff] %vm380_vm0, %v14526_v0 }
  0x2c   : > { %428 = vst.msk [vmem:[#allocation2 + $0x170] sm:$0xff] %vm380_vm0, %v14526_v0 }
  0x2d   : > { %430 = vst.msk [vmem:[#allocation2 + $0x180] sm:$0xff] %vm380_vm0, %v14526_v0 }
  0x2e   : > { %431 = vst.msk [vmem:[#allocation2 + $0x188] sm:$0xff] %vm380_vm0, %v14526_v0 }
  0x2f   : > { %433 = vst.msk [vmem:[#allocation2 + $0x198] sm:$0xff] %vm380_vm0, %v14526_v0 }
  0x30   : > { %434 = vst.msk [vmem:[#allocation2 + $0x1a0] sm:$0xff] %vm380_vm0, %v14526_v0 }
  0x31   : > { %437 = vst.msk [vmem:[#allocation2 + $0x19] sm:$0xff] %vm380_vm0, %v348_v13 }
  0x32   : > { %384 = vst.msk [vmem:[#allocation2 + $0x10] sm:$0x3] %vm383_vm4, %v14526_v0 }
  0x33   : > { %387 = vst.msk [vmem:[#allocation2 + $0x28] sm:$0x3] %vm383_vm4, %v14526_v0 }
  0x34   : > { %390 = vst.msk [vmem:[#allocation2 + $0x40] sm:$0x3] %vm383_vm4, %v14526_v0 }
  0x35   : > { %393 = vst.msk [vmem:[#allocation2 + $0x58] sm:$0x3] %vm383_vm4, %v14526_v0 }
  0x36   : > { %396 = vst.msk [vmem:[#allocation2 + $0x70] sm:$0x3] %vm383_vm4, %v14526_v0 }
  0x37   : > { %399 = vst.msk [vmem:[#allocation2 + $0x88] sm:$0x3] %vm383_vm4, %v14526_v0 }
  0x38   : > { %v472_v14 = vld [vmem:[#allocation2 + $0x18] sm:$0xff]  ;;  %402 = vst.msk [vmem:[#allocation2 + $0xa0] sm:$0x3] %vm383_vm4, %v14526_v0 }
  0x39   : > { %7574 = vmatmul.msk.f32.vlgmr.msra.gmra.mxu3 %vm380_vm0, %v472_v14  ;;  %v471_v15 = vld [vmem:[#allocation2 + $0x10] sm:$0x3]  ;;  %405 = vst.msk [vmem:[#allocation2 + $0xb8] sm:$0x3] %vm383_vm4, %v14526_v0  ;;  %7510 = vmatmul.msk.f32.gmra.mxu1 %vm380_vm0, %v472_v14  ;;  %v578_v25 = vrot.slane %v472_v14, 1  ;;  %v1021_v26 = vrot.slane %v472_v14, 2 }
  0x3a   : > { %v576_v16 = vrot.slane %v471_v15, 1  ;;  %408 = vst.msk [vmem:[#allocation2 + $0xd0] sm:$0x3] %vm383_vm4, %v14526_v0  ;;  %v1019_v17 = vrot.slane %v471_v15, 2 }
  0x3b   : > { %411 = vst.msk [vmem:[#allocation2 + $0xe8] sm:$0x3] %vm383_vm4, %v14526_v0 }
  0x3c   : > { %v577_v18 = vsel %vm572_vm2, %v574_v9, %v576_v16  ;;  %414 = vst.msk [vmem:[#allocation2 + $0x100] sm:$0x3] %vm383_vm4, %v14526_v0  ;;  %v1020_v19 = vsel %vm1015_vm3, %v1017_v10, %v1019_v17 }
  0x3d   : > { %7476 = vmatmul.msk.f32.gmra.mxu0 %vm380_vm0, %v577_v18  ;;  %417 = vst.msk [vmem:[#allocation2 + $0x118] sm:$0x3] %vm383_vm4, %v14526_v0  ;;  %7542 = vmatmul.msk.f32.gmra.mxu2 %vm380_vm0, %v1020_v19  ;;  %v361_v19 = vld [vmem:[%s9557_s29 + $0x68] sm:$0xff] }
  0x3e   : > { %420 = vst.msk [vmem:[#allocation2 + $0x130] sm:$0x3] %vm383_vm4, %v14526_v0 }
  0x3f   : > { %423 = vst.msk [vmem:[#allocation2 + $0x148] sm:$0x3] %vm383_vm4, %v14526_v0 }
  0x40   : > { %426 = vst.msk [vmem:[#allocation2 + $0x160] sm:$0x3] %vm383_vm4, %v14526_v0 }
  0x41   : > { %429 = vst.msk [vmem:[#allocation2 + $0x178] sm:$0x3] %vm383_vm4, %v14526_v0 }
  0x42   : > { %432 = vst.msk [vmem:[#allocation2 + $0x190] sm:$0x3] %vm383_vm4, %v14526_v0 }
  0x43   : > { %435 = vst.msk [vmem:[#allocation2 + $0x1a8] sm:$0x3] %vm383_vm4, %v14526_v0 }
  0x44   : > { %438 = vst.msk [vmem:[#allocation2 + $0x21] sm:$0xff] %vm380_vm0, %v349_v20 }
  0x45   : > { %439 = vst.msk [vmem:[#allocation2 + $0x31] sm:$0xff] %vm380_vm0, %v350_v21 }
  0x46   : > { %440 = vst.msk [vmem:[#allocation2 + $0x39] sm:$0xff] %vm380_vm0, %v351_v22 }
  0x47   : > { %441 = vst.msk [vmem:[#allocation2 + $0x49] sm:$0xff] %vm380_vm0, %v352_v23 }
  0x48   : > { %442 = vst.msk [vmem:[#allocation2 + $0x51] sm:$0xff] %vm380_vm0, %v353_v24 }
  0x49   : > { %443 = vst.msk [vmem:[#allocation2 + $0x61] sm:$0xff] %vm380_vm0, %v354_v28 }
  0x4a   : > { %444 = vst.msk [vmem:[#allocation2 + $0x69] sm:$0xff] %vm380_vm0, %v355_v37  ;;  %v363_v37 = vld [vmem:[%s9557_s29 + $0x78] sm:$0xff] }
  0x4b   : > { %v473_v27 = vld [vmem:[#allocation2 + $0x20] sm:$0xff]  ;;  %v474_v31 = vld [vmem:[#allocation2 + $0x28] sm:$0x3]  ;;  %445 = vst.msk [vmem:[#allocation2 + $0x79] sm:$0xff] %vm380_vm0, %v356_v45 }
  0x4c   : > { %7575 = vmatmul.msk.f32.gmra.mxu3 %vm380_vm0, %v473_v27  ;;  %v579_v29 = vrot.slane %v473_v27, 1  ;;  %v1022_v30 = vrot.slane %v473_v27, 2  ;;  %7511 = vmatmul.msk.f32.gmra.mxu1 %vm380_vm0, %v473_v27  ;;  %v581_v34 = vrot.slane %v474_v31, 1  ;;  %v1024_v35 = vrot.slane %v474_v31, 2  ;;  %v9637_v36 = vld [vmem:[#allocation2 + $0x30] sm:$0xff]  ;;  %446 = vst.msk [vmem:[#allocation2 + $0x81] sm:$0xff] %vm380_vm0, %v357_v52 }
  0x4d   : > { %v9651_v40 = vld [vmem:[#allocation2 + $0x38] sm:$0xff]  ;;  %v583_v41 = vrot.slane %v9637_v36, 1  ;;  %v1026_v43 = vrot.slane %v9637_v36, 2  ;;  %v477_v48 = vld [vmem:[#allocation2 + $0x40] sm:$0x3]  ;;  %447 = vst.msk [vmem:[#allocation2 + $0x91] sm:$0xff] %vm380_vm0, %v358_v60 }
  0x4e   : > { %v9628_v32 = vsel %vm572_vm2, %v578_v25, %v579_v29  ;;  %v9631_v33 = vsel %vm1015_vm3, %v1021_v26, %v1022_v30  ;;  %v9643_v38 = vsel %vm572_vm2, %v579_v29, %v581_v34  ;;  %v9646_v39 = vsel %vm1015_vm3, %v1022_v30, %v1024_v35  ;;  %v9677_v51 = vld [vmem:[#allocation2 + $0x48] sm:$0xff]  ;;  %448 = vst.msk [vmem:[#allocation2 + $0x99] sm:$0xff] %vm380_vm0, %v359_v4  ;;  %v362_v27 = vld [vmem:[%s9557_s29 + $0x70] sm:$0xff] }
  0x4f   : > { %7477 = vmatmul.msk.f32.gmra.mxu0 %vm380_vm0, %v9628_v32  ;;  %7543 = vmatmul.msk.f32.gmra.mxu2 %vm380_vm0, %v9631_v33  ;;  %v584_v42 = vrot.slane %v9651_v40, 1  ;;  %v1027_v44 = vrot.slane %v9651_v40, 2  ;;  %v586_v49 = vrot.slane %v477_v48, 1  ;;  %v1029_v50 = vrot.slane %v477_v48, 2  ;;  %v9691_v55 = vld [vmem:[#allocation2 + $0x50] sm:$0xff]  ;;  %449 = vst.msk [vmem:[#allocation2 + $0xa9] sm:$0xff] %vm380_vm0, %v360_v12 }
  0x50   : > { %v588_v56 = vrot.slane %v9677_v51, 1  ;;  %v589_v57 = vrot.slane %v9691_v55, 1  ;;  %v1031_v58 = vrot.slane %v9677_v51, 2  ;;  %v1032_v59 = vrot.slane %v9691_v55, 2  ;;  %v480_v63 = vld [vmem:[#allocation2 + $0x58] sm:$0x3] }
  0x51   : > { %v9665_v46 = vsel %vm572_vm2, %v583_v41, %v584_v42  ;;  %v9668_v47 = vsel %vm1015_vm3, %v1026_v43, %v1027_v44  ;;  %v9683_v53 = vsel %vm572_vm2, %v584_v42, %v586_v49  ;;  %v9686_v54 = vsel %vm1015_vm3, %v1027_v44, %v1029_v50  ;;  %v9717_v3 = vld [vmem:[#allocation2 + $0x60] sm:$0xff]  ;;  %v9731_v7 = vld [vmem:[#allocation2 + $0x68] sm:$0xff]  ;;  %v483_v15 = vld [vmem:[#allocation2 + $0x70] sm:$0x3]  ;;  %450 = vst.msk [vmem:[#allocation2 + $0xb1] sm:$0xff] %vm380_vm0, %v361_v19 }
  0x52   : > { %v9705_v61 = vsel %vm572_vm2, %v588_v56, %v589_v57  ;;  %v9708_v62 = vsel %vm1015_vm3, %v1031_v58, %v1032_v59  ;;  %v591_v1 = vrot.slane %v480_v63, 1  ;;  %v1034_v2 = vrot.slane %v480_v63, 2  ;;  %v9757_v18 = vld [vmem:[#allocation2 + $0x78] sm:$0xff]  ;;  %451 = vst.msk [vmem:[#allocation2 + $0xc1] sm:$0xff] %vm380_vm0, %v362_v27  ;;  %v364_v50 = vld [vmem:[%s9557_s29 + $0x80] sm:$0xff]  ;;  %v365_v63 = vld [vmem:[%s9557_s29 + $0x88] sm:$0xff] }
  0x53   : > { %v593_v8 = vrot.slane %v9717_v3, 1  ;;  %v594_v9 = vrot.slane %v9731_v7, 1  ;;  %v1036_v10 = vrot.slane %v9717_v3, 2  ;;  %v1037_v11 = vrot.slane %v9731_v7, 2  ;;  %v9771_v22 = vld [vmem:[#allocation2 + $0x80] sm:$0xff]  ;;  %452 = vst.msk [vmem:[#allocation2 + $0xc9] sm:$0xff] %vm380_vm0, %v363_v37 }
  0x54   : > { %7576 = vmatmul.msk.f32.gmra.mxu3 %vm380_vm0, %v9637_v36  ;;  %7512 = vmatmul.msk.f32.gmra.mxu1 %vm380_vm0, %v9637_v36  ;;  %v9723_v5 = vsel %vm572_vm2, %v589_v57, %v591_v1  ;;  %v9726_v6 = vsel %vm1015_vm3, %v1032_v59, %v1034_v2  ;;  %v596_v16 = vrot.slane %v483_v15, 1  ;;  %v1039_v17 = vrot.slane %v483_v15, 2  ;;  %v486_v30 = vld [vmem:[#allocation2 + $0x88] sm:$0x3]  ;;  %v9797_v35 = vld [vmem:[#allocation2 + $0x90] sm:$0xff]  ;;  %453 = vst.msk [vmem:[#allocation2 + $0xd9] sm:$0xff] %vm380_vm0, %v364_v50 }
  0x55   : > { %v9745_v13 = vsel %vm572_vm2, %v593_v8, %v594_v9  ;;  %v9748_v14 = vsel %vm1015_vm3, %v1036_v10, %v1037_v11  ;;  %v598_v23 = vrot.slane %v9757_v18, 1  ;;  %v599_v24 = vrot.slane %v9771_v22, 1  ;;  %v9811_v43 = vld [vmem:[#allocation2 + $0x98] sm:$0xff]  ;;  %v489_v57 = vld [vmem:[#allocation2 + $0xa0] sm:$0x3]  ;;  %454 = vst.msk [vmem:[#allocation2 + $0xe1] sm:$0xff] %vm380_vm0, %v365_v63 }
  0x56   : > { %v9763_v20 = vsel %vm572_vm2, %v594_v9, %v596_v16  ;;  %v9766_v21 = vsel %vm1015_vm3, %v1037_v11, %v1039_v17  ;;  %v1041_v25 = vrot.slane %v9757_v18, 2  ;;  %v1042_v26 = vrot.slane %v9771_v22, 2  ;;  %v9837_v60 = vld [vmem:[#allocation2 + $0xa8] sm:$0xff]  ;;  %v366_v15 = vld [vmem:[%s9557_s29 + $0x90] sm:$0xff]  ;;  %v368_v50 = vld [vmem:[%s9557_s29 + $0xa0] sm:$0xff] }
  0x57   : > { %7478 = vmatmul.msk.f32.gmra.mxu0 %vm380_vm0, %v9643_v38  ;;  %7544 = vmatmul.msk.f32.gmra.mxu2 %vm380_vm0, %v9646_v39  ;;  %v9785_v28 = vsel %vm572_vm2, %v598_v23, %v599_v24  ;;  %v601_v31 = vrot.slane %v486_v30, 1  ;;  %v1044_v34 = vrot.slane %v486_v30, 2  ;;  %v603_v44 = vrot.slane %v9797_v35, 1  ;;  %455 = vst.msk [vmem:[#allocation2 + $0xf1] sm:$0xff] %vm380_vm0, %v366_v15 }
  0x58   : > { %v9788_v29 = vsel %vm1015_vm3, %v1041_v25, %v1042_v26  ;;  %v604_v45 = vrot.slane %v9811_v43, 1  ;;  %v1046_v48 = vrot.slane %v9797_v35, 2  ;;  %v1047_v49 = vrot.slane %v9811_v43, 2  ;;  %v9851_v4 = vld [vmem:[#allocation2 + $0xb0] sm:$0xff]  ;;  %v492_v19 = vld [vmem:[#allocation2 + $0xb8] sm:$0x3] }
  0x59   : > { %v9803_v41 = vsel %vm572_vm2, %v599_v24, %v601_v31  ;;  %v9806_v42 = vsel %vm1015_vm3, %v1042_v26, %v1044_v34  ;;  %v606_v58 = vrot.slane %v489_v57, 1  ;;  %v1049_v59 = vrot.slane %v489_v57, 2  ;;  %v9879_v25 = vld [vmem:[#allocation2 + $0xc0] sm:$0xff]  ;;  %v367_v26 = vld [vmem:[%s9557_s29 + $0x98] sm:$0xff]  ;;  %457 = vst.msk [vmem:[#allocation2 + $0x109] sm:$0xff] %vm380_vm0, %v368_v50 }
  0x5a   : > { %v9825_v52 = vsel %vm572_vm2, %v603_v44, %v604_v45  ;;  %v9828_v56 = vsel %vm1015_vm3, %v1046_v48, %v1047_v49  ;;  %v608_v8 = vrot.slane %v9837_v60, 1  ;;  %v609_v9 = vrot.slane %v9851_v4, 1  ;;  %456 = vst.msk [vmem:[#allocation2 + $0xf9] sm:$0xff] %vm380_vm0, %v367_v26  ;;  %v9893_v31 = vld [vmem:[#allocation2 + $0xc8] sm:$0xff] }
  0x5b   : > { %v9843_v1 = vsel %vm572_vm2, %v604_v45, %v606_v58  ;;  %v9846_v2 = vsel %vm1015_vm3, %v1047_v49, %v1049_v59  ;;  %v1051_v10 = vrot.slane %v9837_v60, 2  ;;  %v1052_v11 = vrot.slane %v9851_v4, 2  ;;  %v495_v59 = vld [vmem:[#allocation2 + $0xd0] sm:$0x3] }
  0x5c   : > { %7577 = vmatmul.msk.f32.gmra.mxu3 %vm380_vm0, %v9651_v40  ;;  %7513 = vmatmul.msk.f32.gmra.mxu1 %vm380_vm0, %v9651_v40  ;;  %v9867_v16 = vsel %vm572_vm2, %v608_v8, %v609_v9  ;;  %v611_v23 = vrot.slane %v492_v19, 1  ;;  %v1054_v24 = vrot.slane %v492_v19, 2  ;;  %v613_v44 = vrot.slane %v9879_v25, 1  ;;  %v369_v19 = vld [vmem:[%s9557_s29 + $0xa8] sm:$0xff] }
  0x5d   : > { %v9870_v17 = vsel %vm1015_vm3, %v1051_v10, %v1052_v11  ;;  %v614_v45 = vrot.slane %v9893_v31, 1  ;;  %v1056_v48 = vrot.slane %v9879_v25, 2  ;;  %v1057_v49 = vrot.slane %v9893_v31, 2  ;;  %458 = vst.msk [vmem:[#allocation2 + $0x111] sm:$0xff] %vm380_vm0, %v369_v19 }
  0x5e   : > { %v9885_v27 = vsel %vm572_vm2, %v609_v9, %v611_v23  ;;  %v9888_v30 = vsel %vm1015_vm3, %v1052_v11, %v1054_v24  ;;  %v616_v9 = vrot.slane %v495_v59, 1  ;;  %v1059_v10 = vrot.slane %v495_v59, 2  ;;  %v9925_v11 = vld [vmem:[#allocation2 + $0xd8] sm:$0xff] }
  0x5f   : > { %7479 = vmatmul.msk.f32.gmra.mxu0 %vm380_vm0, %v9665_v46  ;;  %7545 = vmatmul.msk.f32.gmra.mxu2 %vm380_vm0, %v9668_v47  ;;  %v9911_v57 = vsel %vm572_vm2, %v613_v44, %v614_v45  ;;  %v9914_v58 = vsel %vm1015_vm3, %v1056_v48, %v1057_v49  ;;  %14745 = vst [vmem:[#allocation11_spill] sm:$0xff] %v9925_v11  ;;  %v9943_v44 = vld [vmem:[#allocation2 + $0xe0] sm:$0xff]  ;;  %v618_v48 = vrot.slane %v9925_v11, 1  ;;  %v1061_v50 = vrot.slane %v9925_v11, 2 }
  0x60   : > { %v9933_v23 = vsel %vm572_vm2, %v614_v45, %v616_v9  ;;  %v9936_v24 = vsel %vm1015_vm3, %v1057_v49, %v1059_v10  ;;  %14750 = vst [vmem:[#allocation16_spill] sm:$0xff] %v9943_v44  ;;  %v619_v49 = vrot.slane %v9943_v44, 1  ;;  %v1062_v59 = vrot.slane %v9943_v44, 2  ;;  %v370_v10 = vld [vmem:[%s9557_s29 + $0xb0] sm:$0xff] }
  0x61   : > { %14747 = vst [vmem:[#allocation13_spill] sm:$0xff] %v9933_v23 }
  0x62   : > { %14748 = vst [vmem:[#allocation14_spill] sm:$0xff] %v9936_v24  ;;  %v9959_v0 = vsel %vm572_vm2, %v618_v48, %v619_v49 }
  0x63   : > { %14752 = vst [vmem:[#allocation18_spill] sm:$0xff] %v9959_v0 }
  0x64   : > { %7578 = vmatmul.msk.f32.gmra.mxu3 %vm380_vm0, %v9677_v51  ;;  %7514 = vmatmul.msk.f32.gmra.mxu1 %vm380_vm0, %v9677_v51  ;;  %459 = vst.msk [vmem:[#allocation2 + $0x121] sm:$0xff] %vm380_vm0, %v370_v10 }
  0x67   : > { %7480 = vmatmul.msk.f32.gmra.mxu0 %vm380_vm0, %v9683_v53  ;;  %7546 = vmatmul.msk.f32.gmra.mxu2 %vm380_vm0, %v9686_v54 }
  0x6c   : > { %7579 = vmatmul.msk.f32.gmra.mxu3 %vm380_vm0, %v9691_v55  ;;  %7515 = vmatmul.msk.f32.gmra.mxu1 %vm380_vm0, %v9691_v55 }
  0x6f   : > { %7481 = vmatmul.msk.f32.gmra.mxu0 %vm380_vm0, %v9705_v61  ;;  %7547 = vmatmul.msk.f32.gmra.mxu2 %vm380_vm0, %v9708_v62 }
  0x74   : > { %7580 = vmatmul.msk.f32.gmra.mxu3 %vm380_vm0, %v9717_v3  ;;  %7516 = vmatmul.msk.f32.gmra.mxu1 %vm380_vm0, %v9717_v3 }
  0x77   : > { %7482 = vmatmul.msk.f32.gmra.mxu0 %vm380_vm0, %v9723_v5  ;;  %7548 = vmatmul.msk.f32.gmra.mxu2 %vm380_vm0, %v9726_v6 }
  0x7c   : > { %7581 = vmatmul.msk.f32.gmra.mxu3 %vm380_vm0, %v9731_v7  ;;  %7517 = vmatmul.msk.f32.gmra.mxu1 %vm380_vm0, %v9731_v7 }
  0x7f   : > { %7483 = vmatmul.msk.f32.gmra.mxu0 %vm380_vm0, %v9745_v13  ;;  %7549 = vmatmul.msk.f32.gmra.mxu2 %vm380_vm0, %v9748_v14 }
  0x84   : > { %7582 = vmatmul.msk.f32.gmra.mxu3 %vm380_vm0, %v9757_v18  ;;  %7518 = vmatmul.msk.f32.gmra.mxu1 %vm380_vm0, %v9757_v18 }
  0x87   : > { %7484 = vmatmul.msk.f32.gmra.mxu0 %vm380_vm0, %v9763_v20  ;;  %7550 = vmatmul.msk.f32.gmra.mxu2 %vm380_vm0, %v9766_v21 }
  0x8c   : > { %7583 = vmatmul.msk.f32.gmra.mxu3 %vm380_vm0, %v9771_v22  ;;  %7519 = vmatmul.msk.f32.gmra.mxu1 %vm380_vm0, %v9771_v22 }
  0x8f   : > { %7485 = vmatmul.msk.f32.gmra.mxu0 %vm380_vm0, %v9785_v28  ;;  %7551 = vmatmul.msk.f32.gmra.mxu2 %vm380_vm0, %v9788_v29 }
  0x92   : > { %v9861_v12 = vpop.f32.mrf.mxu1 }
  0x93   : > { %14741 = vst [vmem:[#allocation7_spill] sm:$0xff] %v9861_v12  ;;  %v9973_v12 = vld [vmem:[#allocation2 + $0xf0] sm:$0xff] }
  0x94   : > { %7584 = vmatmul.msk.f32.gmra.mxu3 %vm380_vm0, %v9797_v35  ;;  %7520 = vmatmul.msk.f32.gmra.mxu1 %vm380_vm0, %v9797_v35  ;;  %14755 = vst [vmem:[#allocation21_spill] sm:$0xff] %v9973_v12 }
  0x96   : > { %v9901_v37 = vpop.f32.mrf.mxu0 }
  0x97   : > { %7486 = vmatmul.msk.f32.gmra.mxu0 %vm380_vm0, %v9803_v41  ;;  %7552 = vmatmul.msk.f32.gmra.mxu2 %vm380_vm0, %v9806_v42  ;;  %14743 = vst [vmem:[#allocation9_spill] sm:$0xff] %v9901_v37 }
  0x9a   : > { %v9895_v34 = vpop.f32.mrf.mxu1 }
  0x9b   : > { %14742 = vst [vmem:[#allocation8_spill] sm:$0xff] %v9895_v34  ;;  %v498_v34 = vld [vmem:[#allocation2 + $0xe8] sm:$0x3] }
  0x9c   : > { %7585 = vmatmul.msk.f32.gmra.mxu3 %vm380_vm0, %v9811_v43  ;;  %7521 = vmatmul.msk.f32.gmra.mxu1 %vm380_vm0, %v9811_v43  ;;  %v9919_v63 = vpop.f32.mrf.mxu2  ;;  %v1064_v48 = vrot.slane %v498_v34, 2 }
  0x9d   : > { %14744 = vst [vmem:[#allocation10_spill] sm:$0xff] %v9919_v63 }
  0x9f   : > { %7487 = vmatmul.msk.f32.gmra.mxu0 %vm380_vm0, %v9825_v52  ;;  %7553 = vmatmul.msk.f32.gmra.mxu2 %vm380_vm0, %v9828_v56 }
  0xa4   : > { %7586 = vmatmul.msk.f32.gmra.mxu3 %vm380_vm0, %v9837_v60  ;;  %7522 = vmatmul.msk.f32.gmra.mxu1 %vm380_vm0, %v9837_v60 }
  0xa7   : > { %7488 = vmatmul.msk.f32.gmra.mxu0 %vm380_vm0, %v9843_v1  ;;  %7554 = vmatmul.msk.f32.gmra.mxu2 %vm380_vm0, %v9846_v2 }
  0xac   : > { %7587 = vmatmul.msk.f32.gmra.mxu3 %vm380_vm0, %v9851_v4  ;;  %7523 = vmatmul.msk.f32.gmra.mxu1 %vm380_vm0, %v9851_v4 }
  0xaf   : > { %7489 = vmatmul.msk.f32.gmra.mxu0 %vm380_vm0, %v9867_v16  ;;  %7555 = vmatmul.msk.f32.gmra.mxu2 %vm380_vm0, %v9870_v17 }
  0xb4   : > { %7588 = vmatmul.msk.f32.gmra.mxu3 %vm380_vm0, %v9879_v25  ;;  %7524 = vmatmul.msk.f32.gmra.mxu1 %vm380_vm0, %v9879_v25 }
  0xb6   : > { %v925_v8 = vpop.f32.mrf.mxu1 }
  0xb7   : > { %7490 = vmatmul.msk.f32.gmra.mxu0 %vm380_vm0, %v9885_v27  ;;  %7556 = vmatmul.msk.f32.gmra.mxu2 %vm380_vm0, %v9888_v30 }
  0xba   : > { %v9927_v15 = vpop.f32.mrf.mxu0 }
  0xbb   : > { %14746 = vst [vmem:[#allocation12_spill] sm:$0xff] %v9927_v15 }
  0xbc   : > { %7589 = vmatmul.msk.f32.gmra.mxu3 %vm380_vm0, %v9893_v31  ;;  %7525 = vmatmul.msk.f32.gmra.mxu1 %vm380_vm0, %v9893_v31  ;;  %v9941_v26 = vpop.f32.mrf.mxu3 }
  0xbd   : > { %14749 = vst [vmem:[#allocation15_spill] sm:$0xff] %v9941_v26  ;;  %v621_v26 = vrot.slane %v498_v34, 1  ;;  %v9987_v34 = vld [vmem:[#allocation2 + $0xf8] sm:$0xff] }
  0xbe   : > { %14758 = vst [vmem:[#allocation24_spill] sm:$0xff] %v9987_v34 }
  0xbf   : > { %7491 = vmatmul.msk.f32.gmra.mxu0 %vm380_vm0, %v9911_v57  ;;  %7557 = vmatmul.msk.f32.gmra.mxu2 %vm380_vm0, %v9914_v58 }
  0xc0   : > { %v9949_v45 = vpop.f32.mrf.mxu2 }
  0xc1   : > { %14751 = vst [vmem:[#allocation17_spill] sm:$0xff] %v9949_v45  ;;  %v9962_v45 = vsel %vm1015_vm3, %v1061_v50, %v1062_v59 }
  0xc2   : > { %14753 = vst [vmem:[#allocation19_spill] sm:$0xff] %v9962_v45 }
  0xc4   : > { %7590 = vmatmul.msk.f32.gmra.mxu3 %vm380_vm0, %v9925_v11  ;;  %7526 = vmatmul.msk.f32.gmra.mxu1 %vm380_vm0, %v9925_v11 }
  0xc7   : > { %7492 = vmatmul.msk.f32.gmra.mxu0 %vm380_vm0, %v9933_v23  ;;  %7558 = vmatmul.msk.f32.gmra.mxu2 %vm380_vm0, %v9936_v24  ;;  %v372_v24 = vld [vmem:[%s9557_s29 + $0xc0] sm:$0xff]  ;;  %v373_v23 = vld [vmem:[%s9557_s29 + $0xc8] sm:$0xff] }
  0xc8   : > { %461 = vst.msk [vmem:[#allocation2 + $0x139] sm:$0xff] %vm380_vm0, %v372_v24 }
  0xc9   : > { %v928_v9 = vpop.f32.mrf.mxu1  ;;  %462 = vst.msk [vmem:[#allocation2 + $0x141] sm:$0xff] %vm380_vm0, %v373_v23 }
  0xcc   : > { %7591 = vmatmul.msk.f32.gmra.mxu3 %vm380_vm0, %v9943_v44  ;;  %v745_v19 = vpop.f32.mrf.mxu0  ;;  %7527 = vmatmul.msk.f32.gmra.mxu1 %vm380_vm0, %v9943_v44  ;;  %v371_v44 = vld [vmem:[%s9557_s29 + $0xb8] sm:$0xff] }
  0xcd   : > { %v926_v63 = vadd.f32 %v925_v8, %v745_v19  ;;  %460 = vst.msk [vmem:[#allocation2 + $0x129] sm:$0xff] %vm380_vm0, %v371_v44 }
  0xcf   : > { %v9967_v15 = vpop.f32.mrf.mxu3  ;;  %7493 = vmatmul.msk.f32.gmra.mxu0 %vm380_vm0, %v9959_v0  ;;  %7559 = vmatmul.msk.f32.gmra.mxu2 %vm380_vm0, %v9962_v45  ;;  %v9982_v0 = vsel %vm1015_vm3, %v1062_v59, %v1064_v48  ;;  %v1067_v59 = vrot.slane %v9987_v34, 2 }
  0xd0   : > { %14754 = vst [vmem:[#allocation20_spill] sm:$0xff] %v9967_v15  ;;  %v9979_v15 = vsel %vm572_vm2, %v619_v49, %v621_v26  ;;  %v624_v26 = vrot.slane %v9987_v34, 1  ;;  %v1066_v49 = vrot.slane %v9973_v12, 2 }
  0xd1   : > { %v931_v50 = vpop.f32.mrf.mxu1  ;;  %14756 = vst [vmem:[#allocation22_spill] sm:$0xff] %v9979_v15 }
  0xd2   : > { %v1187_v37 = vpop.f32.mrf.mxu2  ;;  %14757 = vst [vmem:[#allocation23_spill] sm:$0xff] %v9982_v0 }
  0xd3   : > { %v1279_v11 = vadd.f32 %v1187_v37, %v926_v63  ;;  %v623_v63 = vrot.slane %v9973_v12, 1 }
  0xd4   : > { %7592 = vmatmul.msk.f32.gmra.mxu3 %vm380_vm0, %v9973_v12  ;;  %v748_v10 = vpop.f32.mrf.mxu0  ;;  %7528 = vmatmul.msk.f32.gmra.mxu1 %vm380_vm0, %v9973_v12 }
  0xd5   : > { %v929_v44 = vadd.f32 %v928_v9, %v748_v10  ;;  %v501_v9 = vld [vmem:[#allocation2 + $0x100] sm:$0x3] }
  0xd7   : > { %v1342_v37 = vpop.f32.mrf.mxu3  ;;  %7494 = vmatmul.msk.f32.gmra.mxu0 %vm380_vm0, %v9979_v15  ;;  %7560 = vmatmul.msk.f32.gmra.mxu2 %vm380_vm0, %v9982_v0  ;;  %v10003_v0 = vsel %vm572_vm2, %v623_v63, %v624_v26  ;;  %v626_v63 = vrot.slane %v501_v9, 1 }
  0xd8   : > { %v9994_v8 = vadd.f32 %v1342_v37, %v1279_v11  ;;  %14760 = vst [vmem:[#allocation26_spill] sm:$0xff] %v10003_v0  ;;  %v10006_v11 = vsel %vm1015_vm3, %v1066_v49, %v1067_v59  ;;  %v10017_v49 = vld [vmem:[#allocation2 + $0x108] sm:$0xff] }
  0xd9   : > { %v934_v19 = vpop.f32.mrf.mxu1  ;;  %14761 = vst [vmem:[#allocation27_spill] sm:$0xff] %v10006_v11 }
  0xda   : > { %14759 = vst [vmem:[#allocation25_spill] sm:$0xff] %v9994_v8  ;;  %v1190_v48 = vpop.f32.mrf.mxu2 }
  0xdb   : > { %v1280_v45 = vadd.f32 %v1190_v48, %v929_v44  ;;  %v1069_v44 = vrot.slane %v501_v9, 2  ;;  %14763 = vst [vmem:[#allocation29_spill] sm:$0xff] %v10017_v49 }
  0xdc   : > { %7593 = vmatmul.msk.f32.gmra.mxu3 %vm380_vm0, %v9987_v34  ;;  %v751_v15 = vpop.f32.mrf.mxu0  ;;  %7529 = vmatmul.msk.f32.gmra.mxu1 %vm380_vm0, %v9987_v34 }
  0xdd   : > { %v932_v48 = vadd.f32 %v931_v50, %v751_v15  ;;  %v10031_v15 = vld [vmem:[#allocation2 + $0x110] sm:$0xff] }
  0xde   : > { %14766 = vst [vmem:[#allocation32_spill] sm:$0xff] %v10031_v15  ;;  %v1072_v9 = vrot.slane %v10031_v15, 2 }
  0xdf   : > { %v1345_v10 = vpop.f32.mrf.mxu3  ;;  %7495 = vmatmul.msk.f32.gmra.mxu0 %vm380_vm0, %v10003_v0  ;;  %7561 = vmatmul.msk.f32.gmra.mxu2 %vm380_vm0, %v10006_v11  ;;  %v10023_v0 = vsel %vm572_vm2, %v624_v26, %v626_v63  ;;  %v10026_v11 = vsel %vm1015_vm3, %v1067_v59, %v1069_v44  ;;  %v629_v26 = vrot.slane %v10031_v15, 1  ;;  %v1071_v59 = vrot.slane %v10017_v49, 2 }
  0xe0   : > { %v10015_v37 = vadd.f32 %v1345_v10, %v1280_v45  ;;  %14764 = vst [vmem:[#allocation30_spill] sm:$0xff] %v10023_v0  ;;  %v628_v45 = vrot.slane %v10017_v49, 1 }
  0xe1   : > { %v937_v8 = vpop.f32.mrf.mxu1  ;;  %14765 = vst [vmem:[#allocation31_spill] sm:$0xff] %v10026_v11 }
  0xe2   : > { %14762 = vst [vmem:[#allocation28_spill] sm:$0xff] %v10015_v37  ;;  %v1193_v12 = vpop.f32.mrf.mxu2 }
  0xe3   : > { %v1281_v34 = vadd.f32 %v1193_v12, %v932_v48  ;;  %v374_v48 = vld [vmem:[%s9557_s29 + $0xd0] sm:$0xff] }
  0xe4   : > { %7594 = vmatmul.msk.f32.gmra.mxu3 %vm380_vm0, %v10017_v49  ;;  %v754_v24 = vpop.f32.mrf.mxu0  ;;  %7530 = vmatmul.msk.f32.gmra.mxu1 %vm380_vm0, %v10017_v49  ;;  %463 = vst.msk [vmem:[#allocation2 + $0x151] sm:$0xff] %vm380_vm0, %v374_v48 }
  0xe5   : > { %v935_v23 = vadd.f32 %v934_v19, %v754_v24  ;;  %v504_v19 = vld [vmem:[#allocation2 + $0x118] sm:$0x3] }
  0xe7   : > { %v1348_v12 = vpop.f32.mrf.mxu3  ;;  %7496 = vmatmul.msk.f32.gmra.mxu0 %vm380_vm0, %v10023_v0  ;;  %7562 = vmatmul.msk.f32.gmra.mxu2 %vm380_vm0, %v10026_v11  ;;  %v10047_v11 = vsel %vm572_vm2, %v628_v45, %v629_v26  ;;  %v631_v45 = vrot.slane %v504_v19, 1  ;;  %v375_v0 = vld [vmem:[%s9557_s29 + $0xd8] sm:$0xff] }
  0xe8   : > { %v10038_v50 = vadd.f32 %v1348_v12, %v1281_v34  ;;  %14768 = vst [vmem:[#allocation34_spill] sm:$0xff] %v10047_v11  ;;  %v10050_v34 = vsel %vm1015_vm3, %v1071_v59, %v1072_v9  ;;  %v10061_v59 = vld [vmem:[#allocation2 + $0x120] sm:$0xff] }
  0xe9   : > { %v940_v10 = vpop.f32.mrf.mxu1  ;;  %14769 = vst [vmem:[#allocation35_spill] sm:$0xff] %v10050_v34 }
  0xea   : > { %14767 = vst [vmem:[#allocation33_spill] sm:$0xff] %v10038_v50  ;;  %v1196_v63 = vpop.f32.mrf.mxu2 }
  0xeb   : > { %v1282_v44 = vadd.f32 %v1196_v63, %v935_v23  ;;  %v1074_v23 = vrot.slane %v504_v19, 2  ;;  %14771 = vst [vmem:[#allocation37_spill] sm:$0xff] %v10061_v59 }
  0xec   : > { %7595 = vmatmul.msk.f32.gmra.mxu3 %vm380_vm0, %v10031_v15  ;;  %v757_v37 = vpop.f32.mrf.mxu0  ;;  %7531 = vmatmul.msk.f32.gmra.mxu1 %vm380_vm0, %v10031_v15  ;;  %464 = vst.msk [vmem:[#allocation2 + $0x159] sm:$0xff] %vm380_vm0, %v375_v0 }
  0xed   : > { %v938_v63 = vadd.f32 %v937_v8, %v757_v37  ;;  %v10075_v8 = vld [vmem:[#allocation2 + $0x128] sm:$0xff] }
  0xee   : > { %14774 = vst [vmem:[#allocation40_spill] sm:$0xff] %v10075_v8  ;;  %v1077_v19 = vrot.slane %v10075_v8, 2 }
  0xef   : > { %v1351_v24 = vpop.f32.mrf.mxu3  ;;  %7497 = vmatmul.msk.f32.gmra.mxu0 %vm380_vm0, %v10047_v11  ;;  %7563 = vmatmul.msk.f32.gmra.mxu2 %vm380_vm0, %v10050_v34  ;;  %v10067_v11 = vsel %vm572_vm2, %v629_v26, %v631_v45  ;;  %v10070_v34 = vsel %vm1015_vm3, %v1072_v9, %v1074_v23  ;;  %v634_v9 = vrot.slane %v10075_v8, 1 }
  0xf0   : > { %v10059_v12 = vadd.f32 %v1351_v24, %v1282_v44  ;;  %14772 = vst [vmem:[#allocation38_spill] sm:$0xff] %v10067_v11  ;;  %v1076_v44 = vrot.slane %v10061_v59, 2 }
  0xf1   : > { %v943_v50 = vpop.f32.mrf.mxu1  ;;  %14773 = vst [vmem:[#allocation39_spill] sm:$0xff] %v10070_v34 }
  0xf2   : > { %14770 = vst [vmem:[#allocation36_spill] sm:$0xff] %v10059_v12  ;;  %v1199_v49 = vpop.f32.mrf.mxu2 }
  0xf3   : > { %v1283_v15 = vadd.f32 %v1199_v49, %v938_v63  ;;  %v633_v49 = vrot.slane %v10061_v59, 1  ;;  %v376_v63 = vld [vmem:[%s9557_s29 + $0xe0] sm:$0xff] }
  0xf4   : > { %7596 = vmatmul.msk.f32.gmra.mxu3 %vm380_vm0, %v10061_v59  ;;  %v760_v48 = vpop.f32.mrf.mxu0  ;;  %7532 = vmatmul.msk.f32.gmra.mxu1 %vm380_vm0, %v10061_v59  ;;  %465 = vst.msk [vmem:[#allocation2 + $0x169] sm:$0xff] %vm380_vm0, %v376_v63 }
  0xf5   : > { %v941_v0 = vadd.f32 %v940_v10, %v760_v48  ;;  %v507_v10 = vld [vmem:[#allocation2 + $0x130] sm:$0x3] }
  0xf7   : > { %v1354_v37 = vpop.f32.mrf.mxu3  ;;  %7498 = vmatmul.msk.f32.gmra.mxu0 %vm380_vm0, %v10067_v11  ;;  %7564 = vmatmul.msk.f32.gmra.mxu2 %vm380_vm0, %v10070_v34  ;;  %v10091_v34 = vsel %vm572_vm2, %v633_v49, %v634_v9  ;;  %v636_v49 = vrot.slane %v507_v10, 1  ;;  %v379_v11 = vld [vmem:[%s9557_s29 + $0xf8] sm:$0xff] }
  0xf8   : > { %v10082_v26 = vadd.f32 %v1354_v37, %v1283_v15  ;;  %14776 = vst [vmem:[#allocation42_spill] sm:$0xff] %v10091_v34  ;;  %v10094_v15 = vsel %vm1015_vm3, %v1076_v44, %v1077_v19  ;;  %v1470_v44 = vld [vmem:[%s14517_s1 + $0xc] sm:$0x7] }
  0xf9   : > { %v946_v24 = vpop.f32.mrf.mxu1  ;;  %14777 = vst [vmem:[#allocation43_spill] sm:$0xff] %v10094_v15  ;;  %7606 = vmatpush.msk.msrb.mxu0 %vm718_vm1, %v1470_v44 }
  0xfa   : > { %14775 = vst [vmem:[#allocation41_spill] sm:$0xff] %v10082_v26  ;;  %v1202_v45 = vpop.f32.mrf.mxu2  ;;  %v10108_v26 = vld [vmem:[#allocation2 + $0x138] sm:$0xff] }
  0xfb   : > { %v1284_v23 = vadd.f32 %v1202_v45, %v941_v0  ;;  %v1079_v0 = vrot.slane %v507_v10, 2  ;;  %14779 = vst [vmem:[#allocation45_spill] sm:$0xff] %v10108_v26 }
  0xfc   : > { %7597 = vmatmul.msk.f32.gmra.mxu3 %vm380_vm0, %v10075_v8  ;;  %v763_v12 = vpop.f32.mrf.mxu0  ;;  %7533 = vmatmul.msk.f32.gmra.mxu1 %vm380_vm0, %v10075_v8  ;;  %468 = vst.msk [vmem:[#allocation2 + $0x189] sm:$0xff] %vm380_vm0, %v379_v11 }
  0xfd   : > { %v944_v45 = vadd.f32 %v943_v50, %v763_v12  ;;  %v10118_v10 = vsel %vm1015_vm3, %v1077_v19, %v1079_v0  ;;  %v10123_v50 = vld [vmem:[#allocation2 + $0x140] sm:$0xff] }
  0xfe   : > { %14781 = vst [vmem:[#allocation47_spill] sm:$0xff] %v10118_v10  ;;  %v639_v19 = vrot.slane %v10123_v50, 1  ;;  %v1082_v0 = vrot.slane %v10123_v50, 2 }
  0xff   : > { %v1357_v48 = vpop.f32.mrf.mxu3  ;;  %7499 = vmatmul.msk.f32.gmra.mxu0 %vm380_vm0, %v10091_v34  ;;  %7565 = vmatmul.msk.f32.gmra.mxu2 %vm380_vm0, %v10094_v15  ;;  %v377_v34 = vld [vmem:[%s9557_s29 + $0xe8] sm:$0xff]  ;;  %14782 = vst [vmem:[#allocation48_spill] sm:$0xff] %v10123_v50  ;;  %v378_v15 = vld [vmem:[%s9557_s29 + $0xf0] sm:$0xff]  ;;  %s9382_s29 = smov 127  }
 0x100   : > { %v10103_v37 = vadd.f32 %v1357_v48, %v1284_v23  ;;  %v10115_v48 = vsel %vm572_vm2, %v634_v9, %v636_v49  ;;  %466 = vst.msk [vmem:[#allocation2 + $0x171] sm:$0xff] %vm380_vm0, %v377_v34  ;;  %v1081_v49 = vrot.slane %v10108_v26, 2 }
 0x101   : > { %v949_v63 = vpop.f32.mrf.mxu1  ;;  %14780 = vst [vmem:[#allocation46_spill] sm:$0xff] %v10115_v48 }
 0x102   : > { %14778 = vst [vmem:[#allocation44_spill] sm:$0xff] %v10103_v37  ;;  %v1205_v8 = vpop.f32.mrf.mxu2 }
 0x103   : > { %v1285_v59 = vadd.f32 %v1205_v8, %v944_v45  ;;  %v638_v8 = vrot.slane %v10108_v26, 1  ;;  %467 = vst.msk [vmem:[#allocation2 + $0x181] sm:$0xff] %vm380_vm0, %v378_v15 }
 0x104   : > { %7598 = vmatmul.msk.f32.gmra.mxu3 %vm380_vm0, %v10108_v26  ;;  %v766_v23 = vpop.f32.mrf.mxu0  ;;  %7534 = vmatmul.msk.f32.gmra.mxu1 %vm380_vm0, %v10108_v26 }
 0x105   : > { %v947_v34 = vadd.f32 %v946_v24, %v766_v23  ;;  %v510_v24 = vld [vmem:[#allocation2 + $0x148] sm:$0x3] }
 0x107   : > { %v1360_v12 = vpop.f32.mrf.mxu3  ;;  %7500 = vmatmul.msk.f32.gmra.mxu0 %vm380_vm0, %v10115_v48  ;;  %7566 = vmatmul.msk.f32.gmra.mxu2 %vm380_vm0, %v10118_v10  ;;  %v10139_v10 = vsel %vm572_vm2, %v638_v8, %v639_v19  ;;  %v641_v8 = vrot.slane %v510_v24, 1 }
 0x108   : > { %v10130_v9 = vadd.f32 %v1360_v12, %v1285_v59  ;;  %14784 = vst [vmem:[#allocation50_spill] sm:$0xff] %v10139_v10  ;;  %v10142_v59 = vsel %vm1015_vm3, %v1081_v49, %v1082_v0  ;;  %v10153_v49 = vld [vmem:[#allocation2 + $0x150] sm:$0xff] }
 0x109   : > { %v952_v44 = vpop.f32.mrf.mxu1  ;;  %14785 = vst [vmem:[#allocation51_spill] sm:$0xff] %v10142_v59 }
 0x10a   : > { %14783 = vst [vmem:[#allocation49_spill] sm:$0xff] %v10130_v9  ;;  %v1208_v45 = vpop.f32.mrf.mxu2 }
 0x10b   : > { %v1286_v37 = vadd.f32 %v1208_v45, %v947_v34  ;;  %v1084_v34 = vrot.slane %v510_v24, 2  ;;  %14787 = vst [vmem:[#allocation53_spill] sm:$0xff] %v10153_v49 }
 0x10c   : > { %7599 = vmatmul.msk.f32.gmra.mxu3 %vm380_vm0, %v10123_v50  ;;  %v769_v48 = vpop.f32.mrf.mxu0  ;;  %7535 = vmatmul.msk.f32.gmra.mxu1 %vm380_vm0, %v10123_v50 }
 0x10d   : > { %v950_v45 = vadd.f32 %v949_v63, %v769_v48 }
 0x10f   : > { %v1363_v23 = vpop.f32.mrf.mxu3  ;;  %7501 = vmatmul.msk.f32.gmra.mxu0 %vm380_vm0, %v10139_v10  ;;  %7567 = vmatmul.msk.f32.gmra.mxu2 %vm380_vm0, %v10142_v59  ;;  %v10159_v10 = vsel %vm572_vm2, %v639_v19, %v641_v8  ;;  %v10162_v59 = vsel %vm1015_vm3, %v1082_v0, %v1084_v34  ;;  %v1086_v0 = vrot.slane %v10153_v49, 2 }
 0x110   : > { %v10151_v12 = vadd.f32 %v1363_v23, %v1286_v37  ;;  %14788 = vst [vmem:[#allocation54_spill] sm:$0xff] %v10159_v10  ;;  %v10167_v37 = vld [vmem:[#allocation2 + $0x158] sm:$0xff] }
 0x111   : > { %v955_v9 = vpop.f32.mrf.mxu1  ;;  %14789 = vst [vmem:[#allocation55_spill] sm:$0xff] %v10162_v59  ;;  %v644_v19 = vrot.slane %v10167_v37, 1  ;;  %v1087_v24 = vrot.slane %v10167_v37, 2 }
 0x112   : > { %14786 = vst [vmem:[#allocation52_spill] sm:$0xff] %v10151_v12  ;;  %v1211_v26 = vpop.f32.mrf.mxu2 }
 0x113   : > { %v1287_v50 = vadd.f32 %v1211_v26, %v950_v45  ;;  %14790 = vst [vmem:[#allocation56_spill] sm:$0xff] %v10167_v37  ;;  %v643_v26 = vrot.slane %v10153_v49, 1 }
 0x114   : > { %7600 = vmatmul.msk.f32.gmra.mxu3 %vm380_vm0, %v10153_v49  ;;  %v772_v15 = vpop.f32.mrf.mxu0  ;;  %7536 = vmatmul.msk.f32.gmra.mxu1 %vm380_vm0, %v10153_v49 }
 0x115   : > { %v953_v11 = vadd.f32 %v952_v44, %v772_v15  ;;  %v10182_v12 = vsel %vm572_vm2, %v643_v26, %v644_v19  ;;  %v1781_v44 = vld [vmem:[%s14517_s1 + $0x12] sm:$0x7] }
 0x116   : > { %14792 = vst [vmem:[#allocation58_spill] sm:$0xff] %v10182_v12  ;;  %7672 = vmatpush.msk.msrb.mxu2 %vm718_vm1, %v1781_v44 }
 0x117   : > { %v1366_v63 = vpop.f32.mrf.mxu3  ;;  %7502 = vmatmul.msk.f32.gmra.mxu0 %vm380_vm0, %v10159_v10  ;;  %7568 = vmatmul.msk.f32.gmra.mxu2 %vm380_vm0, %v10162_v59 }
 0x118   : > { %v10174_v48 = vadd.f32 %v1366_v63, %v1287_v50  ;;  %v10185_v50 = vsel %vm1015_vm3, %v1086_v0, %v1087_v24  ;;  %v513_v63 = vld [vmem:[#allocation2 + $0x160] sm:$0x3] }
 0x119   : > { %v958_v23 = vpop.f32.mrf.mxu1  ;;  %14793 = vst [vmem:[#allocation59_spill] sm:$0xff] %v10185_v50  ;;  %v1089_v0 = vrot.slane %v513_v63, 2 }
 0x11a   : > { %14791 = vst [vmem:[#allocation57_spill] sm:$0xff] %v10174_v48  ;;  %v1214_v8 = vpop.f32.mrf.mxu2 }
 0x11b   : > { %v1288_v34 = vadd.f32 %v1214_v8, %v953_v11  ;;  %v646_v11 = vrot.slane %v513_v63, 1  ;;  %v1628_v8 = vld [vmem:[%s14517_s1 + $0xf] sm:$0x7] }
 0x11c   : > { %7601 = vmatmul.msk.f32.gmra.mxu3 %vm380_vm0, %v10167_v37  ;;  %v775_v45 = vpop.f32.mrf.mxu0  ;;  %7537 = vmatmul.msk.f32.gmra.mxu1 %vm380_vm0, %v10167_v37  ;;  %v10202_v37 = vld [vmem:[#allocation2 + $0x168] sm:$0xff] }
 0x11d   : > { %v956_v48 = vadd.f32 %v955_v9, %v775_v45  ;;  %14795 = vst [vmem:[#allocation61_spill] sm:$0xff] %v10202_v37  ;;  %7639 = vmatpush.msk.msrb.mxu1 %vm718_vm1, %v1628_v8  ;;  %v10212_v44 = vsel %vm572_vm2, %v644_v19, %v646_v11  ;;  %v10215_v9 = vsel %vm1015_vm3, %v1087_v24, %v1089_v0  ;;  %v10219_v45 = vld [vmem:[#allocation2 + $0x170] sm:$0xff]  ;;  %v1091_v24 = vrot.slane %v10202_v37, 2 }
 0x11e   : > { %14796 = vst [vmem:[#allocation62_spill] sm:$0xff] %v10212_v44  ;;  %v649_v19 = vrot.slane %v10219_v45, 1  ;;  %v1092_v11 = vrot.slane %v10219_v45, 2 }
 0x11f   : > { %v1369_v15 = vpop.f32.mrf.mxu3  ;;  %7503 = vmatmul.msk.f32.gmra.mxu0 %vm380_vm0, %v10182_v12  ;;  %7569 = vmatmul.msk.f32.gmra.mxu2 %vm380_vm0, %v10185_v50  ;;  %14797 = vst [vmem:[#allocation63_spill] sm:$0xff] %v10215_v9 }
 0x120   : > { %v10196_v26 = vadd.f32 %v1369_v15, %v1288_v34  ;;  %v1942_v34 = vld [vmem:[%s14517_s1 + $0x15] sm:$0x7]  ;;  %14798 = vst [vmem:[#allocation64_spill] sm:$0xff] %v10219_v45 }
 0x121   : > { %v961_v49 = vpop.f32.mrf.mxu1  ;;  %7705 = vmatpush.msk.msrb.mxu3 %vm718_vm1, %v1942_v34 }
 0x122   : > { %14794 = vst [vmem:[#allocation60_spill] sm:$0xff] %v10196_v26  ;;  %v1217_v12 = vpop.f32.mrf.mxu2 }
 0x123   : > { %v1289_v15 = vadd.f32 %v1217_v12, %v956_v48  ;;  %v648_v12 = vrot.slane %v10202_v37, 1 }
 0x124   : > { %7602 = vmatmul.msk.f32.gmra.mxu3 %vm380_vm0, %v10202_v37  ;;  %v778_v63 = vpop.f32.mrf.mxu0  ;;  %7538 = vmatmul.msk.f32.gmra.mxu1 %vm380_vm0, %v10202_v37 }
 0x125   : > { %v959_v0 = vadd.f32 %v958_v23, %v778_v63 }
 0x127   : > { %v1372_v8 = vpop.f32.mrf.mxu3  ;;  %7504 = vmatmul.msk.f32.gmra.mxu0 %vm380_vm0, %v10212_v44  ;;  %7570 = vmatmul.msk.f32.gmra.mxu2 %vm380_vm0, %v10215_v9  ;;  %v10234_v9 = vsel %vm572_vm2, %v648_v12, %v649_v19 }
 0x128   : > { %v10226_v48 = vadd.f32 %v1372_v8, %v1289_v15  ;;  %14800 = vst [vmem:[#allocation66_spill] sm:$0xff] %v10234_v9  ;;  %v10237_v15 = vsel %vm1015_vm3, %v1091_v24, %v1092_v11  ;;  %v516_v8 = vld [vmem:[#allocation2 + $0x178] sm:$0x3] }
 0x129   : > { %v964_v34 = vpop.f32.mrf.mxu1  ;;  %v1094_v63 = vrot.slane %v516_v8, 2 }
 0x12a   : > { %14799 = vst [vmem:[#allocation65_spill] sm:$0xff] %v10226_v48  ;;  %v1220_v26 = vpop.f32.mrf.mxu2 }
 0x12b   : > { %v1290_v50 = vadd.f32 %v1220_v26, %v959_v0  ;;  %v651_v26 = vrot.slane %v516_v8, 1  ;;  %v10247_v0 = vld [vmem:[#allocation2 + $0x180] sm:$0xff] }
 0x12c   : > { %7603 = vmatmul.msk.f32.gmra.mxu3 %vm380_vm0, %v10219_v45  ;;  %v781_v44 = vpop.f32.mrf.mxu0  ;;  %7539 = vmatmul.msk.f32.gmra.mxu1 %vm380_vm0, %v10219_v45 }
 0x12d   : > { %v962_v12 = vadd.f32 %v961_v49, %v781_v44  ;;  %v10252_v10 = vsel %vm572_vm2, %v649_v19, %v651_v26  ;;  %v10265_v44 = vld [vmem:[#allocation2 + $0x188] sm:$0xff] }
 0x12f   : > { %v1375_v48 = vpop.f32.mrf.mxu3  ;;  %7505 = vmatmul.msk.f32.gmra.mxu0 %vm380_vm0, %v10234_v9  ;;  %7571 = vmatmul.msk.f32.gmra.mxu2 %vm380_vm0, %v10237_v15  ;;  %v10255_v9 = vsel %vm1015_vm3, %v1092_v11, %v1094_v63 }
 0x130   : > { %v10245_v23 = vadd.f32 %v1375_v48, %v1290_v50 }
 0x131   : > { %v967_v24 = vpop.f32.mrf.mxu1 }
 0x132   : > { %v1223_v37 = vpop.f32.mrf.mxu2 }
 0x133   : > { %v1291_v59 = vadd.f32 %v1223_v37, %v962_v12 }
 0x134   : > { %7604 = vmatmul.msk.f32.gmra.mxu3 %vm380_vm0, %v10247_v0  ;;  %v784_v45 = vpop.f32.mrf.mxu0  ;;  %7640 = vmatmul.msk.f32.vlgmr.msrb.gmra.mxu1 %vm380_vm0, %v9631_v33 }
 0x135   : > { %v965_v37 = vadd.f32 %v964_v34, %v784_v45 }
 0x137   : > { %v1378_v50 = vpop.f32.mrf.mxu3  ;;  %7506 = vmatmul.msk.f32.gmra.mxu0 %vm380_vm0, %v10252_v10  ;;  %7572 = vmatmul.msk.f32.gmra.mxu2 %vm380_vm0, %v10255_v9 }
 0x138   : > { %v10263_v49 = vadd.f32 %v1378_v50, %v1291_v59 }
 0x139   : > { %v970_v48 = vpop.f32.mrf.mxu1 }
 0x13a   : > { %v1226_v19 = vpop.f32.mrf.mxu2 }
 0x13b   : > { %v1292_v8 = vadd.f32 %v1226_v19, %v965_v37 }
 0x13c   : > { %7605 = vmatmul.msk.f32.gmra.mxu3 %vm380_vm0, %v10265_v44  ;;  %v787_v11 = vpop.f32.mrf.mxu0  ;;  %7641 = vmatmul.msk.f32.gmra.mxu1 %vm380_vm0, %v9646_v39 }
 0x13d   : > { %v968_v45 = vadd.f32 %v967_v24, %v787_v11 }
 0x13f   : > { %v1381_v33 = vpop.f32.mrf.mxu3  ;;  %7607 = vmatmul.msk.f32.vlgmr.msrb.gmra.mxu0 %vm380_vm0, %v9628_v32  ;;  %7673 = vmatmul.msk.f32.vlgmr.msrb.gmra.mxu2 %vm380_vm0, %v9637_v36 }
 0x140   : > { %v10275_v59 = vadd.f32 %v1381_v33, %v1292_v8 }
 0x141   : > { %v973_v34 = vpop.f32.mrf.mxu1 }
 0x142   : > { %v1229_v26 = vpop.f32.mrf.mxu2 }
 0x143   : > { %v1293_v63 = vadd.f32 %v1229_v26, %v968_v45 }
 0x144   : > { %7706 = vmatmul.msk.f32.vlgmr.msrb.gmra.mxu3 %vm380_vm0, %v9665_v46  ;;  %v790_v12 = vpop.f32.mrf.mxu0  ;;  %7642 = vmatmul.msk.f32.gmra.mxu1 %vm380_vm0, %v9668_v47 }
 0x145   : > { %v971_v36 = vadd.f32 %v970_v48, %v790_v12 }
 0x147   : > { %v1384_v39 = vpop.f32.mrf.mxu3  ;;  %7608 = vmatmul.msk.f32.gmra.mxu0 %vm380_vm0, %v9643_v38  ;;  %7674 = vmatmul.msk.f32.gmra.mxu2 %vm380_vm0, %v9651_v40 }
 0x148   : > { %v10285_v32 = vadd.f32 %v1384_v39, %v1293_v63 }
 0x149   : > { %v976_v24 = vpop.f32.mrf.mxu1 }
 0x14a   : > { %v1232_v50 = vpop.f32.mrf.mxu2 }
 0x14b   : > { %v1294_v37 = vadd.f32 %v1232_v50, %v971_v36 }
 0x14c   : > { %7707 = vmatmul.msk.f32.gmra.mxu3 %vm380_vm0, %v9683_v53  ;;  %v793_v19 = vpop.f32.mrf.mxu0  ;;  %7643 = vmatmul.msk.f32.gmra.mxu1 %vm380_vm0, %v9686_v54 }
 0x14d   : > { %v974_v40 = vadd.f32 %v973_v34, %v793_v19 }
 0x14f   : > { %v1387_v8 = vpop.f32.mrf.mxu3  ;;  %7609 = vmatmul.msk.f32.gmra.mxu0 %vm380_vm0, %v9665_v46  ;;  %7675 = vmatmul.msk.f32.gmra.mxu2 %vm380_vm0, %v9677_v51 }
 0x150   : > { %v10295_v38 = vadd.f32 %v1387_v8, %v1294_v37 }
 0x151   : > { %v979_v48 = vpop.f32.mrf.mxu1 }
 0x152   : > { %v1235_v11 = vpop.f32.mrf.mxu2 }
 0x153   : > { %v1295_v33 = vadd.f32 %v1235_v11, %v974_v40 }
 0x154   : > { %7708 = vmatmul.msk.f32.gmra.mxu3 %vm380_vm0, %v9705_v61  ;;  %v796_v45 = vpop.f32.mrf.mxu0  ;;  %7644 = vmatmul.msk.f32.gmra.mxu1 %vm380_vm0, %v9708_v62 }
 0x155   : > { %v977_v51 = vadd.f32 %v976_v24, %v796_v45 }
 0x157   : > { %v1390_v26 = vpop.f32.mrf.mxu3  ;;  %7610 = vmatmul.msk.f32.gmra.mxu0 %vm380_vm0, %v9683_v53  ;;  %7676 = vmatmul.msk.f32.gmra.mxu2 %vm380_vm0, %v9691_v55 }
 0x158   : > { %v10305_v46 = vadd.f32 %v1390_v26, %v1295_v33 }
 0x159   : > { %v982_v34 = vpop.f32.mrf.mxu1 }
 0x15a   : > { %v1238_v63 = vpop.f32.mrf.mxu2 }
 0x15b   : > { %v1296_v12 = vadd.f32 %v1238_v63, %v977_v51 }
 0x15c   : > { %7709 = vmatmul.msk.f32.gmra.mxu3 %vm380_vm0, %v9723_v5  ;;  %v799_v39 = vpop.f32.mrf.mxu0  ;;  %7645 = vmatmul.msk.f32.gmra.mxu1 %vm380_vm0, %v9726_v6 }
 0x15d   : > { %v980_v55 = vadd.f32 %v979_v48, %v799_v39 }
 0x15f   : > { %v1393_v36 = vpop.f32.mrf.mxu3  ;;  %7611 = vmatmul.msk.f32.gmra.mxu0 %vm380_vm0, %v9705_v61  ;;  %7677 = vmatmul.msk.f32.gmra.mxu2 %vm380_vm0, %v9717_v3 }
 0x160   : > { %v10315_v53 = vadd.f32 %v1393_v36, %v1296_v12 }
 0x161   : > { %v985_v24 = vpop.f32.mrf.mxu1 }
 0x162   : > { %v1241_v50 = vpop.f32.mrf.mxu2 }
 0x163   : > { %v1297_v37 = vadd.f32 %v1241_v50, %v980_v55 }
 0x164   : > { %7710 = vmatmul.msk.f32.gmra.mxu3 %vm380_vm0, %v9745_v13  ;;  %v802_v19 = vpop.f32.mrf.mxu0  ;;  %7646 = vmatmul.msk.f32.gmra.mxu1 %vm380_vm0, %v9748_v14 }
 0x165   : > { %v983_v3 = vadd.f32 %v982_v34, %v802_v19 }
 0x167   : > { %v1396_v8 = vpop.f32.mrf.mxu3  ;;  %7612 = vmatmul.msk.f32.gmra.mxu0 %vm380_vm0, %v9723_v5  ;;  %7678 = vmatmul.msk.f32.gmra.mxu2 %vm380_vm0, %v9731_v7 }
 0x168   : > { %v10325_v61 = vadd.f32 %v1396_v8, %v1297_v37 }
 0x169   : > { %v988_v40 = vpop.f32.mrf.mxu1 }
 0x16a   : > { %v1244_v48 = vpop.f32.mrf.mxu2 }
 0x16b   : > { %v1298_v11 = vadd.f32 %v1244_v48, %v983_v3 }
 0x16c   : > { %7711 = vmatmul.msk.f32.gmra.mxu3 %vm380_vm0, %v9763_v20  ;;  %v805_v33 = vpop.f32.mrf.mxu0  ;;  %7647 = vmatmul.msk.f32.gmra.mxu1 %vm380_vm0, %v9766_v21 }
 0x16d   : > { %v986_v7 = vadd.f32 %v985_v24, %v805_v33 }
 0x16f   : > { %v1399_v45 = vpop.f32.mrf.mxu3  ;;  %7613 = vmatmul.msk.f32.gmra.mxu0 %vm380_vm0, %v9745_v13  ;;  %7679 = vmatmul.msk.f32.gmra.mxu2 %vm380_vm0, %v9757_v18 }
 0x170   : > { %v10335_v5 = vadd.f32 %v1399_v45, %v1298_v11 }
 0x171   : > { %v991_v26 = vpop.f32.mrf.mxu1 }
 0x172   : > { %14801 = vst [vmem:[#allocation67_spill] sm:$0xff] %v10335_v5  ;;  %v1247_v51 = vpop.f32.mrf.mxu2  ;;  %v9303_v5 = vld [vmem:[%s14518_s2 + $0x1] ss:$0 sm:$0xff] }
 0x173   : > { %v1299_v34 = vadd.f32 %v1247_v51, %v986_v7  ;;  %2324 = vrot.lane.b32.xlu0 %v9303_v5, %s9378_s23  ;;  %s9389_s23 = smov 119  }
 0x174   : > { %7712 = vmatmul.msk.f32.gmra.mxu3 %vm380_vm0, %v9785_v28  ;;  %v808_v63 = vpop.f32.mrf.mxu0  ;;  %7648 = vmatmul.msk.f32.gmra.mxu1 %vm380_vm0, %v9788_v29 }
 0x175   : > { %v989_v18 = vadd.f32 %v988_v40, %v808_v63 }
 0x177   : > { %v1402_v12 = vpop.f32.mrf.mxu3  ;;  %7614 = vmatmul.msk.f32.gmra.mxu0 %vm380_vm0, %v9763_v20  ;;  %7680 = vmatmul.msk.f32.gmra.mxu2 %vm380_vm0, %v9771_v22 }
 0x178   : > { %v10345_v13 = vadd.f32 %v1402_v12, %v1299_v34 }
 0x179   : > { %v994_v39 = vpop.f32.mrf.mxu1 }
 0x17a   : > { %14802 = vst [vmem:[#allocation68_spill] sm:$0xff] %v10345_v13  ;;  %v1250_v36 = vpop.f32.mrf.mxu2 }
 0x17b   : > { %v1300_v55 = vadd.f32 %v1250_v36, %v989_v18 }
 0x17c   : > { %7713 = vmatmul.msk.f32.gmra.mxu3 %vm380_vm0, %v9803_v41  ;;  %v811_v24 = vpop.f32.mrf.mxu0  ;;  %7649 = vmatmul.msk.f32.gmra.mxu1 %vm380_vm0, %v9806_v42 }
 0x17d   : > { %v992_v22 = vadd.f32 %v991_v26, %v811_v24 }
 0x17f   : > { %v1405_v50 = vpop.f32.mrf.mxu3  ;;  %7615 = vmatmul.msk.f32.gmra.mxu0 %vm380_vm0, %v9785_v28  ;;  %7681 = vmatmul.msk.f32.gmra.mxu2 %vm380_vm0, %v9797_v35 }
 0x180   : > { %v10355_v20 = vadd.f32 %v1405_v50, %v1300_v55 }
 0x181   : > { %v997_v37 = vpop.f32.mrf.mxu1 }
 0x182   : > { %14803 = vst [vmem:[#allocation69_spill] sm:$0xff] %v10355_v20  ;;  %v1253_v19 = vpop.f32.mrf.mxu2 }
 0x183   : > { %v1301_v8 = vadd.f32 %v1253_v19, %v992_v22 }
 0x184   : > { %7714 = vmatmul.msk.f32.gmra.mxu3 %vm380_vm0, %v9825_v52  ;;  %v814_v3 = vpop.f32.mrf.mxu0  ;;  %7650 = vmatmul.msk.f32.gmra.mxu1 %vm380_vm0, %v9828_v56 }
 0x185   : > { %v995_v35 = vadd.f32 %v994_v39, %v814_v3 }
 0x187   : > { %v1408_v40 = vpop.f32.mrf.mxu3  ;;  %7616 = vmatmul.msk.f32.gmra.mxu0 %vm380_vm0, %v9803_v41  ;;  %7682 = vmatmul.msk.f32.gmra.mxu2 %vm380_vm0, %v9811_v43 }
 0x188   : > { %v10365_v28 = vadd.f32 %v1408_v40, %v1301_v8 }
 0x189   : > { %v1000_v48 = vpop.f32.mrf.mxu1 }
 0x18a   : > { %14804 = vst [vmem:[#allocation70_spill] sm:$0xff] %v10365_v28  ;;  %v1256_v11 = vpop.f32.mrf.mxu2 }
 0x18b   : > { %v1302_v33 = vadd.f32 %v1256_v11, %v995_v35 }
 0x18c   : > { %7715 = vmatmul.msk.f32.gmra.mxu3 %vm380_vm0, %v9843_v1  ;;  %v817_v45 = vpop.f32.mrf.mxu0  ;;  %7651 = vmatmul.msk.f32.gmra.mxu1 %vm380_vm0, %v9846_v2 }
 0x18d   : > { %v998_v43 = vadd.f32 %v997_v37, %v817_v45 }
 0x18f   : > { %v1411_v7 = vpop.f32.mrf.mxu3  ;;  %7617 = vmatmul.msk.f32.gmra.mxu0 %vm380_vm0, %v9825_v52  ;;  %7683 = vmatmul.msk.f32.gmra.mxu2 %vm380_vm0, %v9837_v60 }
 0x190   : > { %v10375_v41 = vadd.f32 %v1411_v7, %v1302_v33  ;;  %v14810_v33 = vld [vmem:[#allocation14_spill] sm:$0xff] }
 0x191   : > { %v1003_v26 = vpop.f32.mrf.mxu1 }
 0x192   : > { %14805 = vst [vmem:[#allocation71_spill] sm:$0xff] %v10375_v41  ;;  %v1259_v51 = vpop.f32.mrf.mxu2  ;;  %v519_v41 = vld [vmem:[#allocation2 + $0x190] sm:$0x3] }
 0x193   : > { %v1303_v34 = vadd.f32 %v1259_v51, %v998_v43  ;;  %v1468_v20 = vrot.slane %v519_v41, 1  ;;  %v1626_v13 = vrot.slane %v519_v41, 2 }
 0x194   : > { %7716 = vmatmul.msk.f32.gmra.mxu3 %vm380_vm0, %v9867_v16  ;;  %v820_v63 = vpop.f32.mrf.mxu0  ;;  %7652 = vmatmul.msk.f32.gmra.mxu1 %vm380_vm0, %v9870_v17 }
 0x195   : > { %v1001_v60 = vadd.f32 %v1000_v48, %v820_v63  ;;  %v14809_v48 = vld [vmem:[#allocation13_spill] sm:$0xff] }
 0x197   : > { %v1414_v12 = vpop.f32.mrf.mxu3  ;;  %7618 = vmatmul.msk.f32.gmra.mxu0 %vm380_vm0, %v9843_v1  ;;  %7684 = vmatmul.msk.f32.gmra.mxu2 %vm380_vm0, %v9851_v4 }
 0x198   : > { %v10385_v52 = vadd.f32 %v1414_v12, %v1303_v34  ;;  %v14813_v34 = vld [vmem:[#allocation18_spill] sm:$0xff]  ;;  %v14814_v12 = vld [vmem:[#allocation19_spill] sm:$0xff] }
 0x199   : > { %v1006_v18 = vpop.f32.mrf.mxu1 }
 0x19a   : > { %14806 = vst [vmem:[#allocation72_spill] sm:$0xff] %v10385_v52  ;;  %v1262_v39 = vpop.f32.mrf.mxu2  ;;  %v1624_v52 = vrot.slane %v10265_v44, 2 }
 0x19b   : > { %v1304_v36 = vadd.f32 %v1262_v39, %v1001_v60  ;;  %v14815_v60 = vld [vmem:[#allocation9_spill] sm:$0xff] }
 0x19c   : > { %7717 = vmatmul.msk.f32.gmra.mxu3 %vm380_vm0, %v9885_v27  ;;  %v823_v55 = vpop.f32.mrf.mxu0  ;;  %7653 = vmatmul.msk.f32.gmra.mxu1 %vm380_vm0, %v9888_v30 }
 0x19d   : > { %v1004_v4 = vadd.f32 %v1003_v26, %v823_v55 }
 0x19f   : > { %v1417_v24 = vpop.f32.mrf.mxu3  ;;  %7619 = vmatmul.msk.f32.gmra.mxu0 %vm380_vm0, %v9867_v16  ;;  %7685 = vmatmul.msk.f32.gmra.mxu2 %vm380_vm0, %v9879_v25 }
 0x1a0   : > { %v10395_v1 = vadd.f32 %v1417_v24, %v1304_v36  ;;  %v14817_v36 = vld [vmem:[#allocation16_spill] sm:$0xff]  ;;  %v14819_v24 = vld [vmem:[#allocation10_spill] sm:$0xff] }
 0x1a1   : > { %v1009_v50 = vpop.f32.mrf.mxu1 }
 0x1a2   : > { %14807 = vst [vmem:[#allocation73_spill] sm:$0xff] %v10395_v1  ;;  %v1265_v22 = vpop.f32.mrf.mxu2  ;;  %v14857_v1 = vld [vmem:[#allocation55_spill] sm:$0xff] }
 0x1a3   : > { %v1305_v37 = vadd.f32 %v1265_v22, %v1004_v4 }
 0x1a4   : > { %7718 = vmatmul.msk.f32.gmra.mxu3 %vm380_vm0, %v9911_v57  ;;  %v826_v19 = vpop.f32.mrf.mxu0  ;;  %7654 = vmatmul.msk.f32.gmra.mxu1 %vm380_vm0, %v9914_v58 }
 0x1a5   : > { %v1007_v25 = vadd.f32 %v1006_v18, %v826_v19  ;;  %v14816_v18 = vld [vmem:[#allocation7_spill] sm:$0xff] }
 0x1a6   : > { %v920_v39 = vadd.f32 %v14816_v18, %v14815_v60  ;;  %v14820_v19 = vld [vmem:[#allocation15_spill] sm:$0xff] }
 0x1a7   : > { %v1420_v8 = vpop.f32.mrf.mxu3  ;;  %7620 = vmatmul.msk.f32.gmra.mxu0 %vm380_vm0, %v9885_v27  ;;  %7686 = vmatmul.msk.f32.gmra.mxu2 %vm380_vm0, %v9893_v31  ;;  %v14811_v27 = vld [vmem:[#allocation11_spill] sm:$0xff] }
 0x1a8   : > { %v10405_v16 = vadd.f32 %v1420_v8, %v1305_v37  ;;  %v1277_v4 = vadd.f32 %v14819_v24, %v920_v39 }
 0x1a9   : > { %v1012_v3 = vpop.f32.mrf.mxu1 }
 0x1aa   : > { %14808 = vst [vmem:[#allocation74_spill] sm:$0xff] %v10405_v16  ;;  %v1268_v40 = vpop.f32.mrf.mxu2  ;;  %v1432_v8 = vadd.f32 %v14820_v19, %v1277_v4  ;;  %v14830_v19 = vld [vmem:[#allocation27_spill] sm:$0xff] }
 0x1ab   : > { %v1306_v35 = vadd.f32 %v1268_v40, %v1007_v25  ;;  %v14821_v40 = vld [vmem:[#allocation22_spill] sm:$0xff]  ;;  %v14853_v16 = vld [vmem:[#allocation51_spill] sm:$0xff] }
 0x1ac   : > { %7719 = vmatmul.msk.f32.gmra.mxu3 %vm380_vm0, %v14809_v48  ;;  %v829_v11 = vpop.f32.mrf.mxu0  ;;  %7655 = vmatmul.msk.f32.gmra.mxu1 %vm380_vm0, %v14810_v33 }
 0x1ad   : > { %v1010_v7 = vadd.f32 %v1009_v50, %v829_v11  ;;  %v14822_v11 = vld [vmem:[#allocation23_spill] sm:$0xff] }
 0x1af   : > { %v1423_v45 = vpop.f32.mrf.mxu3  ;;  %7621 = vmatmul.msk.f32.gmra.mxu0 %vm380_vm0, %v9911_v57  ;;  %7687 = vmatmul.msk.f32.gmra.mxu2 %vm380_vm0, %v14811_v27  ;;  %v14824_v27 = vld [vmem:[#allocation8_spill] sm:$0xff] }
 0x1b0   : > { %v10415_v31 = vadd.f32 %v1423_v45, %v1306_v35  ;;  %v14823_v45 = vld [vmem:[#allocation12_spill] sm:$0xff] }
 0x1b1   : > { %v1653_v43 = vpop.f32.mrf.mxu1 }
 0x1b2   : > { %14812 = vst [vmem:[#allocation13_spill] sm:$0xff] %v10415_v31  ;;  %v1271_v26 = vpop.f32.mrf.mxu2 }
 0x1b3   : > { %v1307_v51 = vadd.f32 %v1271_v26, %v1010_v7  ;;  %v923_v7 = vadd.f32 %v14824_v27, %v14823_v45  ;;  %v14832_v27 = vld [vmem:[#allocation30_spill] sm:$0xff] }
 0x1b4   : > { %7720 = vmatmul.msk.f32.gmra.mxu3 %vm380_vm0, %v14813_v34  ;;  %v832_v63 = vpop.f32.mrf.mxu0  ;;  %7656 = vmatmul.msk.f32.gmra.mxu1 %vm380_vm0, %v14814_v12 }
 0x1b5   : > { %v1013_v50 = vadd.f32 %v1012_v3, %v832_v63  ;;  %v14825_v3 = vld [vmem:[#allocation21_spill] sm:$0xff] }
 0x1b6   : > { %v14827_v63 = vld [vmem:[#allocation17_spill] sm:$0xff] }
 0x1b7   : > { %v1426_v57 = vpop.f32.mrf.mxu3  ;;  %7622 = vmatmul.msk.f32.gmra.mxu0 %vm380_vm0, %v14809_v48  ;;  %7688 = vmatmul.msk.f32.gmra.mxu2 %vm380_vm0, %v14817_v36  ;;  %v1278_v60 = vadd.f32 %v14827_v63, %v923_v7  ;;  %v14828_v36 = vld [vmem:[#allocation20_spill] sm:$0xff] }
 0x1b8   : > { %v10427_v55 = vadd.f32 %v1426_v57, %v1307_v51 }
 0x1b9   : > { %v1656_v22 = vpop.f32.mrf.mxu1  ;;  %v1433_v24 = vadd.f32 %v14828_v36, %v1278_v60 }
 0x1ba   : > { %14818 = vst [vmem:[#allocation14_spill] sm:$0xff] %v10427_v55  ;;  %v1274_v37 = vpop.f32.mrf.mxu2  ;;  %v14849_v55 = vld [vmem:[#allocation47_spill] sm:$0xff] }
 0x1bb   : > { %v1308_v25 = vadd.f32 %v1274_v37, %v1013_v50  ;;  %v14829_v50 = vld [vmem:[#allocation26_spill] sm:$0xff] }
 0x1bc   : > { %7721 = vmatmul.msk.f32.gmra.mxu3 %vm380_vm0, %v14821_v40  ;;  %v1495_v35 = vpop.f32.mrf.mxu0  ;;  %7657 = vmatmul.msk.f32.gmra.mxu1 %vm380_vm0, %v14822_v11 }
 0x1bd   : > { %v1591_v48 = vadd.f32 %v1495_v35, %v1432_v8 }
 0x1bf   : > { %v1429_v26 = vpop.f32.mrf.mxu3  ;;  %7623 = vmatmul.msk.f32.gmra.mxu0 %vm380_vm0, %v14813_v34  ;;  %7689 = vmatmul.msk.f32.gmra.mxu2 %vm380_vm0, %v14825_v3  ;;  %v1749_v18 = vadd.f32 %v1653_v43, %v1591_v48  ;;  %v14833_v3 = vld [vmem:[#allocation31_spill] sm:$0xff] }
 0x1c0   : > { %v10441_v51 = vadd.f32 %v1429_v26, %v1308_v25  ;;  %v14831_v25 = vld [vmem:[#allocation24_spill] sm:$0xff] }
 0x1c1   : > { %v1659_v57 = vpop.f32.mrf.mxu1 }
 0x1c2   : > { %14826 = vst [vmem:[#allocation11_spill] sm:$0xff] %v10441_v51  ;;  %v1808_v39 = vpop.f32.mrf.mxu2 }
 0x1c3   : > { %v1904_v4 = vadd.f32 %v1808_v39, %v1749_v18 }
 0x1c4   : > { %7722 = vmatmul.msk.f32.gmra.mxu3 %vm380_vm0, %v14829_v50  ;;  %v1498_v37 = vpop.f32.mrf.mxu0  ;;  %7658 = vmatmul.msk.f32.gmra.mxu1 %vm380_vm0, %v14830_v19 }
 0x1c5   : > { %v1592_v34 = vadd.f32 %v1498_v37, %v1433_v24 }
 0x1c7   : > { %v1750_v8 = vadd.f32 %v1656_v22, %v1592_v34  ;;  %v1967_v35 = vpop.f32.mrf.mxu3  ;;  %7624 = vmatmul.msk.f32.gmra.mxu0 %vm380_vm0, %v14821_v40  ;;  %7690 = vmatmul.msk.f32.gmra.mxu2 %vm380_vm0, %v14831_v25  ;;  %v14834_v22 = vld [vmem:[#allocation25_spill] sm:$0xff]  ;;  %v14837_v34 = vld [vmem:[#allocation35_spill] sm:$0xff] }
 0x1c8   : > { %v10453_v43 = vadd.f32 %v1967_v35, %v1904_v4  ;;  %v14835_v40 = vld [vmem:[#allocation29_spill] sm:$0xff]  ;;  %v14836_v4 = vld [vmem:[#allocation34_spill] sm:$0xff] }
 0x1c9   : > { %v1662_v26 = vpop.f32.mrf.mxu1 }
 0x1ca   : > { %v1811_v48 = vpop.f32.mrf.mxu2 }
 0x1cb   : > { %v1905_v45 = vadd.f32 %v1811_v48, %v1750_v8  ;;  %v14838_v8 = vld [vmem:[#allocation28_spill] sm:$0xff] }
 0x1cc   : > { %7723 = vmatmul.msk.f32.gmra.mxu3 %vm380_vm0, %v14832_v27  ;;  %v1501_v7 = vpop.f32.mrf.mxu0  ;;  %7659 = vmatmul.msk.f32.gmra.mxu1 %vm380_vm0, %v14833_v3 }
 0x1cd   : > { %v1593_v63 = vadd.f32 %v1501_v7, %v14834_v22 }
 0x1cf   : > { %v1751_v60 = vadd.f32 %v1659_v57, %v1593_v63  ;;  %v1970_v18 = vpop.f32.mrf.mxu3  ;;  %7625 = vmatmul.msk.f32.gmra.mxu0 %vm380_vm0, %v14829_v50  ;;  %7691 = vmatmul.msk.f32.gmra.mxu2 %vm380_vm0, %v14835_v40  ;;  %v14839_v50 = vld [vmem:[#allocation32_spill] sm:$0xff]  ;;  %v14840_v63 = vld [vmem:[#allocation38_spill] sm:$0xff]  ;;  %v14842_v40 = vld [vmem:[#allocation33_spill] sm:$0xff] }
 0x1d0   : > { %v10464_v39 = vadd.f32 %v1970_v18, %v1905_v45  ;;  %v14841_v18 = vld [vmem:[#allocation39_spill] sm:$0xff] }
 0x1d1   : > { %v1665_v35 = vpop.f32.mrf.mxu1 }
 0x1d2   : > { %v1814_v36 = vpop.f32.mrf.mxu2 }
 0x1d3   : > { %v1906_v24 = vadd.f32 %v1814_v36, %v1751_v60 }
 0x1d4   : > { %7724 = vmatmul.msk.f32.gmra.mxu3 %vm380_vm0, %v14836_v4  ;;  %v1504_v37 = vpop.f32.mrf.mxu0  ;;  %7660 = vmatmul.msk.f32.gmra.mxu1 %vm380_vm0, %v14837_v34 }
 0x1d5   : > { %v1594_v57 = vadd.f32 %v1504_v37, %v14838_v8 }
 0x1d7   : > { %v1752_v25 = vadd.f32 %v1662_v26, %v1594_v57  ;;  %v1973_v48 = vpop.f32.mrf.mxu3  ;;  %7626 = vmatmul.msk.f32.gmra.mxu0 %vm380_vm0, %v14832_v27  ;;  %7692 = vmatmul.msk.f32.gmra.mxu2 %vm380_vm0, %v14839_v50  ;;  %v14843_v27 = vld [vmem:[#allocation37_spill] sm:$0xff] }
 0x1d8   : > { %v10475_v45 = vadd.f32 %v1973_v48, %v1906_v24  ;;  %v14844_v48 = vld [vmem:[#allocation42_spill] sm:$0xff] }
 0x1d9   : > { %v1668_v8 = vpop.f32.mrf.mxu1 }
 0x1da   : > { %v1817_v7 = vpop.f32.mrf.mxu2 }
 0x1db   : > { %v1907_v22 = vadd.f32 %v1817_v7, %v1752_v25  ;;  %v14845_v7 = vld [vmem:[#allocation43_spill] sm:$0xff] }
 0x1dc   : > { %7725 = vmatmul.msk.f32.gmra.mxu3 %vm380_vm0, %v14840_v63  ;;  %v1507_v60 = vpop.f32.mrf.mxu0  ;;  %7661 = vmatmul.msk.f32.gmra.mxu1 %vm380_vm0, %v14841_v18 }
 0x1dd   : > { %v1595_v26 = vadd.f32 %v1507_v60, %v14842_v40 }
 0x1df   : > { %v1753_v36 = vadd.f32 %v1665_v35, %v1595_v26  ;;  %v1976_v37 = vpop.f32.mrf.mxu3  ;;  %7627 = vmatmul.msk.f32.gmra.mxu0 %vm380_vm0, %v14836_v4  ;;  %7693 = vmatmul.msk.f32.gmra.mxu2 %vm380_vm0, %v14843_v27  ;;  %v14846_v35 = vld [vmem:[#allocation36_spill] sm:$0xff] }
 0x1e0   : > { %v10486_v24 = vadd.f32 %v1976_v37, %v1907_v22  ;;  %v14847_v4 = vld [vmem:[#allocation40_spill] sm:$0xff] }
 0x1e1   : > { %v1671_v37 = vpop.f32.mrf.mxu1 }
 0x1e2   : > { %v1820_v57 = vpop.f32.mrf.mxu2 }
 0x1e3   : > { %v1908_v25 = vadd.f32 %v1820_v57, %v1753_v36  ;;  %v14848_v57 = vld [vmem:[#allocation46_spill] sm:$0xff] }
 0x1e4   : > { %7726 = vmatmul.msk.f32.gmra.mxu3 %vm380_vm0, %v14844_v48  ;;  %v1510_v50 = vpop.f32.mrf.mxu0  ;;  %7662 = vmatmul.msk.f32.gmra.mxu1 %vm380_vm0, %v14845_v7 }
 0x1e5   : > { %v1596_v60 = vadd.f32 %v1510_v50, %v14846_v35 }
 0x1e7   : > { %v1754_v40 = vadd.f32 %v1668_v8, %v1596_v60  ;;  %v1979_v26 = vpop.f32.mrf.mxu3  ;;  %7628 = vmatmul.msk.f32.gmra.mxu0 %vm380_vm0, %v14840_v63  ;;  %7694 = vmatmul.msk.f32.gmra.mxu2 %vm380_vm0, %v14847_v4  ;;  %v14850_v8 = vld [vmem:[#allocation41_spill] sm:$0xff]  ;;  %v14852_v4 = vld [vmem:[#allocation50_spill] sm:$0xff] }
 0x1e8   : > { %v10497_v22 = vadd.f32 %v1979_v26, %v1908_v25  ;;  %v14851_v63 = vld [vmem:[#allocation45_spill] sm:$0xff] }
 0x1e9   : > { %v1674_v31 = vpop.f32.mrf.mxu1 }
 0x1ea   : > { %v1823_v36 = vpop.f32.mrf.mxu2 }
 0x1eb   : > { %v1909_v27 = vadd.f32 %v1823_v36, %v1754_v40 }
 0x1ec   : > { %7727 = vmatmul.msk.f32.gmra.mxu3 %vm380_vm0, %v14848_v57  ;;  %v1513_v51 = vpop.f32.mrf.mxu0  ;;  %7663 = vmatmul.msk.f32.gmra.mxu1 %vm380_vm0, %v14849_v55 }
 0x1ed   : > { %v1597_v50 = vadd.f32 %v1513_v51, %v14850_v8  ;;  %v14854_v51 = vld [vmem:[#allocation44_spill] sm:$0xff] }
 0x1ef   : > { %v1755_v35 = vadd.f32 %v1671_v37, %v1597_v50  ;;  %v1982_v60 = vpop.f32.mrf.mxu3  ;;  %7629 = vmatmul.msk.f32.gmra.mxu0 %vm380_vm0, %v14844_v48  ;;  %7695 = vmatmul.msk.f32.gmra.mxu2 %vm380_vm0, %v14851_v63  ;;  %v14855_v48 = vld [vmem:[#allocation48_spill] sm:$0xff]  ;;  %v14856_v63 = vld [vmem:[#allocation54_spill] sm:$0xff] }
 0x1f0   : > { %v10508_v25 = vadd.f32 %v1982_v60, %v1909_v27 }
 0x1f2   : > { %v1826_v40 = vpop.f32.mrf.mxu2 }
 0x1f3   : > { %v1910_v26 = vadd.f32 %v1826_v40, %v1755_v35 }
 0x1f4   : > { %7728 = vmatmul.msk.f32.gmra.mxu3 %vm380_vm0, %v14852_v4  ;;  %v1516_v36 = vpop.f32.mrf.mxu0  ;;  %7664 = vmatmul.msk.f32.gmra.mxu1 %vm380_vm0, %v14853_v16 }
 0x1f5   : > { %v1598_v37 = vadd.f32 %v1516_v36, %v14854_v51  ;;  %v14859_v51 = vld [vmem:[#allocation58_spill] sm:$0xff] }
 0x1f7   : > { %v1756_v8 = vadd.f32 %v1674_v31, %v1598_v37  ;;  %v1985_v50 = vpop.f32.mrf.mxu3  ;;  %7630 = vmatmul.msk.f32.gmra.mxu0 %vm380_vm0, %v14848_v57  ;;  %7696 = vmatmul.msk.f32.gmra.mxu2 %vm380_vm0, %v14855_v48  ;;  %v14858_v57 = vld [vmem:[#allocation53_spill] sm:$0xff] }
 0x1f8   : > { %v10519_v27 = vadd.f32 %v1985_v50, %v1910_v26  ;;  %v2100_v26 = vld [vmem:[%s14517_s1 + $0x18] sm:$0x7] }
 0x1f9   : > { %7738 = vmatpush.msk.msra.mxu0 %vm718_vm1, %v2100_v26  ;;  %v14862_v50 = vld [vmem:[#allocation62_spill] sm:$0xff] }
 0x1fa   : > { %v1829_v35 = vpop.f32.mrf.mxu2 }
 0x1fb   : > { %v1911_v60 = vadd.f32 %v1829_v35, %v1756_v8  ;;  %v14860_v8 = vld [vmem:[#allocation59_spill] sm:$0xff] }
 0x1fc   : > { %7729 = vmatmul.msk.f32.gmra.mxu3 %vm380_vm0, %v14856_v63  ;;  %v10523_v40 = vpop.f32.mrf.mxu0  ;;  %7665 = vmatmul.msk.f32.gmra.mxu1 %vm380_vm0, %v14857_v1  ;;  %v14863_v35 = vld [vmem:[#allocation63_spill] sm:$0xff] }
 0x1ff   : > { %v1988_v31 = vpop.f32.mrf.mxu3  ;;  %7631 = vmatmul.msk.f32.gmra.mxu0 %vm380_vm0, %v14852_v4  ;;  %7697 = vmatmul.msk.f32.gmra.mxu2 %vm380_vm0, %v14858_v57  ;;  %v14861_v4 = vld [vmem:[#allocation56_spill] sm:$0xff] }
 0x200   : > { %v10531_v36 = vadd.f32 %v1988_v31, %v1911_v60  ;;  %v14864_v60 = vld [vmem:[#allocation61_spill] sm:$0xff]  ;;  %v14865_v31 = vld [vmem:[#allocation66_spill] sm:$0xff]  ;;  %v14866_v57 = vld [vmem:[#allocation64_spill] sm:$0xff] }
 0x204   : > { %7730 = vmatmul.msk.f32.gmra.mxu3 %vm380_vm0, %v14859_v51  ;;  %v10539_v37 = vpop.f32.mrf.mxu0  ;;  %7666 = vmatmul.msk.f32.gmra.mxu1 %vm380_vm0, %v14860_v8 }
 0x207   : > { %7632 = vmatmul.msk.f32.gmra.mxu0 %vm380_vm0, %v14856_v63  ;;  %7698 = vmatmul.msk.f32.gmra.mxu2 %vm380_vm0, %v14861_v4  ;;  %v1623_v4 = vrot.slane %v10247_v0, 2 }
 0x20c   : > { %7731 = vmatmul.msk.f32.gmra.mxu3 %vm380_vm0, %v14862_v50  ;;  %v10549_v48 = vpop.f32.mrf.mxu0  ;;  %7667 = vmatmul.msk.f32.gmra.mxu1 %vm380_vm0, %v14863_v35 }
 0x20f   : > { %7633 = vmatmul.msk.f32.gmra.mxu0 %vm380_vm0, %v14859_v51  ;;  %7699 = vmatmul.msk.f32.gmra.mxu2 %vm380_vm0, %v14864_v60  ;;  %v1465_v51 = vrot.slane %v10247_v0, 1  ;;  %v1466_v60 = vrot.slane %v10265_v44, 1 }
 0x214   : > { %7732 = vmatmul.msk.f32.gmra.mxu3 %vm380_vm0, %v14865_v31  ;;  %v10559_v63 = vpop.f32.mrf.mxu0  ;;  %7668 = vmatmul.msk.f32.gmra.mxu1 %vm380_vm0, %v10237_v15 }
 0x217   : > { %7634 = vmatmul.msk.f32.gmra.mxu0 %vm380_vm0, %v14862_v50  ;;  %7700 = vmatmul.msk.f32.gmra.mxu2 %vm380_vm0, %v14866_v57  ;;  %v1467_v50 = vsel %vm572_vm2, %v1465_v51, %v1466_v60  ;;  %v10583_v57 = vsel %vm1015_vm3, %v1623_v4, %v1624_v52  ;;  %v10598_v51 = vld [vmem:[#allocation2 + $0x198] sm:$0xff]  ;;  %v10600_v4 = vld [vmem:[#allocation2 + $0x1a0] sm:$0xff] }
 0x21c   : > { %7733 = vmatmul.msk.f32.gmra.mxu3 %vm380_vm0, %v10252_v10  ;;  %v10569_v26 = vpop.f32.mrf.mxu0  ;;  %7669 = vmatmul.msk.f32.gmra.mxu1 %vm380_vm0, %v10255_v9 }
 0x21f   : > { %7635 = vmatmul.msk.f32.gmra.mxu0 %vm380_vm0, %v14865_v31  ;;  %7701 = vmatmul.msk.f32.gmra.mxu2 %vm380_vm0, %v10247_v0  ;;  %v1469_v0 = vsel %vm572_vm2, %v1466_v60, %v1468_v20  ;;  %v10596_v31 = vsel %vm1015_vm3, %v1624_v52, %v1626_v13  ;;  %v10616_v20 = vld [vmem:[#allocation2 + $0x1a8] sm:$0x3] }
 0x220   : > { %v1940_v60 = vrot.slane %v10616_v20, 1 }
 0x224   : > { %7734 = vmatmul.msk.f32.gmra.mxu3 %vm380_vm0, %v1467_v50  ;;  %v10586_v28 = vpop.f32.mrf.mxu0  ;;  %7670 = vmatmul.msk.f32.gmra.mxu1 %vm380_vm0, %v10583_v57 }
 0x227   : > { %7636 = vmatmul.msk.f32.gmra.mxu0 %vm380_vm0, %v10252_v10  ;;  %7702 = vmatmul.msk.f32.gmra.mxu2 %vm380_vm0, %v10265_v44  ;;  %v1937_v10 = vrot.slane %v10598_v51, 1  ;;  %v1938_v44 = vrot.slane %v10600_v4, 1 }
 0x229   : > { %v1939_v13 = vsel %vm572_vm2, %v1937_v10, %v1938_v44  ;;  %v1941_v5 = vsel %vm572_vm2, %v1938_v44, %v1940_v60  ;;  %v10691_v60 = vpop.permute.xlu0 %2324 }
 0x22c   : > { %7735 = vmatmul.msk.f32.gmra.mxu3 %vm380_vm0, %v1469_v0  ;;  %v10606_v41 = vpop.f32.mrf.mxu0  ;;  %7671 = vmatmul.msk.f32.gmra.mxu1 %vm380_vm0, %v10596_v31 }
 0x22f   : > { %7637 = vmatmul.msk.f32.gmra.mxu0 %vm380_vm0, %v1467_v50  ;;  %7703 = vmatmul.msk.f32.gmra.mxu2 %vm380_vm0, %v10598_v51 }
 0x234   : > { %7736 = vmatmul.msk.f32.gmra.mxu3 %vm380_vm0, %v1939_v13  ;;  %v10619_v52 = vpop.f32.mrf.mxu0 }
 0x237   : > { %7638 = vmatmul.msk.f32.gmra.mxu0 %vm380_vm0, %v1469_v0  ;;  %7704 = vmatmul.msk.f32.gmra.mxu2 %vm380_vm0, %v10600_v4 }
 0x23c   : > { %7737 = vmatmul.msk.f32.gmra.mxu3 %vm380_vm0, %v1941_v5  ;;  %v10627_v50 = vpop.f32.mrf.mxu0 }
 0x23f   : > { %7739 = vmatmul.msk.f32.vlgmr.msra.gmra.mxu0 %vm380_vm0, %v9668_v47 }
 0x244   : > { %v10631_v10 = vpop.f32.mrf.mxu0 }
 0x247   : > { %7740 = vmatmul.msk.f32.gmra.mxu0 %vm380_vm0, %v9686_v54 }
 0x24c   : > { %v10635_v13 = vpop.f32.mrf.mxu0 }
 0x24f   : > { %7741 = vmatmul.msk.f32.gmra.mxu0 %vm380_vm0, %v9708_v62 }
 0x254   : > { %v10639_v0 = vpop.f32.mrf.mxu0 }
 0x257   : > { %7742 = vmatmul.msk.f32.gmra.mxu0 %vm380_vm0, %v9726_v6 }
 0x25c   : > { %v10643_v44 = vpop.f32.mrf.mxu0 }
 0x25f   : > { %7743 = vmatmul.msk.f32.gmra.mxu0 %vm380_vm0, %v9748_v14 }
 0x264   : > { %v10647_v47 = vpop.f32.mrf.mxu0 }
 0x265   : > { %14867 = vst [vmem:[#allocation18_spill] sm:$0xff] %v10647_v47  ;;  %v14881_v47 = vld [vmem:[#allocation52_spill] sm:$0xff] }
 0x267   : > { %7744 = vmatmul.msk.f32.gmra.mxu0 %vm380_vm0, %v9766_v21 }
 0x26c   : > { %v10651_v54 = vpop.f32.mrf.mxu0 }
 0x26d   : > { %14868 = vst [vmem:[#allocation19_spill] sm:$0xff] %v10651_v54 }
 0x26f   : > { %7745 = vmatmul.msk.f32.gmra.mxu0 %vm380_vm0, %v9788_v29 }
 0x274   : > { %v10655_v62 = vpop.f32.mrf.mxu0 }
 0x275   : > { %14869 = vst [vmem:[#allocation9_spill] sm:$0xff] %v10655_v62 }
 0x277   : > { %7746 = vmatmul.msk.f32.gmra.mxu0 %vm380_vm0, %v9806_v42 }
 0x27c   : > { %v10659_v6 = vpop.f32.mrf.mxu0 }
 0x27d   : > { %14870 = vst [vmem:[#allocation7_spill] sm:$0xff] %v10659_v6 }
 0x27f   : > { %7747 = vmatmul.msk.f32.gmra.mxu0 %vm380_vm0, %v9828_v56 }
 0x284   : > { %v10663_v14 = vpop.f32.mrf.mxu0 }
 0x285   : > { %14871 = vst [vmem:[#allocation16_spill] sm:$0xff] %v10663_v14 }
 0x287   : > { %7748 = vmatmul.msk.f32.gmra.mxu0 %vm380_vm0, %v9846_v2 }
 0x28c   : > { %v10667_v21 = vpop.f32.mrf.mxu0 }
 0x28d   : > { %14872 = vst [vmem:[#allocation10_spill] sm:$0xff] %v10667_v21 }
 0x28f   : > { %7749 = vmatmul.msk.f32.gmra.mxu0 %vm380_vm0, %v9870_v17 }
 0x294   : > { %v10671_v29 = vpop.f32.mrf.mxu0 }
 0x295   : > { %14873 = vst [vmem:[#allocation15_spill] sm:$0xff] %v10671_v29 }
 0x297   : > { %7750 = vmatmul.msk.f32.gmra.mxu0 %vm380_vm0, %v9888_v30 }
 0x29c   : > { %v10675_v42 = vpop.f32.mrf.mxu0 }
 0x29d   : > { %14874 = vst [vmem:[#allocation22_spill] sm:$0xff] %v10675_v42 }
 0x29f   : > { %7751 = vmatmul.msk.f32.gmra.mxu0 %vm380_vm0, %v9914_v58 }
 0x2a4   : > { %v10679_v56 = vpop.f32.mrf.mxu0 }
 0x2a5   : > { %14875 = vst [vmem:[#allocation23_spill] sm:$0xff] %v10679_v56 }
 0x2a7   : > { %7752 = vmatmul.msk.f32.gmra.mxu0 %vm380_vm0, %v14810_v33 }
 0x2ac   : > { %v10683_v2 = vpop.f32.mrf.mxu0 }
 0x2ad   : > { %14876 = vst [vmem:[#allocation12_spill] sm:$0xff] %v10683_v2 }
 0x2af   : > { %7753 = vmatmul.msk.f32.gmra.mxu0 %vm380_vm0, %v14814_v12  ;;  %v1832_v12 = vpop.f32.mrf.mxu2 }
 0x2b4   : > { %v10687_v17 = vpop.f32.mrf.mxu0 }
 0x2b5   : > { %14877 = vst [vmem:[#allocation8_spill] sm:$0xff] %v10687_v17 }
 0x2b7   : > { %7754 = vmatmul.msk.f32.gmra.mxu0 %vm380_vm0, %v14822_v11  ;;  %v1677_v11 = vpop.f32.mrf.mxu1 }
 0x2bc   : > { %v2125_v30 = vpop.f32.mrf.mxu0 }
 0x2bd   : > { %v10694_v58 = vadd.f32 %v2125_v30, %v10453_v43  ;;  %v1835_v30 = vpop.f32.mrf.mxu2 }
 0x2bf   : > { %7755 = vmatmul.msk.f32.gmra.mxu0 %vm380_vm0, %v14830_v19  ;;  %v2327_v33 = vadd.f32 %v10691_v60, %v10694_v58  ;;  %v1991_v19 = vpop.f32.mrf.mxu3 }
 0x2c1   : > { %2391 = vrot.lane.b32.xlu0 %v2327_v33, %s9379_s24 }
 0x2c4   : > { %v2128_v5 = vpop.f32.mrf.mxu0 }
 0x2c5   : > { %v10702_v17 = vadd.f32 %v2128_v5, %v10464_v39  ;;  %v1680_v39 = vpop.f32.mrf.mxu1 }
 0x2c7   : > { %7756 = vmatmul.msk.f32.gmra.mxu0 %vm380_vm0, %v14833_v3  ;;  %v2328_v43 = vadd.f32 %v10691_v60, %v10702_v17  ;;  %v1994_v3 = vpop.f32.mrf.mxu3 }
 0x2c9   : > { %2393 = vrot.lane.b32.xlu1 %v2328_v43, %s9379_s24  ;;  %v1838_v43 = vpop.f32.mrf.mxu2 }
 0x2cc   : > { %v2131_v2 = vpop.f32.mrf.mxu0 }
 0x2cd   : > { %v10710_v56 = vadd.f32 %v2131_v2, %v10475_v45  ;;  %v1683_v2 = vpop.f32.mrf.mxu1 }
 0x2cf   : > { %v2329_v33 = vadd.f32 %v10691_v60, %v10710_v56  ;;  %7757 = vmatmul.msk.f32.gmra.mxu0 %vm380_vm0, %v14837_v34 }
 0x2d1   : > { %2395 = vrot.lane.b32.xlu1 %v2329_v33, %s9379_s24  ;;  %v1997_v33 = vpop.f32.mrf.mxu3 }
 0x2d4   : > { %v2134_v5 = vpop.f32.mrf.mxu0 }
 0x2d5   : > { %v10718_v42 = vadd.f32 %v2134_v5, %v10486_v24  ;;  %v10732_v24 = vpop.f32.mrf.mxu2 }
 0x2d7   : > { %7758 = vmatmul.msk.f32.gmra.mxu0 %vm380_vm0, %v14841_v18  ;;  %v2330_v45 = vadd.f32 %v10691_v60, %v10718_v42  ;;  %v1686_v18 = vpop.f32.mrf.mxu1 }
 0x2d9   : > { %2397 = vrot.lane.b32.xlu2 %v2330_v45, %s9379_s24 }
 0x2dc   : > { %v2137_v29 = vpop.f32.mrf.mxu0 }
 0x2dd   : > { %v10726_v34 = vadd.f32 %v2137_v29, %v10497_v22  ;;  %v10742_v29 = vpop.f32.mrf.mxu3 }
 0x2df   : > { %v2331_v21 = vadd.f32 %v10691_v60, %v10726_v34  ;;  %7759 = vmatmul.msk.f32.gmra.mxu0 %vm380_vm0, %v14845_v7  ;;  %v10745_v7 = vpop.f32.mrf.mxu2  ;;  %v10750_v6 = vpop.f32.mrf.mxu1 }
 0x2e1   : > { %2399 = vrot.lane.b32.xlu2 %v2331_v21, %s9379_s24 }
 0x2e4   : > { %v2140_v5 = vpop.f32.mrf.mxu0 }
 0x2e5   : > { %v10736_v45 = vadd.f32 %v2140_v5, %v10508_v25  ;;  %v14880_v5 = vld [vmem:[#allocation49_spill] sm:$0xff] }
 0x2e7   : > { %14878 = vst [vmem:[#allocation21_spill] sm:$0xff] %v10736_v45  ;;  %v2332_v22 = vadd.f32 %v10691_v60, %v10736_v45  ;;  %7760 = vmatmul.msk.f32.gmra.mxu0 %vm380_vm0, %v14849_v55  ;;  %v10757_v55 = vpop.f32.mrf.mxu3  ;;  %v10761_v62 = vpop.f32.mrf.mxu2 }
 0x2e9   : > { %2401 = vrot.lane.b32.xlu0 %v2332_v22, %s9379_s24  ;;  %v1599_v22 = vadd.f32 %v10523_v40, %v14880_v5  ;;  %v1600_v40 = vadd.f32 %v10539_v37, %v14881_v47 }
 0x2ec   : > { %v2143_v14 = vpop.f32.mrf.mxu0 }
 0x2ed   : > { %v10748_v21 = vadd.f32 %v2143_v14, %v10519_v27  ;;  %v1757_v14 = vadd.f32 %v1677_v11, %v1599_v22  ;;  %v1758_v22 = vadd.f32 %v1680_v39, %v1600_v40 }
 0x2ef   : > { %14879 = vst [vmem:[#allocation17_spill] sm:$0xff] %v10748_v21  ;;  %v2333_v25 = vadd.f32 %v10691_v60, %v10748_v21  ;;  %7761 = vmatmul.msk.f32.gmra.mxu0 %vm380_vm0, %v14853_v16  ;;  %v10770_v16 = vpop.f32.mrf.mxu1  ;;  %v10775_v45 = vpop.f32.mrf.mxu3  ;;  %v1913_v37 = vadd.f32 %v1835_v30, %v1758_v22 }
 0x2f0   : > { %v10779_v11 = vpop.f32.mrf.mxu2 }
 0x2f1   : > { %2403 = vrot.lane.b32.xlu1 %v2333_v25, %s9379_s24  ;;  %v1912_v25 = vadd.f32 %v1832_v12, %v1757_v14  ;;  %v2857_v12 = vld [vmem:[%s14519_s3 + $0x8] sm:$0xff]  ;;  %v2072_v39 = vadd.f32 %v1994_v3, %v1913_v37 }
 0x2f2   : > { %2937 = vmatpush.msra.mxu1 %v2857_v12 }
 0x2f3   : > { %v2071_v5 = vadd.f32 %v1991_v19, %v1912_v25  ;;  %v14882_v19 = vld [vmem:[#allocation57_spill] sm:$0xff] }
 0x2f4   : > { %v2146_v54 = vpop.f32.mrf.mxu0 }
 0x2f5   : > { %v10764_v27 = vadd.f32 %v2146_v54, %v10531_v36 }
 0x2f7   : > { %v2334_v21 = vadd.f32 %v10691_v60, %v10764_v27  ;;  %7762 = vmatmul.msk.f32.gmra.mxu0 %vm380_vm0, %v14857_v1  ;;  %v10789_v47 = vpop.f32.mrf.mxu1  ;;  %v10795_v40 = vpop.f32.mrf.mxu3 }
 0x2f8   : > { %v10801_v30 = vpop.f32.mrf.mxu2 }
 0x2f9   : > { %2405 = vrot.lane.b32.xlu2 %v2334_v21, %s9379_s24  ;;  %v1601_v21 = vadd.f32 %v10549_v48, %v14882_v19  ;;  %v14883_v48 = vld [vmem:[#allocation60_spill] sm:$0xff] }
 0x2fa   : > { %v1602_v3 = vadd.f32 %v10559_v63, %v14883_v48 }
 0x2fc   : > { %v2149_v36 = vpop.f32.mrf.mxu0 }
 0x2fd   : > { %v10777_v54 = vadd.f32 %v2149_v36, %v2071_v5 }
 0x2ff   : > { %v2335_v1 = vadd.f32 %v10691_v60, %v10777_v54  ;;  %7763 = vmatmul.msk.f32.gmra.mxu0 %vm380_vm0, %v14860_v8  ;;  %v1759_v8 = vadd.f32 %v1683_v2, %v1601_v21  ;;  %v10808_v2 = vpop.f32.mrf.mxu1  ;;  %v10827_v37 = vpop.f32.mrf.mxu3  ;;  %v14885_v21 = vld [vmem:[#allocation65_spill] sm:$0xff] }
 0x301   : > { %2407 = vrot.lane.b32.xlu0 %v2335_v1, %s9379_s24  ;;  %v1914_v36 = vadd.f32 %v1838_v43, %v1759_v8  ;;  %v14884_v1 = vmov 0.0   ;;  %v1760_v43 = vadd.f32 %v1686_v18, %v1602_v3 }
 0x302   : > { %2586 = vst.msk [vmem:[#allocation3] sm:$0xff] %vm2585_vm5, %v14884_v1 }
 0x303   : > { %v2073_v22 = vadd.f32 %v1997_v33, %v1914_v36  ;;  %2587 = vst.msk [vmem:[#allocation3 + $0x8] sm:$0xff] %vm2585_vm5, %v14884_v1  ;;  %v2728_v33 = vld [vmem:[%s14519_s3] sm:$0xff]  ;;  %v1915_v18 = vadd.f32 %v10732_v24, %v1760_v43 }
 0x304   : > { %v2152_v14 = vpop.f32.mrf.mxu0  ;;  %2590 = vst.msk [vmem:[#allocation3 + $0x18] sm:$0xff] %vm2585_vm5, %v14884_v1  ;;  %3114 = vmatpush.msra.mxu2 %v2728_v33 }
 0x305   : > { %v10793_v25 = vadd.f32 %v2152_v14, %v2072_v39  ;;  %2591 = vst.msk [vmem:[#allocation3 + $0x20] sm:$0xff] %vm2585_vm5, %v14884_v1  ;;  %v1603_v39 = vadd.f32 %v10569_v26, %v14885_v21  ;;  %v2074_v14 = vadd.f32 %v10742_v29, %v1915_v18 }
 0x306   : > { %2593 = vst.msk [vmem:[#allocation3 + $0x30] sm:$0xff] %vm2585_vm5, %v14884_v1 }
 0x307   : > { %v2336_v5 = vadd.f32 %v10691_v60, %v10793_v25  ;;  %7764 = vmatmul.msk.f32.gmra.mxu0 %vm380_vm0, %v14863_v35  ;;  %2594 = vst.msk [vmem:[#allocation3 + $0x38] sm:$0xff] %vm2585_vm5, %v14884_v1  ;;  %v10851_v36 = vpop.f32.mrf.mxu1  ;;  %v1761_v29 = vadd.f32 %v10750_v6, %v1603_v39 }
 0x308   : > { %2596 = vst.msk [vmem:[#allocation3 + $0x48] sm:$0xff] %vm2585_vm5, %v14884_v1 }
 0x309   : > { %2409 = vrot.lane.b32.xlu1 %v2336_v5, %s9379_s24  ;;  %v2674_v19 = vld [vmem:[#allocation3] sm:$0xff]  ;;  %2597 = vst.msk [vmem:[#allocation3 + $0x50] sm:$0xff] %vm2585_vm5, %v14884_v1  ;;  %v1916_v6 = vadd.f32 %v10745_v7, %v1761_v29  ;;  %v1604_v7 = vadd.f32 %v10586_v28, %v10245_v23 }
 0x30a   : > { %7803 = vmatmul.msk.f32.vlgmr.msra.gmra.mxu2 %vm2585_vm5, %v2674_v19  ;;  %2599 = vst.msk [vmem:[#allocation3 + $0x60] sm:$0xff] %vm2585_vm5, %v14884_v1  ;;  %v3212_v5 = vrot.slane %v2674_v19, 2  ;;  %v10855_v26 = vld [vmem:[#allocation3 + $0x8] sm:$0xff]  ;;  %v2777_v43 = vrot.slane %v2674_v19, 1 }
 0x30b   : > { %2600 = vst.msk [vmem:[#allocation3 + $0x68] sm:$0xff] %vm2585_vm5, %v14884_v1  ;;  %v3213_v3 = vrot.slane %v10855_v26, 2  ;;  %v2778_v19 = vrot.slane %v10855_v26, 1  ;;  %v1762_v28 = vadd.f32 %v10770_v16, %v1604_v7  ;;  %v1605_v16 = vadd.f32 %v10606_v41, %v10263_v49 }
 0x30c   : > { %v2155_v12 = vpop.f32.mrf.mxu0  ;;  %2602 = vst.msk [vmem:[#allocation3 + $0x78] sm:$0xff] %vm2585_vm5, %v14884_v1 }
 0x30d   : > { %v10812_v35 = vadd.f32 %v2155_v12, %v2073_v22  ;;  %2603 = vst.msk [vmem:[#allocation3 + $0x80] sm:$0xff] %vm2585_vm5, %v14884_v1  ;;  %v3292_v22 = vld [vmem:[%s14519_s3 + $0x10] sm:$0xff]  ;;  %v10877_v12 = vpop.f32.mrf.mxu3  ;;  %v2779_v23 = vsel %vm572_vm2, %v2777_v43, %v2778_v19  ;;  %v1763_v49 = vadd.f32 %v10789_v47, %v1605_v16  ;;  %v11017_v16 = vld [vmem:[%s14518_s2 + $0x3] ss:$0 sm:$0xff] }
 0x30e   : > { %2605 = vst.msk [vmem:[#allocation3 + $0x90] sm:$0xff] %vm2585_vm5, %v14884_v1  ;;  %3372 = vmatpush.msra.mxu3 %v3292_v22  ;;  %7771 = vmatmul.msk.f32.vlgmr.msra.gmra.mxu1 %vm2585_vm5, %v2779_v23  ;;  %v2096_v22 = vrot.slane %v10600_v4, 2 }
 0x30f   : > { %v2337_v63 = vadd.f32 %v10691_v60, %v10812_v35  ;;  %7765 = vmatmul.msk.f32.gmra.mxu0 %vm380_vm0, %v10237_v15  ;;  %v10835_v15 = vpop.f32.mrf.mxu2  ;;  %2606 = vst.msk [vmem:[#allocation3 + $0x98] sm:$0xff] %vm2585_vm5, %v14884_v1  ;;  %v10911_v39 = vpop.f32.mrf.mxu1 }
 0x310   : > { %2608 = vst.msk [vmem:[#allocation3 + $0xa8] sm:$0xff] %vm2585_vm5, %v14884_v1 }
 0x311   : > { %2411 = vrot.lane.b32.xlu2 %v2337_v63, %s9379_s24  ;;  %2609 = vst.msk [vmem:[#allocation3 + $0xb0] sm:$0xff] %vm2585_vm5, %v14884_v1  ;;  %v2075_v63 = vadd.f32 %v10757_v55, %v1916_v6  ;;  %v1918_v6 = vadd.f32 %v10779_v11, %v1763_v49 }
 0x312   : > { %2611 = vst.msk [vmem:[#allocation3 + $0xc0] sm:$0xff] %vm2585_vm5, %v14884_v1  ;;  %7804 = vmatmul.msk.f32.gmra.mxu2 %vm2585_vm5, %v10855_v26 }
 0x313   : > { %2612 = vst.msk [vmem:[#allocation3 + $0xc8] sm:$0xff] %vm2585_vm5, %v14884_v1  ;;  %v2077_v4 = vadd.f32 %v10795_v40, %v1918_v6 }
 0x314   : > { %v2158_v24 = vpop.f32.mrf.mxu0  ;;  %2614 = vst.msk [vmem:[#allocation3 + $0xd8] sm:$0xff] %vm2585_vm5, %v14884_v1 }
 0x315   : > { %v10847_v8 = vadd.f32 %v2158_v24, %v2074_v14  ;;  %2615 = vst.msk [vmem:[#allocation3 + $0xe0] sm:$0xff] %vm2585_vm5, %v14884_v1  ;;  %v1917_v14 = vadd.f32 %v10761_v62, %v1762_v28  ;;  %v10929_v62 = vpop.f32.mrf.mxu3 }
 0x316   : > { %2617 = vst.msk [vmem:[#allocation3 + $0xf0] sm:$0xff] %vm2585_vm5, %v14884_v1 }
 0x317   : > { %v2338_v48 = vadd.f32 %v10691_v60, %v10847_v8  ;;  %7766 = vmatmul.msk.f32.gmra.mxu0 %vm380_vm0, %v10255_v9  ;;  %v3214_v9 = vsel %vm1015_vm3, %v3212_v5, %v3213_v3  ;;  %v10889_v33 = vpop.f32.mrf.mxu2  ;;  %2618 = vst.msk [vmem:[#allocation3 + $0xf8] sm:$0xff] %vm2585_vm5, %v14884_v1  ;;  %v2076_v24 = vadd.f32 %v10775_v45, %v1917_v14  ;;  %v2095_v45 = vrot.slane %v10598_v51, 2  ;;  %v10956_v47 = vpop.f32.mrf.mxu1 }
 0x318   : > { %7835 = vmatmul.msk.f32.vlgmr.msra.gmra.mxu3 %vm2585_vm5, %v3214_v9  ;;  %2620 = vst.msk [vmem:[#allocation3 + $0x108] sm:$0xff] %vm2585_vm5, %v14884_v1  ;;  %v1606_v51 = vadd.f32 %v10619_v52, %v10275_v59 }
 0x319   : > { %2413 = vrot.lane.b32.xlu0 %v2338_v48, %s9379_s24  ;;  %2621 = vst.msk [vmem:[#allocation3 + $0x110] sm:$0xff] %vm2585_vm5, %v14884_v1  ;;  %v2097_v9 = vsel %vm1015_vm3, %v2095_v45, %v2096_v22 }
 0x31a   : > { %2623 = vst.msk [vmem:[#allocation3 + $0x120] sm:$0xff] %vm2585_vm5, %v14884_v1  ;;  %v1764_v40 = vadd.f32 %v10808_v2, %v1606_v51  ;;  %v11003_v2 = vld [vmem:[%s14518_s2 + $0x2] ss:$0 sm:$0xff] }
 0x31b   : > { %2624 = vst.msk [vmem:[#allocation3 + $0x128] sm:$0xff] %vm2585_vm5, %v14884_v1 }
 0x31c   : > { %v2161_v18 = vpop.f32.mrf.mxu0  ;;  %2626 = vst.msk [vmem:[#allocation3 + $0x138] sm:$0xff] %vm2585_vm5, %v14884_v1 }
 0x31d   : > { %v10894_v21 = vadd.f32 %v2161_v18, %v2075_v63  ;;  %2627 = vst.msk [vmem:[#allocation3 + $0x140] sm:$0xff] %vm2585_vm5, %v14884_v1  ;;  %v10977_v7 = vpop.f32.mrf.mxu3 }
 0x31e   : > { %2629 = vst.msk [vmem:[#allocation3 + $0x150] sm:$0xff] %vm2585_vm5, %v14884_v1 }
 0x31f   : > { %v2339_v55 = vadd.f32 %v10691_v60, %v10894_v21  ;;  %7767 = vmatmul.msk.f32.gmra.mxu0 %vm380_vm0, %v10583_v57  ;;  %v3502_v57 = vld [vmem:[%s14519_s3 + $0x18] sm:$0xff]  ;;  %v10937_v48 = vpop.f32.mrf.mxu2  ;;  %2630 = vst.msk [vmem:[#allocation3 + $0x158] sm:$0xff] %vm2585_vm5, %v14884_v1 }
 0x320   : > { %3524 = vmatpush.msrb.mxu0 %v3502_v57  ;;  %2632 = vst.msk [vmem:[#allocation3 + $0x168] sm:$0xff] %vm2585_vm5, %v14884_v1  ;;  %v11012_v57 = vpop.f32.mrf.mxu1 }
 0x321   : > { %2415 = vrot.lane.b32.xlu1 %v2339_v55, %s9379_s24  ;;  %2633 = vst.msk [vmem:[#allocation3 + $0x170] sm:$0xff] %vm2585_vm5, %v14884_v1 }
 0x322   : > { %2635 = vst.msk [vmem:[#allocation3 + $0x180] sm:$0xff] %vm2585_vm5, %v14884_v1 }
 0x323   : > { %2636 = vst.msk [vmem:[#allocation3 + $0x188] sm:$0xff] %vm2585_vm5, %v14884_v1 }
 0x324   : > { %v2164_v5 = vpop.f32.mrf.mxu0  ;;  %2638 = vst.msk [vmem:[#allocation3 + $0x198] sm:$0xff] %vm2585_vm5, %v14884_v1 }
 0x325   : > { %v10933_v29 = vadd.f32 %v2164_v5, %v2076_v24  ;;  %2639 = vst.msk [vmem:[#allocation3 + $0x1a0] sm:$0xff] %vm2585_vm5, %v14884_v1 }
 0x326   : > { %2595 = vst.msk [vmem:[#allocation3 + $0x40] sm:$0x3] %vm2588_vm6, %v14884_v1 }
 0x327   : > { %v2340_v41 = vadd.f32 %v10691_v60, %v10933_v29  ;;  %7768 = vmatmul.msk.f32.gmra.mxu0 %vm380_vm0, %v10596_v31  ;;  %v10961_v31 = vld [vmem:[%s14518_s2] ss:$0 sm:$0xff]  ;;  %v10991_v18 = vpop.f32.mrf.mxu2  ;;  %2589 = vst.msk [vmem:[#allocation3 + $0x10] sm:$0x3] %vm2588_vm6, %v14884_v1 }
 0x328   : > { %v2258_v59 = vadd.f32 %v10961_v31, %v10694_v58  ;;  %v2261_v52 = vadd.f32 %v10961_v31, %v10718_v42  ;;  %v2098_v42 = vrot.slane %v10616_v20, 2  ;;  %v1919_v58 = vadd.f32 %v10801_v30, %v1764_v40  ;;  %2592 = vst.msk [vmem:[#allocation3 + $0x28] sm:$0x3] %vm2588_vm6, %v14884_v1 }
 0x329   : > { %2417 = vrot.lane.b32.xlu2 %v2340_v41, %s9379_s24  ;;  %2598 = vst.msk [vmem:[#allocation3 + $0x58] sm:$0x3] %vm2588_vm6, %v14884_v1  ;;  %v1607_v20 = vadd.f32 %v10627_v50, %v10285_v32  ;;  %v2259_v49 = vadd.f32 %v10961_v31, %v10702_v17  ;;  %v2262_v41 = vadd.f32 %v10961_v31, %v10726_v34 }
 0x32a   : > { %v2290_v23 = vmax.f32 %v2258_v59, 0.0  ;;  %v2293_v28 = vmax.f32 %v2261_v52, 0.0  ;;  %v2078_v30 = vadd.f32 %v10827_v37, %v1919_v58  ;;  %2601 = vst.msk [vmem:[#allocation3 + $0x70] sm:$0x3] %vm2588_vm6, %v14884_v1  ;;  %v2099_v50 = vsel %vm1015_vm3, %v2096_v22, %v2098_v42 }
 0x32b   : > { %2604 = vst.msk [vmem:[#allocation3 + $0x88] sm:$0x3] %vm2588_vm6, %v14884_v1  ;;  %v1765_v22 = vadd.f32 %v10851_v36, %v1607_v20  ;;  %v2291_v40 = vmax.f32 %v2259_v49, 0.0 }
 0x32c   : > { %v2167_v11 = vpop.f32.mrf.mxu0  ;;  %2607 = vst.msk [vmem:[#allocation3 + $0xa0] sm:$0x3] %vm2588_vm6, %v14884_v1 }
 0x32d   : > { %v10973_v43 = vadd.f32 %v2167_v11, %v2077_v4  ;;  %2610 = vst.msk [vmem:[#allocation3 + $0xb8] sm:$0x3] %vm2588_vm6, %v14884_v1  ;;  %v11040_v4 = vpop.f32.mrf.mxu3  ;;  %v1920_v59 = vadd.f32 %v10835_v15, %v1765_v22  ;;  %v1608_v15 = vadd.f32 %v10631_v10, %v10295_v38  ;;  %v11071_v10 = vpop.f32.mrf.mxu1 }
 0x32e   : > { %2613 = vst.msk [vmem:[#allocation3 + $0xd0] sm:$0x3] %vm2588_vm6, %v14884_v1  ;;  %v2676_v17 = vld [vmem:[#allocation3 + $0x10] sm:$0x3] }
 0x32f   : > { %v2341_v63 = vadd.f32 %v10691_v60, %v10973_v43  ;;  %7769 = vmatmul.msk.f32.gmra.mxu0 %vm380_vm0, %v2097_v9  ;;  %2616 = vst.msk [vmem:[#allocation3 + $0xe8] sm:$0x3] %vm2588_vm6, %v14884_v1  ;;  %v3215_v9 = vrot.slane %v2676_v17, 2  ;;  %v2780_v36 = vrot.slane %v2676_v17, 1  ;;  %v11050_v52 = vpop.f32.mrf.mxu2 }
 0x330   : > { %2619 = vst.msk [vmem:[#allocation3 + $0x100] sm:$0x3] %vm2588_vm6, %v14884_v1 }
 0x331   : > { %2419 = vrot.lane.b32.xlu0 %v2341_v63, %s9379_s24  ;;  %v2294_v63 = vmax.f32 %v2262_v41, 0.0  ;;  %v3216_v42 = vsel %vm1015_vm3, %v3213_v3, %v3215_v9  ;;  %v2781_v58 = vsel %vm572_vm2, %v2778_v19, %v2780_v36  ;;  %2622 = vst.msk [vmem:[#allocation3 + $0x118] sm:$0x3] %vm2588_vm6, %v14884_v1  ;;  %v1610_v9 = vadd.f32 %v10639_v0, %v10315_v53 }
 0x332   : > { %7836 = vmatmul.msk.f32.gmra.mxu3 %vm2585_vm5, %v3216_v42  ;;  %7772 = vmatmul.msk.f32.gmra.mxu1 %vm2585_vm5, %v2781_v58  ;;  %2625 = vst.msk [vmem:[#allocation3 + $0x130] sm:$0x3] %vm2588_vm6, %v14884_v1 }
 0x333   : > { %v2392_v55 = vpop.permute.xlu0 %2391  ;;  %v2398_v14 = vpop.permute.xlu2 %2397  ;;  %2628 = vst.msk [vmem:[#allocation3 + $0x148] sm:$0x3] %vm2588_vm6, %v14884_v1 }
 0x334   : > { %v2487_v24 = vadd.f32 %v2392_v55, %v2290_v23  ;;  %v2490_v5 = vadd.f32 %v2398_v14, %v2293_v28  ;;  %v2170_v32 = vpop.f32.mrf.mxu0  ;;  %v2079_v23 = vadd.f32 %v10877_v12, %v1920_v59  ;;  %v2260_v12 = vadd.f32 %v10961_v31, %v10710_v56  ;;  %2631 = vst.msk [vmem:[#allocation3 + $0x160] sm:$0x3] %vm2588_vm6, %v14884_v1 }
 0x335   : > { %v11024_v37 = vadd.f32 %v2170_v32, %v2078_v30  ;;  %v1766_v14 = vadd.f32 %v10911_v39, %v1608_v15  ;;  %2634 = vst.msk [vmem:[#allocation3 + $0x178] sm:$0x3] %vm2588_vm6, %v14884_v1  ;;  %v11094_v49 = vpop.f32.mrf.mxu3 }
 0x336   : > { %v2520_v45 = vmul.f32 %v11003_v2, %v2487_v24  ;;  %v2523_v6 = vmul.f32 %v11003_v2, %v2490_v5  ;;  %2637 = vst.msk [vmem:[#allocation3 + $0x190] sm:$0x3] %vm2588_vm6, %v14884_v1  ;;  %v2292_v41 = vmax.f32 %v2260_v12, 0.0 }
 0x337   : > { %v2342_v51 = vadd.f32 %v10691_v60, %v11024_v37  ;;  %7770 = vmatmul.msk.f32.gmra.mxu0 %vm380_vm0, %v2099_v50  ;;  %v1921_v32 = vadd.f32 %v10889_v33, %v1766_v14  ;;  %v1609_v50 = vadd.f32 %v10635_v13, %v10305_v46  ;;  %2640 = vst.msk [vmem:[#allocation3 + $0x1a8] sm:$0x3] %vm2588_vm6, %v14884_v1  ;;  %v11103_v46 = vpop.f32.mrf.mxu2 }
 0x338   : > { %v2553_v34 = vadd.f32 %v11017_v16, %v2520_v45  ;;  %v2556_v11 = vadd.f32 %v11017_v16, %v2523_v6 }
 0x339   : > { %2421 = vrot.lane.b32.xlu1 %v2342_v51, %s9379_s24  ;;  %v2080_v33 = vadd.f32 %v10929_v62, %v1921_v32  ;;  %v1767_v1 = vadd.f32 %v10956_v47, %v1609_v50 }
 0x33a   : > { %2642 = vst.msk [vmem:[#allocation3 + $0x19] sm:$0xff] %vm2585_vm5, %v2553_v34  ;;  %v11112_v34 = vpop.f32.mrf.mxu1 }
 0x33b   : > { %2645 = vst.msk [vmem:[#allocation3 + $0x39] sm:$0xff] %vm2585_vm5, %v2556_v11  ;;  %v2394_v28 = vpop.permute.xlu1 %2393  ;;  %v2400_v20 = vpop.permute.xlu2 %2399  ;;  %v1922_v62 = vadd.f32 %v10937_v48, %v1767_v1 }
 0x33c   : > { %v2488_v3 = vadd.f32 %v2394_v28, %v2291_v40  ;;  %v2491_v26 = vadd.f32 %v2400_v20, %v2294_v63  ;;  %v2173_v30 = vpop.f32.mrf.mxu0  ;;  %v1768_v28 = vadd.f32 %v11012_v57, %v1610_v9  ;;  %v14887_v9 = vld [vmem:[#allocation67_spill] sm:$0xff] }
 0x33d   : > { %v11069_v38 = vadd.f32 %v2173_v30, %v2079_v23  ;;  %v2081_v36 = vadd.f32 %v10977_v7, %v1922_v62  ;;  %v11122_v42 = vpop.f32.mrf.mxu3  ;;  %v2265_v7 = vadd.f32 %v10961_v31, %v10764_v27 }
 0x33e   : > { %v2521_v19 = vmul.f32 %v11003_v2, %v2488_v3  ;;  %v2524_v55 = vmul.f32 %v11003_v2, %v2491_v26  ;;  %v1923_v26 = vadd.f32 %v10991_v18, %v1768_v28  ;;  %v14889_v28 = vld [vmem:[#allocation17_spill] sm:$0xff] }
 0x33f   : > { %v2343_v24 = vadd.f32 %v10691_v60, %v11069_v38  ;;  %v11139_v20 = vpop.f32.mrf.mxu2  ;;  %v2297_v14 = vmax.f32 %v2265_v7, 0.0 }
 0x340   : > { %v2554_v56 = vadd.f32 %v11017_v16, %v2521_v19  ;;  %v2557_v5 = vadd.f32 %v11017_v16, %v2524_v55  ;;  %v1611_v19 = vadd.f32 %v10643_v44, %v10325_v61  ;;  %v2082_v57 = vadd.f32 %v11040_v4, %v1923_v26  ;;  %v14886_v4 = vld [vmem:[#allocation21_spill] sm:$0xff] }
 0x341   : > { %2423 = vrot.lane.b32.xlu2 %v2343_v24, %s9379_s24  ;;  %v2677_v39 = vld [vmem:[#allocation3 + $0x18] sm:$0xff]  ;;  %v2263_v50 = vadd.f32 %v10961_v31, %v14886_v4 }
 0x342   : > { %7805 = vmatmul.msk.f32.gmra.mxu2 %vm2585_vm5, %v2677_v39  ;;  %7867 = vmatmul.msk.f32.vlgmr.msrb.gmra.mxu0 %vm2585_vm5, %v2677_v39  ;;  %2643 = vst.msk [vmem:[#allocation3 + $0x21] sm:$0xff] %vm2585_vm5, %v2554_v56  ;;  %v2782_v59 = vrot.slane %v2677_v39, 1  ;;  %v3217_v40 = vrot.slane %v2677_v39, 2  ;;  %v11147_v55 = vpop.f32.mrf.mxu1  ;;  %v1769_v61 = vadd.f32 %v11071_v10, %v1611_v19  ;;  %v2682_v19 = vld [vmem:[#allocation3 + $0x40] sm:$0x3] }
 0x343   : > { %v2396_v45 = vpop.permute.xlu1 %2395  ;;  %2646 = vst.msk [vmem:[#allocation3 + $0x49] sm:$0xff] %vm2585_vm5, %v2557_v5 }
 0x344   : > { %v2489_v6 = vadd.f32 %v2396_v45, %v2292_v41  ;;  %v2176_v22 = vpop.f32.mrf.mxu0 }
 0x345   : > { %v11105_v13 = vadd.f32 %v2176_v22, %v2080_v33  ;;  %v11161_v44 = vpop.f32.mrf.mxu3 }
 0x346   : > { %v2522_v51 = vmul.f32 %v11003_v2, %v2489_v6  ;;  %v1924_v6 = vadd.f32 %v11050_v52, %v1769_v61 }
 0x347   : > { %v2344_v17 = vadd.f32 %v10691_v60, %v11105_v13  ;;  %v11174_v22 = vpop.f32.mrf.mxu2 }
 0x348   : > { %v2555_v11 = vadd.f32 %v11017_v16, %v2522_v51 }
 0x349   : > { %2425 = vrot.lane.b32.xlu0 %v2344_v17, %s9379_s24  ;;  %v2678_v47 = vld [vmem:[#allocation3 + $0x20] sm:$0xff]  ;;  %v2679_v23 = vld [vmem:[#allocation3 + $0x28] sm:$0x3] }
 0x34a   : > { %2644 = vst.msk [vmem:[#allocation3 + $0x31] sm:$0xff] %vm2585_vm5, %v2555_v11  ;;  %v2783_v63 = vrot.slane %v2678_v47, 1  ;;  %7806 = vmatmul.msk.f32.gmra.mxu2 %vm2585_vm5, %v2678_v47  ;;  %v3218_v48 = vrot.slane %v2678_v47, 2  ;;  %7868 = vmatmul.msk.f32.gmra.mxu0 %vm2585_vm5, %v2678_v47  ;;  %v2785_v27 = vrot.slane %v2679_v23, 1  ;;  %v3220_v12 = vrot.slane %v2679_v23, 2 }
 0x34b   : > { %v2295_v11 = vmax.f32 %v2263_v50, 0.0 }
 0x34c   : > { %v2179_v58 = vpop.f32.mrf.mxu0  ;;  %v11127_v53 = vsel %vm572_vm2, %v2782_v59, %v2783_v63  ;;  %v11130_v0 = vsel %vm1015_vm3, %v3217_v40, %v3218_v48  ;;  %v11155_v32 = vsel %vm572_vm2, %v2783_v63, %v2785_v27  ;;  %v11158_v39 = vsel %vm1015_vm3, %v3218_v48, %v3220_v12  ;;  %v11183_v40 = vpop.f32.mrf.mxu1 }
 0x34d   : > { %v11124_v15 = vadd.f32 %v2179_v58, %v2081_v36  ;;  %7773 = vmatmul.msk.f32.gmra.mxu1 %vm2585_vm5, %v11127_v53  ;;  %7837 = vmatmul.msk.f32.gmra.mxu3 %vm2585_vm5, %v11130_v0  ;;  %v14888_v36 = vld [vmem:[#allocation18_spill] sm:$0xff]  ;;  %v2083_v59 = vadd.f32 %v11094_v49, %v1924_v6  ;;  %v2264_v49 = vadd.f32 %v10961_v31, %v14889_v28  ;;  %v11203_v27 = vpop.f32.mrf.mxu3 }
 0x34e   : > { %v1612_v47 = vadd.f32 %v14888_v36, %v14887_v9  ;;  %v2268_v6 = vadd.f32 %v10961_v31, %v10812_v35 }
 0x34f   : > { %v2345_v3 = vadd.f32 %v10691_v60, %v11124_v15  ;;  %v11212_v4 = vpop.f32.mrf.mxu2 }
 0x350   : > { %v1770_v26 = vadd.f32 %v11112_v34, %v1612_v47  ;;  %v2300_v47 = vmax.f32 %v2268_v6, 0.0  ;;  %v14894_v6 = vld [vmem:[#allocation70_spill] sm:$0xff] }
 0x351   : > { %2427 = vrot.lane.b32.xlu1 %v2345_v3, %s9379_s24  ;;  %v2680_v30 = vld [vmem:[#allocation3 + $0x30] sm:$0xff]  ;;  %v2681_v33 = vld [vmem:[#allocation3 + $0x38] sm:$0xff] }
 0x352   : > { %7807 = vmatmul.msk.f32.gmra.mxu2 %vm2585_vm5, %v2680_v30  ;;  %7869 = vmatmul.msk.f32.gmra.mxu0 %vm2585_vm5, %v2680_v30  ;;  %v2787_v1 = vrot.slane %v2680_v30, 1  ;;  %v2788_v51 = vrot.slane %v2681_v33, 1  ;;  %v3222_v17 = vrot.slane %v2680_v30, 2  ;;  %v3223_v62 = vrot.slane %v2681_v33, 2 }
 0x353   : > { %v2406_v24 = vpop.permute.xlu2 %2405 }
 0x354   : > { %v2494_v56 = vadd.f32 %v2406_v24, %v2297_v14  ;;  %v2182_v18 = vpop.f32.mrf.mxu0  ;;  %v11188_v7 = vsel %vm572_vm2, %v2787_v1, %v2788_v51  ;;  %v11191_v23 = vsel %vm1015_vm3, %v3222_v17, %v3223_v62  ;;  %v1925_v14 = vadd.f32 %v11103_v46, %v1770_v26  ;;  %v1725_v17 = vpop.f32.mrf.mxu1 }
 0x355   : > { %v11152_v5 = vadd.f32 %v2182_v18, %v2082_v57  ;;  %7774 = vmatmul.msk.f32.gmra.mxu1 %vm2585_vm5, %v11155_v32  ;;  %7838 = vmatmul.msk.f32.gmra.mxu3 %vm2585_vm5, %v11158_v39  ;;  %v2683_v57 = vld [vmem:[#allocation3 + $0x48] sm:$0xff]  ;;  %v2296_v24 = vmax.f32 %v2264_v49, 0.0  ;;  %v14891_v18 = vld [vmem:[#allocation19_spill] sm:$0xff]  ;;  %v3225_v46 = vrot.slane %v2682_v19, 2  ;;  %v14893_v49 = vld [vmem:[#allocation9_spill] sm:$0xff] }
 0x356   : > { %v2527_v41 = vmul.f32 %v11003_v2, %v2494_v56  ;;  %v14890_v56 = vld [vmem:[#allocation68_spill] sm:$0xff]  ;;  %v2084_v34 = vadd.f32 %v11122_v42, %v1925_v14 }
 0x357   : > { %v2346_v45 = vadd.f32 %v10691_v60, %v11152_v5  ;;  %v1613_v61 = vadd.f32 %v14891_v18, %v14890_v56  ;;  %v11224_v42 = vsel %vm1015_vm3, %v3223_v62, %v3225_v46 }
 0x358   : > { %v2560_v10 = vadd.f32 %v11017_v16, %v2527_v41  ;;  %v2790_v41 = vrot.slane %v2682_v19, 1 }
 0x359   : > { %2429 = vrot.lane.b32.xlu2 %v2346_v45, %s9379_s24  ;;  %v1771_v9 = vadd.f32 %v11147_v55, %v1613_v61  ;;  %v14892_v55 = vld [vmem:[#allocation69_spill] sm:$0xff] }
 0x35a   : > { %2649 = vst.msk [vmem:[#allocation3 + $0x69] sm:$0xff] %vm2585_vm5, %v2560_v10  ;;  %7808 = vmatmul.msk.f32.gmra.mxu2 %vm2585_vm5, %v2681_v33  ;;  %7870 = vmatmul.msk.f32.gmra.mxu0 %vm2585_vm5, %v2681_v33  ;;  %v11221_v1 = vsel %vm572_vm2, %v2788_v51, %v2790_v41 }
 0x35b   : > { %v2402_v52 = vpop.permute.xlu0 %2401  ;;  %v1926_v36 = vadd.f32 %v11139_v20, %v1771_v9 }
 0x35c   : > { %v2492_v63 = vadd.f32 %v2402_v52, %v2295_v11  ;;  %v2185_v48 = vpop.f32.mrf.mxu0  ;;  %v2792_v52 = vrot.slane %v2683_v57, 1 }
 0x35d   : > { %v11185_v58 = vadd.f32 %v2185_v48, %v2083_v59  ;;  %7775 = vmatmul.msk.f32.gmra.mxu1 %vm2585_vm5, %v11188_v7  ;;  %7839 = vmatmul.msk.f32.gmra.mxu3 %vm2585_vm5, %v11191_v23  ;;  %v11237_v59 = vpop.f32.mrf.mxu3  ;;  %v3227_v48 = vrot.slane %v2683_v57, 2  ;;  %v2085_v26 = vadd.f32 %v11161_v44, %v1926_v36  ;;  %v2266_v44 = vadd.f32 %v10961_v31, %v10777_v54 }
 0x35e   : > { %v2525_v3 = vmul.f32 %v11003_v2, %v2492_v63 }
 0x35f   : > { %v2347_v30 = vadd.f32 %v10691_v60, %v11185_v58 }
 0x360   : > { %v2558_v12 = vadd.f32 %v11017_v16, %v2525_v3  ;;  %v1614_v3 = vadd.f32 %v14893_v49, %v14892_v55 }
 0x361   : > { %2431 = vrot.lane.b32.xlu0 %v2347_v30, %s9379_s24 }
 0x362   : > { %2647 = vst.msk [vmem:[#allocation3 + $0x51] sm:$0xff] %vm2585_vm5, %v2558_v12  ;;  %7809 = vmatmul.msk.f32.gmra.mxu2 %vm2585_vm5, %v2683_v57  ;;  %7871 = vmatmul.msk.f32.gmra.mxu0 %vm2585_vm5, %v2683_v57  ;;  %v11251_v57 = vpop.f32.mrf.mxu2  ;;  %v1772_v61 = vadd.f32 %v11183_v40, %v1614_v3 }
 0x363   : > { %v2404_v50 = vpop.permute.xlu1 %2403 }
 0x364   : > { %v2493_v33 = vadd.f32 %v2404_v50, %v2296_v24  ;;  %v2188_v45 = vpop.f32.mrf.mxu0  ;;  %v1728_v50 = vpop.f32.mrf.mxu1  ;;  %v1927_v46 = vadd.f32 %v11174_v22, %v1772_v61  ;;  %v14897_v61 = vld [vmem:[#allocation16_spill] sm:$0xff] }
 0x365   : > { %v11218_v10 = vadd.f32 %v2188_v45, %v2084_v34  ;;  %7776 = vmatmul.msk.f32.gmra.mxu1 %vm2585_vm5, %v11221_v1  ;;  %7840 = vmatmul.msk.f32.gmra.mxu3 %vm2585_vm5, %v11224_v42  ;;  %v2042_v36 = vpop.f32.mrf.mxu3 }
 0x366   : > { %v2526_v11 = vmul.f32 %v11003_v2, %v2493_v33  ;;  %v2086_v40 = vadd.f32 %v11203_v27, %v1927_v46  ;;  %v2267_v27 = vadd.f32 %v10961_v31, %v10793_v25 }
 0x367   : > { %v2348_v35 = vadd.f32 %v10691_v60, %v11218_v10 }
 0x368   : > { %v2559_v51 = vadd.f32 %v11017_v16, %v2526_v11  ;;  %v14895_v11 = vld [vmem:[#allocation7_spill] sm:$0xff] }
 0x369   : > { %2433 = vrot.lane.b32.xlu1 %v2348_v35, %s9379_s24  ;;  %v2684_v62 = vld [vmem:[#allocation3 + $0x50] sm:$0xff]  ;;  %v2685_v18 = vld [vmem:[#allocation3 + $0x58] sm:$0x3]  ;;  %v1615_v9 = vadd.f32 %v14895_v11, %v14894_v6  ;;  %v2298_v35 = vmax.f32 %v2266_v44, 0.0 }
 0x36a   : > { %2648 = vst.msk [vmem:[#allocation3 + $0x61] sm:$0xff] %vm2585_vm5, %v2559_v51  ;;  %v2793_v63 = vrot.slane %v2684_v62, 1  ;;  %v3228_v28 = vrot.slane %v2684_v62, 2  ;;  %7810 = vmatmul.msk.f32.gmra.mxu2 %vm2585_vm5, %v2684_v62  ;;  %7872 = vmatmul.msk.f32.gmra.mxu0 %vm2585_vm5, %v2684_v62  ;;  %v2795_v33 = vrot.slane %v2685_v18, 1  ;;  %v3230_v45 = vrot.slane %v2685_v18, 2  ;;  %v14896_v18 = vld [vmem:[#allocation71_spill] sm:$0xff] }
 0x36b   : > { %v2412_v20 = vpop.permute.xlu2 %2411  ;;  %v1773_v55 = vadd.f32 %v1725_v17, %v1615_v9  ;;  %v2271_v9 = vadd.f32 %v10961_v31, %v10933_v29 }
 0x36c   : > { %v2497_v30 = vadd.f32 %v2412_v20, %v2300_v47  ;;  %v2191_v12 = vpop.f32.mrf.mxu0  ;;  %v11246_v19 = vsel %vm572_vm2, %v2792_v52, %v2793_v63  ;;  %v11249_v14 = vsel %vm1015_vm3, %v3227_v48, %v3228_v28  ;;  %v11277_v52 = vsel %vm572_vm2, %v2793_v63, %v2795_v33  ;;  %v1731_v44 = vpop.f32.mrf.mxu1 }
 0x36d   : > { %v11253_v24 = vadd.f32 %v2191_v12, %v2085_v26  ;;  %7777 = vmatmul.msk.f32.gmra.mxu1 %vm2585_vm5, %v11246_v19  ;;  %7841 = vmatmul.msk.f32.gmra.mxu3 %vm2585_vm5, %v11249_v14  ;;  %v11280_v48 = vsel %vm1015_vm3, %v3228_v28, %v3230_v45  ;;  %v1886_v26 = vpop.f32.mrf.mxu2  ;;  %v1928_v28 = vadd.f32 %v11212_v4, %v1773_v55  ;;  %v2045_v11 = vpop.f32.mrf.mxu3 }
 0x36e   : > { %v2530_v56 = vmul.f32 %v11003_v2, %v2497_v30 }
 0x36f   : > { %v2349_v34 = vadd.f32 %v10691_v60, %v11253_v24 }
 0x370   : > { %v2563_v41 = vadd.f32 %v11017_v16, %v2530_v56  ;;  %v2299_v56 = vmax.f32 %v2267_v27, 0.0  ;;  %v2303_v27 = vmax.f32 %v2271_v9, 0.0 }
 0x371   : > { %2435 = vrot.lane.b32.xlu2 %v2349_v34, %s9379_s24  ;;  %v2686_v54 = vld [vmem:[#allocation3 + $0x60] sm:$0xff]  ;;  %v2687_v3 = vld [vmem:[#allocation3 + $0x68] sm:$0xff]  ;;  %v1616_v34 = vadd.f32 %v14897_v61, %v14896_v18  ;;  %v2269_v18 = vadd.f32 %v10961_v31, %v10847_v8 }
 0x372   : > { %2652 = vst.msk [vmem:[#allocation3 + $0x91] sm:$0xff] %vm2585_vm5, %v2563_v41  ;;  %7811 = vmatmul.msk.f32.gmra.mxu2 %vm2585_vm5, %v2686_v54  ;;  %7873 = vmatmul.msk.f32.gmra.mxu0 %vm2585_vm5, %v2686_v54  ;;  %v2797_v25 = vrot.slane %v2686_v54, 1  ;;  %v2798_v20 = vrot.slane %v2687_v3, 1  ;;  %v3232_v30 = vrot.slane %v2686_v54, 2  ;;  %v3233_v12 = vrot.slane %v2687_v3, 2 }
 0x373   : > { %v2408_v51 = vpop.permute.xlu0 %2407  ;;  %v2087_v41 = vadd.f32 %v11237_v59, %v1928_v28  ;;  %v2301_v9 = vmax.f32 %v2269_v18, 0.0 }
 0x374   : > { %v2495_v22 = vadd.f32 %v2408_v51, %v2298_v35  ;;  %v2194_v62 = vpop.f32.mrf.mxu0  ;;  %v11303_v54 = vsel %vm572_vm2, %v2797_v25, %v2798_v20  ;;  %v11306_v6 = vsel %vm1015_vm3, %v3232_v30, %v3233_v12  ;;  %v1774_v35 = vadd.f32 %v1728_v50, %v1616_v34  ;;  %v1734_v30 = vpop.f32.mrf.mxu1 }
 0x375   : > { %v11274_v47 = vadd.f32 %v2194_v62, %v2086_v40  ;;  %7778 = vmatmul.msk.f32.gmra.mxu1 %vm2585_vm5, %v11277_v52  ;;  %7842 = vmatmul.msk.f32.gmra.mxu3 %vm2585_vm5, %v11280_v48  ;;  %v1889_v55 = vpop.f32.mrf.mxu2 }
 0x376   : > { %v2528_v49 = vmul.f32 %v11003_v2, %v2495_v22  ;;  %v2688_v22 = vld [vmem:[#allocation3 + $0x70] sm:$0x3]  ;;  %v1929_v62 = vadd.f32 %v11251_v57, %v1774_v35 }
 0x377   : > { %v2350_v63 = vadd.f32 %v10691_v60, %v11274_v47  ;;  %v3235_v25 = vrot.slane %v2688_v22, 2 }
 0x378   : > { %v2561_v17 = vadd.f32 %v11017_v16, %v2528_v49  ;;  %v14898_v49 = vld [vmem:[#allocation72_spill] sm:$0xff]  ;;  %v2088_v28 = vadd.f32 %v2042_v36, %v1929_v62  ;;  %v14901_v62 = vld [vmem:[#allocation15_spill] sm:$0xff] }
 0x379   : > { %2437 = vrot.lane.b32.xlu0 %v2350_v63, %s9379_s24  ;;  %v11333_v36 = vsel %vm1015_vm3, %v3233_v12, %v3235_v25 }
 0x37a   : > { %2650 = vst.msk [vmem:[#allocation3 + $0x79] sm:$0xff] %vm2585_vm5, %v2561_v17  ;;  %7812 = vmatmul.msk.f32.gmra.mxu2 %vm2585_vm5, %v2687_v3  ;;  %7874 = vmatmul.msk.f32.gmra.mxu0 %vm2585_vm5, %v2687_v3  ;;  %v14899_v3 = vld [vmem:[#allocation10_spill] sm:$0xff]  ;;  %v2800_v17 = vrot.slane %v2688_v22, 1  ;;  %v14900_v22 = vld [vmem:[#allocation73_spill] sm:$0xff] }
 0x37b   : > { %v2410_v4 = vpop.permute.xlu1 %2409  ;;  %v1617_v63 = vadd.f32 %v14899_v3, %v14898_v49 }
 0x37c   : > { %v2496_v46 = vadd.f32 %v2410_v4, %v2299_v56  ;;  %v2197_v33 = vpop.f32.mrf.mxu0  ;;  %v11330_v34 = vsel %vm572_vm2, %v2798_v20, %v2800_v17  ;;  %v1737_v17 = vpop.f32.mrf.mxu1 }
 0x37d   : > { %v11300_v45 = vadd.f32 %v2197_v33, %v2087_v41  ;;  %7779 = vmatmul.msk.f32.gmra.mxu1 %vm2585_vm5, %v11303_v54  ;;  %7843 = vmatmul.msk.f32.gmra.mxu3 %vm2585_vm5, %v11306_v6  ;;  %v1775_v4 = vadd.f32 %v1731_v44, %v1617_v63  ;;  %v1618_v44 = vadd.f32 %v14901_v62, %v14900_v22  ;;  %v1892_v49 = vpop.f32.mrf.mxu2 }
 0x37e   : > { %v2529_v59 = vmul.f32 %v11003_v2, %v2496_v46  ;;  %v2048_v46 = vpop.f32.mrf.mxu3 }
 0x37f   : > { %v2351_v40 = vadd.f32 %v10691_v60, %v11300_v45  ;;  %v1930_v20 = vadd.f32 %v1886_v26, %v1775_v4 }
 0x380   : > { %v2562_v51 = vadd.f32 %v11017_v16, %v2529_v59 }
 0x381   : > { %2439 = vrot.lane.b32.xlu1 %v2351_v40, %s9379_s24  ;;  %v2689_v29 = vld [vmem:[#allocation3 + $0x78] sm:$0xff] }
 0x382   : > { %2651 = vst.msk [vmem:[#allocation3 + $0x81] sm:$0xff] %vm2585_vm5, %v2562_v51  ;;  %7813 = vmatmul.msk.f32.gmra.mxu2 %vm2585_vm5, %v2689_v29  ;;  %7875 = vmatmul.msk.f32.gmra.mxu0 %vm2585_vm5, %v2689_v29  ;;  %v2802_v59 = vrot.slane %v2689_v29, 1  ;;  %v3237_v40 = vrot.slane %v2689_v29, 2 }
 0x383   : > { %v2418_v50 = vpop.permute.xlu2 %2417 }
 0x384   : > { %v2500_v57 = vadd.f32 %v2418_v50, %v2303_v27  ;;  %v2200_v56 = vpop.f32.mrf.mxu0  ;;  %v2089_v27 = vadd.f32 %v2045_v11, %v1930_v20  ;;  %v2270_v11 = vadd.f32 %v10961_v31, %v10894_v21  ;;  %v2692_v20 = vld [vmem:[#allocation3 + $0x90] sm:$0xff] }
 0x385   : > { %v11327_v61 = vadd.f32 %v2200_v56, %v2088_v28  ;;  %7780 = vmatmul.msk.f32.gmra.mxu1 %vm2585_vm5, %v11330_v34  ;;  %7844 = vmatmul.msk.f32.gmra.mxu3 %vm2585_vm5, %v11333_v36  ;;  %v1776_v56 = vadd.f32 %v1734_v30, %v1618_v44  ;;  %v1895_v44 = vpop.f32.mrf.mxu2 }
 0x386   : > { %v2533_v41 = vmul.f32 %v11003_v2, %v2500_v57 }
 0x387   : > { %v2352_v8 = vadd.f32 %v10691_v60, %v11327_v61  ;;  %v1931_v4 = vadd.f32 %v1889_v55, %v1776_v56 }
 0x388   : > { %v2566_v33 = vadd.f32 %v11017_v16, %v2533_v41 }
 0x389   : > { %2441 = vrot.lane.b32.xlu2 %v2352_v8, %s9379_s24  ;;  %v2690_v12 = vld [vmem:[#allocation3 + $0x80] sm:$0xff]  ;;  %v2691_v57 = vld [vmem:[#allocation3 + $0x88] sm:$0x3]  ;;  %v2090_v22 = vadd.f32 %v2048_v46, %v1931_v4  ;;  %v3242_v4 = vrot.slane %v2692_v20, 2 }
 0x38a   : > { %2655 = vst.msk [vmem:[#allocation3 + $0xb1] sm:$0xff] %vm2585_vm5, %v2566_v33  ;;  %v2803_v35 = vrot.slane %v2690_v12, 1  ;;  %v3238_v51 = vrot.slane %v2690_v12, 2  ;;  %7814 = vmatmul.msk.f32.gmra.mxu2 %vm2585_vm5, %v2690_v12  ;;  %7876 = vmatmul.msk.f32.gmra.mxu0 %vm2585_vm5, %v2690_v12  ;;  %v2805_v8 = vrot.slane %v2691_v57, 1  ;;  %v3240_v21 = vrot.slane %v2691_v57, 2  ;;  %v2051_v33 = vpop.f32.mrf.mxu3 }
 0x38b   : > { %v2414_v26 = vpop.permute.xlu0 %2413  ;;  %v2302_v12 = vmax.f32 %v2270_v11, 0.0 }
 0x38c   : > { %v2498_v3 = vadd.f32 %v2414_v26, %v2301_v9  ;;  %v2203_v63 = vpop.f32.mrf.mxu0  ;;  %v11350_v28 = vsel %vm572_vm2, %v2802_v59, %v2803_v35  ;;  %v11353_v50 = vsel %vm1015_vm3, %v3237_v40, %v3238_v51  ;;  %v14902_v9 = vld [vmem:[#allocation74_spill] sm:$0xff] }
 0x38d   : > { %v11355_v29 = vadd.f32 %v2203_v63, %v2089_v27  ;;  %7781 = vmatmul.msk.f32.gmra.mxu1 %vm2585_vm5, %v11350_v28  ;;  %7845 = vmatmul.msk.f32.gmra.mxu3 %vm2585_vm5, %v11353_v50  ;;  %v14903_v59 = vld [vmem:[#allocation22_spill] sm:$0xff]  ;;  %v2274_v27 = vadd.f32 %v10961_v31, %v11069_v38  ;;  %v11381_v63 = vsel %vm1015_vm3, %v3238_v51, %v3240_v21  ;;  %v14904_v21 = vld [vmem:[#allocation13_spill] sm:$0xff] }
 0x38e   : > { %v2531_v25 = vmul.f32 %v11003_v2, %v2498_v3  ;;  %v1619_v40 = vadd.f32 %v14903_v59, %v14902_v9  ;;  %v11378_v3 = vsel %vm572_vm2, %v2803_v35, %v2805_v8 }
 0x38f   : > { %v2353_v18 = vadd.f32 %v10691_v60, %v11355_v29  ;;  %v2306_v56 = vmax.f32 %v2274_v27, 0.0 }
 0x390   : > { %v2564_v41 = vadd.f32 %v11017_v16, %v2531_v25  ;;  %v1777_v11 = vadd.f32 %v1737_v17, %v1619_v40  ;;  %v1740_v25 = vpop.f32.mrf.mxu1 }
 0x391   : > { %2443 = vrot.lane.b32.xlu0 %v2353_v18, %s9379_s24  ;;  %v2807_v18 = vrot.slane %v2692_v20, 1 }
 0x392   : > { %2653 = vst.msk [vmem:[#allocation3 + $0x99] sm:$0xff] %vm2585_vm5, %v2564_v41  ;;  %7815 = vmatmul.msk.f32.gmra.mxu2 %vm2585_vm5, %v2692_v20  ;;  %7877 = vmatmul.msk.f32.gmra.mxu0 %vm2585_vm5, %v2692_v20  ;;  %v1932_v35 = vadd.f32 %v1892_v49, %v1777_v11  ;;  %v2054_v49 = vpop.f32.mrf.mxu3  ;;  %v1898_v11 = vpop.f32.mrf.mxu2 }
 0x393   : > { %v2416_v30 = vpop.permute.xlu1 %2415 }
 0x394   : > { %v2499_v62 = vadd.f32 %v2416_v30, %v2302_v12  ;;  %v2206_v55 = vpop.f32.mrf.mxu0  ;;  %v14905_v12 = vld [vmem:[#allocation23_spill] sm:$0xff]  ;;  %v2091_v9 = vadd.f32 %v2051_v33, %v1932_v35 }
 0x395   : > { %v11375_v26 = vadd.f32 %v2206_v55, %v2090_v22  ;;  %7782 = vmatmul.msk.f32.gmra.mxu1 %vm2585_vm5, %v11378_v3  ;;  %7846 = vmatmul.msk.f32.gmra.mxu3 %vm2585_vm5, %v11381_v63  ;;  %v1620_v17 = vadd.f32 %v14905_v12, %v14904_v21  ;;  %v2272_v55 = vadd.f32 %v10961_v31, %v10973_v43 }
 0x396   : > { %v2532_v46 = vmul.f32 %v11003_v2, %v2499_v62 }
 0x397   : > { %v2354_v38 = vadd.f32 %v10691_v60, %v11375_v26 }
 0x398   : > { %v2565_v57 = vadd.f32 %v11017_v16, %v2532_v46  ;;  %v1778_v46 = vadd.f32 %v1740_v25, %v1620_v17  ;;  %v1743_v12 = vpop.f32.mrf.mxu1 }
 0x399   : > { %2445 = vrot.lane.b32.xlu1 %v2354_v38, %s9379_s24  ;;  %v2693_v51 = vld [vmem:[#allocation3 + $0x98] sm:$0xff]  ;;  %v2694_v27 = vld [vmem:[#allocation3 + $0xa0] sm:$0x3] }
 0x39a   : > { %2654 = vst.msk [vmem:[#allocation3 + $0xa9] sm:$0xff] %vm2585_vm5, %v2565_v57  ;;  %v2808_v41 = vrot.slane %v2693_v51, 1  ;;  %v3243_v8 = vrot.slane %v2693_v51, 2  ;;  %7816 = vmatmul.msk.f32.gmra.mxu2 %vm2585_vm5, %v2693_v51  ;;  %7878 = vmatmul.msk.f32.gmra.mxu0 %vm2585_vm5, %v2693_v51  ;;  %v1933_v35 = vadd.f32 %v1895_v44, %v1778_v46  ;;  %v2810_v51 = vrot.slane %v2694_v27, 1  ;;  %v2057_v46 = vpop.f32.mrf.mxu3 }
 0x39b   : > { %v2424_v59 = vpop.permute.xlu2 %2423 }
 0x39c   : > { %v2503_v40 = vadd.f32 %v2424_v59, %v2306_v56  ;;  %v2209_v22 = vpop.f32.mrf.mxu0  ;;  %v11398_v30 = vsel %vm572_vm2, %v2807_v18, %v2808_v41  ;;  %v11401_v62 = vsel %vm1015_vm3, %v3242_v4, %v3243_v8  ;;  %v3245_v56 = vrot.slane %v2694_v27, 2  ;;  %v14906_v18 = vld [vmem:[#allocation14_spill] sm:$0xff]  ;;  %v14907_v4 = vld [vmem:[#allocation12_spill] sm:$0xff] }
 0x39d   : > { %v11403_v20 = vadd.f32 %v2209_v22, %v2091_v9  ;;  %7783 = vmatmul.msk.f32.gmra.mxu1 %vm2585_vm5, %v11398_v30  ;;  %7847 = vmatmul.msk.f32.gmra.mxu3 %vm2585_vm5, %v11401_v62  ;;  %v1621_v21 = vadd.f32 %v14907_v4, %v14906_v18  ;;  %v2304_v9 = vmax.f32 %v2272_v55, 0.0  ;;  %v2092_v25 = vadd.f32 %v2054_v49, %v1933_v35  ;;  %v1901_v35 = vpop.f32.mrf.mxu2 }
 0x39e   : > { %v2536_v33 = vmul.f32 %v11003_v2, %v2503_v40  ;;  %v11424_v22 = vsel %vm572_vm2, %v2808_v41, %v2810_v51  ;;  %v2273_v49 = vadd.f32 %v10961_v31, %v11024_v37 }
 0x39f   : > { %v2355_v38 = vadd.f32 %v10691_v60, %v11403_v20  ;;  %v1779_v27 = vadd.f32 %v1743_v12, %v1621_v21  ;;  %v14908_v21 = vld [vmem:[#allocation11_spill] sm:$0xff]  ;;  %v14909_v12 = vld [vmem:[#allocation8_spill] sm:$0xff] }
 0x3a0   : > { %v2569_v57 = vadd.f32 %v11017_v16, %v2536_v33  ;;  %v11427_v33 = vsel %vm1015_vm3, %v3243_v8, %v3245_v56  ;;  %v2305_v4 = vmax.f32 %v2273_v49, 0.0  ;;  %v2277_v49 = vadd.f32 %v10961_v31, %v11152_v5 }
 0x3a1   : > { %2447 = vrot.lane.b32.xlu2 %v2355_v38, %s9379_s24  ;;  %v2695_v43 = vld [vmem:[#allocation3 + $0xa8] sm:$0xff]  ;;  %v2696_v38 = vld [vmem:[#allocation3 + $0xb0] sm:$0xff] }
 0x3a2   : > { %2658 = vst.msk [vmem:[#allocation3 + $0xd9] sm:$0xff] %vm2585_vm5, %v2569_v57  ;;  %7817 = vmatmul.msk.f32.gmra.mxu2 %vm2585_vm5, %v2695_v43  ;;  %7879 = vmatmul.msk.f32.gmra.mxu0 %vm2585_vm5, %v2695_v43  ;;  %v1934_v57 = vadd.f32 %v1898_v11, %v1779_v27  ;;  %v2812_v51 = vrot.slane %v2695_v43, 1  ;;  %v2813_v37 = vrot.slane %v2696_v38, 1  ;;  %v3247_v56 = vrot.slane %v2695_v43, 2 }
 0x3a3   : > { %v2420_v17 = vpop.permute.xlu0 %2419  ;;  %v3248_v18 = vrot.slane %v2696_v38, 2 }
 0x3a4   : > { %v2501_v59 = vadd.f32 %v2420_v17, %v2304_v9  ;;  %v2212_v44 = vpop.f32.mrf.mxu0  ;;  %v1622_v9 = vadd.f32 %v14909_v12, %v14908_v21  ;;  %v1746_v17 = vpop.f32.mrf.mxu1  ;;  %v11448_v43 = vsel %vm572_vm2, %v2812_v51, %v2813_v37  ;;  %v2697_v51 = vld [vmem:[#allocation3 + $0xb8] sm:$0x3]  ;;  %v2309_v21 = vmax.f32 %v2277_v49, 0.0 }
 0x3a5   : > { %v11421_v40 = vadd.f32 %v2212_v44, %v2092_v25  ;;  %7784 = vmatmul.msk.f32.gmra.mxu1 %vm2585_vm5, %v11424_v22  ;;  %7848 = vmatmul.msk.f32.gmra.mxu3 %vm2585_vm5, %v11427_v33  ;;  %v2093_v25 = vadd.f32 %v2057_v46, %v1934_v57  ;;  %v2060_v57 = vpop.f32.mrf.mxu3 }
 0x3a6   : > { %v2534_v55 = vmul.f32 %v11003_v2, %v2501_v59 }
 0x3a7   : > { %v2356_v41 = vadd.f32 %v10691_v60, %v11421_v40 }
 0x3a8   : > { %v2567_v8 = vadd.f32 %v11017_v16, %v2534_v55  ;;  %v11451_v55 = vsel %vm1015_vm3, %v3247_v56, %v3248_v18 }
 0x3a9   : > { %2449 = vrot.lane.b32.xlu0 %v2356_v41, %s9379_s24 }
 0x3aa   : > { %2656 = vst.msk [vmem:[#allocation3 + $0xc1] sm:$0xff] %vm2585_vm5, %v2567_v8  ;;  %7818 = vmatmul.msk.f32.gmra.mxu2 %vm2585_vm5, %v2696_v38  ;;  %7880 = vmatmul.msk.f32.gmra.mxu0 %vm2585_vm5, %v2696_v38  ;;  %v1780_v38 = vadd.f32 %v1746_v17, %v1622_v9 }
 0x3ab   : > { %v2422_v11 = vpop.permute.xlu1 %2421 }
 0x3ac   : > { %v2502_v59 = vadd.f32 %v2422_v11, %v2305_v4  ;;  %v2215_v44 = vpop.f32.mrf.mxu0  ;;  %v1935_v56 = vadd.f32 %v1901_v35, %v1780_v38  ;;  %v11464_v4 = vpop.f32.mrf.mxu2  ;;  %v3250_v11 = vrot.slane %v2697_v51, 2  ;;  %v2275_v35 = vadd.f32 %v10961_v31, %v11105_v13 }
 0x3ad   : > { %v11445_v27 = vadd.f32 %v2215_v44, %v2093_v25  ;;  %7785 = vmatmul.msk.f32.gmra.mxu1 %vm2585_vm5, %v11448_v43  ;;  %7849 = vmatmul.msk.f32.gmra.mxu3 %vm2585_vm5, %v11451_v55  ;;  %14910 = vst [vmem:[#allocation20_spill] sm:$0xff] %v11464_v4  ;;  %v2815_v25 = vrot.slane %v2697_v51, 1  ;;  %v11486_v31 = vpop.f32.mrf.mxu1 }
 0x3ae   : > { %v2535_v46 = vmul.f32 %v11003_v2, %v2502_v59  ;;  %v2094_v12 = vadd.f32 %v2060_v57, %v1935_v56  ;;  %v11477_v49 = vsel %vm1015_vm3, %v3248_v18, %v3250_v11  ;;  %14911 = vst [vmem:[#allocation26_spill] sm:$0xff] %v11486_v31  ;;  %v2307_v18 = vmax.f32 %v2275_v35, 0.0  ;;  %v11504_v11 = vld [vmem:[%s14518_s2] ss:$0 sm:$0xff]  ;;  %v11513_v35 = vpop.f32.mrf.mxu3 }
 0x3af   : > { %v2357_v41 = vadd.f32 %v10691_v60, %v11445_v27  ;;  %14913 = vst [vmem:[#allocation24_spill] sm:$0xff] %v11513_v35 }
 0x3b0   : > { %v2568_v8 = vadd.f32 %v11017_v16, %v2535_v46  ;;  %v11474_v46 = vsel %vm572_vm2, %v2813_v37, %v2815_v25 }
 0x3b1   : > { %2451 = vrot.lane.b32.xlu1 %v2357_v41, %s9379_s24  ;;  %v2698_v5 = vld [vmem:[#allocation3 + $0xc0] sm:$0xff] }
 0x3b2   : > { %2657 = vst.msk [vmem:[#allocation3 + $0xc9] sm:$0xff] %vm2585_vm5, %v2568_v8  ;;  %7819 = vmatmul.msk.f32.gmra.mxu2 %vm2585_vm5, %v2698_v5  ;;  %7881 = vmatmul.msk.f32.gmra.mxu0 %vm2585_vm5, %v2698_v5  ;;  %v2817_v57 = vrot.slane %v2698_v5, 1  ;;  %v3252_v51 = vrot.slane %v2698_v5, 2  ;;  %v2276_v5 = vadd.f32 %v11504_v11, %v11124_v15  ;;  %v2701_v15 = vld [vmem:[#allocation3 + $0xd8] sm:$0xff] }
 0x3b3   : > { %v2430_v9 = vpop.permute.xlu2 %2429 }
 0x3b4   : > { %v2506_v17 = vadd.f32 %v2430_v9, %v2309_v21  ;;  %v2218_v59 = vpop.f32.mrf.mxu0 }
 0x3b5   : > { %v11471_v44 = vadd.f32 %v2218_v59, %v2094_v12  ;;  %7786 = vmatmul.msk.f32.gmra.mxu1 %vm2585_vm5, %v11474_v46  ;;  %7850 = vmatmul.msk.f32.gmra.mxu3 %vm2585_vm5, %v11477_v49 }
 0x3b6   : > { %v2539_v38 = vmul.f32 %v11003_v2, %v2506_v17 }
 0x3b7   : > { %v2358_v41 = vadd.f32 %v10691_v60, %v11471_v44  ;;  %v11493_v60 = vpop.f32.mrf.mxu2 }
 0x3b8   : > { %v2572_v13 = vadd.f32 %v11017_v16, %v2539_v38  ;;  %14912 = vst [vmem:[#allocation27_spill] sm:$0xff] %v11493_v60 }
 0x3b9   : > { %2453 = vrot.lane.b32.xlu2 %v2358_v41, %s9379_s24  ;;  %v2699_v37 = vld [vmem:[#allocation3 + $0xc8] sm:$0xff]  ;;  %v2700_v59 = vld [vmem:[#allocation3 + $0xd0] sm:$0x3] }
 0x3ba   : > { %2661 = vst.msk [vmem:[#allocation3 + $0xf9] sm:$0xff] %vm2585_vm5, %v2572_v13  ;;  %v2818_v8 = vrot.slane %v2699_v37, 1  ;;  %v3253_v56 = vrot.slane %v2699_v37, 2  ;;  %7820 = vmatmul.msk.f32.gmra.mxu2 %vm2585_vm5, %v2699_v37  ;;  %7882 = vmatmul.msk.f32.gmra.mxu0 %vm2585_vm5, %v2699_v37  ;;  %v11518_v13 = vpop.f32.mrf.mxu1  ;;  %v2820_v37 = vrot.slane %v2700_v59, 1 }
 0x3bb   : > { %v2426_v21 = vpop.permute.xlu0 %2425  ;;  %14915 = vst [vmem:[#allocation31_spill] sm:$0xff] %v11518_v13 }
 0x3bc   : > { %v2504_v12 = vadd.f32 %v2426_v21, %v2307_v18  ;;  %v11496_v9 = vsel %vm572_vm2, %v2817_v57, %v2818_v8  ;;  %v11499_v25 = vsel %vm1015_vm3, %v3252_v51, %v3253_v56  ;;  %v3255_v18 = vrot.slane %v2700_v59, 2 }
 0x3bd   : > { %7787 = vmatmul.msk.f32.gmra.mxu1 %vm2585_vm5, %v11496_v9  ;;  %7851 = vmatmul.msk.f32.gmra.mxu3 %vm2585_vm5, %v11499_v25  ;;  %v2308_v57 = vmax.f32 %v2276_v5, 0.0  ;;  %v11526_v60 = vsel %vm572_vm2, %v2818_v8, %v2820_v37 }
 0x3be   : > { %v2537_v17 = vmul.f32 %v11003_v2, %v2504_v12  ;;  %v2280_v12 = vadd.f32 %v11504_v11, %v11253_v24  ;;  %v11529_v13 = vsel %vm1015_vm3, %v3253_v56, %v3255_v18  ;;  %v11539_v24 = vpop.f32.mrf.mxu3  ;;  %v2822_v56 = vrot.slane %v2701_v15, 1 }
 0x3bf   : > { %v11515_v38 = vpop.f32.mrf.mxu0  ;;  %14917 = vst [vmem:[#allocation29_spill] sm:$0xff] %v11539_v24  ;;  %v3257_v18 = vrot.slane %v2701_v15, 2 }
 0x3c0   : > { %14914 = vst [vmem:[#allocation30_spill] sm:$0xff] %v11515_v38  ;;  %v2570_v41 = vadd.f32 %v11017_v16, %v2537_v17  ;;  %v2312_v37 = vmax.f32 %v2280_v12, 0.0 }
 0x3c2   : > { %2659 = vst.msk [vmem:[#allocation3 + $0xe1] sm:$0xff] %vm2585_vm5, %v2570_v41  ;;  %7821 = vmatmul.msk.f32.gmra.mxu2 %vm2585_vm5, %v2701_v15  ;;  %7883 = vmatmul.msk.f32.gmra.mxu0 %vm2585_vm5, %v2701_v15  ;;  %v2278_v15 = vadd.f32 %v11504_v11, %v11185_v58  ;;  %v11571_v58 = vld [vmem:[%s14518_s2 + $0x3] ss:$0 sm:$0xff] }
 0x3c3   : > { %v2428_v51 = vpop.permute.xlu1 %2427 }
 0x3c4   : > { %v2505_v21 = vadd.f32 %v2428_v51, %v2308_v57  ;;  %v2310_v4 = vmax.f32 %v2278_v15, 0.0 }
 0x3c5   : > { %v3122_v17 = vpop.f32.mrf.mxu2  ;;  %7788 = vmatmul.msk.f32.gmra.mxu1 %vm2585_vm5, %v11526_v60  ;;  %7852 = vmatmul.msk.f32.gmra.mxu3 %vm2585_vm5, %v11529_v13 }
 0x3c6   : > { %v2538_v59 = vmul.f32 %v11003_v2, %v2505_v21 }
 0x3c7   : > { %v11537_v41 = vpop.f32.mrf.mxu0 }
 0x3c8   : > { %v2571_v5 = vadd.f32 %v11017_v16, %v2538_v59  ;;  %14916 = vst [vmem:[#allocation25_spill] sm:$0xff] %v11537_v41 }
 0x3c9   : > { %v11541_v8 = vld [vmem:[#allocation3 + $0xe0] sm:$0xff] }
 0x3ca   : > { %14918 = vst [vmem:[#allocation34_spill] sm:$0xff] %v11541_v8  ;;  %v2823_v2 = vrot.slane %v11541_v8, 1  ;;  %v3258_v57 = vrot.slane %v11541_v8, 2  ;;  %v2945_v51 = vpop.f32.mrf.mxu1  ;;  %7822 = vmatmul.msk.f32.gmra.mxu2 %vm2585_vm5, %v11541_v8  ;;  %7884 = vmatmul.msk.f32.gmra.mxu0 %vm2585_vm5, %v11541_v8 }
 0x3cb   : > { %2660 = vst.msk [vmem:[#allocation3 + $0xf1] sm:$0xff] %vm2585_vm5, %v2571_v5  ;;  %v2436_v16 = vpop.permute.xlu2 %2435  ;;  %v11561_v5 = vld [vmem:[%s14518_s2 + $0x2] ss:$0 sm:$0xff] }
 0x3cc   : > { %v2509_v21 = vadd.f32 %v2436_v16, %v2312_v37  ;;  %v11551_v59 = vsel %vm572_vm2, %v2822_v56, %v2823_v2  ;;  %v11554_v12 = vsel %vm1015_vm3, %v3257_v18, %v3258_v57  ;;  %v2703_v56 = vld [vmem:[#allocation3 + $0xe8] sm:$0x3]  ;;  %v3123_v18 = vadd.f32 %v3122_v17, %v2945_v51 }
 0x3cd   : > { %14919 = vst [vmem:[#allocation35_spill] sm:$0xff] %v11551_v59  ;;  %7789 = vmatmul.msk.f32.gmra.mxu1 %vm2585_vm5, %v11551_v59  ;;  %v3125_v37 = vpop.f32.mrf.mxu2  ;;  %7853 = vmatmul.msk.f32.gmra.mxu3 %vm2585_vm5, %v11554_v12  ;;  %v3260_v35 = vrot.slane %v2703_v56, 2 }
 0x3ce   : > { %14920 = vst [vmem:[#allocation28_spill] sm:$0xff] %v11554_v12  ;;  %v2542_v41 = vmul.f32 %v11561_v5, %v2509_v21  ;;  %v2825_v21 = vrot.slane %v2703_v56, 1 }
 0x3cf   : > { %v3532_v24 = vpop.f32.mrf.mxu0  ;;  %v11585_v31 = vsel %vm1015_vm3, %v3258_v57, %v3260_v35 }
 0x3d0   : > { %v2575_v16 = vadd.f32 %v11571_v58, %v2542_v41  ;;  %v3380_v38 = vpop.f32.mrf.mxu3  ;;  %v11582_v41 = vsel %vm572_vm2, %v2823_v2, %v2825_v21 }
 0x3d1   : > { %v3472_v59 = vadd.f32 %v3380_v38, %v3123_v18  ;;  %14922 = vst [vmem:[#allocation38_spill] sm:$0xff] %v11582_v41  ;;  %v2279_v38 = vadd.f32 %v11504_v11, %v11218_v10 }
 0x3d2   : > { %v11574_v8 = vld [vmem:[#allocation3 + $0xf0] sm:$0xff]  ;;  %2664 = vst.msk [vmem:[#allocation3 + $0x121] sm:$0xff] %vm2585_vm5, %v2575_v16  ;;  %v2948_v12 = vpop.f32.mrf.mxu1 }
 0x3d3   : > { %14921 = vst [vmem:[#allocation32_spill] sm:$0xff] %v11574_v8  ;;  %7823 = vmatmul.msk.f32.gmra.mxu2 %vm2585_vm5, %v11574_v8  ;;  %7885 = vmatmul.msk.f32.gmra.mxu0 %vm2585_vm5, %v11574_v8  ;;  %v2432_v17 = vpop.permute.xlu0 %2431  ;;  %v11587_v56 = vadd.f32 %v3532_v24, %v3472_v59  ;;  %v3126_v2 = vadd.f32 %v3125_v37, %v2948_v12  ;;  %v2827_v59 = vrot.slane %v11574_v8, 1  ;;  %v3262_v16 = vrot.slane %v11574_v8, 2 }
 0x3d4   : > { %v2507_v51 = vadd.f32 %v2432_v17, %v2310_v4  ;;  %v11596_v4 = vld [vmem:[#allocation3 + $0xf8] sm:$0xff] }
 0x3d5   : > { %14923 = vst [vmem:[#allocation39_spill] sm:$0xff] %v11587_v56  ;;  %7790 = vmatmul.msk.f32.gmra.mxu1 %vm2585_vm5, %v11582_v41  ;;  %v3128_v18 = vpop.f32.mrf.mxu2  ;;  %7854 = vmatmul.msk.f32.gmra.mxu3 %vm2585_vm5, %v11585_v31  ;;  %v2828_v10 = vrot.slane %v11596_v4, 1  ;;  %v3263_v21 = vrot.slane %v11596_v4, 2 }
 0x3d6   : > { %v2540_v15 = vmul.f32 %v11561_v5, %v2507_v51  ;;  %14924 = vst [vmem:[#allocation33_spill] sm:$0xff] %v11596_v4  ;;  %v2311_v51 = vmax.f32 %v2279_v38, 0.0  ;;  %v2283_v38 = vadd.f32 %v11504_v11, %v11327_v61 }
 0x3d7   : > { %v3535_v57 = vpop.f32.mrf.mxu0  ;;  %v11611_v41 = vsel %vm572_vm2, %v2827_v59, %v2828_v10  ;;  %v11614_v8 = vsel %vm1015_vm3, %v3262_v16, %v3263_v21 }
 0x3d8   : > { %v2573_v35 = vadd.f32 %v11571_v58, %v2540_v15  ;;  %v3383_v24 = vpop.f32.mrf.mxu3  ;;  %14926 = vst [vmem:[#allocation42_spill] sm:$0xff] %v11611_v41 }
 0x3d9   : > { %v3473_v17 = vadd.f32 %v3383_v24, %v3126_v2 }
 0x3da   : > { %2662 = vst.msk [vmem:[#allocation3 + $0x109] sm:$0xff] %vm2585_vm5, %v2573_v35  ;;  %v2951_v56 = vpop.f32.mrf.mxu1 }
 0x3db   : > { %7824 = vmatmul.msk.f32.gmra.mxu2 %vm2585_vm5, %v11596_v4  ;;  %7886 = vmatmul.msk.f32.gmra.mxu0 %vm2585_vm5, %v11596_v4  ;;  %v2434_v12 = vpop.permute.xlu1 %2433  ;;  %v11608_v15 = vadd.f32 %v3535_v57, %v3473_v17  ;;  %v3129_v57 = vadd.f32 %v3128_v18, %v2951_v56  ;;  %v2706_v17 = vld [vmem:[#allocation3 + $0x100] sm:$0x3] }
 0x3dc   : > { %v2508_v37 = vadd.f32 %v2434_v12, %v2311_v51  ;;  %v2315_v12 = vmax.f32 %v2283_v38, 0.0  ;;  %v2830_v56 = vrot.slane %v2706_v17, 1  ;;  %v3265_v18 = vrot.slane %v2706_v17, 2 }
 0x3dd   : > { %14925 = vst [vmem:[#allocation37_spill] sm:$0xff] %v11608_v15  ;;  %7791 = vmatmul.msk.f32.gmra.mxu1 %vm2585_vm5, %v11611_v41  ;;  %v3131_v35 = vpop.f32.mrf.mxu2  ;;  %7855 = vmatmul.msk.f32.gmra.mxu3 %vm2585_vm5, %v11614_v8  ;;  %v2281_v41 = vadd.f32 %v11504_v11, %v11274_v47 }
 0x3de   : > { %v2541_v2 = vmul.f32 %v11561_v5, %v2508_v37  ;;  %v11639_v38 = vsel %vm1015_vm3, %v3263_v21, %v3265_v18 }
 0x3df   : > { %v3538_v59 = vpop.f32.mrf.mxu0 }
 0x3e0   : > { %v2574_v24 = vadd.f32 %v11571_v58, %v2541_v2  ;;  %v3386_v51 = vpop.f32.mrf.mxu3 }
 0x3e1   : > { %v11624_v16 = vld [vmem:[#allocation3 + $0x108] sm:$0xff]  ;;  %v3474_v61 = vadd.f32 %v3386_v51, %v3129_v57 }
 0x3e2   : > { %14927 = vst [vmem:[#allocation43_spill] sm:$0xff] %v11624_v16  ;;  %v2954_v37 = vpop.f32.mrf.mxu1  ;;  %v2832_v21 = vrot.slane %v11624_v16, 1  ;;  %v3267_v18 = vrot.slane %v11624_v16, 2 }
 0x3e3   : > { %2663 = vst.msk [vmem:[#allocation3 + $0x111] sm:$0xff] %vm2585_vm5, %v2574_v24  ;;  %7825 = vmatmul.msk.f32.gmra.mxu2 %vm2585_vm5, %v11624_v16  ;;  %7887 = vmatmul.msk.f32.gmra.mxu0 %vm2585_vm5, %v11624_v16  ;;  %v2442_v15 = vpop.permute.xlu2 %2441  ;;  %v11631_v4 = vadd.f32 %v3538_v59, %v3474_v61  ;;  %v11636_v24 = vsel %vm572_vm2, %v2828_v10, %v2830_v56  ;;  %v2313_v10 = vmax.f32 %v2281_v41, 0.0 }
 0x3e4   : > { %v2512_v2 = vadd.f32 %v2442_v15, %v2315_v12  ;;  %14929 = vst [vmem:[#allocation40_spill] sm:$0xff] %v11636_v24  ;;  %v3132_v15 = vadd.f32 %v3131_v35, %v2954_v37 }
 0x3e5   : > { %14928 = vst [vmem:[#allocation36_spill] sm:$0xff] %v11631_v4  ;;  %7792 = vmatmul.msk.f32.gmra.mxu1 %vm2585_vm5, %v11636_v24  ;;  %v3134_v51 = vpop.f32.mrf.mxu2  ;;  %7856 = vmatmul.msk.f32.gmra.mxu3 %vm2585_vm5, %v11639_v38 }
 0x3e6   : > { %v2545_v57 = vmul.f32 %v11561_v5, %v2512_v2 }
 0x3e7   : > { %v3541_v17 = vpop.f32.mrf.mxu0 }
 0x3e8   : > { %v2578_v59 = vadd.f32 %v11571_v58, %v2545_v57  ;;  %v3389_v47 = vpop.f32.mrf.mxu3 }
 0x3e9   : > { %v3475_v12 = vadd.f32 %v3389_v47, %v3132_v15 }
 0x3ea   : > { %v11647_v61 = vld [vmem:[#allocation3 + $0x110] sm:$0xff]  ;;  %2667 = vst.msk [vmem:[#allocation3 + $0x141] sm:$0xff] %vm2585_vm5, %v2578_v59  ;;  %v2957_v4 = vpop.f32.mrf.mxu1  ;;  %v2282_v59 = vadd.f32 %v11504_v11, %v11300_v45 }
 0x3eb   : > { %14930 = vst [vmem:[#allocation46_spill] sm:$0xff] %v11647_v61  ;;  %v2833_v56 = vrot.slane %v11647_v61, 1  ;;  %v3268_v2 = vrot.slane %v11647_v61, 2  ;;  %7826 = vmatmul.msk.f32.gmra.mxu2 %vm2585_vm5, %v11647_v61  ;;  %7888 = vmatmul.msk.f32.gmra.mxu0 %vm2585_vm5, %v11647_v61  ;;  %v2438_v35 = vpop.permute.xlu0 %2437  ;;  %v11664_v15 = vadd.f32 %v3541_v17, %v3475_v12 }
 0x3ec   : > { %v2510_v41 = vadd.f32 %v2438_v35, %v2313_v10  ;;  %v2709_v10 = vld [vmem:[#allocation3 + $0x118] sm:$0x3] }
 0x3ed   : > { %v11659_v37 = vsel %vm572_vm2, %v2832_v21, %v2833_v56  ;;  %v11662_v57 = vsel %vm1015_vm3, %v3267_v18, %v3268_v2  ;;  %14931 = vst [vmem:[#allocation47_spill] sm:$0xff] %v11664_v15  ;;  %v3137_v16 = vpop.f32.mrf.mxu2  ;;  %v3135_v21 = vadd.f32 %v3134_v51, %v2957_v4  ;;  %v2835_v17 = vrot.slane %v2709_v10, 1  ;;  %v11675_v15 = vld [vmem:[#allocation3 + $0x120] sm:$0xff] }
 0x3ee   : > { %v2543_v47 = vmul.f32 %v11561_v5, %v2510_v41  ;;  %7793 = vmatmul.msk.f32.gmra.mxu1 %vm2585_vm5, %v11659_v37  ;;  %7857 = vmatmul.msk.f32.gmra.mxu3 %vm2585_vm5, %v11662_v57  ;;  %v3270_v12 = vrot.slane %v2709_v10, 2  ;;  %14932 = vst [vmem:[#allocation41_spill] sm:$0xff] %v11675_v15  ;;  %v2314_v41 = vmax.f32 %v2282_v59, 0.0  ;;  %v2286_v10 = vadd.f32 %v11504_v11, %v11403_v20 }
 0x3ef   : > { %v3544_v18 = vpop.f32.mrf.mxu0 }
 0x3f0   : > { %v2576_v35 = vadd.f32 %v11571_v58, %v2543_v47  ;;  %v3392_v61 = vpop.f32.mrf.mxu3 }
 0x3f1   : > { %v3476_v45 = vadd.f32 %v3392_v61, %v3135_v21  ;;  %v11689_v61 = vsel %vm1015_vm3, %v3268_v2, %v3270_v12  ;;  %v2837_v2 = vrot.slane %v11675_v15, 1 }
 0x3f2   : > { %2665 = vst.msk [vmem:[#allocation3 + $0x129] sm:$0xff] %vm2585_vm5, %v2576_v35  ;;  %v2960_v24 = vpop.f32.mrf.mxu1  ;;  %v11686_v35 = vsel %vm572_vm2, %v2833_v56, %v2835_v17  ;;  %v2318_v56 = vmax.f32 %v2286_v10, 0.0 }
 0x3f3   : > { %7827 = vmatmul.msk.f32.gmra.mxu2 %vm2585_vm5, %v11675_v15  ;;  %7889 = vmatmul.msk.f32.gmra.mxu0 %vm2585_vm5, %v11675_v15  ;;  %v2440_v4 = vpop.permute.xlu1 %2439  ;;  %v11681_v47 = vadd.f32 %v3544_v18, %v3476_v45  ;;  %14934 = vst [vmem:[#allocation50_spill] sm:$0xff] %v11686_v35  ;;  %v3138_v18 = vadd.f32 %v3137_v16, %v2960_v24 }
 0x3f4   : > { %v2511_v51 = vadd.f32 %v2440_v4, %v2314_v41  ;;  %14935 = vst [vmem:[#allocation51_spill] sm:$0xff] %v11689_v61 }
 0x3f5   : > { %14933 = vst [vmem:[#allocation45_spill] sm:$0xff] %v11681_v47  ;;  %v3140_v21 = vpop.f32.mrf.mxu2 }
 0x3f6   : > { %v2544_v59 = vmul.f32 %v11561_v5, %v2511_v51  ;;  %7794 = vmatmul.msk.f32.gmra.mxu1 %vm2585_vm5, %v11686_v35  ;;  %7858 = vmatmul.msk.f32.gmra.mxu3 %vm2585_vm5, %v11689_v61  ;;  %v3272_v51 = vrot.slane %v11675_v15, 2 }
 0x3f7   : > { %v3547_v41 = vpop.f32.mrf.mxu0 }
 0x3f8   : > { %v2577_v45 = vadd.f32 %v11571_v58, %v2544_v59  ;;  %v3395_v20 = vpop.f32.mrf.mxu3 }
 0x3f9   : > { %v11697_v4 = vld [vmem:[#allocation3 + $0x128] sm:$0xff]  ;;  %v3477_v17 = vadd.f32 %v3395_v20, %v3138_v18 }
 0x3fa   : > { %14936 = vst [vmem:[#allocation44_spill] sm:$0xff] %v11697_v4  ;;  %v2838_v12 = vrot.slane %v11697_v4, 1  ;;  %v3273_v47 = vrot.slane %v11697_v4, 2  ;;  %v2963_v35 = vpop.f32.mrf.mxu1 }
 0x3fb   : > { %2666 = vst.msk [vmem:[#allocation3 + $0x139] sm:$0xff] %vm2585_vm5, %v2577_v45  ;;  %7828 = vmatmul.msk.f32.gmra.mxu2 %vm2585_vm5, %v11697_v4  ;;  %7890 = vmatmul.msk.f32.gmra.mxu0 %vm2585_vm5, %v11697_v4  ;;  %v2448_v16 = vpop.permute.xlu2 %2447  ;;  %v11714_v18 = vadd.f32 %v3547_v41, %v3477_v17  ;;  %v2284_v45 = vadd.f32 %v11504_v11, %v11355_v29 }
 0x3fc   : > { %v2515_v24 = vadd.f32 %v2448_v16, %v2318_v56  ;;  %v11709_v10 = vsel %vm572_vm2, %v2837_v2, %v2838_v12  ;;  %v11712_v59 = vsel %vm1015_vm3, %v3272_v51, %v3273_v47  ;;  %v2712_v56 = vld [vmem:[#allocation3 + $0x130] sm:$0x3]  ;;  %v3141_v2 = vadd.f32 %v3140_v21, %v2963_v35 }
 0x3fd   : > { %14937 = vst [vmem:[#allocation48_spill] sm:$0xff] %v11709_v10  ;;  %v3143_v15 = vpop.f32.mrf.mxu2  ;;  %v2840_v17 = vrot.slane %v2712_v56, 1 }
 0x3fe   : > { %14938 = vst [vmem:[#allocation54_spill] sm:$0xff] %v11714_v18  ;;  %v2548_v20 = vmul.f32 %v11561_v5, %v2515_v24  ;;  %7795 = vmatmul.msk.f32.gmra.mxu1 %vm2585_vm5, %v11709_v10  ;;  %7859 = vmatmul.msk.f32.gmra.mxu3 %vm2585_vm5, %v11712_v59  ;;  %v3275_v18 = vrot.slane %v2712_v56, 2  ;;  %v2316_v24 = vmax.f32 %v2284_v45, 0.0  ;;  %v3660_v10 = vld [vmem:[%s14519_s3 + $0x20] sm:$0xff]  ;;  %v2285_v56 = vadd.f32 %v11504_v11, %v11375_v26 }
 0x3ff   : > { %v3550_v51 = vpop.f32.mrf.mxu0  ;;  %3680 = vmatpush.msrb.mxu1 %v3660_v10 }
 0x400   : > { %v2581_v16 = vadd.f32 %v11571_v58, %v2548_v20  ;;  %v3398_v4 = vpop.f32.mrf.mxu3  ;;  %v11735_v20 = vsel %vm572_vm2, %v2838_v12, %v2840_v17 }
 0x401   : > { %v3478_v29 = vadd.f32 %v3398_v4, %v3141_v2  ;;  %14940 = vst [vmem:[#allocation53_spill] sm:$0xff] %v11735_v20  ;;  %v11738_v4 = vsel %vm1015_vm3, %v3273_v47, %v3275_v18 }
 0x402   : > { %v11724_v41 = vld [vmem:[#allocation3 + $0x138] sm:$0xff]  ;;  %2670 = vst.msk [vmem:[#allocation3 + $0x169] sm:$0xff] %vm2585_vm5, %v2581_v16  ;;  %v2966_v61 = vpop.f32.mrf.mxu1  ;;  %v11749_v10 = vld [vmem:[#allocation3 + $0x140] sm:$0xff] }
 0x403   : > { %14939 = vst [vmem:[#allocation55_spill] sm:$0xff] %v11724_v41  ;;  %7829 = vmatmul.msk.f32.gmra.mxu2 %vm2585_vm5, %v11724_v41  ;;  %7891 = vmatmul.msk.f32.gmra.mxu0 %vm2585_vm5, %v11724_v41  ;;  %v2444_v35 = vpop.permute.xlu0 %2443  ;;  %v11740_v45 = vadd.f32 %v3550_v51, %v3478_v29  ;;  %v3144_v12 = vadd.f32 %v3143_v15, %v2966_v61  ;;  %v2842_v17 = vrot.slane %v11724_v41, 1  ;;  %v2843_v26 = vrot.slane %v11749_v10, 1 }
 0x404   : > { %v2513_v21 = vadd.f32 %v2444_v35, %v2316_v24  ;;  %14942 = vst [vmem:[#allocation59_spill] sm:$0xff] %v11749_v10  ;;  %v3277_v29 = vrot.slane %v11724_v41, 2  ;;  %v3278_v24 = vrot.slane %v11749_v10, 2 }
 0x405   : > { %14941 = vst [vmem:[#allocation58_spill] sm:$0xff] %v11740_v45  ;;  %v3146_v16 = vpop.f32.mrf.mxu2 }
 0x406   : > { %v2546_v2 = vmul.f32 %v11561_v5, %v2513_v21  ;;  %7796 = vmatmul.msk.f32.gmra.mxu1 %vm2585_vm5, %v11735_v20  ;;  %7860 = vmatmul.msk.f32.gmra.mxu3 %vm2585_vm5, %v11738_v4  ;;  %v2317_v21 = vmax.f32 %v2285_v56, 0.0  ;;  %v11764_v20 = vsel %vm572_vm2, %v2842_v17, %v2843_v26  ;;  %v11767_v41 = vsel %vm1015_vm3, %v3277_v29, %v3278_v24 }
 0x407   : > { %v3553_v18 = vpop.f32.mrf.mxu0  ;;  %14944 = vst [vmem:[#allocation62_spill] sm:$0xff] %v11764_v20  ;;  %v2289_v56 = vadd.f32 %v11504_v11, %v11471_v44 }
 0x408   : > { %v2579_v47 = vadd.f32 %v11571_v58, %v2546_v2  ;;  %v3401_v51 = vpop.f32.mrf.mxu3  ;;  %14945 = vst [vmem:[#allocation63_spill] sm:$0xff] %v11767_v41 }
 0x409   : > { %v3479_v35 = vadd.f32 %v3401_v51, %v3144_v12 }
 0x40a   : > { %2668 = vst.msk [vmem:[#allocation3 + $0x151] sm:$0xff] %vm2585_vm5, %v2579_v47  ;;  %v2969_v45 = vpop.f32.mrf.mxu1 }
 0x40b   : > { %7830 = vmatmul.msk.f32.gmra.mxu2 %vm2585_vm5, %v11749_v10  ;;  %7892 = vmatmul.msk.f32.gmra.mxu0 %vm2585_vm5, %v11749_v10  ;;  %v2446_v15 = vpop.permute.xlu1 %2445  ;;  %v11761_v2 = vadd.f32 %v3553_v18, %v3479_v35  ;;  %v3147_v18 = vadd.f32 %v3146_v16, %v2969_v45  ;;  %v2715_v35 = vld [vmem:[#allocation3 + $0x148] sm:$0x3] }
 0x40c   : > { %v2514_v61 = vadd.f32 %v2446_v15, %v2317_v21  ;;  %v2321_v15 = vmax.f32 %v2289_v56, 0.0  ;;  %v2845_v16 = vrot.slane %v2715_v35, 1  ;;  %v2287_v56 = vadd.f32 %v11504_v11, %v11421_v40 }
 0x40d   : > { %14943 = vst [vmem:[#allocation56_spill] sm:$0xff] %v11761_v2  ;;  %v3149_v47 = vpop.f32.mrf.mxu2 }
 0x40e   : > { %v2547_v12 = vmul.f32 %v11561_v5, %v2514_v61  ;;  %7797 = vmatmul.msk.f32.gmra.mxu1 %vm2585_vm5, %v11764_v20  ;;  %7861 = vmatmul.msk.f32.gmra.mxu3 %vm2585_vm5, %v11767_v41  ;;  %v3815_v61 = vld [vmem:[%s14519_s3 + $0x28] sm:$0xff] }
 0x40f   : > { %v3556_v17 = vpop.f32.mrf.mxu0  ;;  %3835 = vmatpush.msrb.mxu2 %v3815_v61 }
 0x410   : > { %v2580_v51 = vadd.f32 %v11571_v58, %v2547_v12  ;;  %v3404_v21 = vpop.f32.mrf.mxu3  ;;  %v3280_v12 = vrot.slane %v2715_v35, 2 }
 0x411   : > { %v11777_v29 = vld [vmem:[#allocation3 + $0x150] sm:$0xff]  ;;  %v3480_v44 = vadd.f32 %v3404_v21, %v3147_v18  ;;  %v11792_v18 = vsel %vm572_vm2, %v2843_v26, %v2845_v16  ;;  %v2319_v26 = vmax.f32 %v2287_v56, 0.0 }
 0x412   : > { %2669 = vst.msk [vmem:[#allocation3 + $0x159] sm:$0xff] %vm2585_vm5, %v2580_v51  ;;  %v2972_v2 = vpop.f32.mrf.mxu1  ;;  %v11795_v51 = vsel %vm1015_vm3, %v3278_v24, %v3280_v12  ;;  %v2847_v24 = vrot.slane %v11777_v29, 1 }
 0x413   : > { %7831 = vmatmul.msk.f32.gmra.mxu2 %vm2585_vm5, %v11777_v29  ;;  %7893 = vmatmul.msk.f32.gmra.mxu0 %vm2585_vm5, %v11777_v29  ;;  %v2454_v45 = vpop.permute.xlu2 %2453  ;;  %v11787_v20 = vadd.f32 %v3556_v17, %v3480_v44  ;;  %v3150_v17 = vadd.f32 %v3149_v47, %v2972_v2 }
 0x414   : > { %v2518_v10 = vadd.f32 %v2454_v45, %v2321_v15  ;;  %v3282_v45 = vrot.slane %v11777_v29, 2 }
 0x415   : > { %14946 = vst [vmem:[#allocation61_spill] sm:$0xff] %v11787_v20  ;;  %v3152_v41 = vpop.f32.mrf.mxu2 }
 0x416   : > { %v2551_v21 = vmul.f32 %v11561_v5, %v2518_v10  ;;  %7798 = vmatmul.msk.f32.gmra.mxu1 %vm2585_vm5, %v11792_v18  ;;  %7862 = vmatmul.msk.f32.gmra.mxu3 %vm2585_vm5, %v11795_v51 }
 0x417   : > { %v3559_v44 = vpop.f32.mrf.mxu0 }
 0x418   : > { %v2584_v35 = vadd.f32 %v11571_v58, %v2551_v21  ;;  %v3407_v40 = vpop.f32.mrf.mxu3 }
 0x419   : > { %v11803_v15 = vld [vmem:[#allocation3 + $0x158] sm:$0xff]  ;;  %v3481_v10 = vadd.f32 %v3407_v40, %v3150_v17  ;;  %v3965_v17 = vld [vmem:[%s14519_s3 + $0x30] sm:$0xff]  ;;  %v2288_v40 = vadd.f32 %v11504_v11, %v11445_v27  ;;  %v11834_v11 = vld [vmem:[#allocation3 + $0x168] sm:$0xff] }
 0x41a   : > { %14947 = vst [vmem:[#allocation66_spill] sm:$0xff] %v11803_v15  ;;  %v2848_v61 = vrot.slane %v11803_v15, 1  ;;  %v3283_v16 = vrot.slane %v11803_v15, 2  ;;  %v2975_v12 = vpop.f32.mrf.mxu1  ;;  %3987 = vmatpush.msrb.mxu3 %v3965_v17 }
 0x41b   : > { %2673 = vst.msk [vmem:[#allocation3 + $0x189] sm:$0xff] %vm2585_vm5, %v2584_v35  ;;  %7832 = vmatmul.msk.f32.gmra.mxu2 %vm2585_vm5, %v11803_v15  ;;  %7894 = vmatmul.msk.f32.gmra.mxu0 %vm2585_vm5, %v11803_v15  ;;  %v2450_v2 = vpop.permute.xlu0 %2449  ;;  %v11823_v35 = vadd.f32 %v3559_v44, %v3481_v10 }
 0x41c   : > { %v2516_v47 = vadd.f32 %v2450_v2, %v2319_v26  ;;  %v11815_v56 = vsel %vm572_vm2, %v2847_v24, %v2848_v61  ;;  %v11818_v21 = vsel %vm1015_vm3, %v3282_v45, %v3283_v16  ;;  %v2718_v24 = vld [vmem:[#allocation3 + $0x160] sm:$0x3]  ;;  %v3153_v45 = vadd.f32 %v3152_v41, %v2975_v12  ;;  %14950 = vst [vmem:[#allocation52_spill] sm:$0xff] %v11834_v11 }
 0x41d   : > { %14948 = vst [vmem:[#allocation64_spill] sm:$0xff] %v11815_v56  ;;  %v3155_v26 = vpop.f32.mrf.mxu2  ;;  %v2850_v44 = vrot.slane %v2718_v24, 1  ;;  %v3285_v10 = vrot.slane %v2718_v24, 2 }
 0x41e   : > { %14949 = vst [vmem:[#allocation49_spill] sm:$0xff] %v11823_v35  ;;  %v2549_v20 = vmul.f32 %v11561_v5, %v2516_v47  ;;  %7799 = vmatmul.msk.f32.gmra.mxu1 %vm2585_vm5, %v11815_v56  ;;  %7863 = vmatmul.msk.f32.gmra.mxu3 %vm2585_vm5, %v11818_v21  ;;  %v2320_v47 = vmax.f32 %v2288_v40, 0.0  ;;  %v4123_v35 = vld [vmem:[%s14519_s3 + $0x38] sm:$0xff] }
 0x41f   : > { %v3562_v15 = vpop.f32.mrf.mxu0  ;;  %4143 = vmatpush.msra.mxu0 %v4123_v35  ;;  %v11846_v24 = vsel %vm572_vm2, %v2848_v61, %v2850_v44  ;;  %v11849_v40 = vsel %vm1015_vm3, %v3283_v16, %v3285_v10  ;;  %v2852_v61 = vrot.slane %v11834_v11, 1  ;;  %v3287_v44 = vrot.slane %v11834_v11, 2 }
 0x420   : > { %v2582_v2 = vadd.f32 %v11571_v58, %v2549_v20  ;;  %v3410_v17 = vpop.f32.mrf.mxu3 }
 0x421   : > { %v3482_v27 = vadd.f32 %v3410_v17, %v3153_v45 }
 0x422   : > { %2671 = vst.msk [vmem:[#allocation3 + $0x171] sm:$0xff] %vm2585_vm5, %v2582_v2  ;;  %v2978_v56 = vpop.f32.mrf.mxu1 }
 0x423   : > { %7833 = vmatmul.msk.f32.gmra.mxu2 %vm2585_vm5, %v11834_v11  ;;  %7895 = vmatmul.msk.f32.gmra.mxu0 %vm2585_vm5, %v11834_v11  ;;  %v2452_v41 = vpop.permute.xlu1 %2451  ;;  %v11843_v12 = vadd.f32 %v3562_v15, %v3482_v27  ;;  %v3156_v17 = vadd.f32 %v3155_v26, %v2978_v56 }
 0x424   : > { %v2517_v20 = vadd.f32 %v2452_v41, %v2320_v47 }
 0x425   : > { %14951 = vst [vmem:[#allocation57_spill] sm:$0xff] %v11843_v12  ;;  %v3158_v2 = vpop.f32.mrf.mxu2 }
 0x426   : > { %v2550_v45 = vmul.f32 %v11561_v5, %v2517_v20  ;;  %7800 = vmatmul.msk.f32.gmra.mxu1 %vm2585_vm5, %v11846_v24  ;;  %7864 = vmatmul.msk.f32.gmra.mxu3 %vm2585_vm5, %v11849_v40 }
 0x427   : > { %v3565_v15 = vpop.f32.mrf.mxu0 }
 0x428   : > { %v2583_v35 = vadd.f32 %v11571_v58, %v2550_v45  ;;  %v3413_v27 = vpop.f32.mrf.mxu3 }
 0x429   : > { %v11857_v47 = vld [vmem:[#allocation3 + $0x170] sm:$0xff]  ;;  %v3483_v16 = vadd.f32 %v3413_v27, %v3156_v17  ;;  %v2721_v45 = vld [vmem:[#allocation3 + $0x178] sm:$0x3] }
 0x42a   : > { %14952 = vst [vmem:[#allocation60_spill] sm:$0xff] %v11857_v47  ;;  %v2853_v5 = vrot.slane %v11857_v47, 1  ;;  %v3288_v10 = vrot.slane %v11857_v47, 2  ;;  %v2981_v41 = vpop.f32.mrf.mxu1 }
 0x42b   : > { %2672 = vst.msk [vmem:[#allocation3 + $0x181] sm:$0xff] %vm2585_vm5, %v2583_v35  ;;  %7834 = vmatmul.msk.f32.gmra.mxu2 %vm2585_vm5, %v11857_v47  ;;  %7896 = vmatmul.msk.f32.gmra.mxu0 %vm2585_vm5, %v11857_v47  ;;  %v11874_v26 = vadd.f32 %v3565_v15, %v3483_v16  ;;  %v3159_v17 = vadd.f32 %v3158_v2, %v2981_v41  ;;  %v3290_v47 = vrot.slane %v2721_v45, 2 }
 0x42c   : > { %v11869_v58 = vsel %vm572_vm2, %v2852_v61, %v2853_v5  ;;  %v11872_v56 = vsel %vm1015_vm3, %v3287_v44, %v3288_v10  ;;  %v2855_v61 = vrot.slane %v2721_v45, 1 }
 0x42d   : > { %14953 = vst [vmem:[#allocation65_spill] sm:$0xff] %v11874_v26  ;;  %v3161_v20 = vpop.f32.mrf.mxu2  ;;  %v11892_v2 = vsel %vm1015_vm3, %v3288_v10, %v3290_v47  ;;  %v9314_v10 = vld [vmem:[#allocation3 + $0x30] sm:$0xff] }
 0x42e   : > { %7801 = vmatmul.msk.f32.gmra.mxu1 %vm2585_vm5, %v11869_v58  ;;  %7865 = vmatmul.msk.f32.gmra.mxu3 %vm2585_vm5, %v11872_v56  ;;  %v11889_v16 = vsel %vm572_vm2, %v2853_v5, %v2855_v61 }
 0x42f   : > { %v3568_v35 = vpop.f32.mrf.mxu0 }
 0x430   : > { %v3416_v27 = vpop.f32.mrf.mxu3 }
 0x431   : > { %v3484_v11 = vadd.f32 %v3416_v27, %v3159_v17 }
 0x432   : > { %v11880_v12 = vld [vmem:[#allocation3 + $0x180] sm:$0xff]  ;;  %v2984_v44 = vpop.f32.mrf.mxu1 }
 0x433   : > { %7897 = vmatmul.msk.f32.gmra.mxu0 %vm2585_vm5, %v11880_v12  ;;  %7931 = vmatmul.msk.f32.vlgmr.msrb.gmra.mxu2 %vm2585_vm5, %v11130_v0  ;;  %v11886_v15 = vadd.f32 %v3568_v35, %v3484_v11  ;;  %v3162_v45 = vadd.f32 %v3161_v20, %v2984_v44  ;;  %v11898_v0 = vld [vmem:[#allocation3 + $0x188] sm:$0xff] }
 0x435   : > { %v3164_v41 = vpop.f32.mrf.mxu2 }
 0x436   : > { %7802 = vmatmul.msk.f32.gmra.mxu1 %vm2585_vm5, %v11889_v16  ;;  %7866 = vmatmul.msk.f32.gmra.mxu3 %vm2585_vm5, %v11892_v2 }
 0x437   : > { %v3571_v17 = vpop.f32.mrf.mxu0 }
 0x438   : > { %v3419_v27 = vpop.f32.mrf.mxu3 }
 0x439   : > { %v3485_v26 = vadd.f32 %v3419_v27, %v3162_v45 }
 0x43a   : > { %v2987_v11 = vpop.f32.mrf.mxu1 }
 0x43b   : > { %7898 = vmatmul.msk.f32.gmra.mxu0 %vm2585_vm5, %v11898_v0  ;;  %7932 = vmatmul.msk.f32.gmra.mxu2 %vm2585_vm5, %v11158_v39  ;;  %v11904_v47 = vadd.f32 %v3571_v17, %v3485_v26  ;;  %v3165_v20 = vadd.f32 %v3164_v41, %v2987_v11 }
 0x43d   : > { %v3167_v5 = vpop.f32.mrf.mxu2 }
 0x43e   : > { %7899 = vmatmul.msk.f32.vlgmr.msrb.gmra.mxu1 %vm2585_vm5, %v11127_v53  ;;  %7963 = vmatmul.msk.f32.vlgmr.msrb.gmra.mxu3 %vm2585_vm5, %v9314_v10  ;;  %v9315_v53 = vld [vmem:[#allocation3 + $0x38] sm:$0xff] }
 0x43f   : > { %v3574_v35 = vpop.f32.mrf.mxu0 }
 0x440   : > { %v3422_v61 = vpop.f32.mrf.mxu3 }
 0x441   : > { %v3486_v44 = vadd.f32 %v3422_v61, %v3165_v20 }
 0x442   : > { %v2990_v45 = vpop.f32.mrf.mxu1 }
 0x443   : > { %7933 = vmatmul.msk.f32.gmra.mxu2 %vm2585_vm5, %v11191_v23  ;;  %7995 = vmatmul.msk.f32.vlgmr.msra.gmra.mxu0 %vm2585_vm5, %v11188_v7  ;;  %v11913_v39 = vadd.f32 %v3574_v35, %v3486_v44  ;;  %v3168_v41 = vadd.f32 %v3167_v5, %v2990_v45 }
 0x445   : > { %v3170_v26 = vpop.f32.mrf.mxu2 }
 0x446   : > { %7900 = vmatmul.msk.f32.gmra.mxu1 %vm2585_vm5, %v11155_v32  ;;  %7964 = vmatmul.msk.f32.gmra.mxu3 %vm2585_vm5, %v9315_v53  ;;  %v9316_v32 = vld [vmem:[#allocation3 + $0x48] sm:$0xff] }
 0x447   : > { %v3577_v17 = vpop.f32.mrf.mxu0 }
 0x448   : > { %v3425_v27 = vpop.f32.mrf.mxu3 }
 0x449   : > { %v3487_v11 = vadd.f32 %v3425_v27, %v3168_v41 }
 0x44a   : > { %v2993_v10 = vpop.f32.mrf.mxu1 }
 0x44b   : > { %7934 = vmatmul.msk.f32.gmra.mxu2 %vm2585_vm5, %v11224_v42  ;;  %7996 = vmatmul.msk.f32.gmra.mxu0 %vm2585_vm5, %v11221_v1  ;;  %v11922_v20 = vadd.f32 %v3577_v17, %v3487_v11  ;;  %v3171_v5 = vadd.f32 %v3170_v26, %v2993_v10 }
 0x44d   : > { %v3173_v35 = vpop.f32.mrf.mxu2 }
 0x44e   : > { %7901 = vmatmul.msk.f32.gmra.mxu1 %vm2585_vm5, %v11188_v7  ;;  %7965 = vmatmul.msk.f32.gmra.mxu3 %vm2585_vm5, %v9316_v32  ;;  %v9317_v7 = vld [vmem:[#allocation3 + $0x50] sm:$0xff] }
 0x450   : > { %v3580_v61 = vpop.f32.mrf.mxu0  ;;  %v3428_v44 = vpop.f32.mrf.mxu3 }
 0x451   : > { %v3488_v45 = vadd.f32 %v3428_v44, %v3171_v5 }
 0x452   : > { %v2996_v53 = vpop.f32.mrf.mxu1 }
 0x453   : > { %7935 = vmatmul.msk.f32.gmra.mxu2 %vm2585_vm5, %v11249_v14  ;;  %7997 = vmatmul.msk.f32.gmra.mxu0 %vm2585_vm5, %v11246_v19  ;;  %v11931_v41 = vadd.f32 %v3580_v61, %v3488_v45  ;;  %v3174_v26 = vadd.f32 %v3173_v35, %v2996_v53 }
 0x456   : > { %v3176_v17 = vpop.f32.mrf.mxu2  ;;  %7902 = vmatmul.msk.f32.gmra.mxu1 %vm2585_vm5, %v11221_v1  ;;  %7966 = vmatmul.msk.f32.gmra.mxu3 %vm2585_vm5, %v9317_v7  ;;  %v9318_v1 = vld [vmem:[#allocation3 + $0x60] sm:$0xff] }
 0x458   : > { %v3583_v27 = vpop.f32.mrf.mxu0  ;;  %v3431_v11 = vpop.f32.mrf.mxu3 }
 0x459   : > { %v3489_v10 = vadd.f32 %v3431_v11, %v3174_v26 }
 0x45a   : > { %v2999_v32 = vpop.f32.mrf.mxu1 }
 0x45b   : > { %7936 = vmatmul.msk.f32.gmra.mxu2 %vm2585_vm5, %v11280_v48  ;;  %7998 = vmatmul.msk.f32.gmra.mxu0 %vm2585_vm5, %v11277_v52  ;;  %v11940_v5 = vadd.f32 %v3583_v27, %v3489_v10  ;;  %v3177_v35 = vadd.f32 %v3176_v17, %v2999_v32 }
 0x45e   : > { %v3179_v61 = vpop.f32.mrf.mxu2  ;;  %7903 = vmatmul.msk.f32.gmra.mxu1 %vm2585_vm5, %v11246_v19  ;;  %7967 = vmatmul.msk.f32.gmra.mxu3 %vm2585_vm5, %v9318_v1  ;;  %v9319_v19 = vld [vmem:[#allocation3 + $0x68] sm:$0xff] }
 0x460   : > { %v3586_v44 = vpop.f32.mrf.mxu0  ;;  %v3434_v45 = vpop.f32.mrf.mxu3 }
 0x461   : > { %v3490_v53 = vadd.f32 %v3434_v45, %v3177_v35 }
 0x462   : > { %v3002_v7 = vpop.f32.mrf.mxu1 }
 0x463   : > { %7937 = vmatmul.msk.f32.gmra.mxu2 %vm2585_vm5, %v11306_v6  ;;  %7999 = vmatmul.msk.f32.gmra.mxu0 %vm2585_vm5, %v11303_v54  ;;  %v11949_v26 = vadd.f32 %v3586_v44, %v3490_v53  ;;  %v3180_v17 = vadd.f32 %v3179_v61, %v3002_v7 }
 0x466   : > { %v3182_v27 = vpop.f32.mrf.mxu2  ;;  %7904 = vmatmul.msk.f32.gmra.mxu1 %vm2585_vm5, %v11277_v52  ;;  %7968 = vmatmul.msk.f32.gmra.mxu3 %vm2585_vm5, %v9319_v19  ;;  %v9320_v52 = vld [vmem:[#allocation3 + $0x78] sm:$0xff] }
 0x468   : > { %v3589_v11 = vpop.f32.mrf.mxu0  ;;  %v3437_v10 = vpop.f32.mrf.mxu3 }
 0x469   : > { %v3491_v32 = vadd.f32 %v3437_v10, %v3180_v17 }
 0x46b   : > { %v3005_v1 = vpop.f32.mrf.mxu1  ;;  %7938 = vmatmul.msk.f32.gmra.mxu2 %vm2585_vm5, %v11333_v36  ;;  %8000 = vmatmul.msk.f32.gmra.mxu0 %vm2585_vm5, %v11330_v34  ;;  %v11958_v35 = vadd.f32 %v3589_v11, %v3491_v32 }
 0x46c   : > { %v3183_v61 = vadd.f32 %v3182_v27, %v3005_v1 }
 0x46e   : > { %v3185_v44 = vpop.f32.mrf.mxu2  ;;  %7905 = vmatmul.msk.f32.gmra.mxu1 %vm2585_vm5, %v11303_v54  ;;  %7969 = vmatmul.msk.f32.gmra.mxu3 %vm2585_vm5, %v9320_v52  ;;  %v9321_v54 = vld [vmem:[#allocation3 + $0x80] sm:$0xff] }
 0x470   : > { %v3592_v45 = vpop.f32.mrf.mxu0 }
 0x471   : > { %v3440_v53 = vpop.f32.mrf.mxu3 }
 0x472   : > { %v3492_v7 = vadd.f32 %v3440_v53, %v3183_v61 }
 0x473   : > { %v3008_v19 = vpop.f32.mrf.mxu1  ;;  %7939 = vmatmul.msk.f32.gmra.mxu2 %vm2585_vm5, %v11353_v50  ;;  %8001 = vmatmul.msk.f32.gmra.mxu0 %vm2585_vm5, %v11350_v28 }
 0x474   : > { %v11967_v17 = vadd.f32 %v3592_v45, %v3492_v7  ;;  %v3186_v27 = vadd.f32 %v3185_v44, %v3008_v19 }
 0x476   : > { %14954 = vst [vmem:[#allocation21_spill] sm:$0xff] %v11967_v17  ;;  %v3188_v11 = vpop.f32.mrf.mxu2  ;;  %7906 = vmatmul.msk.f32.gmra.mxu1 %vm2585_vm5, %v11330_v34  ;;  %7970 = vmatmul.msk.f32.gmra.mxu3 %vm2585_vm5, %v9321_v54  ;;  %v9322_v34 = vld [vmem:[#allocation3 + $0x90] sm:$0xff]  ;;  %v14995_v17 = vld [vmem:[#allocation62_spill] sm:$0xff] }
 0x478   : > { %v3595_v10 = vpop.f32.mrf.mxu0 }
 0x479   : > { %v3443_v32 = vpop.f32.mrf.mxu3 }
 0x47a   : > { %v3493_v1 = vadd.f32 %v3443_v32, %v3186_v27 }
 0x47b   : > { %v3011_v52 = vpop.f32.mrf.mxu1  ;;  %7940 = vmatmul.msk.f32.gmra.mxu2 %vm2585_vm5, %v11381_v63  ;;  %8002 = vmatmul.msk.f32.gmra.mxu0 %vm2585_vm5, %v11378_v3 }
 0x47c   : > { %v11976_v61 = vadd.f32 %v3595_v10, %v3493_v1  ;;  %v3189_v44 = vadd.f32 %v3188_v11, %v3011_v52 }
 0x47e   : > { %14955 = vst [vmem:[#allocation67_spill] sm:$0xff] %v11976_v61  ;;  %v3191_v45 = vpop.f32.mrf.mxu2  ;;  %7907 = vmatmul.msk.f32.gmra.mxu1 %vm2585_vm5, %v11350_v28  ;;  %7971 = vmatmul.msk.f32.gmra.mxu3 %vm2585_vm5, %v9322_v34  ;;  %v9323_v28 = vld [vmem:[#allocation3 + $0x98] sm:$0xff] }
 0x480   : > { %v3598_v53 = vpop.f32.mrf.mxu0 }
 0x481   : > { %v3446_v7 = vpop.f32.mrf.mxu3 }
 0x482   : > { %v3494_v19 = vadd.f32 %v3446_v7, %v3189_v44 }
 0x483   : > { %v3014_v54 = vpop.f32.mrf.mxu1  ;;  %7941 = vmatmul.msk.f32.gmra.mxu2 %vm2585_vm5, %v11401_v62  ;;  %8003 = vmatmul.msk.f32.gmra.mxu0 %vm2585_vm5, %v11398_v30 }
 0x484   : > { %v11985_v27 = vadd.f32 %v3598_v53, %v3494_v19  ;;  %v3192_v11 = vadd.f32 %v3191_v45, %v3014_v54 }
 0x486   : > { %14956 = vst [vmem:[#allocation18_spill] sm:$0xff] %v11985_v27  ;;  %v3194_v10 = vpop.f32.mrf.mxu2  ;;  %7908 = vmatmul.msk.f32.gmra.mxu1 %vm2585_vm5, %v11378_v3  ;;  %7972 = vmatmul.msk.f32.gmra.mxu3 %vm2585_vm5, %v9323_v28  ;;  %v9324_v3 = vld [vmem:[#allocation3 + $0xa8] sm:$0xff] }
 0x488   : > { %v3601_v32 = vpop.f32.mrf.mxu0 }
 0x489   : > { %v3449_v1 = vpop.f32.mrf.mxu3 }
 0x48a   : > { %v3495_v52 = vadd.f32 %v3449_v1, %v3192_v11 }
 0x48b   : > { %v3017_v34 = vpop.f32.mrf.mxu1  ;;  %7942 = vmatmul.msk.f32.gmra.mxu2 %vm2585_vm5, %v11427_v33  ;;  %8004 = vmatmul.msk.f32.gmra.mxu0 %vm2585_vm5, %v11424_v22 }
 0x48c   : > { %v11994_v44 = vadd.f32 %v3601_v32, %v3495_v52  ;;  %v3195_v45 = vadd.f32 %v3194_v10, %v3017_v34 }
 0x48e   : > { %14957 = vst [vmem:[#allocation17_spill] sm:$0xff] %v11994_v44  ;;  %v3197_v53 = vpop.f32.mrf.mxu2  ;;  %7909 = vmatmul.msk.f32.gmra.mxu1 %vm2585_vm5, %v11398_v30  ;;  %7973 = vmatmul.msk.f32.gmra.mxu3 %vm2585_vm5, %v9324_v3  ;;  %v9325_v30 = vld [vmem:[#allocation3 + $0xb0] sm:$0xff] }
 0x48f   : > { %v14970_v44 = vld [vmem:[#allocation31_spill] sm:$0xff] }
 0x490   : > { %v3604_v7 = vpop.f32.mrf.mxu0 }
 0x491   : > { %v3452_v19 = vpop.f32.mrf.mxu3 }
 0x492   : > { %v3496_v54 = vadd.f32 %v3452_v19, %v3195_v45 }
 0x493   : > { %v3020_v28 = vpop.f32.mrf.mxu1  ;;  %7943 = vmatmul.msk.f32.gmra.mxu2 %vm2585_vm5, %v11451_v55  ;;  %8005 = vmatmul.msk.f32.gmra.mxu0 %vm2585_vm5, %v11448_v43 }
 0x494   : > { %v12003_v11 = vadd.f32 %v3604_v7, %v3496_v54  ;;  %v3198_v10 = vadd.f32 %v3197_v53, %v3020_v28 }
 0x496   : > { %14958 = vst [vmem:[#allocation68_spill] sm:$0xff] %v12003_v11  ;;  %v3200_v32 = vpop.f32.mrf.mxu2  ;;  %7910 = vmatmul.msk.f32.gmra.mxu1 %vm2585_vm5, %v11424_v22  ;;  %7974 = vmatmul.msk.f32.gmra.mxu3 %vm2585_vm5, %v9325_v30  ;;  %v9326_v22 = vld [vmem:[#allocation3 + $0xc0] sm:$0xff]  ;;  %v14971_v11 = vld [vmem:[#allocation27_spill] sm:$0xff] }
 0x497   : > { %v3120_v27 = vadd.f32 %v14971_v11, %v14970_v44 }
 0x498   : > { %v3607_v1 = vpop.f32.mrf.mxu0 }
 0x499   : > { %v3455_v52 = vpop.f32.mrf.mxu3 }
 0x49a   : > { %v3497_v34 = vadd.f32 %v3455_v52, %v3198_v10 }
 0x49b   : > { %v3023_v3 = vpop.f32.mrf.mxu1  ;;  %7944 = vmatmul.msk.f32.gmra.mxu2 %vm2585_vm5, %v11477_v49  ;;  %8006 = vmatmul.msk.f32.gmra.mxu0 %vm2585_vm5, %v11474_v46 }
 0x49c   : > { %v12012_v45 = vadd.f32 %v3607_v1, %v3497_v34  ;;  %v3201_v53 = vadd.f32 %v3200_v32, %v3023_v3 }
 0x49e   : > { %14959 = vst [vmem:[#allocation19_spill] sm:$0xff] %v12012_v45  ;;  %v3203_v7 = vpop.f32.mrf.mxu2  ;;  %7911 = vmatmul.msk.f32.gmra.mxu1 %vm2585_vm5, %v11448_v43  ;;  %7975 = vmatmul.msk.f32.gmra.mxu3 %vm2585_vm5, %v9326_v22  ;;  %v9327_v43 = vld [vmem:[#allocation3 + $0xc8] sm:$0xff]  ;;  %v14964_v45 = vld [vmem:[#allocation28_spill] sm:$0xff] }
 0x4a0   : > { %v3610_v19 = vpop.f32.mrf.mxu0 }
 0x4a1   : > { %v3458_v54 = vpop.f32.mrf.mxu3 }
 0x4a2   : > { %v3498_v28 = vadd.f32 %v3458_v54, %v3201_v53 }
 0x4a3   : > { %v3026_v30 = vpop.f32.mrf.mxu1  ;;  %7945 = vmatmul.msk.f32.gmra.mxu2 %vm2585_vm5, %v11499_v25  ;;  %8007 = vmatmul.msk.f32.gmra.mxu0 %vm2585_vm5, %v11496_v9 }
 0x4a4   : > { %v12021_v10 = vadd.f32 %v3610_v19, %v3498_v28  ;;  %v3204_v32 = vadd.f32 %v3203_v7, %v3026_v30  ;;  %v14962_v30 = vld [vmem:[#allocation26_spill] sm:$0xff] }
 0x4a6   : > { %14960 = vst [vmem:[#allocation69_spill] sm:$0xff] %v12021_v10  ;;  %v3206_v1 = vpop.f32.mrf.mxu2  ;;  %7912 = vmatmul.msk.f32.gmra.mxu1 %vm2585_vm5, %v11474_v46  ;;  %7976 = vmatmul.msk.f32.gmra.mxu3 %vm2585_vm5, %v9327_v43  ;;  %v9328_v46 = vld [vmem:[#allocation3 + $0xd8] sm:$0xff] }
 0x4a7   : > { %v14963_v43 = vld [vmem:[#allocation20_spill] sm:$0xff] }
 0x4a8   : > { %v3613_v52 = vpop.f32.mrf.mxu0 }
 0x4a9   : > { %v3461_v34 = vpop.f32.mrf.mxu3 }
 0x4aa   : > { %v3499_v3 = vadd.f32 %v3461_v34, %v3204_v32  ;;  %v3117_v32 = vadd.f32 %v14963_v43, %v14962_v30  ;;  %v14969_v30 = vld [vmem:[#allocation30_spill] sm:$0xff] }
 0x4ab   : > { %v3029_v22 = vpop.f32.mrf.mxu1  ;;  %7946 = vmatmul.msk.f32.gmra.mxu2 %vm2585_vm5, %v11529_v13  ;;  %8008 = vmatmul.msk.f32.gmra.mxu0 %vm2585_vm5, %v11526_v60 }
 0x4ac   : > { %v12030_v53 = vadd.f32 %v3613_v52, %v3499_v3  ;;  %v3207_v7 = vadd.f32 %v3206_v1, %v3029_v22  ;;  %v14965_v52 = vld [vmem:[#allocation35_spill] sm:$0xff]  ;;  %v14968_v22 = vld [vmem:[#allocation34_spill] sm:$0xff] }
 0x4ae   : > { %14961 = vst [vmem:[#allocation9_spill] sm:$0xff] %v12030_v53  ;;  %v3209_v19 = vpop.f32.mrf.mxu2  ;;  %7913 = vmatmul.msk.f32.gmra.mxu1 %vm2585_vm5, %v11496_v9  ;;  %7977 = vmatmul.msk.f32.gmra.mxu3 %vm2585_vm5, %v9328_v46  ;;  %v14967_v9 = vld [vmem:[#allocation24_spill] sm:$0xff] }
 0x4af   : > { %v3470_v53 = vadd.f32 %v14967_v9, %v3117_v32  ;;  %v14972_v32 = vld [vmem:[#allocation38_spill] sm:$0xff]  ;;  %v14974_v9 = vld [vmem:[#allocation29_spill] sm:$0xff] }
 0x4b0   : > { %v3616_v54 = vpop.f32.mrf.mxu0 }
 0x4b1   : > { %v3464_v28 = vpop.f32.mrf.mxu3  ;;  %v3622_v43 = vadd.f32 %v14969_v30, %v3470_v53 }
 0x4b2   : > { %v3500_v34 = vadd.f32 %v3464_v28, %v3207_v7 }
 0x4b3   : > { %v3032_v10 = vpop.f32.mrf.mxu1  ;;  %7947 = vmatmul.msk.f32.gmra.mxu2 %vm2585_vm5, %v14964_v45  ;;  %8009 = vmatmul.msk.f32.gmra.mxu0 %vm2585_vm5, %v14965_v52 }
 0x4b4   : > { %v12041_v3 = vadd.f32 %v3616_v54, %v3500_v34  ;;  %v3210_v46 = vadd.f32 %v3209_v19, %v3032_v10  ;;  %v3471_v10 = vadd.f32 %v14974_v9, %v3120_v27  ;;  %v14975_v19 = vld [vmem:[#allocation32_spill] sm:$0xff] }
 0x4b6   : > { %14966 = vst [vmem:[#allocation70_spill] sm:$0xff] %v12041_v3  ;;  %7914 = vmatmul.msk.f32.gmra.mxu1 %vm2585_vm5, %v11526_v60  ;;  %v3837_v1 = vpop.f32.mrf.mxu2  ;;  %7978 = vmatmul.msk.f32.gmra.mxu3 %vm2585_vm5, %v14968_v22 }
 0x4b8   : > { %v3619_v7 = vpop.f32.mrf.mxu0 }
 0x4b9   : > { %v3467_v28 = vpop.f32.mrf.mxu3 }
 0x4ba   : > { %v3501_v61 = vadd.f32 %v3467_v28, %v3210_v46  ;;  %v14976_v46 = vld [vmem:[#allocation25_spill] sm:$0xff] }
 0x4bb   : > { %v3682_v54 = vpop.f32.mrf.mxu1  ;;  %7948 = vmatmul.msk.f32.gmra.mxu2 %vm2585_vm5, %v11585_v31  ;;  %8010 = vmatmul.msk.f32.gmra.mxu0 %vm2585_vm5, %v14972_v32  ;;  %v3623_v28 = vadd.f32 %v14976_v46, %v3471_v10 }
 0x4bc   : > { %v3778_v60 = vadd.f32 %v3682_v54, %v3622_v43  ;;  %v12055_v34 = vadd.f32 %v3619_v7, %v3501_v61  ;;  %v14977_v61 = vld [vmem:[#allocation42_spill] sm:$0xff]  ;;  %v14978_v43 = vld [vmem:[#allocation33_spill] sm:$0xff] }
 0x4be   : > { %14973 = vst [vmem:[#allocation7_spill] sm:$0xff] %v12055_v34  ;;  %7915 = vmatmul.msk.f32.gmra.mxu1 %vm2585_vm5, %v14965_v52  ;;  %v3840_v53 = vpop.f32.mrf.mxu2  ;;  %7979 = vmatmul.msk.f32.gmra.mxu3 %vm2585_vm5, %v14975_v19  ;;  %v3933_v11 = vadd.f32 %v3837_v1, %v3778_v60  ;;  %v14979_v19 = vld [vmem:[#allocation40_spill] sm:$0xff]  ;;  %v14991_v34 = vld [vmem:[#allocation53_spill] sm:$0xff] }
 0x4c0   : > { %v4145_v44 = vpop.f32.mrf.mxu0 }
 0x4c1   : > { %v3989_v22 = vpop.f32.mrf.mxu3 }
 0x4c2   : > { %v4085_v30 = vadd.f32 %v3989_v22, %v3933_v11  ;;  %v14981_v22 = vld [vmem:[#allocation43_spill] sm:$0xff] }
 0x4c3   : > { %v3685_v3 = vpop.f32.mrf.mxu1  ;;  %7949 = vmatmul.msk.f32.gmra.mxu2 %vm2585_vm5, %v11614_v8  ;;  %8011 = vmatmul.msk.f32.gmra.mxu0 %vm2585_vm5, %v14977_v61 }
 0x4c4   : > { %v3779_v27 = vadd.f32 %v3685_v3, %v3623_v28  ;;  %v12067_v7 = vadd.f32 %v4145_v44, %v4085_v30  ;;  %v14980_v3 = vld [vmem:[#allocation39_spill] sm:$0xff] }
 0x4c6   : > { %7916 = vmatmul.msk.f32.gmra.mxu1 %vm2585_vm5, %v14972_v32  ;;  %v3843_v52 = vpop.f32.mrf.mxu2  ;;  %7980 = vmatmul.msk.f32.gmra.mxu3 %vm2585_vm5, %v14978_v43  ;;  %v3934_v54 = vadd.f32 %v3840_v53, %v3779_v27  ;;  %v14982_v43 = vld [vmem:[#allocation37_spill] sm:$0xff] }
 0x4c8   : > { %v4148_v1 = vpop.f32.mrf.mxu0 }
 0x4c9   : > { %v3992_v60 = vpop.f32.mrf.mxu3 }
 0x4ca   : > { %v4086_v9 = vadd.f32 %v3992_v60, %v3934_v54 }
 0x4cb   : > { %v3688_v10 = vpop.f32.mrf.mxu1  ;;  %7950 = vmatmul.msk.f32.gmra.mxu2 %vm2585_vm5, %v11639_v38  ;;  %8012 = vmatmul.msk.f32.gmra.mxu0 %vm2585_vm5, %v14979_v19 }
 0x4cc   : > { %v3780_v44 = vadd.f32 %v3688_v10, %v14980_v3  ;;  %v12078_v11 = vadd.f32 %v4148_v1, %v4086_v9 }
 0x4ce   : > { %7917 = vmatmul.msk.f32.gmra.mxu1 %vm2585_vm5, %v14977_v61  ;;  %v3846_v32 = vpop.f32.mrf.mxu2  ;;  %7981 = vmatmul.msk.f32.gmra.mxu3 %vm2585_vm5, %v14981_v22  ;;  %v3935_v53 = vadd.f32 %v3843_v52, %v3780_v44  ;;  %v14983_v61 = vld [vmem:[#allocation46_spill] sm:$0xff]  ;;  %v14984_v22 = vld [vmem:[#allocation51_spill] sm:$0xff] }
 0x4d0   : > { %v4151_v46 = vpop.f32.mrf.mxu0 }
 0x4d1   : > { %v3995_v28 = vpop.f32.mrf.mxu3 }
 0x4d2   : > { %v4087_v30 = vadd.f32 %v3995_v28, %v3935_v53  ;;  %v14985_v53 = vld [vmem:[#allocation50_spill] sm:$0xff] }
 0x4d3   : > { %v3691_v27 = vpop.f32.mrf.mxu1  ;;  %7951 = vmatmul.msk.f32.gmra.mxu2 %vm2585_vm5, %v11662_v57  ;;  %8013 = vmatmul.msk.f32.gmra.mxu0 %vm2585_vm5, %v11659_v37 }
 0x4d4   : > { %v3781_v1 = vadd.f32 %v3691_v27, %v14982_v43  ;;  %v12089_v54 = vadd.f32 %v4151_v46, %v4087_v30  ;;  %v14986_v46 = vld [vmem:[#allocation36_spill] sm:$0xff] }
 0x4d6   : > { %7918 = vmatmul.msk.f32.gmra.mxu1 %vm2585_vm5, %v14979_v19  ;;  %7982 = vmatmul.msk.f32.gmra.mxu3 %vm2585_vm5, %v14983_v61  ;;  %v3936_v52 = vadd.f32 %v3846_v32, %v3781_v1  ;;  %v3849_v60 = vpop.f32.mrf.mxu2  ;;  %v14987_v19 = vld [vmem:[#allocation41_spill] sm:$0xff] }
 0x4d8   : > { %v4154_v9 = vpop.f32.mrf.mxu0 }
 0x4d9   : > { %v3998_v10 = vpop.f32.mrf.mxu3 }
 0x4da   : > { %v4088_v3 = vadd.f32 %v3998_v10, %v3936_v52  ;;  %v14988_v10 = vld [vmem:[#allocation48_spill] sm:$0xff] }
 0x4db   : > { %v3694_v44 = vpop.f32.mrf.mxu1  ;;  %7952 = vmatmul.msk.f32.gmra.mxu2 %vm2585_vm5, %v14984_v22  ;;  %8014 = vmatmul.msk.f32.gmra.mxu0 %vm2585_vm5, %v14985_v53 }
 0x4dc   : > { %v3782_v28 = vadd.f32 %v3694_v44, %v14986_v46  ;;  %v12100_v30 = vadd.f32 %v4154_v9, %v4088_v3  ;;  %v14989_v9 = vld [vmem:[#allocation47_spill] sm:$0xff] }
 0x4de   : > { %7919 = vmatmul.msk.f32.gmra.mxu1 %vm2585_vm5, %v11659_v37  ;;  %7983 = vmatmul.msk.f32.gmra.mxu3 %vm2585_vm5, %v14987_v19  ;;  %v3937_v32 = vadd.f32 %v3849_v60, %v3782_v28  ;;  %v3852_v43 = vpop.f32.mrf.mxu2  ;;  %v14990_v37 = vld [vmem:[#allocation44_spill] sm:$0xff] }
 0x4e0   : > { %v4157_v27 = vpop.f32.mrf.mxu0 }
 0x4e1   : > { %v4001_v1 = vpop.f32.mrf.mxu3 }
 0x4e2   : > { %v4089_v61 = vadd.f32 %v4001_v1, %v3937_v32 }
 0x4e3   : > { %v3697_v52 = vpop.f32.mrf.mxu1  ;;  %7953 = vmatmul.msk.f32.gmra.mxu2 %vm2585_vm5, %v11712_v59  ;;  %8015 = vmatmul.msk.f32.gmra.mxu0 %vm2585_vm5, %v14988_v10 }
 0x4e4   : > { %v3783_v3 = vadd.f32 %v3697_v52, %v14989_v9  ;;  %v12111_v44 = vadd.f32 %v4157_v27, %v4089_v61  ;;  %v14992_v27 = vld [vmem:[#allocation45_spill] sm:$0xff] }
 0x4e6   : > { %7920 = vmatmul.msk.f32.gmra.mxu1 %vm2585_vm5, %v14985_v53  ;;  %7984 = vmatmul.msk.f32.gmra.mxu3 %vm2585_vm5, %v14990_v37  ;;  %v3938_v60 = vadd.f32 %v3852_v43, %v3783_v3  ;;  %v3855_v32 = vpop.f32.mrf.mxu2  ;;  %v14993_v53 = vld [vmem:[#allocation55_spill] sm:$0xff] }
 0x4e8   : > { %v4160_v46 = vpop.f32.mrf.mxu0 }
 0x4e9   : > { %v4004_v28 = vpop.f32.mrf.mxu3 }
 0x4ea   : > { %v4090_v19 = vadd.f32 %v4004_v28, %v3938_v60  ;;  %v14994_v28 = vld [vmem:[#allocation63_spill] sm:$0xff] }
 0x4eb   : > { %v3700_v1 = vpop.f32.mrf.mxu1  ;;  %7954 = vmatmul.msk.f32.gmra.mxu2 %vm2585_vm5, %v11738_v4  ;;  %8016 = vmatmul.msk.f32.gmra.mxu0 %vm2585_vm5, %v14991_v34 }
 0x4ec   : > { %v3784_v61 = vadd.f32 %v3700_v1, %v14992_v27  ;;  %v12122_v52 = vadd.f32 %v4160_v46, %v4090_v19  ;;  %v14996_v1 = vld [vmem:[#allocation54_spill] sm:$0xff] }
 0x4ee   : > { %7921 = vmatmul.msk.f32.gmra.mxu1 %vm2585_vm5, %v14988_v10  ;;  %7985 = vmatmul.msk.f32.gmra.mxu3 %vm2585_vm5, %v14993_v53  ;;  %v3939_v43 = vadd.f32 %v3855_v32, %v3784_v61  ;;  %v3858_v27 = vpop.f32.mrf.mxu2  ;;  %v14997_v10 = vld [vmem:[#allocation59_spill] sm:$0xff] }
 0x4f0   : > { %v4163_v9 = vpop.f32.mrf.mxu0 }
 0x4f1   : > { %v4007_v3 = vpop.f32.mrf.mxu3 }
 0x4f2   : > { %v4091_v37 = vadd.f32 %v4007_v3, %v3939_v43 }
 0x4f3   : > { %v3703_v60 = vpop.f32.mrf.mxu1  ;;  %7955 = vmatmul.msk.f32.gmra.mxu2 %vm2585_vm5, %v14994_v28  ;;  %8017 = vmatmul.msk.f32.gmra.mxu0 %vm2585_vm5, %v14995_v17 }
 0x4f4   : > { %v3785_v46 = vadd.f32 %v3703_v60, %v14996_v1  ;;  %v12133_v19 = vadd.f32 %v4163_v9, %v4091_v37  ;;  %v4278_v9 = vld [vmem:[%s14519_s3 + $0x40] sm:$0xff]  ;;  %v14998_v60 = vld [vmem:[#allocation64_spill] sm:$0xff]  ;;  %v14999_v1 = vld [vmem:[#allocation66_spill] sm:$0xff] }
 0x4f5   : > { %4298 = vmatpush.msra.mxu1 %v4278_v9 }
 0x4f6   : > { %7922 = vmatmul.msk.f32.gmra.mxu1 %vm2585_vm5, %v14991_v34  ;;  %7986 = vmatmul.msk.f32.gmra.mxu3 %vm2585_vm5, %v14997_v10  ;;  %v3940_v32 = vadd.f32 %v3858_v27, %v3785_v46  ;;  %v3655_v10 = vrot.slane %v11880_v12, 1 }
 0x4f8   : > { %v4166_v43 = vpop.f32.mrf.mxu0 }
 0x4f9   : > { %v4010_v61 = vpop.f32.mrf.mxu3 }
 0x4fa   : > { %v4092_v53 = vadd.f32 %v4010_v61, %v3940_v32  ;;  %v3810_v32 = vrot.slane %v11880_v12, 2  ;;  %v3656_v61 = vrot.slane %v11898_v0, 1 }
 0x4fb   : > { %v12139_v3 = vpop.f32.mrf.mxu1  ;;  %7956 = vmatmul.msk.f32.gmra.mxu2 %vm2585_vm5, %v11795_v51  ;;  %8018 = vmatmul.msk.f32.gmra.mxu0 %vm2585_vm5, %v11792_v18 }
 0x4fc   : > { %v12148_v34 = vadd.f32 %v4166_v43, %v4092_v53  ;;  %v3811_v53 = vrot.slane %v11898_v0, 2  ;;  %v3657_v43 = vsel %vm572_vm2, %v3655_v10, %v3656_v61  ;;  %v9307_v10 = vld [vmem:[%s14520_s4 + $0x1] ss:$0 sm:$0xff] }
 0x4fd   : > { %4499 = vrot.lane.b32.xlu0 %v9307_v10, %s9380_s20 }
 0x4fe   : > { %7923 = vmatmul.msk.f32.gmra.mxu1 %vm2585_vm5, %v14995_v17  ;;  %7987 = vmatmul.msk.f32.gmra.mxu3 %vm2585_vm5, %v11777_v29  ;;  %v15000_v29 = vld [vmem:[#allocation52_spill] sm:$0xff] }
 0x503   : > { %v12154_v37 = vpop.f32.mrf.mxu1  ;;  %7957 = vmatmul.msk.f32.gmra.mxu2 %vm2585_vm5, %v11818_v21  ;;  %8019 = vmatmul.msk.f32.gmra.mxu0 %vm2585_vm5, %v14998_v60 }
 0x506   : > { %7924 = vmatmul.msk.f32.gmra.mxu1 %vm2585_vm5, %v11792_v18  ;;  %7988 = vmatmul.msk.f32.gmra.mxu3 %vm2585_vm5, %v14999_v1  ;;  %v15001_v18 = vld [vmem:[#allocation60_spill] sm:$0xff]  ;;  %v12211_v1 = vld [vmem:[#allocation3 + $0x1a0] sm:$0xff] }
 0x50b   : > { %v12164_v46 = vpop.f32.mrf.mxu1  ;;  %7958 = vmatmul.msk.f32.gmra.mxu2 %vm2585_vm5, %v11849_v40  ;;  %8020 = vmatmul.msk.f32.gmra.mxu0 %vm2585_vm5, %v11846_v24 }
 0x50e   : > { %7925 = vmatmul.msk.f32.gmra.mxu1 %vm2585_vm5, %v14998_v60  ;;  %7989 = vmatmul.msk.f32.gmra.mxu3 %vm2585_vm5, %v15000_v29  ;;  %v2724_v60 = vld [vmem:[#allocation3 + $0x190] sm:$0x3] }
 0x513   : > { %v12174_v17 = vpop.f32.mrf.mxu1  ;;  %7959 = vmatmul.msk.f32.gmra.mxu2 %vm2585_vm5, %v11872_v56  ;;  %8021 = vmatmul.msk.f32.gmra.mxu0 %vm2585_vm5, %v11869_v58 }
 0x516   : > { %7926 = vmatmul.msk.f32.gmra.mxu1 %vm2585_vm5, %v11846_v24  ;;  %7990 = vmatmul.msk.f32.gmra.mxu3 %vm2585_vm5, %v15001_v18  ;;  %v12199_v24 = vsel %vm1015_vm3, %v3810_v32, %v3811_v53 }
 0x51b   : > { %v12184_v27 = vpop.f32.mrf.mxu1  ;;  %7960 = vmatmul.msk.f32.gmra.mxu2 %vm2585_vm5, %v11892_v2  ;;  %8022 = vmatmul.msk.f32.gmra.mxu0 %vm2585_vm5, %v11889_v16 }
 0x51e   : > { %7927 = vmatmul.msk.f32.gmra.mxu1 %vm2585_vm5, %v11869_v58  ;;  %7991 = vmatmul.msk.f32.gmra.mxu3 %vm2585_vm5, %v11880_v12  ;;  %v3813_v12 = vrot.slane %v2724_v60, 2  ;;  %v3658_v58 = vrot.slane %v2724_v60, 1  ;;  %v12233_v60 = vld [vmem:[#allocation3 + $0x1a8] sm:$0x3] }
 0x520   : > { %v12214_v29 = vsel %vm1015_vm3, %v3811_v53, %v3813_v12  ;;  %v3659_v18 = vsel %vm572_vm2, %v3656_v61, %v3658_v58  ;;  %v4119_v53 = vrot.slane %v12211_v1, 1  ;;  %v4121_v58 = vrot.slane %v12233_v60, 1 }
 0x523   : > { %v12202_v9 = vpop.f32.mrf.mxu1  ;;  %7961 = vmatmul.msk.f32.gmra.mxu2 %vm2585_vm5, %v12199_v24  ;;  %8023 = vmatmul.msk.f32.gmra.mxu0 %vm2585_vm5, %v3657_v43 }
 0x526   : > { %7928 = vmatmul.msk.f32.gmra.mxu1 %vm2585_vm5, %v11889_v16  ;;  %7992 = vmatmul.msk.f32.gmra.mxu3 %vm2585_vm5, %v11898_v0  ;;  %v12225_v16 = vld [vmem:[#allocation3 + $0x198] sm:$0xff] }
 0x527   : > { %v4118_v0 = vrot.slane %v12225_v16, 1 }
 0x529   : > { %v4120_v61 = vsel %vm572_vm2, %v4118_v0, %v4119_v53 }
 0x52b   : > { %v12220_v32 = vpop.f32.mrf.mxu1  ;;  %7962 = vmatmul.msk.f32.gmra.mxu2 %vm2585_vm5, %v12214_v29  ;;  %8024 = vmatmul.msk.f32.gmra.mxu0 %vm2585_vm5, %v3659_v18 }
 0x52e   : > { %7929 = vmatmul.msk.f32.gmra.mxu1 %vm2585_vm5, %v3657_v43  ;;  %7993 = vmatmul.msk.f32.gmra.mxu3 %vm2585_vm5, %v12225_v16  ;;  %v4122_v43 = vsel %vm572_vm2, %v4119_v53, %v4121_v58 }
 0x533   : > { %v12235_v12 = vpop.f32.mrf.mxu1  ;;  %8025 = vmatmul.msk.f32.gmra.mxu0 %vm2585_vm5, %v4120_v61 }
 0x536   : > { %7930 = vmatmul.msk.f32.gmra.mxu1 %vm2585_vm5, %v3659_v18  ;;  %7994 = vmatmul.msk.f32.gmra.mxu3 %vm2585_vm5, %v12211_v1 }
 0x53b   : > { %v12243_v10 = vpop.f32.mrf.mxu1  ;;  %8026 = vmatmul.msk.f32.gmra.mxu0 %vm2585_vm5, %v4122_v43 }
 0x53e   : > { %8027 = vmatmul.msk.f32.vlgmr.msra.gmra.mxu1 %vm2585_vm5, %v11191_v23 }
 0x543   : > { %v12248_v0 = vpop.f32.mrf.mxu1 }
 0x546   : > { %8028 = vmatmul.msk.f32.gmra.mxu1 %vm2585_vm5, %v11224_v42 }
 0x54b   : > { %v12252_v61 = vpop.f32.mrf.mxu1 }
 0x54e   : > { %8029 = vmatmul.msk.f32.gmra.mxu1 %vm2585_vm5, %v11249_v14 }
 0x553   : > { %v12256_v18 = vpop.f32.mrf.mxu1 }
 0x556   : > { %8030 = vmatmul.msk.f32.gmra.mxu1 %vm2585_vm5, %v11280_v48 }
 0x55b   : > { %v12260_v53 = vpop.f32.mrf.mxu1 }
 0x55e   : > { %8031 = vmatmul.msk.f32.gmra.mxu1 %vm2585_vm5, %v11306_v6 }
 0x563   : > { %v12264_v23 = vpop.f32.mrf.mxu1 }
 0x566   : > { %8032 = vmatmul.msk.f32.gmra.mxu1 %vm2585_vm5, %v11333_v36 }
 0x56b   : > { %v12268_v42 = vpop.f32.mrf.mxu1 }
 0x56e   : > { %8033 = vmatmul.msk.f32.gmra.mxu1 %vm2585_vm5, %v11353_v50 }
 0x56f   : > { %v12308_v58 = vpop.permute.xlu0 %4499 }
 0x573   : > { %v12272_v14 = vpop.f32.mrf.mxu1 }
 0x576   : > { %8034 = vmatmul.msk.f32.gmra.mxu1 %vm2585_vm5, %v11381_v63 }
 0x57b   : > { %v12276_v48 = vpop.f32.mrf.mxu1 }
 0x57e   : > { %8035 = vmatmul.msk.f32.gmra.mxu1 %vm2585_vm5, %v11401_v62 }
 0x583   : > { %v12280_v6 = vpop.f32.mrf.mxu1 }
 0x584   : > { %15002 = vst [vmem:[#allocation71_spill] sm:$0xff] %v12280_v6 }
 0x586   : > { %8036 = vmatmul.msk.f32.gmra.mxu1 %vm2585_vm5, %v11427_v33 }
 0x58b   : > { %v12284_v36 = vpop.f32.mrf.mxu1 }
 0x58e   : > { %8037 = vmatmul.msk.f32.gmra.mxu1 %vm2585_vm5, %v11451_v55 }
 0x593   : > { %v12288_v50 = vpop.f32.mrf.mxu1 }
 0x594   : > { %15003 = vst [vmem:[#allocation16_spill] sm:$0xff] %v12288_v50 }
 0x596   : > { %8038 = vmatmul.msk.f32.gmra.mxu1 %vm2585_vm5, %v11477_v49 }
 0x59b   : > { %v12292_v63 = vpop.f32.mrf.mxu1 }
 0x59c   : > { %15004 = vst [vmem:[#allocation72_spill] sm:$0xff] %v12292_v63 }
 0x59e   : > { %8039 = vmatmul.msk.f32.gmra.mxu1 %vm2585_vm5, %v11499_v25 }
 0x5a3   : > { %v12296_v62 = vpop.f32.mrf.mxu1 }
 0x5a4   : > { %15005 = vst [vmem:[#allocation10_spill] sm:$0xff] %v12296_v62 }
 0x5a6   : > { %8040 = vmatmul.msk.f32.gmra.mxu1 %vm2585_vm5, %v11529_v13 }
 0x5ab   : > { %v12300_v33 = vpop.f32.mrf.mxu1 }
 0x5ac   : > { %15006 = vst [vmem:[#allocation73_spill] sm:$0xff] %v12300_v33 }
 0x5ae   : > { %8041 = vmatmul.msk.f32.gmra.mxu1 %vm2585_vm5, %v14964_v45 }
 0x5b3   : > { %v12304_v55 = vpop.f32.mrf.mxu1 }
 0x5b4   : > { %15007 = vst [vmem:[#allocation15_spill] sm:$0xff] %v12304_v55 }
 0x5b6   : > { %8042 = vmatmul.msk.f32.gmra.mxu1 %vm2585_vm5, %v11585_v31 }
 0x5bb   : > { %v4300_v49 = vpop.f32.mrf.mxu1 }
 0x5bc   : > { %v12311_v25 = vadd.f32 %v4300_v49, %v12067_v7 }
 0x5be   : > { %8043 = vmatmul.msk.f32.gmra.mxu1 %vm2585_vm5, %v11614_v8  ;;  %v4502_v13 = vadd.f32 %v12308_v58, %v12311_v25 }
 0x5c0   : > { %4566 = vrot.lane.b32.xlu1 %v4502_v13, %s9381_s21 }
 0x5c3   : > { %v4303_v45 = vpop.f32.mrf.mxu1 }
 0x5c4   : > { %v12319_v43 = vadd.f32 %v4303_v45, %v12078_v11 }
 0x5c6   : > { %v4503_v31 = vadd.f32 %v12308_v58, %v12319_v43  ;;  %8044 = vmatmul.msk.f32.gmra.mxu1 %vm2585_vm5, %v11639_v38 }
 0x5c8   : > { %4568 = vrot.lane.b32.xlu2 %v4503_v31, %s9381_s21  ;;  %v3861_v31 = vpop.f32.mrf.mxu2 }
 0x5cb   : > { %v4306_v7 = vpop.f32.mrf.mxu1 }
 0x5cc   : > { %v12327_v8 = vadd.f32 %v4306_v7, %v12089_v54 }
 0x5ce   : > { %v4504_v49 = vadd.f32 %v12308_v58, %v12327_v8  ;;  %8045 = vmatmul.msk.f32.gmra.mxu1 %vm2585_vm5, %v11662_v57 }
 0x5d0   : > { %4570 = vrot.lane.b32.xlu0 %v4504_v49, %s9381_s21 }
 0x5d3   : > { %v4309_v11 = vpop.f32.mrf.mxu1 }
 0x5d4   : > { %v12335_v13 = vadd.f32 %v4309_v11, %v12100_v30  ;;  %v4013_v30 = vpop.f32.mrf.mxu3 }
 0x5d6   : > { %v4505_v38 = vadd.f32 %v12308_v58, %v12335_v13  ;;  %8046 = vmatmul.msk.f32.gmra.mxu1 %vm2585_vm5, %v14984_v22  ;;  %v4169_v22 = vpop.f32.mrf.mxu0 }
 0x5d8   : > { %4572 = vrot.lane.b32.xlu1 %v4505_v38, %s9381_s21 }
 0x5db   : > { %v4312_v54 = vpop.f32.mrf.mxu1 }
 0x5dc   : > { %v12343_v45 = vadd.f32 %v4312_v54, %v12111_v44  ;;  %v3864_v44 = vpop.f32.mrf.mxu2  ;;  %v4016_v38 = vpop.f32.mrf.mxu3 }
 0x5de   : > { %v4506_v57 = vadd.f32 %v12308_v58, %v12343_v45  ;;  %8047 = vmatmul.msk.f32.gmra.mxu1 %vm2585_vm5, %v11712_v59 }
 0x5e0   : > { %4574 = vrot.lane.b32.xlu2 %v4506_v57, %s9381_s21 }
 0x5e3   : > { %v4315_v7 = vpop.f32.mrf.mxu1 }
 0x5e4   : > { %v12351_v49 = vadd.f32 %v4315_v7, %v12122_v52  ;;  %v4172_v52 = vpop.f32.mrf.mxu0  ;;  %v15008_v7 = vld [vmem:[#allocation58_spill] sm:$0xff]  ;;  %v4019_v33 = vpop.f32.mrf.mxu3 }
 0x5e5   : > { %v3786_v55 = vadd.f32 %v12139_v3, %v15008_v7 }
 0x5e6   : > { %v4507_v11 = vadd.f32 %v12308_v58, %v12351_v49  ;;  %8048 = vmatmul.msk.f32.gmra.mxu1 %vm2585_vm5, %v11738_v4  ;;  %v3867_v4 = vpop.f32.mrf.mxu2 }
 0x5e7   : > { %v3941_v62 = vadd.f32 %v3861_v31, %v3786_v55 }
 0x5e8   : > { %4576 = vrot.lane.b32.xlu0 %v4507_v11, %s9381_s21 }
 0x5eb   : > { %v4318_v54 = vpop.f32.mrf.mxu1 }
 0x5ec   : > { %v12359_v59 = vadd.f32 %v4318_v54, %v12133_v19  ;;  %v4093_v19 = vadd.f32 %v4013_v30, %v3941_v62  ;;  %v4175_v3 = vpop.f32.mrf.mxu0 }
 0x5ee   : > { %v4508_v57 = vadd.f32 %v12308_v58, %v12359_v59  ;;  %8049 = vmatmul.msk.f32.gmra.mxu1 %vm2585_vm5, %v14994_v28  ;;  %v15009_v28 = vld [vmem:[#allocation56_spill] sm:$0xff]  ;;  %v3870_v55 = vpop.f32.mrf.mxu2 }
 0x5ef   : > { %v3787_v50 = vadd.f32 %v12154_v37, %v15009_v28 }
 0x5f0   : > { %4578 = vrot.lane.b32.xlu1 %v4508_v57, %s9381_s21  ;;  %v4249_v57 = vadd.f32 %v4169_v22, %v4093_v19 }
 0x5f1   : > { %v3942_v6 = vadd.f32 %v3864_v44, %v3787_v50 }
 0x5f3   : > { %v4321_v11 = vpop.f32.mrf.mxu1  ;;  %v4094_v62 = vadd.f32 %v4016_v38, %v3942_v6  ;;  %v15011_v38 = vld [vmem:[#allocation49_spill] sm:$0xff] }
 0x5f4   : > { %v12369_v63 = vadd.f32 %v4321_v11, %v12148_v34  ;;  %v4022_v34 = vpop.f32.mrf.mxu3  ;;  %v4178_v22 = vpop.f32.mrf.mxu0 }
 0x5f5   : > { %v4250_v11 = vadd.f32 %v4172_v52, %v4094_v62  ;;  %v4273_v52 = vrot.slane %v12225_v16, 2  ;;  %v15012_v16 = vld [vmem:[#allocation57_spill] sm:$0xff] }
 0x5f6   : > { %v4509_v54 = vadd.f32 %v12308_v58, %v12369_v63  ;;  %8050 = vmatmul.msk.f32.gmra.mxu1 %vm2585_vm5, %v11795_v51  ;;  %v15010_v51 = vld [vmem:[#allocation61_spill] sm:$0xff]  ;;  %v3873_v28 = vpop.f32.mrf.mxu2 }
 0x5f7   : > { %v3788_v37 = vadd.f32 %v12164_v46, %v15010_v51  ;;  %v3789_v46 = vadd.f32 %v12174_v17, %v15011_v38  ;;  %v15013_v38 = vld [vmem:[#allocation65_spill] sm:$0xff] }
 0x5f8   : > { %4580 = vrot.lane.b32.xlu2 %v4509_v54, %s9381_s21 }
 0x5f9   : > { %v3943_v50 = vadd.f32 %v3867_v4, %v3788_v37  ;;  %v4274_v4 = vrot.slane %v12211_v1, 2  ;;  %v3790_v37 = vadd.f32 %v12184_v27, %v15012_v16  ;;  %v3791_v27 = vadd.f32 %v12202_v9, %v15013_v38 }
 0x5fb   : > { %v4324_v7 = vpop.f32.mrf.mxu1  ;;  %v4095_v54 = vadd.f32 %v4019_v33, %v3943_v50  ;;  %v3944_v33 = vadd.f32 %v3870_v55, %v3789_v46  ;;  %v4275_v17 = vsel %vm1015_vm3, %v4273_v52, %v4274_v4 }
 0x5fc   : > { %v12378_v31 = vadd.f32 %v4324_v7, %v4249_v57 }
 0x5fd   : > { %v4251_v57 = vadd.f32 %v4175_v3, %v4095_v54  ;;  %v4096_v51 = vadd.f32 %v4022_v34, %v3944_v33  ;;  %v3945_v34 = vadd.f32 %v3873_v28, %v3790_v37 }
 0x5fe   : > { %v4510_v30 = vadd.f32 %v12308_v58, %v12378_v31  ;;  %8051 = vmatmul.msk.f32.gmra.mxu1 %vm2585_vm5, %v11818_v21  ;;  %v4025_v21 = vpop.f32.mrf.mxu3  ;;  %v3876_v3 = vpop.f32.mrf.mxu2 }
 0x5ff   : > { %v4097_v54 = vadd.f32 %v4025_v21, %v3945_v34  ;;  %v3946_v28 = vadd.f32 %v3876_v3, %v3791_v27 }
 0x600   : > { %4582 = vrot.lane.b32.xlu0 %v4510_v30, %s9381_s21  ;;  %v4181_v30 = vpop.f32.mrf.mxu0 }
 0x601   : > { %v4253_v52 = vadd.f32 %v4181_v30, %v4097_v54 }
 0x603   : > { %v4327_v19 = vpop.f32.mrf.mxu1 }
 0x604   : > { %v12387_v44 = vadd.f32 %v4327_v19, %v4250_v11  ;;  %v4252_v11 = vadd.f32 %v4178_v22, %v4096_v51 }
 0x606   : > { %v4511_v6 = vadd.f32 %v12308_v58, %v12387_v44  ;;  %8052 = vmatmul.msk.f32.gmra.mxu1 %vm2585_vm5, %v11849_v40  ;;  %v4028_v55 = vpop.f32.mrf.mxu3  ;;  %v3879_v46 = vpop.f32.mrf.mxu2 }
 0x607   : > { %v4098_v21 = vadd.f32 %v4028_v55, %v3946_v28 }
 0x608   : > { %4584 = vrot.lane.b32.xlu1 %v4511_v6, %s9381_s21  ;;  %v4184_v6 = vpop.f32.mrf.mxu0 }
 0x609   : > { %v4254_v51 = vadd.f32 %v4184_v6, %v4098_v21 }
 0x60b   : > { %v4330_v7 = vpop.f32.mrf.mxu1 }
 0x60c   : > { %v12398_v62 = vadd.f32 %v4330_v7, %v4251_v57 }
 0x60e   : > { %v4512_v40 = vadd.f32 %v12308_v58, %v12398_v62  ;;  %8053 = vmatmul.msk.f32.gmra.mxu1 %vm2585_vm5, %v11872_v56  ;;  %v4031_v22 = vpop.f32.mrf.mxu3 }
 0x610   : > { %4586 = vrot.lane.b32.xlu2 %v4512_v40, %s9381_s21  ;;  %v4187_v9 = vpop.f32.mrf.mxu0  ;;  %v3882_v40 = vpop.f32.mrf.mxu2 }
 0x613   : > { %v4333_v19 = vpop.f32.mrf.mxu1 }
 0x614   : > { %v12410_v50 = vadd.f32 %v4333_v19, %v4252_v11 }
 0x616   : > { %v4513_v56 = vadd.f32 %v12308_v58, %v12410_v50  ;;  %8054 = vmatmul.msk.f32.gmra.mxu1 %vm2585_vm5, %v11892_v2  ;;  %v3792_v2 = vadd.f32 %v12220_v32, %v11886_v15  ;;  %v4034_v3 = vpop.f32.mrf.mxu3  ;;  %v12437_v15 = vld [vmem:[%s14520_s4] ss:$0 sm:$0xff] }
 0x617   : > { %v4434_v32 = vadd.f32 %v12437_v15, %v12319_v43  ;;  %v12454_v43 = vld [vmem:[%s14520_s4 + $0x2] ss:$0 sm:$0xff] }
 0x618   : > { %4588 = vrot.lane.b32.xlu0 %v4513_v56, %s9381_s21  ;;  %v3947_v16 = vadd.f32 %v3879_v46, %v3792_v2  ;;  %v4190_v34 = vpop.f32.mrf.mxu0  ;;  %v3885_v46 = vpop.f32.mrf.mxu2 }
 0x619   : > { %v4466_v27 = vmax.f32 %v4434_v32, 0.0 }
 0x61a   : > { %v4099_v55 = vadd.f32 %v4031_v22, %v3947_v16 }
 0x61b   : > { %v4336_v57 = vpop.f32.mrf.mxu1 }
 0x61c   : > { %v12419_v7 = vadd.f32 %v4336_v57, %v4253_v52  ;;  %v4255_v19 = vadd.f32 %v4187_v9, %v4099_v55  ;;  %v4276_v57 = vrot.slane %v12233_v60, 2 }
 0x61e   : > { %v4514_v33 = vadd.f32 %v12308_v58, %v12419_v7  ;;  %8055 = vmatmul.msk.f32.gmra.mxu1 %vm2585_vm5, %v12199_v24  ;;  %v3793_v24 = vadd.f32 %v12235_v12, %v11904_v47  ;;  %v4037_v12 = vpop.f32.mrf.mxu3  ;;  %v4277_v60 = vsel %vm1015_vm3, %v4274_v4, %v4276_v57 }
 0x620   : > { %4590 = vrot.lane.b32.xlu1 %v4514_v33, %s9381_s21  ;;  %v3948_v56 = vadd.f32 %v3882_v40, %v3793_v24  ;;  %v3888_v1 = vpop.f32.mrf.mxu2 }
 0x622   : > { %v4569_v6 = vpop.permute.xlu2 %4568  ;;  %v4100_v52 = vadd.f32 %v4034_v3, %v3948_v56 }
 0x623   : > { %v4339_v30 = vpop.f32.mrf.mxu1  ;;  %v4663_v22 = vadd.f32 %v4569_v6, %v4466_v27  ;;  %v3796_v6 = vadd.f32 %v12252_v61, %v11931_v41  ;;  %v4436_v41 = vadd.f32 %v12437_v15, %v12335_v13 }
 0x624   : > { %v12428_v37 = vadd.f32 %v4339_v30, %v4254_v51  ;;  %v4256_v33 = vadd.f32 %v4190_v34, %v4100_v52 }
 0x625   : > { %v4696_v2 = vmul.f32 %v12454_v43, %v4663_v22  ;;  %v4435_v22 = vadd.f32 %v12437_v15, %v12327_v8 }
 0x626   : > { %v4515_v11 = vadd.f32 %v12308_v58, %v12428_v37  ;;  %8056 = vmatmul.msk.f32.gmra.mxu1 %vm2585_vm5, %v12214_v29  ;;  %v4433_v29 = vadd.f32 %v12437_v15, %v12311_v25  ;;  %v3794_v25 = vadd.f32 %v12243_v10, %v11913_v39  ;;  %v4193_v10 = vpop.f32.mrf.mxu0  ;;  %v4040_v4 = vpop.f32.mrf.mxu3 }
 0x628   : > { %4592 = vrot.lane.b32.xlu2 %v4515_v11, %s9381_s21  ;;  %v4465_v28 = vmax.f32 %v4433_v29, 0.0  ;;  %v3949_v30 = vadd.f32 %v3885_v46, %v3794_v25  ;;  %v3795_v29 = vadd.f32 %v12248_v0, %v11922_v20  ;;  %v3891_v27 = vpop.f32.mrf.mxu2  ;;  %v4468_v25 = vmax.f32 %v4436_v41, 0.0 }
 0x62a   : > { %v4101_v16 = vadd.f32 %v4037_v12, %v3949_v30  ;;  %v3950_v12 = vadd.f32 %v3888_v1, %v3795_v29  ;;  %v3798_v29 = vadd.f32 %v12260_v53, %v11949_v26 }
 0x62b   : > { %v4342_v54 = vpop.f32.mrf.mxu1 }
 0x62c   : > { %v12444_v38 = vadd.f32 %v4342_v54, %v4255_v19  ;;  %v4257_v32 = vadd.f32 %v4193_v10, %v4101_v16  ;;  %v4102_v57 = vadd.f32 %v4040_v4, %v3950_v12  ;;  %v4437_v12 = vadd.f32 %v12437_v15, %v12343_v45 }
 0x62e   : > { %v4516_v47 = vadd.f32 %v12308_v58, %v12444_v38  ;;  %8057 = vmatmul.msk.f32.gmra.mxu1 %vm2585_vm5, %v4275_v17  ;;  %v12463_v17 = vld [vmem:[%s14520_s4 + $0x3] ss:$0 sm:$0xff]  ;;  %v4196_v56 = vpop.f32.mrf.mxu0  ;;  %v4043_v46 = vpop.f32.mrf.mxu3 }
 0x62f   : > { %v12476_v55 = vadd.f32 %v12463_v17, %v4696_v2  ;;  %v4258_v13 = vadd.f32 %v4196_v56, %v4102_v57 }
 0x630   : > { %4594 = vrot.lane.b32.xlu0 %v4516_v47, %s9381_s21  ;;  %v3951_v47 = vadd.f32 %v3891_v27, %v3796_v6 }
 0x631   : > { %15014 = vst [vmem:[#allocation74_spill] sm:$0xff] %v12476_v55 }
 0x632   : > { %v4567_v21 = vpop.permute.xlu1 %4566  ;;  %v4103_v61 = vadd.f32 %v4043_v46, %v3951_v47 }
 0x633   : > { %v4662_v9 = vadd.f32 %v4567_v21, %v4465_v28  ;;  %v4345_v51 = vpop.f32.mrf.mxu1  ;;  %v4467_v28 = vmax.f32 %v4435_v22, 0.0 }
 0x634   : > { %v12469_v39 = vadd.f32 %v4345_v51, %v4256_v33 }
 0x635   : > { %v4695_v40 = vmul.f32 %v12454_v43, %v4662_v9 }
 0x636   : > { %v4517_v3 = vadd.f32 %v12308_v58, %v12469_v39  ;;  %8058 = vmatmul.msk.f32.gmra.mxu1 %vm2585_vm5, %v4277_v60  ;;  %v4199_v20 = vpop.f32.mrf.mxu0  ;;  %v4046_v1 = vpop.f32.mrf.mxu3 }
 0x637   : > { %v12479_v11 = vadd.f32 %v12463_v17, %v4695_v40  ;;  %v4259_v33 = vadd.f32 %v4199_v20, %v4103_v61  ;;  %v4469_v20 = vmax.f32 %v4437_v12, 0.0 }
 0x638   : > { %4596 = vrot.lane.b32.xlu1 %v4517_v3, %s9381_s21  ;;  %v3894_v3 = vpop.f32.mrf.mxu2 }
 0x639   : > { %15015 = vst [vmem:[#allocation22_spill] sm:$0xff] %v12479_v11  ;;  %v12484_v24 = vpack.i.bf16 %v12476_v55, %v12479_v11 }
 0x63a   : > { %v4575_v26 = vpop.permute.xlu2 %4574 }
 0x63b   : > { %v4348_v19 = vpop.f32.mrf.mxu1  ;;  %8104 = vrot.lane.b32.xlu0 %v12484_v24, %s9382_s29  ;;  %v4666_v45 = vadd.f32 %v4575_v26, %v4469_v20 }
 0x63c   : > { %v12488_v34 = vadd.f32 %v4348_v19, %v4257_v32  ;;  %v3797_v19 = vadd.f32 %v12256_v18, %v11940_v5 }
 0x63e   : > { %v4518_v54 = vadd.f32 %v12308_v58, %v12488_v34  ;;  %v4202_v56 = vpop.f32.mrf.mxu0  ;;  %v3952_v27 = vadd.f32 %v3894_v3, %v3797_v19  ;;  %v4049_v46 = vpop.f32.mrf.mxu3  ;;  %v4439_v19 = vadd.f32 %v12437_v15, %v12359_v59 }
 0x640   : > { %8109 = vrot.lane.b32.xlu1 %v12484_v24, %s9383_s10  ;;  %4598 = vrot.lane.b32.xlu2 %v4518_v54, %s9381_s21  ;;  %v3897_v5 = vpop.f32.mrf.mxu2  ;;  %v4104_v18 = vadd.f32 %v4046_v1, %v3952_v27  ;;  %v4471_v27 = vmax.f32 %v4439_v19, 0.0 }
 0x641   : > { %v3953_v47 = vadd.f32 %v3897_v5, %v3798_v29 }
 0x642   : > { %v4571_v0 = vpop.permute.xlu0 %4570  ;;  %v4260_v22 = vadd.f32 %v4202_v56, %v4104_v18 }
 0x643   : > { %v4351_v52 = vpop.f32.mrf.mxu1  ;;  %8119 = vrot.lane.b32.xlu0 %v12484_v24, %s9384_s11  ;;  %v4664_v8 = vadd.f32 %v4571_v0, %v4467_v28  ;;  %v4105_v41 = vadd.f32 %v4049_v46, %v3953_v47  ;;  %v15020_v47 = vld [vmem:[#allocation21_spill] sm:$0xff] }
 0x644   : > { %v12513_v60 = vadd.f32 %v4351_v52, %v4258_v13  ;;  %v4438_v52 = vadd.f32 %v12437_v15, %v12351_v49  ;;  %v3800_v12 = vadd.f32 %v12268_v42, %v15020_v47 }
 0x645   : > { %v4697_v40 = vmul.f32 %v12454_v43, %v4664_v8 }
 0x646   : > { %v4519_v16 = vadd.f32 %v12308_v58, %v12513_v60  ;;  %v4470_v57 = vmax.f32 %v4438_v52, 0.0  ;;  %v4205_v53 = vpop.f32.mrf.mxu0 }
 0x647   : > { %v12529_v32 = vadd.f32 %v12463_v17, %v4697_v40  ;;  %v4261_v28 = vadd.f32 %v4205_v53, %v4105_v41 }
 0x648   : > { %8124 = vrot.lane.b32.xlu1 %v12484_v24, %s9385_s12  ;;  %8114 = vrot.lane.b32.xlu2 %v12484_v24, %s9386_s14 }
 0x649   : > { %15017 = vst [vmem:[#allocation23_spill] sm:$0xff] %v12529_v32 }
 0x64a   : > { %v4573_v21 = vpop.permute.xlu1 %4572 }
 0x64b   : > { %v4665_v2 = vadd.f32 %v4573_v21, %v4468_v25  ;;  %v4354_v9 = vpop.f32.mrf.mxu1  ;;  %8134 = vrot.lane.b32.xlu0 %v12484_v24, %s9387_s15 }
 0x64c   : > { %v12511_v51 = vadd.f32 %v4354_v9, %v4259_v33  ;;  %v3900_v9 = vpop.f32.mrf.mxu2 }
 0x64d   : > { %v4698_v30 = vmul.f32 %v12454_v43, %v4665_v2  ;;  %v4699_v2 = vmul.f32 %v12454_v43, %v4666_v45 }
 0x64e   : > { %v4520_v10 = vadd.f32 %v12308_v58, %v12511_v51  ;;  %v4208_v1 = vpop.f32.mrf.mxu0 }
 0x64f   : > { %v12525_v4 = vadd.f32 %v12463_v17, %v4698_v30  ;;  %v4052_v30 = vpop.f32.mrf.mxu3  ;;  %v12573_v40 = vadd.f32 %v12463_v17, %v4699_v2  ;;  %v15023_v2 = vld [vmem:[#allocation67_spill] sm:$0xff] }
 0x650   : > { %8129 = vrot.lane.b32.xlu2 %v12484_v24, %s9388_s16  ;;  %4602 = vrot.lane.b32.xlu1 %v4520_v10, %s9381_s21 }
 0x651   : > { %15016 = vst [vmem:[#allocation13_spill] sm:$0xff] %v12525_v4  ;;  %v12535_v54 = vpack.i.bf16 %v12525_v4, %v12529_v32 }
 0x652   : > { %15019 = vst [vmem:[#allocation12_spill] sm:$0xff] %v12573_v40  ;;  %v4581_v59 = vpop.permute.xlu2 %4580 }
 0x653   : > { %4600 = vrot.lane.b32.xlu0 %v4519_v16, %s9381_s21  ;;  %v4357_v6 = vpop.f32.mrf.mxu1  ;;  %v3799_v16 = vadd.f32 %v12264_v23, %v11958_v35 }
 0x654   : > { %v12553_v0 = vadd.f32 %v4357_v6, %v4260_v22  ;;  %v4440_v6 = vadd.f32 %v12437_v15, %v12369_v63  ;;  %v3903_v23 = vpop.f32.mrf.mxu2 }
 0x655   : > { %v3954_v29 = vadd.f32 %v3900_v9, %v3799_v16  ;;  %v3955_v26 = vadd.f32 %v3903_v23, %v3800_v12  ;;  %v3801_v9 = vadd.f32 %v12272_v14, %v15023_v2  ;;  %v4442_v23 = vadd.f32 %v12437_v15, %v12387_v44 }
 0x656   : > { %v4521_v33 = vadd.f32 %v12308_v58, %v12553_v0  ;;  %v4472_v46 = vmax.f32 %v4440_v6, 0.0  ;;  %v4211_v63 = vpop.f32.mrf.mxu0 }
 0x657   : > { %v4106_v5 = vadd.f32 %v4052_v30, %v3954_v29  ;;  %v4055_v18 = vpop.f32.mrf.mxu3 }
 0x658   : > { %8144 = vrot.lane.b32.xlu2 %v12535_v54, %s9383_s10  ;;  %8139 = vrot.lane.b32.xlu1 %v12535_v54, %s9382_s29  ;;  %v4669_v41 = vadd.f32 %v4581_v59, %v4472_v46  ;;  %v4107_v42 = vadd.f32 %v4055_v18, %v3955_v26 }
 0x65a   : > { %v4577_v61 = vpop.permute.xlu0 %4576  ;;  %v4702_v20 = vmul.f32 %v12454_v43, %v4669_v41 }
 0x65b   : > { %8149 = vrot.lane.b32.xlu0 %v12535_v54, %s9386_s14  ;;  %v4667_v49 = vadd.f32 %v4577_v61, %v4470_v57  ;;  %v4360_v25 = vpop.f32.mrf.mxu1  ;;  %v4262_v61 = vadd.f32 %v4208_v1, %v4106_v5  ;;  %v4441_v5 = vadd.f32 %v12437_v15, %v12378_v31 }
 0x65c   : > { %v12557_v21 = vadd.f32 %v4360_v25, %v4261_v28 }
 0x65d   : > { %v4700_v13 = vmul.f32 %v12454_v43, %v4667_v49  ;;  %v3906_v49 = vpop.f32.mrf.mxu2  ;;  %v4473_v41 = vmax.f32 %v4441_v5, 0.0 }
 0x65e   : > { %v4522_v8 = vadd.f32 %v12308_v58, %v12557_v21  ;;  %v4214_v16 = vpop.f32.mrf.mxu0  ;;  %v3956_v19 = vadd.f32 %v3906_v49, %v3801_v9 }
 0x65f   : > { %v12569_v10 = vadd.f32 %v12463_v17, %v4700_v13  ;;  %v4058_v28 = vpop.f32.mrf.mxu3  ;;  %v4263_v13 = vadd.f32 %v4211_v63, %v4107_v42 }
 0x660   : > { %8159 = vrot.lane.b32.xlu2 %v12535_v54, %s9385_s12  ;;  %8154 = vrot.lane.b32.xlu1 %v12535_v54, %s9384_s11  ;;  %v4108_v14 = vadd.f32 %v4058_v28, %v3956_v19 }
 0x661   : > { %15018 = vst [vmem:[#allocation14_spill] sm:$0xff] %v12569_v10  ;;  %v12579_v3 = vpack.i.bf16 %v12569_v10, %v12573_v40 }
 0x662   : > { %v4579_v35 = vpop.permute.xlu1 %4578  ;;  %v4264_v46 = vadd.f32 %v4214_v16, %v4108_v14 }
 0x663   : > { %8164 = vrot.lane.b32.xlu0 %v12535_v54, %s9388_s16  ;;  %v4363_v56 = vpop.f32.mrf.mxu1  ;;  %v4668_v52 = vadd.f32 %v4579_v35, %v4471_v27 }
 0x664   : > { %v12598_v53 = vadd.f32 %v4363_v56, %v4262_v61  ;;  %v15024_v56 = vld [vmem:[#allocation18_spill] sm:$0xff] }
 0x665   : > { %v4701_v22 = vmul.f32 %v12454_v43, %v4668_v52  ;;  %v3802_v6 = vadd.f32 %v12276_v48, %v15024_v56  ;;  %v3909_v35 = vpop.f32.mrf.mxu2  ;;  %v4474_v52 = vmax.f32 %v4442_v23, 0.0  ;;  %v15025_v56 = vld [vmem:[#allocation68_spill] sm:$0xff] }
 0x666   : > { %v4523_v45 = vadd.f32 %v12308_v58, %v12598_v53  ;;  %v4217_v44 = vpop.f32.mrf.mxu0 }
 0x667   : > { %v12604_v25 = vadd.f32 %v12463_v17, %v4701_v22  ;;  %v4061_v27 = vpop.f32.mrf.mxu3  ;;  %v3957_v18 = vadd.f32 %v3909_v35, %v3802_v6  ;;  %v3804_v6 = vadd.f32 %v12284_v36, %v15025_v56  ;;  %v4443_v36 = vadd.f32 %v12437_v15, %v12398_v62 }
 0x668   : > { %8169 = vrot.lane.b32.xlu1 %v12535_v54, %s9387_s15  ;;  %4604 = vrot.lane.b32.xlu2 %v4521_v33, %s9381_s21  ;;  %v12609_v33 = vadd.f32 %v12463_v17, %v4702_v20 }
 0x669   : > { %15021 = vst [vmem:[#allocation11_spill] sm:$0xff] %v12604_v25  ;;  %v4109_v47 = vadd.f32 %v4061_v27, %v3957_v18  ;;  %v4444_v27 = vadd.f32 %v12437_v15, %v12410_v50  ;;  %v4475_v50 = vmax.f32 %v4443_v36, 0.0 }
 0x66a   : > { %15022 = vst [vmem:[#allocation8_spill] sm:$0xff] %v12609_v33  ;;  %v4587_v59 = vpop.permute.xlu2 %4586 }
 0x66b   : > { %4606 = vrot.lane.b32.xlu0 %v4522_v8, %s9381_s21  ;;  %v4366_v57 = vpop.f32.mrf.mxu1  ;;  %v12618_v8 = vpack.i.bf16 %v12609_v33, %v12604_v25  ;;  %v4265_v26 = vadd.f32 %v4217_v44, %v4109_v47 }
 0x66c   : > { %v12620_v30 = vadd.f32 %v4366_v57, %v4263_v13 }
 0x66d   : > { %v3912_v31 = vpop.f32.mrf.mxu2 }
 0x66e   : > { %v4524_v29 = vadd.f32 %v12308_v58, %v12620_v30  ;;  %v4220_v16 = vpop.f32.mrf.mxu0 }
 0x66f   : > { %v4064_v49 = vpop.f32.mrf.mxu3 }
 0x670   : > { %8184 = vrot.lane.b32.xlu1 %v12579_v3, %s9386_s14  ;;  %8174 = vrot.lane.b32.xlu2 %v12579_v3, %s9382_s29 }
 0x672   : > { %v4583_v12 = vpop.permute.xlu0 %4582 }
 0x673   : > { %8179 = vrot.lane.b32.xlu0 %v12579_v3, %s9383_s10  ;;  %v4369_v1 = vpop.f32.mrf.mxu1  ;;  %v4670_v57 = vadd.f32 %v4583_v12, %v4473_v41  ;;  %v4476_v12 = vmax.f32 %v4444_v27, 0.0 }
 0x674   : > { %v12637_v61 = vadd.f32 %v4369_v1, %v4264_v46  ;;  %v15027_v46 = vld [vmem:[#allocation71_spill] sm:$0xff] }
 0x675   : > { %v4703_v13 = vmul.f32 %v12454_v43, %v4670_v57  ;;  %v3915_v14 = vpop.f32.mrf.mxu2 }
 0x676   : > { %v4525_v20 = vadd.f32 %v12308_v58, %v12637_v61  ;;  %v3959_v5 = vadd.f32 %v3915_v14, %v3804_v6  ;;  %v4223_v44 = vpop.f32.mrf.mxu0 }
 0x677   : > { %v12658_v1 = vadd.f32 %v12463_v17, %v4703_v13  ;;  %v4067_v23 = vpop.f32.mrf.mxu3 }
 0x678   : > { %8199 = vrot.lane.b32.xlu1 %v12579_v3, %s9388_s16  ;;  %8189 = vrot.lane.b32.xlu2 %v12579_v3, %s9384_s11  ;;  %v4111_v47 = vadd.f32 %v4067_v23, %v3959_v5 }
 0x67a   : > { %v4585_v48 = vpop.permute.xlu1 %4584 }
 0x67b   : > { %8194 = vrot.lane.b32.xlu0 %v12579_v3, %s9385_s12  ;;  %v4671_v63 = vadd.f32 %v4585_v48, %v4474_v52  ;;  %v4372_v22 = vpop.f32.mrf.mxu1  ;;  %v15026_v48 = vld [vmem:[#allocation17_spill] sm:$0xff] }
 0x67c   : > { %v12646_v28 = vadd.f32 %v4372_v22, %v4265_v26  ;;  %v3803_v52 = vadd.f32 %v15027_v46, %v15026_v48  ;;  %v15030_v46 = vld [vmem:[#allocation19_spill] sm:$0xff] }
 0x67d   : > { %v4704_v42 = vmul.f32 %v12454_v43, %v4671_v63  ;;  %v3918_v14 = vpop.f32.mrf.mxu2 }
 0x67e   : > { %v4526_v9 = vadd.f32 %v12308_v58, %v12646_v28  ;;  %v3958_v63 = vadd.f32 %v3912_v31, %v3803_v52  ;;  %v15031_v52 = vld [vmem:[#allocation16_spill] sm:$0xff] }
 0x67f   : > { %v12653_v2 = vadd.f32 %v12463_v17, %v4704_v42  ;;  %v4672_v42 = vadd.f32 %v4587_v59, %v4475_v50  ;;  %v3805_v36 = vadd.f32 %v15031_v52, %v15030_v46  ;;  %v15035_v46 = vld [vmem:[#allocation69_spill] sm:$0xff]  ;;  %v15036_v52 = vld [vmem:[#allocation72_spill] sm:$0xff] }
 0x680   : > { %8204 = vrot.lane.b32.xlu2 %v12579_v3, %s9387_s15  ;;  %4608 = vrot.lane.b32.xlu1 %v4523_v45, %s9381_s21  ;;  %v4110_v62 = vadd.f32 %v4064_v49, %v3958_v63 }
 0x681   : > { %v4705_v6 = vmul.f32 %v12454_v43, %v4672_v42  ;;  %v3960_v50 = vadd.f32 %v3918_v14, %v3805_v36 }
 0x682   : > { %v12648_v45 = vpop.permute.xlu2 %4592  ;;  %v4266_v31 = vadd.f32 %v4220_v16, %v4110_v62  ;;  %v4070_v16 = vpop.f32.mrf.mxu3 }
 0x683   : > { %8209 = vrot.lane.b32.xlu0 %v12618_v8, %s9382_s29  ;;  %v4375_v19 = vpop.f32.mrf.mxu1 }
 0x684   : > { %v12699_v59 = vadd.f32 %v4375_v19, %v4266_v31 }
 0x685   : > { %v3921_v42 = vpop.f32.mrf.mxu2 }
 0x686   : > { %v4527_v19 = vadd.f32 %v12308_v58, %v12699_v59 }
 0x688   : > { %8214 = vrot.lane.b32.xlu1 %v12618_v8, %s9383_s10  ;;  %4610 = vrot.lane.b32.xlu2 %v4524_v29, %s9381_s21  ;;  %v12667_v29 = vpack.i.bf16 %v12653_v2, %v12658_v1 }
 0x68a   : > { %v4589_v18 = vpop.permute.xlu0 %4588 }
 0x68b   : > { %8224 = vrot.lane.b32.xlu0 %v12618_v8, %s9384_s11  ;;  %v4378_v41 = vpop.f32.mrf.mxu1  ;;  %v4673_v22 = vadd.f32 %v4589_v18, %v4476_v12  ;;  %v12710_v18 = vadd.f32 %v12463_v17, %v4705_v6  ;;  %v4226_v12 = vpop.f32.mrf.mxu0 }
 0x68d   : > { %v4706_v56 = vmul.f32 %v12454_v43, %v4673_v22 }
 0x68f   : > { %v12702_v23 = vadd.f32 %v12463_v17, %v4706_v56  ;;  %v4073_v56 = vpop.f32.mrf.mxu3 }
 0x690   : > { %8229 = vrot.lane.b32.xlu1 %v12618_v8, %s9385_s12  ;;  %8219 = vrot.lane.b32.xlu2 %v12618_v8, %s9386_s14 }
 0x692   : > { %v4591_v57 = vpop.permute.xlu1 %4590 }
 0x693   : > { %4612 = vrot.lane.b32.xlu0 %v4525_v20, %s9381_s21  ;;  %v4267_v20 = vadd.f32 %v4223_v44, %v4111_v47  ;;  %v12720_v47 = vpack.i.bf16 %v12702_v23, %v12710_v18  ;;  %v4445_v44 = vadd.f32 %v12437_v15, %v12419_v7  ;;  %v4381_v63 = vpop.f32.mrf.mxu1  ;;  %v4112_v7 = vadd.f32 %v4070_v16, %v3960_v50 }
 0x695   : > { %v12687_v13 = vadd.f32 %v4378_v41, %v4267_v20  ;;  %v4446_v41 = vadd.f32 %v12437_v15, %v12428_v37  ;;  %v4477_v62 = vmax.f32 %v4445_v44, 0.0  ;;  %v3806_v37 = vadd.f32 %v15036_v52, %v15035_v46 }
 0x696   : > { %v4268_v36 = vadd.f32 %v4226_v12, %v4112_v7 }
 0x697   : > { %v4528_v49 = vadd.f32 %v12308_v58, %v12687_v13  ;;  %v4478_v6 = vmax.f32 %v4446_v41, 0.0  ;;  %v4674_v31 = vadd.f32 %v4591_v57, %v4477_v62  ;;  %v3961_v44 = vadd.f32 %v3921_v42, %v3806_v37  ;;  %v3924_v42 = vpop.f32.mrf.mxu2  ;;  %v15041_v37 = vld [vmem:[#allocation10_spill] sm:$0xff] }
 0x698   : > { %8234 = vrot.lane.b32.xlu2 %v12618_v8, %s9388_s16  ;;  %4614 = vrot.lane.b32.xlu1 %v4526_v9, %s9381_s21  ;;  %v12745_v41 = vadd.f32 %v4381_v63, %v4268_v36 }
 0x699   : > { %v4675_v14 = vadd.f32 %v12648_v45, %v4478_v6  ;;  %v4707_v16 = vmul.f32 %v12454_v43, %v4674_v31  ;;  %v4113_v12 = vadd.f32 %v4073_v56, %v3961_v44  ;;  %v4076_v31 = vpop.f32.mrf.mxu3  ;;  %v15040_v56 = vld [vmem:[#allocation9_spill] sm:$0xff] }
 0x69a   : > { %v12669_v35 = vpop.permute.xlu2 %4598  ;;  %v4529_v63 = vadd.f32 %v12308_v58, %v12745_v41 }
 0x69b   : > { %8249 = vrot.lane.b32.xlu0 %v12667_v29, %s9386_s14  ;;  %v4708_v62 = vmul.f32 %v12454_v43, %v4675_v14  ;;  %v4384_v45 = vpop.f32.mrf.mxu1  ;;  %v12755_v7 = vadd.f32 %v12463_v17, %v4707_v16  ;;  %v3807_v14 = vadd.f32 %v15041_v37, %v15040_v56 }
 0x69d   : > { %v12762_v46 = vadd.f32 %v12463_v17, %v4708_v62  ;;  %v3962_v62 = vadd.f32 %v3924_v42, %v3807_v14  ;;  %v4447_v42 = vadd.f32 %v12437_v15, %v12444_v38 }
 0x69f   : > { %v12771_v36 = vpack.i.bf16 %v12762_v46, %v12755_v7 }
 0x6a0   : > { %8244 = vrot.lane.b32.xlu2 %v12667_v29, %s9383_s10  ;;  %8239 = vrot.lane.b32.xlu1 %v12667_v29, %s9382_s29 }
 0x6a2   : > { %v12683_v26 = vpop.permute.xlu2 %8114  ;;  %v12689_v9 = vpop.permute.xlu0 %4594 }
 0x6a3   : > { %15028 = vst [vmem:[#allocation26_spill] sm:$0xff] %v12683_v26  ;;  %8264 = vrot.lane.b32.xlu0 %v12667_v29, %s9388_s16 }
 0x6a8   : > { %8259 = vrot.lane.b32.xlu2 %v12667_v29, %s9385_s12  ;;  %8254 = vrot.lane.b32.xlu1 %v12667_v29, %s9384_s11 }
 0x6aa   : > { %v12704_v27 = vpop.permute.xlu1 %4596  ;;  %v12706_v5 = vpop.permute.xlu2 %8129 }
 0x6ab   : > { %15029 = vst [vmem:[#allocation20_spill] sm:$0xff] %v12706_v5  ;;  %4618 = vrot.lane.b32.xlu0 %v4528_v49, %s9381_s21  ;;  %v15042_v5 = vld [vmem:[#allocation70_spill] sm:$0xff] }
 0x6ad   : > { %v12712_v48 = vpop.permute.xlu0 %8104 }
 0x6b0   : > { %8279 = vrot.lane.b32.xlu1 %v12720_v47, %s9386_s14  ;;  %4616 = vrot.lane.b32.xlu2 %v4527_v19, %s9381_s21  ;;  %v4229_v19 = vpop.f32.mrf.mxu0 }
 0x6b1   : > { %v4269_v52 = vadd.f32 %v4229_v19, %v4113_v12  ;;  %v4387_v12 = vpop.f32.mrf.mxu1 }
 0x6b2   : > { %v12729_v22 = vpop.permute.xlu1 %8109  ;;  %v12731_v20 = vpop.permute.xlu2 %8144 }
 0x6b3   : > { %15032 = vst [vmem:[#allocation28_spill] sm:$0xff] %v12729_v22  ;;  %8274 = vrot.lane.b32.xlu0 %v12720_v47, %s9383_s10  ;;  %v12773_v16 = vadd.f32 %v4384_v45, %v4269_v52  ;;  %v4448_v45 = vadd.f32 %v12437_v15, %v12469_v39  ;;  %v3927_v52 = vpop.f32.mrf.mxu2  ;;  %v4479_v22 = vmax.f32 %v4447_v42, 0.0 }
 0x6b4   : > { %15033 = vst [vmem:[#allocation35_spill] sm:$0xff] %v12731_v20 }
 0x6b5   : > { %v12735_v49 = vpop.permute.xlu0 %8119  ;;  %v4530_v37 = vadd.f32 %v12308_v58, %v12773_v16  ;;  %v4676_v38 = vadd.f32 %v12689_v9, %v4479_v22 }
 0x6b6   : > { %15034 = vst [vmem:[#allocation24_spill] sm:$0xff] %v12735_v49  ;;  %v4079_v49 = vpop.f32.mrf.mxu3 }
 0x6b7   : > { %v4709_v9 = vmul.f32 %v12454_v43, %v4676_v38 }
 0x6b8   : > { %8294 = vrot.lane.b32.xlu1 %v12720_v47, %s9388_s16  ;;  %8269 = vrot.lane.b32.xlu2 %v12720_v47, %s9382_s29  ;;  %v4232_v19 = vpop.f32.mrf.mxu0 }
 0x6ba   : > { %v12747_v57 = vpop.permute.xlu1 %8124  ;;  %v12749_v50 = vpop.permute.xlu2 %8159 }
 0x6bb   : > { %15037 = vst [vmem:[#allocation34_spill] sm:$0xff] %v12747_v57  ;;  %8289 = vrot.lane.b32.xlu0 %v12720_v47, %s9385_s12  ;;  %v15043_v57 = vld [vmem:[#allocation73_spill] sm:$0xff] }
 0x6bc   : > { %15038 = vst [vmem:[#allocation30_spill] sm:$0xff] %v12749_v50  ;;  %v3808_v56 = vadd.f32 %v15043_v57, %v15042_v5  ;;  %v4114_v50 = vadd.f32 %v4076_v31, %v3962_v62  ;;  %v4480_v31 = vmax.f32 %v4448_v45, 0.0 }
 0x6bd   : > { %v12757_v6 = vpop.permute.xlu0 %8134 }
 0x6be   : > { %15039 = vst [vmem:[#allocation31_spill] sm:$0xff] %v12757_v6  ;;  %v3963_v14 = vadd.f32 %v3927_v52, %v3808_v56  ;;  %v4270_v57 = vadd.f32 %v4232_v19, %v4114_v50  ;;  %v4390_v56 = vpop.f32.mrf.mxu1 }
 0x6c0   : > { %8284 = vrot.lane.b32.xlu2 %v12720_v47, %s9384_s11  ;;  %4620 = vrot.lane.b32.xlu1 %v4529_v63, %s9381_s21  ;;  %v4115_v39 = vadd.f32 %v4079_v49, %v3963_v14  ;;  %v4235_v62 = vpop.f32.mrf.mxu0  ;;  %v12798_v20 = vadd.f32 %v4387_v12, %v4270_v57  ;;  %v4450_v14 = vadd.f32 %v12437_v15, %v12513_v60 }
 0x6c1   : > { %v12829_v57 = vadd.f32 %v12463_v17, %v4709_v9 }
 0x6c2   : > { %v12775_v44 = vpop.permute.xlu1 %4602  ;;  %v12777_v6 = vpop.permute.xlu2 %4604  ;;  %v4271_v52 = vadd.f32 %v4235_v62, %v4115_v39  ;;  %v4531_v49 = vadd.f32 %v12308_v58, %v12798_v20  ;;  %v4482_v60 = vmax.f32 %v4450_v14, 0.0 }
 0x6c3   : > { %8299 = vrot.lane.b32.xlu0 %v12771_v36, %s9382_s29 }
 0x6c4   : > { %v12811_v19 = vadd.f32 %v4390_v56, %v4271_v52 }
 0x6c5   : > { %v4601_v63 = vpop.permute.xlu0 %4600 }
 0x6c6   : > { %v4532_v42 = vadd.f32 %v12308_v58, %v12811_v19  ;;  %v4679_v56 = vadd.f32 %v4601_v63, %v4482_v60 }
 0x6c8   : > { %8304 = vrot.lane.b32.xlu1 %v12771_v36, %s9383_s10  ;;  %4622 = vrot.lane.b32.xlu2 %v4530_v37, %s9381_s21  ;;  %v4677_v37 = vadd.f32 %v12704_v27, %v4480_v31  ;;  %v4449_v31 = vadd.f32 %v12437_v15, %v12488_v34  ;;  %v4712_v14 = vmul.f32 %v12454_v43, %v4679_v56  ;;  %v4238_v60 = vpop.f32.mrf.mxu0 }
 0x6c9   : > { %v4451_v56 = vadd.f32 %v12437_v15, %v12511_v51 }
 0x6ca   : > { %v12792_v26 = vpop.permute.xlu1 %8139  ;;  %v12794_v5 = vpop.permute.xlu2 %8174  ;;  %v4710_v50 = vmul.f32 %v12454_v43, %v4677_v37  ;;  %v4481_v38 = vmax.f32 %v4449_v31, 0.0 }
 0x6cb   : > { %8314 = vrot.lane.b32.xlu0 %v12771_v36, %s9384_s11 }
 0x6cc   : > { %v12820_v22 = vadd.f32 %v12463_v17, %v4710_v50  ;;  %v15052_v50 = vld [vmem:[#allocation15_spill] sm:$0xff]  ;;  %v4678_v34 = vadd.f32 %v12669_v35, %v4481_v38  ;;  %v12862_v38 = vadd.f32 %v12463_v17, %v4712_v14  ;;  %v4483_v14 = vmax.f32 %v4451_v56, 0.0 }
 0x6cd   : > { %v12801_v11 = vpop.permute.xlu0 %8149 }
 0x6ce   : > { %15044 = vst [vmem:[#allocation27_spill] sm:$0xff] %v12801_v11  ;;  %v12838_v39 = vpack.i.bf16 %v12820_v22, %v12829_v57  ;;  %v4711_v31 = vmul.f32 %v12454_v43, %v4678_v34  ;;  %v4393_v34 = vpop.f32.mrf.mxu1 }
 0x6cf   : > { %15047 = vst [vmem:[#allocation32_spill] sm:$0xff] %v12820_v22 }
 0x6d0   : > { %8319 = vrot.lane.b32.xlu1 %v12771_v36, %s9385_s12  ;;  %8309 = vrot.lane.b32.xlu2 %v12771_v36, %s9386_s14  ;;  %15053 = vst [vmem:[#allocation40_spill] sm:$0xff] %v12862_v38 }
 0x6d2   : > { %v12813_v27 = vpop.permute.xlu1 %8154  ;;  %v12815_v12 = vpop.permute.xlu2 %8189 }
 0x6d3   : > { %15045 = vst [vmem:[#allocation38_spill] sm:$0xff] %v12813_v27  ;;  %4624 = vrot.lane.b32.xlu0 %v4531_v49, %s9381_s21  ;;  %v15051_v49 = vld [vmem:[#allocation7_spill] sm:$0xff] }
 0x6d4   : > { %15046 = vst [vmem:[#allocation29_spill] sm:$0xff] %v12815_v12  ;;  %v3809_v9 = vadd.f32 %v15052_v50, %v15051_v49  ;;  %v4452_v50 = vadd.f32 %v12437_v15, %v12553_v0 }
 0x6d5   : > { %v12822_v45 = vpop.permute.xlu0 %8164 }
 0x6d6   : > { %15048 = vst [vmem:[#allocation25_spill] sm:$0xff] %v12822_v45 }
 0x6d8   : > { %8324 = vrot.lane.b32.xlu2 %v12771_v36, %s9388_s16  ;;  %4626 = vrot.lane.b32.xlu1 %v4532_v42, %s9381_s21  ;;  %v3930_v42 = vpop.f32.mrf.mxu2 }
 0x6da   : > { %v12840_v62 = vpop.permute.xlu1 %8169  ;;  %v12842_v37 = vpop.permute.xlu2 %8204 }
 0x6db   : > { %15049 = vst [vmem:[#allocation42_spill] sm:$0xff] %v12840_v62  ;;  %8339 = vrot.lane.b32.xlu0 %v12838_v39, %s9386_s14  ;;  %v4082_v62 = vpop.f32.mrf.mxu3 }
 0x6dc   : > { %15050 = vst [vmem:[#allocation33_spill] sm:$0xff] %v12842_v37  ;;  %v3964_v37 = vadd.f32 %v3930_v42, %v3809_v9  ;;  %v12871_v9 = vadd.f32 %v12463_v17, %v4711_v31  ;;  %v4484_v31 = vmax.f32 %v4452_v50, 0.0 }
 0x6dd   : > { %v4607_v52 = vpop.permute.xlu0 %4606 }
 0x6de   : > { %v4116_v35 = vadd.f32 %v4082_v62, %v3964_v37  ;;  %15054 = vst [vmem:[#allocation39_spill] sm:$0xff] %v12871_v9  ;;  %v12879_v62 = vpack.i.bf16 %v12862_v38, %v12871_v9 }
 0x6e0   : > { %8334 = vrot.lane.b32.xlu2 %v12838_v39, %s9383_s10  ;;  %8329 = vrot.lane.b32.xlu1 %v12838_v39, %s9382_s29  ;;  %v4272_v42 = vadd.f32 %v4238_v60, %v4116_v35  ;;  %v4680_v35 = vadd.f32 %v12775_v44, %v4483_v14  ;;  %v4681_v60 = vadd.f32 %v12777_v6, %v4484_v31 }
 0x6e1   : > { %v4453_v14 = vadd.f32 %v12437_v15, %v12557_v21 }
 0x6e2   : > { %v12854_v45 = vpop.permute.xlu1 %8184  ;;  %v12856_v63 = vpop.permute.xlu2 %4610  ;;  %v12881_v37 = vadd.f32 %v4393_v34, %v4272_v42  ;;  %v4713_v56 = vmul.f32 %v12454_v43, %v4680_v35  ;;  %v4714_v50 = vmul.f32 %v12454_v43, %v4681_v60 }
 0x6e3   : > { %8354 = vrot.lane.b32.xlu0 %v12838_v39, %s9388_s16 }
 0x6e4   : > { %v4533_v9 = vadd.f32 %v12308_v58, %v12881_v37  ;;  %v12905_v6 = vadd.f32 %v12463_v17, %v4713_v56  ;;  %v12908_v58 = vadd.f32 %v12463_v17, %v4714_v50 }
 0x6e5   : > { %v12864_v49 = vpop.permute.xlu0 %8179 }
 0x6e6   : > { %15058 = vst [vmem:[#allocation51_spill] sm:$0xff] %v12905_v6  ;;  %v12922_v31 = vpack.i.bf16 %v12908_v58, %v12905_v6 }
 0x6e7   : > { %15059 = vst [vmem:[#allocation50_spill] sm:$0xff] %v12908_v58 }
 0x6e8   : > { %8349 = vrot.lane.b32.xlu2 %v12838_v39, %s9385_s12  ;;  %8344 = vrot.lane.b32.xlu1 %v12838_v39, %s9384_s11 }
 0x6ea   : > { %v12883_v51 = vpop.permute.xlu1 %8199  ;;  %v12885_v0 = vpop.permute.xlu2 %8219 }
 0x6eb   : > { %15055 = vst [vmem:[#allocation43_spill] sm:$0xff] %v12883_v51  ;;  %8364 = vrot.lane.b32.xlu0 %v12879_v62, %s9383_s10 }
 0x6ed   : > { %v12891_v27 = vpop.permute.xlu0 %8194 }
 0x6ee   : > { %15056 = vst [vmem:[#allocation37_spill] sm:$0xff] %v12891_v27 }
 0x6f0   : > { %8369 = vrot.lane.b32.xlu1 %v12879_v62, %s9386_s14  ;;  %4628 = vrot.lane.b32.xlu2 %v4533_v9, %s9381_s21  ;;  %v4454_v9 = vadd.f32 %v12437_v15, %v12598_v53  ;;  %v4485_v53 = vmax.f32 %v4453_v14, 0.0  ;;  %v4456_v14 = vadd.f32 %v12437_v15, %v12637_v61  ;;  %s7473_s21 = sshll.u32 %s15216_s13, 2 }
 0x6f2   : > { %v4609_v34 = vpop.permute.xlu1 %4608  ;;  %v12900_v42 = vpop.permute.xlu2 %8234  ;;  %v4486_v56 = vmax.f32 %v4454_v9, 0.0  ;;  %v4488_v58 = vmax.f32 %v4456_v14, 0.0 }
 0x6f3   : > { %15057 = vst [vmem:[#allocation46_spill] sm:$0xff] %v12900_v42  ;;  %8379 = vrot.lane.b32.xlu0 %v12879_v62, %s9385_s12  ;;  %v4682_v42 = vadd.f32 %v4607_v52, %v4485_v53 }
 0x6f4   : > { %v4683_v50 = vadd.f32 %v4609_v34, %v4486_v56 }
 0x6f5   : > { %v12910_v44 = vpop.permute.xlu0 %8209  ;;  %v4715_v9 = vmul.f32 %v12454_v43, %v4682_v42  ;;  %v4455_v42 = vadd.f32 %v12437_v15, %v12620_v30 }
 0x6f6   : > { %v4716_v21 = vmul.f32 %v12454_v43, %v4683_v50 }
 0x6f7   : > { %v12950_v56 = vadd.f32 %v12463_v17, %v4715_v9  ;;  %v4487_v61 = vmax.f32 %v4455_v42, 0.0 }
 0x6f8   : > { %8384 = vrot.lane.b32.xlu1 %v12879_v62, %s9388_s16  ;;  %8359 = vrot.lane.b32.xlu2 %v12879_v62, %s9382_s29  ;;  %v12945_v34 = vadd.f32 %v12463_v17, %v4716_v21 }
 0x6f9   : > { %15064 = vst [vmem:[#allocation44_spill] sm:$0xff] %v12950_v56 }
 0x6fa   : > { %v12924_v35 = vpop.permute.xlu1 %8214  ;;  %v12926_v60 = vpop.permute.xlu2 %8244  ;;  %15063 = vst [vmem:[#allocation47_spill] sm:$0xff] %v12945_v34  ;;  %v12960_v53 = vpack.i.bf16 %v12945_v34, %v12950_v56  ;;  %v13017_v34 = vld [vmem:[%s14520_s4 + $0x2] ss:$0 sm:$0xff] }
 0x6fb   : > { %8389 = vrot.lane.b32.xlu0 %v12922_v31, %s9382_s29 }
 0x6fd   : > { %v12930_v51 = vpop.permute.xlu0 %8224 }
 0x6fe   : > { %15060 = vst [vmem:[#allocation36_spill] sm:$0xff] %v12930_v51 }
 0x700   : > { %8394 = vrot.lane.b32.xlu1 %v12922_v31, %s9383_s10  ;;  %8374 = vrot.lane.b32.xlu2 %v12879_v62, %s9384_s11 }
 0x702   : > { %v12937_v38 = vpop.permute.xlu1 %8229  ;;  %v12939_v6 = vpop.permute.xlu2 %8259 }
 0x703   : > { %15061 = vst [vmem:[#allocation41_spill] sm:$0xff] %v12937_v38  ;;  %8404 = vrot.lane.b32.xlu0 %v12922_v31, %s9384_s11  ;;  %v4684_v38 = vadd.f32 %v12856_v63, %v4487_v61 }
 0x704   : > { %15062 = vst [vmem:[#allocation48_spill] sm:$0xff] %v12939_v6 }
 0x705   : > { %v4613_v52 = vpop.permute.xlu0 %4612  ;;  %v4717_v56 = vmul.f32 %v12454_v43, %v4684_v38 }
 0x706   : > { %v4685_v9 = vadd.f32 %v4613_v52, %v4488_v58  ;;  %v12987_v52 = vld [vmem:[%s14520_s4] ss:$0 sm:$0xff] }
 0x707   : > { %v4457_v42 = vadd.f32 %v12987_v52, %v12646_v28  ;;  %v4458_v61 = vadd.f32 %v12987_v52, %v12699_v59  ;;  %v4460_v12 = vadd.f32 %v12987_v52, %v12745_v41 }
 0x708   : > { %8409 = vrot.lane.b32.xlu1 %v12922_v31, %s9385_s12  ;;  %8399 = vrot.lane.b32.xlu2 %v12922_v31, %s9386_s14  ;;  %v4718_v15 = vmul.f32 %v12454_v43, %v4685_v9  ;;  %v12994_v43 = vadd.f32 %v12463_v17, %v4717_v56 }
 0x709   : > { %v4489_v28 = vmax.f32 %v4457_v42, 0.0 }
 0x70a   : > { %v4615_v50 = vpop.permute.xlu1 %4614  ;;  %v4617_v21 = vpop.permute.xlu2 %4616  ;;  %v12980_v58 = vadd.f32 %v12463_v17, %v4718_v15  ;;  %15067 = vst [vmem:[#allocation55_spill] sm:$0xff] %v12994_v43 }
 0x70b   : > { %8429 = vrot.lane.b32.xlu0 %v12960_v53, %s9386_s14  ;;  %v4686_v17 = vadd.f32 %v4615_v50, %v4489_v28 }
 0x70c   : > { %15065 = vst [vmem:[#allocation53_spill] sm:$0xff] %v12980_v58  ;;  %v13002_v38 = vpack.i.bf16 %v12980_v58, %v12994_v43 }
 0x70d   : > { %v12964_v27 = vpop.permute.xlu0 %8249  ;;  %v4719_v42 = vmul.f32 %v13017_v34, %v4686_v17 }
 0x710   : > { %8419 = vrot.lane.b32.xlu1 %v12960_v53, %s9382_s29  ;;  %8414 = vrot.lane.b32.xlu2 %v12922_v31, %s9388_s16 }
 0x712   : > { %v12972_v30 = vpop.permute.xlu1 %8239  ;;  %v12974_v14 = vpop.permute.xlu2 %8269 }
 0x713   : > { %8444 = vrot.lane.b32.xlu0 %v12960_v53, %s9388_s16 }
 0x715   : > { %v12982_v63 = vpop.permute.xlu0 %8264 }
 0x716   : > { %15066 = vst [vmem:[#allocation45_spill] sm:$0xff] %v12982_v63  ;;  %v4490_v63 = vmax.f32 %v4458_v61, 0.0 }
 0x718   : > { %8434 = vrot.lane.b32.xlu1 %v12960_v53, %s9384_s11  ;;  %8424 = vrot.lane.b32.xlu2 %v12960_v53, %s9383_s10  ;;  %v4687_v59 = vadd.f32 %v4617_v21, %v4490_v63  ;;  %v13028_v21 = vld [vmem:[%s14520_s4 + $0x3] ss:$0 sm:$0xff] }
 0x719   : > { %v13031_v63 = vadd.f32 %v13028_v21, %v4719_v42 }
 0x71a   : > { %v13004_v9 = vpop.permute.xlu1 %8254  ;;  %v13006_v15 = vpop.permute.xlu2 %8284  ;;  %v4720_v61 = vmul.f32 %v13017_v34, %v4687_v59  ;;  %v4459_v59 = vadd.f32 %v12987_v52, %v12687_v13  ;;  %v4492_v13 = vmax.f32 %v4460_v12, 0.0 }
 0x71b   : > { %15068 = vst [vmem:[#allocation63_spill] sm:$0xff] %v13004_v9  ;;  %8454 = vrot.lane.b32.xlu0 %v13002_v38, %s9383_s10 }
 0x71c   : > { %15069 = vst [vmem:[#allocation62_spill] sm:$0xff] %v13006_v15  ;;  %v13034_v28 = vadd.f32 %v13028_v21, %v4720_v61  ;;  %v4491_v61 = vmax.f32 %v4459_v59, 0.0 }
 0x71d   : > { %v4619_v56 = vpop.permute.xlu0 %4618  ;;  %15070 = vst [vmem:[#allocation54_spill] sm:$0xff] %v13031_v63 }
 0x71e   : > { %15071 = vst [vmem:[#allocation59_spill] sm:$0xff] %v13034_v28  ;;  %v13046_v58 = vpack.i.bf16 %v13034_v28, %v13031_v63  ;;  %v4688_v9 = vadd.f32 %v4619_v56, %v4491_v61 }
 0x720   : > { %8459 = vrot.lane.b32.xlu1 %v13002_v38, %s9386_s14  ;;  %8439 = vrot.lane.b32.xlu2 %v12960_v53, %s9385_s12  ;;  %v4721_v28 = vmul.f32 %v13017_v34, %v4688_v9 }
 0x722   : > { %v13021_v43 = vpop.permute.xlu1 %8279  ;;  %v4623_v50 = vpop.permute.xlu2 %4622  ;;  %v13069_v56 = vadd.f32 %v13028_v21, %v4721_v28  ;;  %v4461_v28 = vadd.f32 %v12987_v52, %v12773_v16 }
 0x723   : > { %8469 = vrot.lane.b32.xlu0 %v13002_v38, %s9385_s12 }
 0x724   : > { %15075 = vst [vmem:[#allocation60_spill] sm:$0xff] %v13069_v56 }
 0x725   : > { %v13036_v17 = vpop.permute.xlu0 %8274 }
 0x728   : > { %8474 = vrot.lane.b32.xlu1 %v13002_v38, %s9388_s16  ;;  %8449 = vrot.lane.b32.xlu2 %v13002_v38, %s9382_s29 }
 0x72a   : > { %v13048_v42 = vpop.permute.xlu1 %8294  ;;  %v13050_v6 = vpop.permute.xlu2 %8309 }
 0x72b   : > { %15072 = vst [vmem:[#allocation64_spill] sm:$0xff] %v13048_v42  ;;  %8479 = vrot.lane.b32.xlu0 %v13046_v58, %s9382_s29 }
 0x72d   : > { %v13056_v51 = vpop.permute.xlu0 %8289 }
 0x72e   : > { %15073 = vst [vmem:[#allocation66_spill] sm:$0xff] %v13056_v51 }
 0x730   : > { %8484 = vrot.lane.b32.xlu1 %v13046_v58, %s9383_s10  ;;  %8464 = vrot.lane.b32.xlu2 %v13002_v38, %s9384_s11 }
 0x732   : > { %v4621_v42 = vpop.permute.xlu1 %4620  ;;  %v13062_v63 = vpop.permute.xlu2 %8324 }
 0x733   : > { %15074 = vst [vmem:[#allocation52_spill] sm:$0xff] %v13062_v63  ;;  %v4689_v15 = vadd.f32 %v4621_v42, %v4492_v13  ;;  %8494 = vrot.lane.b32.xlu0 %v13046_v58, %s9384_s11  ;;  %v4493_v13 = vmax.f32 %v4461_v28, 0.0 }
 0x735   : > { %v4722_v41 = vmul.f32 %v13017_v34, %v4689_v15  ;;  %v8300_v59 = vpop.permute.xlu0 %8299  ;;  %v4690_v63 = vadd.f32 %v4623_v50, %v4493_v13  ;;  %v4463_v50 = vadd.f32 %v12987_v52, %v12811_v19  ;;  %v4464_v13 = vadd.f32 %v12987_v52, %v12881_v37 }
 0x737   : > { %v13072_v61 = vadd.f32 %v13028_v21, %v4722_v41  ;;  %v4462_v41 = vadd.f32 %v12987_v52, %v12798_v20  ;;  %v4723_v28 = vmul.f32 %v13017_v34, %v4690_v63  ;;  %v4496_v11 = vmax.f32 %v4464_v13, 0.0 }
 0x738   : > { %8499 = vrot.lane.b32.xlu1 %v13046_v58, %s9385_s12  ;;  %8489 = vrot.lane.b32.xlu2 %v13046_v58, %s9386_s14 }
 0x739   : > { %15076 = vst [vmem:[#allocation58_spill] sm:$0xff] %v13072_v61  ;;  %v13080_v12 = vpack.i.bf16 %v13072_v61, %v13069_v56  ;;  %v4494_v16 = vmax.f32 %v4462_v41, 0.0  ;;  %v13115_v41 = vadd.f32 %v13028_v21, %v4723_v28 }
 0x73a   : > { %v13082_v9 = vpop.permute.xlu1 %8304  ;;  %v13084_v15 = vpop.permute.xlu2 %8334 }
 0x73b   : > { %8519 = vrot.lane.b32.xlu0 %v13080_v12, %s9386_s14  ;;  %15080 = vst [vmem:[#allocation57_spill] sm:$0xff] %v13115_v41 }
 0x73d   : > { %v13090_v42 = vpop.permute.xlu0 %8314 }
 0x73e   : > { %15077 = vst [vmem:[#allocation56_spill] sm:$0xff] %v13090_v42 }
 0x740   : > { %8509 = vrot.lane.b32.xlu1 %v13080_v12, %s9382_s29  ;;  %8504 = vrot.lane.b32.xlu2 %v13046_v58, %s9388_s16 }
 0x742   : > { %v13098_v56 = vpop.permute.xlu1 %8319  ;;  %v13100_v61 = vpop.permute.xlu2 %8349 }
 0x743   : > { %15078 = vst [vmem:[#allocation61_spill] sm:$0xff] %v13098_v56  ;;  %8534 = vrot.lane.b32.xlu0 %v13080_v12, %s9388_s16 }
 0x744   : > { %15079 = vst [vmem:[#allocation49_spill] sm:$0xff] %v13100_v61  ;;  %v4495_v61 = vmax.f32 %v4463_v50, 0.0 }
 0x745   : > { %v4625_v51 = vpop.permute.xlu0 %4624 }
 0x746   : > { %v4691_v42 = vadd.f32 %v4625_v51, %v4494_v16 }
 0x748   : > { %v4724_v20 = vmul.f32 %v13017_v34, %v4691_v42  ;;  %8524 = vrot.lane.b32.xlu1 %v13080_v12, %s9384_s11  ;;  %8514 = vrot.lane.b32.xlu2 %v13080_v12, %s9383_s10 }
 0x74a   : > { %v13118_v63 = vadd.f32 %v13028_v21, %v4724_v20  ;;  %v4627_v51 = vpop.permute.xlu1 %4626  ;;  %v4629_v42 = vpop.permute.xlu2 %4628 }
 0x74b   : > { %v4692_v19 = vadd.f32 %v4627_v51, %v4495_v61  ;;  %v4693_v37 = vadd.f32 %v4629_v42, %v4496_v11  ;;  %v8302_v11 = vunpack.i.h.bf16 %v8300_v59 }
 0x74c   : > { %15081 = vst [vmem:[#allocation65_spill] sm:$0xff] %v13118_v63  ;;  %v13122_v16 = vpack.i.bf16 %v13118_v63, %v13115_v41 }
 0x74d   : > { %v13124_v56 = vpop.permute.xlu0 %8339  ;;  %v4725_v41 = vmul.f32 %v13017_v34, %v4692_v19  ;;  %v4726_v50 = vmul.f32 %v13017_v34, %v4693_v37  ;;  %v8301_v34 = vunpack.i.l.bf16 %v8300_v59  ;;  %v8272_v37 = vunpack.i.h.bf16 %v12974_v14 }
 0x74e   : > { %8544 = vrot.lane.b32.xlu0 %v13122_v16, %s9383_s10  ;;  %v8242_v59 = vunpack.i.h.bf16 %v12972_v30 }
 0x74f   : > { %v13141_v61 = vadd.f32 %v13028_v21, %v4725_v41  ;;  %v13144_v51 = vadd.f32 %v13028_v21, %v4726_v50  ;;  %v8271_v21 = vunpack.i.l.bf16 %v12974_v14 }
 0x750   : > { %8549 = vrot.lane.b32.xlu1 %v13122_v16, %s9386_s14  ;;  %8529 = vrot.lane.b32.xlu2 %v13080_v12, %s9385_s12 }
 0x751   : > { %15082 = vst [vmem:[#allocation21_spill] sm:$0xff] %v13144_v51  ;;  %v13157_v41 = vpack.i.bf16 %v13144_v51, %v13141_v61 }
 0x752   : > { %v8330_v52 = vpop.permute.xlu1 %8329  ;;  %v13132_v28 = vpop.permute.xlu2 %8359 }
 0x753   : > { %v8332_v20 = vunpack.i.h.bf16 %v8330_v52  ;;  %v8331_v13 = vunpack.i.l.bf16 %v8330_v52 }
 0x755   : > { %v13136_v63 = vpop.permute.xlu0 %8354  ;;  %4905 = vmatpush.msra.mxu2 %v8332_v20  ;;  %v8241_v20 = vunpack.i.l.bf16 %v12972_v30  ;;  %v8176_v30 = vunpack.i.l.bf16 %v12794_v5 }
 0x756   : > { %8559 = vrot.lane.b32.xlu0 %v13122_v16, %s9385_s12 }
 0x757   : > { %4906 = vmatpush.msra.mxu2 %v8331_v13  ;;  %v8212_v13 = vunpack.i.h.bf16 %v12910_v44 }
 0x758   : > { %8564 = vrot.lane.b32.xlu1 %v13122_v16, %s9388_s16  ;;  %8539 = vrot.lane.b32.xlu2 %v13122_v16, %s9382_s29 }
 0x759   : > { %4907 = vmatpush.msra.mxu2 %v8302_v11  ;;  %v8211_v11 = vunpack.i.l.bf16 %v12910_v44 }
 0x75a   : > { %v13150_v42 = vpop.permute.xlu1 %8344  ;;  %v13152_v19 = vpop.permute.xlu2 %8374 }
 0x75b   : > { %15083 = vst [vmem:[#allocation67_spill] sm:$0xff] %v13152_v19  ;;  %4908 = vmatpush.msra.mxu2 %v8301_v34  ;;  %v4760_v19 = vld [vmem:[#allocation4] sm:$0xff] }
 0x75d   : > { %v13160_v52 = vpop.permute.xlu0 %8364  ;;  %4909 = vmatpush.msra.mxu2 %v8272_v37  ;;  %v8177_v37 = vunpack.i.h.bf16 %v12794_v5  ;;  %v8106_v5 = vunpack.i.l.bf16 %v12712_v48 }
 0x75e   : > { %8569 = vrot.lane.b32.xlu0 %v13157_v41, %s9382_s29  ;;  %s9395_s29 = smov 114  }
 0x75f   : > { %4910 = vmatpush.msra.mxu2 %v8271_v21 }
 0x760   : > { %8579 = vrot.lane.b32.xlu1 %v12667_v29, %s9387_s15  ;;  %8554 = vrot.lane.b32.xlu2 %v13122_v16, %s9384_s11 }
 0x761   : > { %4911 = vmatpush.msra.mxu2 %v8242_v59  ;;  %v8142_v59 = vunpack.i.h.bf16 %v12792_v26 }
 0x762   : > { %v13170_v50 = vpop.permute.xlu1 %8369  ;;  %v13172_v14 = vpop.permute.xlu2 %8399 }
 0x763   : > { %4912 = vmatpush.msra.mxu2 %v8241_v20  ;;  %v8141_v20 = vunpack.i.l.bf16 %v12792_v26 }
 0x765   : > { %v13176_v34 = vpop.permute.xlu0 %8379  ;;  %4913 = vmatpush.msra.mxu2 %v8212_v13 }
 0x766   : > { %15084 = vst [vmem:[#allocation18_spill] sm:$0xff] %v13176_v34  ;;  %8574 = vrot.lane.b32.xlu0 %v12618_v8, %s9387_s15 }
 0x767   : > { %4914 = vmatpush.msra.mxu2 %v8211_v11  ;;  %v8107_v11 = vunpack.i.h.bf16 %v12712_v48 }
 0x768   : > { %8594 = vrot.lane.b32.xlu1 %v12838_v39, %s9387_s15  ;;  %8584 = vrot.lane.b32.xlu2 %v12720_v47, %s9387_s15 }
 0x769   : > { %4915 = vmatpush.msra.mxu2 %v8177_v37 }
 0x76a   : > { %v13186_v21 = vpop.permute.xlu1 %8384  ;;  %v13188_v44 = vpop.permute.xlu2 %8414 }
 0x76b   : > { %15085 = vst [vmem:[#allocation68_spill] sm:$0xff] %v13186_v21  ;;  %4916 = vmatpush.msra.mxu2 %v8176_v30  ;;  %v4769_v30 = vld [vmem:[#allocation4 + $0x40] sm:$0xff] }
 0x76c   : > { %15086 = vst [vmem:[#allocation17_spill] sm:$0xff] %v13188_v44 }
 0x76d   : > { %v13192_v13 = vpop.permute.xlu0 %8389  ;;  %4917 = vmatpush.msra.mxu2 %v8142_v59 }
 0x76e   : > { %8589 = vrot.lane.b32.xlu0 %v12771_v36, %s9387_s15 }
 0x76f   : > { %4918 = vmatpush.msra.mxu2 %v8141_v20 }
 0x770   : > { %8609 = vrot.lane.b32.xlu1 %v12960_v53, %s9387_s15  ;;  %8599 = vrot.lane.b32.xlu2 %v12879_v62, %s9387_s15 }
 0x771   : > { %4919 = vmatpush.msra.mxu2 %v8107_v11  ;;  %v4771_v11 = vld [vmem:[#allocation4 + $0x50] sm:$0xff] }
 0x772   : > { %v13202_v37 = vpop.permute.xlu1 %8394  ;;  %v13204_v26 = vpop.permute.xlu2 %8424 }
 0x773   : > { %4920 = vmatpush.msra.mxu2 %v8106_v5 }
 0x774   : > { %4921 = vmatmul.f32.vlgmr.msra.gmra.mxu2 %v4769_v30 }
 0x775   : > { %4963 = vmatpush.msrb.mxu2 %v12820_v22  ;;  %v13207_v59 = vpop.permute.xlu0 %8404 }
 0x776   : > { %15087 = vst [vmem:[#allocation71_spill] sm:$0xff] %v13207_v59  ;;  %8604 = vrot.lane.b32.xlu0 %v12922_v31, %s9387_s15 }
 0x777   : > { %4964 = vmatpush.msrb.mxu2 %v12829_v57 }
 0x778   : > { %8624 = vrot.lane.b32.xlu1 %v13080_v12, %s9387_s15  ;;  %8614 = vrot.lane.b32.xlu2 %v13002_v38, %s9387_s15 }
 0x779   : > { %4965 = vmatpush.msrb.mxu2 %v12762_v46 }
 0x77a   : > { %v13217_v48 = vpop.permute.xlu1 %8409  ;;  %v13220_v20 = vpop.permute.xlu2 %8439 }
 0x77b   : > { %15088 = vst [vmem:[#allocation19_spill] sm:$0xff] %v13217_v48  ;;  %4966 = vmatpush.msrb.mxu2 %v12755_v7  ;;  %v8337_v48 = vunpack.i.h.bf16 %v13084_v15 }
 0x77c   : > { %15089 = vst [vmem:[#allocation16_spill] sm:$0xff] %v13220_v20  ;;  %4924 = vmatmul.f32.gmra.mxu2 %v4771_v11  ;;  %v4773_v11 = vld [vmem:[#allocation4 + $0x60] sm:$0xff] }
 0x77d   : > { %4967 = vmatpush.msrb.mxu2 %v12702_v23  ;;  %v13223_v5 = vpop.permute.xlu0 %8429 }
 0x77e   : > { %8619 = vrot.lane.b32.xlu0 %v13046_v58, %s9387_s15 }
 0x77f   : > { %4968 = vmatpush.msrb.mxu2 %v12710_v18 }
 0x780   : > { %8634 = vrot.lane.b32.xlu1 %v12484_v24, %s9379_s24  ;;  %8629 = vrot.lane.b32.xlu2 %v13122_v16, %s9387_s15 }
 0x781   : > { %4969 = vmatpush.msrb.mxu2 %v12653_v2 }
 0x782   : > { %v13233_v30 = vpop.permute.xlu1 %8419  ;;  %v13236_v21 = vpop.permute.xlu2 %8449 }
 0x783   : > { %4970 = vmatpush.msrb.mxu2 %v12658_v1 }
 0x784   : > { %4927 = vmatmul.f32.gmra.mxu2 %v4773_v11  ;;  %v4775_v11 = vld [vmem:[#allocation4 + $0x70] sm:$0xff] }
 0x785   : > { %4971 = vmatpush.msrb.mxu2 %v12609_v33  ;;  %v13239_v44 = vpop.permute.xlu0 %8444 }
 0x786   : > { %15090 = vst [vmem:[#allocation69_spill] sm:$0xff] %v13239_v44  ;;  %8644 = vrot.lane.b32.xlu0 %v12579_v3, %s9379_s24 }
 0x787   : > { %4972 = vmatpush.msrb.mxu2 %v12604_v25 }
 0x788   : > { %8649 = vrot.lane.b32.xlu1 %v12618_v8, %s9379_s24  ;;  %8639 = vrot.lane.b32.xlu2 %v12535_v54, %s9379_s24 }
 0x789   : > { %4973 = vmatpush.msrb.mxu2 %v12569_v10 }
 0x78a   : > { %v13249_v22 = vpop.permute.xlu1 %8434  ;;  %v13252_v34 = vpop.permute.xlu2 %8464 }
 0x78b   : > { %15091 = vst [vmem:[#allocation72_spill] sm:$0xff] %v13249_v22  ;;  %4974 = vmatpush.msrb.mxu2 %v12573_v40  ;;  %v8336_v40 = vunpack.i.l.bf16 %v13084_v15  ;;  %v15101_v22 = vld [vmem:[#allocation28_spill] sm:$0xff] }
 0x78c   : > { %15092 = vst [vmem:[#allocation9_spill] sm:$0xff] %v13252_v34  ;;  %4930 = vmatmul.f32.gmra.mxu2 %v4775_v11 }
 0x78d   : > { %4975 = vmatpush.msrb.mxu2 %v12525_v4  ;;  %v13255_v44 = vpop.permute.xlu0 %8454  ;;  %v15093_v4 = vld [vmem:[#allocation22_spill] sm:$0xff] }
 0x78e   : > { %8659 = vrot.lane.b32.xlu0 %v12720_v47, %s9379_s24 }
 0x78f   : > { %4976 = vmatpush.msrb.mxu2 %v12529_v32  ;;  %v8307_v32 = vunpack.i.h.bf16 %v13082_v9 }
 0x790   : > { %8664 = vrot.lane.b32.xlu1 %v12771_v36, %s9379_s24  ;;  %8654 = vrot.lane.b32.xlu2 %v12667_v29, %s9379_s24 }
 0x791   : > { %4977 = vmatpush.msrb.mxu2 %v12476_v55  ;;  %v8306_v55 = vunpack.i.l.bf16 %v13082_v9  ;;  %v8247_v9 = vunpack.i.h.bf16 %v12926_v60 }
 0x792   : > { %v13266_v20 = vpop.permute.xlu1 %8459  ;;  %v13269_v11 = vpop.permute.xlu2 %8489 }
 0x793   : > { %4978 = vmatpush.msrb.mxu2 %v15093_v4  ;;  %v8277_v4 = vunpack.i.h.bf16 %v13036_v17 }
 0x794   : > { %4979 = vmatmul.f32.vlgmr.msrb.gmra.mxu2 %v4760_v19  ;;  %v4762_v19 = vld [vmem:[#allocation4 + $0x10] sm:$0xff] }
 0x795   : > { %5126 = vmatpush.msra.mxu2 %v8337_v48  ;;  %v13273_v59 = vpop.permute.xlu0 %8469 }
 0x796   : > { %15094 = vst [vmem:[#allocation10_spill] sm:$0xff] %v13273_v59  ;;  %8674 = vrot.lane.b32.xlu0 %v12879_v62, %s9379_s24  ;;  %v8246_v59 = vunpack.i.l.bf16 %v12926_v60  ;;  %v8182_v60 = vunpack.i.h.bf16 %v12864_v49 }
 0x797   : > { %5127 = vmatpush.msra.mxu2 %v8336_v40  ;;  %v8276_v40 = vunpack.i.l.bf16 %v13036_v17 }
 0x798   : > { %8679 = vrot.lane.b32.xlu1 %v12922_v31, %s9379_s24  ;;  %8669 = vrot.lane.b32.xlu2 %v12838_v39, %s9379_s24 }
 0x799   : > { %5128 = vmatpush.msra.mxu2 %v8307_v32 }
 0x79a   : > { %v13283_v15 = vpop.permute.xlu1 %8474  ;;  %v13285_v48 = vpop.permute.xlu2 %8504 }
 0x79b   : > { %5129 = vmatpush.msra.mxu2 %v8306_v55  ;;  %15095 = vst [vmem:[#allocation70_spill] sm:$0xff] %v13283_v15  ;;  %v8217_v55 = vunpack.i.h.bf16 %v12924_v35  ;;  %v8181_v15 = vunpack.i.l.bf16 %v12864_v49  ;;  %v8112_v49 = vunpack.i.h.bf16 %v15101_v22 }
 0x79c   : > { %15096 = vst [vmem:[#allocation73_spill] sm:$0xff] %v13285_v48  ;;  %4982 = vmatmul.f32.gmra.mxu2 %v4762_v19  ;;  %v4764_v19 = vld [vmem:[#allocation4 + $0x20] sm:$0xff] }
 0x79d   : > { %5130 = vmatpush.msra.mxu2 %v8277_v4  ;;  %v13289_v32 = vpop.permute.xlu0 %8479 }
 0x79e   : > { %8689 = vrot.lane.b32.xlu0 %v13002_v38, %s9379_s24 }
 0x79f   : > { %5131 = vmatpush.msra.mxu2 %v8276_v40  ;;  %v8216_v40 = vunpack.i.l.bf16 %v12924_v35 }
 0x7a0   : > { %8694 = vrot.lane.b32.xlu1 %v13157_v41, %s9383_s10  ;;  %8684 = vrot.lane.b32.xlu2 %v12960_v53, %s9379_s24 }
 0x7a1   : > { %5132 = vmatpush.msra.mxu2 %v8247_v9 }
 0x7a2   : > { %v13299_v4 = vpop.permute.xlu1 %8484  ;;  %v13301_v17 = vpop.permute.xlu2 %8514 }
 0x7a3   : > { %5133 = vmatpush.msra.mxu2 %v8246_v59  ;;  %v15098_v59 = vld [vmem:[#allocation35_spill] sm:$0xff] }
 0x7a4   : > { %4985 = vmatmul.f32.gmra.mxu2 %v4764_v19  ;;  %v8147_v48 = vunpack.i.h.bf16 %v15098_v59  ;;  %v4766_v19 = vld [vmem:[#allocation4 + $0x30] sm:$0xff] }
 0x7a5   : > { %5134 = vmatpush.msra.mxu2 %v8217_v55  ;;  %v13305_v9 = vpop.permute.xlu0 %8494 }
 0x7a6   : > { %15097 = vst [vmem:[#allocation7_spill] sm:$0xff] %v13305_v9  ;;  %8709 = vrot.lane.b32.xlu0 %v13122_v16, %s9379_s24 }
 0x7a7   : > { %5135 = vmatpush.msra.mxu2 %v8216_v40  ;;  %v8146_v40 = vunpack.i.l.bf16 %v15098_v59 }
 0x7a8   : > { %8699 = vrot.lane.b32.xlu1 %v13046_v58, %s9379_s24  ;;  %8704 = vrot.lane.b32.xlu2 %v13080_v12, %s9379_s24 }
 0x7a9   : > { %5136 = vmatpush.msra.mxu2 %v8182_v60 }
 0x7aa   : > { %v13315_v35 = vpop.permute.xlu1 %8499  ;;  %v13317_v55 = vpop.permute.xlu2 %8529 }
 0x7ab   : > { %5137 = vmatpush.msra.mxu2 %v8181_v15  ;;  %15099 = vst [vmem:[#allocation15_spill] sm:$0xff] %v13315_v35  ;;  %v8111_v15 = vunpack.i.l.bf16 %v15101_v22  ;;  %v8342_v35 = vunpack.i.h.bf16 %v13124_v56  ;;  %v5022_v22 = vld [vmem:[#allocation4 + $0x80] sm:$0xff] }
 0x7ac   : > { %15100 = vst [vmem:[#allocation35_spill] sm:$0xff] %v13317_v55  ;;  %4988 = vmatmul.f32.gmra.mxu2 %v4766_v19  ;;  %v8312_v19 = vunpack.i.h.bf16 %v13050_v6 }
 0x7ad   : > { %5138 = vmatpush.msra.mxu2 %v8147_v48  ;;  %v13321_v60 = vpop.permute.xlu0 %8519  ;;  %v8341_v48 = vunpack.i.l.bf16 %v13124_v56  ;;  %v8281_v56 = vunpack.i.l.bf16 %v13021_v43 }
 0x7ae   : > { %8719 = vrot.lane.b32.xlu0 %v12535_v54, %s9389_s23 }
 0x7af   : > { %5139 = vmatpush.msra.mxu2 %v8146_v40 }
 0x7b0   : > { %8724 = vrot.lane.b32.xlu1 %v12579_v3, %s9389_s23  ;;  %8714 = vrot.lane.b32.xlu2 %v12484_v24, %s9389_s23 }
 0x7b1   : > { %5140 = vmatpush.msra.mxu2 %v8112_v49  ;;  %v8311_v49 = vunpack.i.l.bf16 %v13050_v6 }
 0x7b2   : > { %v13332_v59 = vpop.permute.xlu1 %8509  ;;  %v13334_v40 = vpop.permute.xlu2 %8539 }
 0x7b3   : > { %5141 = vmatpush.msra.mxu2 %v8111_v15  ;;  %v8282_v15 = vunpack.i.h.bf16 %v13021_v43  ;;  %v8221_v43 = vunpack.i.l.bf16 %v12885_v0 }
 0x7b4   : > { %5142 = vmatmul.f32.vlgmr.msra.gmra.mxu2 %v5022_v22  ;;  %v8251_v22 = vunpack.i.l.bf16 %v12964_v27 }
 0x7b5   : > { %5293 = vmatpush.msrb.mxu2 %v8342_v35  ;;  %v13341_v55 = vpop.permute.xlu0 %8534 }
 0x7b6   : > { %8734 = vrot.lane.b32.xlu0 %v12667_v29, %s9389_s23  ;;  %15102 = vst [vmem:[#allocation28_spill] sm:$0xff] %v13341_v55 }
 0x7b7   : > { %5294 = vmatpush.msrb.mxu2 %v8341_v48  ;;  %v8252_v48 = vunpack.i.h.bf16 %v12964_v27 }
 0x7b8   : > { %8739 = vrot.lane.b32.xlu1 %v12720_v47, %s9389_s23  ;;  %8729 = vrot.lane.b32.xlu2 %v12618_v8, %s9389_s23 }
 0x7b9   : > { %5295 = vmatpush.msrb.mxu2 %v8312_v19  ;;  %v5024_v19 = vld [vmem:[#allocation4 + $0x90] sm:$0xff] }
 0x7ba   : > { %v13348_v35 = vpop.permute.xlu1 %8524  ;;  %v13350_v6 = vpop.permute.xlu2 %8554 }
 0x7bb   : > { %5296 = vmatpush.msrb.mxu2 %v8311_v49  ;;  %15103 = vst [vmem:[#allocation75_spill] sm:$0xff] %v13348_v35  ;;  %v8222_v49 = vunpack.i.h.bf16 %v12885_v0 }
 0x7bc   : > { %5145 = vmatmul.f32.gmra.mxu2 %v5024_v19  ;;  %v8186_v19 = vunpack.i.l.bf16 %v12854_v45 }
 0x7bd   : > { %5297 = vmatpush.msrb.mxu2 %v8282_v15 }
 0x7be   : > { %8749 = vrot.lane.b32.xlu0 %v12838_v39, %s9389_s23 }
 0x7bf   : > { %5298 = vmatpush.msrb.mxu2 %v8281_v56  ;;  %v8187_v56 = vunpack.i.h.bf16 %v12854_v45 }
 0x7c0   : > { %v13357_v55 = vpop.permute.xlu0 %8544  ;;  %8754 = vrot.lane.b32.xlu1 %v12879_v62, %s9389_s23  ;;  %8744 = vrot.lane.b32.xlu2 %v12771_v36, %s9389_s23 }
 0x7c1   : > { %5299 = vmatpush.msrb.mxu2 %v8252_v48  ;;  %v5026_v48 = vld [vmem:[#allocation4 + $0xa0] sm:$0xff] }
 0x7c2   : > { %v13364_v15 = vpop.permute.xlu1 %8549  ;;  %v13366_v27 = vpop.permute.xlu2 %8584 }
 0x7c3   : > { %5300 = vmatpush.msrb.mxu2 %v8251_v22  ;;  %v15104_v22 = vld [vmem:[#allocation27_spill] sm:$0xff] }
 0x7c4   : > { %5148 = vmatmul.f32.gmra.mxu2 %v5026_v48  ;;  %v8152_v34 = vunpack.i.h.bf16 %v15104_v22  ;;  %v8151_v0 = vunpack.i.l.bf16 %v15104_v22  ;;  %v5028_v48 = vld [vmem:[#allocation4 + $0xb0] sm:$0xff]  ;;  %v8346_v22 = vunpack.i.l.bf16 %v13150_v42 }
 0x7c5   : > { %5301 = vmatpush.msrb.mxu2 %v8222_v49 }
 0x7c6   : > { %8769 = vrot.lane.b32.xlu0 %v12960_v53, %s9389_s23 }
 0x7c7   : > { %5302 = vmatpush.msrb.mxu2 %v8221_v43  ;;  %v15108_v43 = vld [vmem:[#allocation26_spill] sm:$0xff] }
 0x7c8   : > { %v13373_v9 = vpop.permute.xlu0 %8559  ;;  %8774 = vrot.lane.b32.xlu1 %v13002_v38, %s9389_s23  ;;  %8759 = vrot.lane.b32.xlu2 %v13157_v41, %s9386_s14 }
 0x7c9   : > { %5303 = vmatpush.msrb.mxu2 %v8187_v56  ;;  %15105 = vst [vmem:[#allocation27_spill] sm:$0xff] %v13373_v9  ;;  %v8117_v56 = vunpack.i.h.bf16 %v15108_v43  ;;  %v8116_v9 = vunpack.i.l.bf16 %v15108_v43 }
 0x7ca   : > { %v13380_v49 = vpop.permute.xlu1 %8564  ;;  %v13382_v45 = vpop.permute.xlu2 %8599 }
 0x7cb   : > { %5304 = vmatpush.msrb.mxu2 %v8186_v19  ;;  %15106 = vst [vmem:[#allocation76_spill] sm:$0xff] %v13380_v49  ;;  %v8347_v19 = vunpack.i.h.bf16 %v13150_v42  ;;  %v5189_v42 = vld [vmem:[#allocation4 + $0xc0] sm:$0xff] }
 0x7cc   : > { %15107 = vst [vmem:[#allocation77_spill] sm:$0xff] %v13382_v45  ;;  %5151 = vmatmul.f32.gmra.mxu2 %v5028_v48  ;;  %v8542_v48 = vunpack.i.h.bf16 %v13334_v40 }
 0x7cd   : > { %5305 = vmatpush.msrb.mxu2 %v8152_v34 }
 0x7ce   : > { %8784 = vrot.lane.b32.xlu0 %v13080_v12, %s9389_s23 }
 0x7cf   : > { %5306 = vmatpush.msrb.mxu2 %v8151_v0 }
 0x7d0   : > { %8789 = vrot.lane.b32.xlu1 %v13122_v16, %s9389_s23  ;;  %v8570_v34 = vpop.permute.xlu0 %8569  ;;  %8764 = vrot.lane.b32.xlu2 %v12922_v31, %s9389_s23 }
 0x7d1   : > { %5307 = vmatpush.msrb.mxu2 %v8117_v56  ;;  %v8572_v0 = vunpack.i.h.bf16 %v8570_v34  ;;  %v15109_v56 = vld [vmem:[#allocation56_spill] sm:$0xff]  ;;  %v8571_v49 = vunpack.i.l.bf16 %v8570_v34  ;;  %v15111_v34 = vld [vmem:[#allocation62_spill] sm:$0xff] }
 0x7d2   : > { %v13394_v43 = vpop.permute.xlu1 %8579  ;;  %v8317_v45 = vunpack.i.h.bf16 %v15109_v56  ;;  %v13397_v10 = vpop.permute.xlu2 %8614  ;;  %v8287_v35 = vunpack.i.h.bf16 %v15111_v34 }
 0x7d3   : > { %5308 = vmatpush.msrb.mxu2 %v8116_v9  ;;  %15110 = vst [vmem:[#allocation26_spill] sm:$0xff] %v13397_v10  ;;  %4934 = vmatpush.msra.mxu3 %v8572_v0  ;;  %v8316_v9 = vunpack.i.l.bf16 %v15109_v56  ;;  %v8511_v0 = vunpack.i.l.bf16 %v13332_v59 }
 0x7d4   : > { %5309 = vmatmul.f32.vlgmr.msrb.gmra.mxu2 %v5189_v42  ;;  %v8482_v42 = vunpack.i.h.bf16 %v13289_v32 }
 0x7d5   : > { %5460 = vmatpush.msra.mxu2 %v8347_v19  ;;  %4935 = vmatpush.msra.mxu3 %v8571_v49  ;;  %v8541_v19 = vunpack.i.l.bf16 %v13334_v40  ;;  %v8512_v49 = vunpack.i.h.bf16 %v13332_v59 }
 0x7d6   : > { %8794 = vrot.lane.b32.xlu0 %v12484_v24, %s9390_s25 }
 0x7d7   : > { %5461 = vmatpush.msra.mxu2 %v8346_v22  ;;  %4936 = vmatpush.msra.mxu3 %v8542_v48 }
 0x7d8   : > { %8799 = vrot.lane.b32.xlu1 %v12535_v54, %s9390_s25  ;;  %v13407_v22 = vpop.permute.xlu0 %8574  ;;  %8779 = vrot.lane.b32.xlu2 %v13046_v58, %s9389_s23 }
 0x7d9   : > { %5462 = vmatpush.msra.mxu2 %v8317_v45  ;;  %4937 = vmatpush.msra.mxu3 %v8541_v19  ;;  %v8286_v45 = vunpack.i.l.bf16 %v15111_v34  ;;  %v15114_v19 = vld [vmem:[#allocation36_spill] sm:$0xff] }
 0x7da   : > { %v13413_v40 = vpop.permute.xlu1 %8594  ;;  %v13416_v56 = vpop.permute.xlu2 %8629  ;;  %v8227_v59 = vunpack.i.h.bf16 %v15114_v19 }
 0x7db   : > { %5463 = vmatpush.msra.mxu2 %v8316_v9  ;;  %15112 = vst [vmem:[#allocation56_spill] sm:$0xff] %v13416_v56  ;;  %4938 = vmatpush.msra.mxu3 %v8512_v49  ;;  %v15113_v9 = vld [vmem:[#allocation63_spill] sm:$0xff]  ;;  %v5191_v49 = vld [vmem:[#allocation4 + $0xd0] sm:$0xff]  ;;  %v8422_v56 = vunpack.i.h.bf16 %v13233_v30 }
 0x7dc   : > { %v8257_v48 = vunpack.i.h.bf16 %v15113_v9  ;;  %v8256_v10 = vunpack.i.l.bf16 %v15113_v9  ;;  %v8451_v9 = vunpack.i.l.bf16 %v13236_v21  ;;  %5312 = vmatmul.f32.gmra.mxu2 %v5191_v49  ;;  %v5193_v49 = vld [vmem:[#allocation4 + $0xe0] sm:$0xff] }
 0x7dd   : > { %5464 = vmatpush.msra.mxu2 %v8287_v35  ;;  %4939 = vmatpush.msra.mxu3 %v8511_v0  ;;  %v8481_v35 = vunpack.i.l.bf16 %v13289_v32  ;;  %v8226_v0 = vunpack.i.l.bf16 %v15114_v19 }
 0x7de   : > { %8809 = vrot.lane.b32.xlu0 %v13157_v41, %s9384_s11 }
 0x7df   : > { %5465 = vmatpush.msra.mxu2 %v8286_v45  ;;  %4940 = vmatpush.msra.mxu3 %v8482_v42  ;;  %v8452_v45 = vunpack.i.h.bf16 %v13236_v21  ;;  %v15117_v21 = vld [vmem:[#allocation38_spill] sm:$0xff] }
 0x7e0   : > { %8819 = vrot.lane.b32.xlu1 %v12667_v29, %s9390_s25  ;;  %v13427_v34 = vpop.permute.xlu0 %8589  ;;  %8804 = vrot.lane.b32.xlu2 %v12579_v3, %s9390_s25  ;;  %v8157_v19 = vunpack.i.h.bf16 %v15117_v21 }
 0x7e1   : > { %5466 = vmatpush.msra.mxu2 %v8257_v48  ;;  %4941 = vmatpush.msra.mxu3 %v8481_v35  ;;  %v15116_v48 = vld [vmem:[#allocation29_spill] sm:$0xff]  ;;  %v8421_v35 = vunpack.i.l.bf16 %v13233_v30 }
 0x7e2   : > { %v13433_v32 = vpop.permute.xlu1 %8609  ;;  %v8192_v42 = vunpack.i.h.bf16 %v15116_v48  ;;  %v8191_v25 = vunpack.i.l.bf16 %v15116_v48 }
 0x7e3   : > { %5467 = vmatpush.msra.mxu2 %v8256_v10  ;;  %15115 = vst [vmem:[#allocation62_spill] sm:$0xff] %v13433_v32  ;;  %v13436_v10 = vpop.permute.xlu2 %8639  ;;  %4942 = vmatpush.msra.mxu3 %v8452_v45  ;;  %v8392_v45 = vunpack.i.h.bf16 %v13192_v13 }
 0x7e4   : > { %5315 = vmatmul.f32.gmra.mxu2 %v5193_v49 }
 0x7e5   : > { %5468 = vmatpush.msra.mxu2 %v8227_v59  ;;  %4943 = vmatpush.msra.mxu3 %v8451_v9  ;;  %v15120_v9 = vld [vmem:[#allocation24_spill] sm:$0xff] }
 0x7e6   : > { %8814 = vrot.lane.b32.xlu0 %v12618_v8, %s9390_s25  ;;  %v8122_v48 = vunpack.i.h.bf16 %v15120_v9 }
 0x7e7   : > { %5469 = vmatpush.msra.mxu2 %v8226_v0  ;;  %4944 = vmatpush.msra.mxu3 %v8422_v56  ;;  %v8156_v0 = vunpack.i.l.bf16 %v15117_v21  ;;  %v8391_v56 = vunpack.i.l.bf16 %v13192_v13  ;;  %v8361_v13 = vunpack.i.l.bf16 %v13132_v28 }
 0x7e8   : > { %8834 = vrot.lane.b32.xlu1 %v12838_v39, %s9390_s25  ;;  %v13447_v59 = vpop.permute.xlu0 %8604  ;;  %8824 = vrot.lane.b32.xlu2 %v12720_v47, %s9390_s25 }
 0x7e9   : > { %5470 = vmatpush.msra.mxu2 %v8192_v42  ;;  %15118 = vst [vmem:[#allocation63_spill] sm:$0xff] %v13447_v59  ;;  %4945 = vmatpush.msra.mxu3 %v8421_v35  ;;  %v8362_v42 = vunpack.i.h.bf16 %v13132_v28  ;;  %v8121_v59 = vunpack.i.l.bf16 %v15120_v9  ;;  %v15121_v35 = vld [vmem:[#allocation49_spill] sm:$0xff] }
 0x7ea   : > { %v13453_v30 = vpop.permute.xlu1 %8624  ;;  %v8352_v21 = vunpack.i.h.bf16 %v15121_v35  ;;  %v8351_v49 = vunpack.i.l.bf16 %v15121_v35  ;;  %v15123_v9 = vld [vmem:[#allocation61_spill] sm:$0xff] }
 0x7eb   : > { %5471 = vmatpush.msra.mxu2 %v8191_v25  ;;  %15119 = vst [vmem:[#allocation36_spill] sm:$0xff] %v13453_v30  ;;  %v13456_v25 = vpop.permute.xlu2 %8654  ;;  %4946 = vmatpush.msra.mxu3 %v8392_v45  ;;  %v4770_v45 = vld [vmem:[#allocation4 + $0x48] sm:$0xff]  ;;  %v15136_v30 = vld [vmem:[#allocation53_spill] sm:$0xff] }
 0x7ed   : > { %5472 = vmatpush.msra.mxu2 %v8157_v19  ;;  %4947 = vmatpush.msra.mxu3 %v8391_v56 }
 0x7ee   : > { %8829 = vrot.lane.b32.xlu0 %v12771_v36, %s9390_s25 }
 0x7ef   : > { %5473 = vmatpush.msra.mxu2 %v8156_v0  ;;  %4948 = vmatpush.msra.mxu3 %v8362_v42  ;;  %v5195_v0 = vld [vmem:[#allocation4 + $0xf0] sm:$0xff]  ;;  %v15124_v42 = vld [vmem:[#allocation66_spill] sm:$0xff] }
 0x7f0   : > { %8849 = vrot.lane.b32.xlu1 %v12960_v53, %s9390_s25  ;;  %v13467_v19 = vpop.permute.xlu0 %8619  ;;  %8839 = vrot.lane.b32.xlu2 %v12879_v62, %s9390_s25  ;;  %v8292_v35 = vunpack.i.h.bf16 %v15124_v42 }
 0x7f1   : > { %5474 = vmatpush.msra.mxu2 %v8122_v48  ;;  %15122 = vst [vmem:[#allocation29_spill] sm:$0xff] %v13467_v19  ;;  %4949 = vmatpush.msra.mxu3 %v8361_v13  ;;  %v8322_v48 = vunpack.i.h.bf16 %v15123_v9 }
 0x7f2   : > { %v13472_v56 = vpop.permute.xlu1 %8634  ;;  %4950 = vmatmul.f32.vlgmr.msra.gmra.mxu3 %v4770_v45  ;;  %5318 = vmatmul.f32.gmra.mxu2 %v5195_v0  ;;  %v5356_v45 = vld [vmem:[#allocation4 + $0x100] sm:$0xff]  ;;  %v15126_v0 = vld [vmem:[#allocation57_spill] sm:$0xff] }
 0x7f3   : > { %5475 = vmatpush.msra.mxu2 %v8121_v59  ;;  %v8670_v28 = vpop.permute.xlu2 %8669  ;;  %4992 = vmatpush.msrb.mxu3 %v13144_v51  ;;  %v8321_v59 = vunpack.i.l.bf16 %v15123_v9  ;;  %v4772_v9 = vld [vmem:[#allocation4 + $0x58] sm:$0xff] }
 0x7f4   : > { %v8672_v53 = vunpack.i.h.bf16 %v8670_v28  ;;  %v8671_v62 = vunpack.i.l.bf16 %v8670_v28  ;;  %v15138_v51 = vld [vmem:[#allocation30_spill] sm:$0xff] }
 0x7f5   : > { %5627 = vmatpush.msrb.mxu2 %v8352_v21  ;;  %4993 = vmatpush.msrb.mxu3 %v13141_v61  ;;  %v15125_v21 = vld [vmem:[#allocation65_spill] sm:$0xff]  ;;  %v8162_v33 = vunpack.i.h.bf16 %v15138_v51 }
 0x7f6   : > { %6128 = vmatpush.msrb.mxu0 %v8672_v53  ;;  %8844 = vrot.lane.b32.xlu0 %v12922_v31, %s9390_s25 }
 0x7f7   : > { %5628 = vmatpush.msrb.mxu2 %v8351_v49  ;;  %4994 = vmatpush.msrb.mxu3 %v15125_v21  ;;  %v8291_v49 = vunpack.i.l.bf16 %v15124_v42 }
 0x7f8   : > { %6129 = vmatpush.msrb.mxu0 %v8671_v62  ;;  %8864 = vrot.lane.b32.xlu1 %v13080_v12, %s9390_s25  ;;  %v13484_v13 = vpop.permute.xlu0 %8644  ;;  %v15129_v12 = vld [vmem:[#allocation58_spill] sm:$0xff]  ;;  %v15130_v62 = vld [vmem:[#allocation60_spill] sm:$0xff] }
 0x7f9   : > { %5629 = vmatpush.msrb.mxu2 %v8322_v48  ;;  %8854 = vrot.lane.b32.xlu2 %v13002_v38, %s9390_s25  ;;  %v15127_v48 = vld [vmem:[#allocation48_spill] sm:$0xff]  ;;  %v15131_v38 = vld [vmem:[#allocation41_spill] sm:$0xff] }
 0x7fa   : > { %4995 = vmatpush.msrb.mxu3 %v15126_v0  ;;  %v13490_v31 = vpop.permute.xlu1 %8649  ;;  %v8262_v28 = vunpack.i.h.bf16 %v15127_v48  ;;  %5476 = vmatmul.f32.vlgmr.msra.gmra.mxu2 %v5356_v45  ;;  %v8232_v42 = vunpack.i.h.bf16 %v15131_v38  ;;  %v8231_v45 = vunpack.i.l.bf16 %v15131_v38 }
 0x7fb   : > { %5630 = vmatpush.msrb.mxu2 %v8321_v59  ;;  %v13493_v53 = vpop.permute.xlu2 %8684  ;;  %v8261_v59 = vunpack.i.l.bf16 %v15127_v48  ;;  %4953 = vmatmul.f32.gmra.mxu3 %v4772_v9  ;;  %v5358_v9 = vld [vmem:[#allocation4 + $0x110] sm:$0xff]  ;;  %v15133_v48 = vld [vmem:[#allocation54_spill] sm:$0xff] }
 0x7fc   : > { %15128 = vst [vmem:[#allocation38_spill] sm:$0xff] %v13493_v53  ;;  %4996 = vmatpush.msrb.mxu3 %v15129_v12  ;;  %v15134_v53 = vld [vmem:[#allocation37_spill] sm:$0xff] }
 0x7fd   : > { %5631 = vmatpush.msrb.mxu2 %v8292_v35  ;;  %v15132_v35 = vld [vmem:[#allocation59_spill] sm:$0xff]  ;;  %v8197_v32 = vunpack.i.h.bf16 %v15134_v53  ;;  %v8196_v38 = vunpack.i.l.bf16 %v15134_v53  ;;  %v8161_v53 = vunpack.i.l.bf16 %v15138_v51  ;;  %v15144_v51 = vld [vmem:[#allocation34_spill] sm:$0xff] }
 0x7fe   : > { %4997 = vmatpush.msrb.mxu3 %v15130_v62  ;;  %8859 = vrot.lane.b32.xlu0 %v13046_v58, %s9390_s25  ;;  %v4774_v58 = vld [vmem:[#allocation4 + $0x68] sm:$0xff] }
 0x7ff   : > { %5632 = vmatpush.msrb.mxu2 %v8291_v49 }
 0x800   : > { %4998 = vmatpush.msrb.mxu3 %v15132_v35  ;;  %8874 = vrot.lane.b32.xlu1 %v13157_v41, %s9385_s12  ;;  %v8660_v49 = vpop.permute.xlu0 %8659 }
 0x801   : > { %5633 = vmatpush.msrb.mxu2 %v8262_v28  ;;  %8869 = vrot.lane.b32.xlu2 %v13122_v16, %s9390_s25  ;;  %v15137_v16 = vld [vmem:[#allocation55_spill] sm:$0xff] }
 0x802   : > { %4999 = vmatpush.msrb.mxu3 %v15133_v48  ;;  %v8665_v28 = vpop.permute.xlu1 %8664  ;;  %5479 = vmatmul.f32.gmra.mxu2 %v5358_v9  ;;  %v8662_v9 = vunpack.i.h.bf16 %v8660_v49 }
 0x803   : > { %5634 = vmatpush.msrb.mxu2 %v8261_v59  ;;  %v8667_v59 = vunpack.i.h.bf16 %v8665_v28  ;;  %v13509_v19 = vpop.permute.xlu2 %8704  ;;  %4956 = vmatmul.f32.gmra.mxu3 %v4774_v58 }
 0x804   : > { %15135 = vst [vmem:[#allocation24_spill] sm:$0xff] %v13509_v19  ;;  %5000 = vmatpush.msrb.mxu3 %v15136_v30 }
 0x805   : > { %5635 = vmatpush.msrb.mxu2 %v8232_v42  ;;  %v8666_v42 = vunpack.i.l.bf16 %v8665_v28  ;;  %6130 = vmatpush.msrb.mxu0 %v8667_v59  ;;  %v15141_v28 = vld [vmem:[#allocation44_spill] sm:$0xff]  ;;  %v8661_v59 = vunpack.i.l.bf16 %v8660_v49  ;;  %v8357_v49 = vunpack.i.h.bf16 %v13136_v63 }
 0x806   : > { %5001 = vmatpush.msrb.mxu3 %v15137_v16  ;;  %8889 = vrot.lane.b32.xlu0 %v12579_v3, %s9391_s26  ;;  %v4776_v3 = vld [vmem:[#allocation4 + $0x78] sm:$0xff] }
 0x807   : > { %5636 = vmatpush.msrb.mxu2 %v8231_v45  ;;  %v15139_v45 = vld [vmem:[#allocation47_spill] sm:$0xff]  ;;  %6131 = vmatpush.msrb.mxu0 %v8666_v42  ;;  %v8127_v42 = vunpack.i.h.bf16 %v15144_v51 }
 0x808   : > { %5002 = vmatpush.msrb.mxu3 %v15139_v45  ;;  %v13518_v19 = vpop.permute.xlu0 %8674  ;;  %8879 = vrot.lane.b32.xlu1 %v12484_v24, %s9391_s26  ;;  %v8126_v24 = vunpack.i.l.bf16 %v15144_v51  ;;  %v8652_v51 = vunpack.i.h.bf16 %v13490_v31 }
 0x809   : > { %5637 = vmatpush.msrb.mxu2 %v8197_v32  ;;  %15140 = vst [vmem:[#allocation49_spill] sm:$0xff] %v13518_v19  ;;  %8884 = vrot.lane.b32.xlu2 %v12535_v54, %s9391_s26  ;;  %v5360_v32 = vld [vmem:[#allocation4 + $0x120] sm:$0xff]  ;;  %v8657_v54 = vunpack.i.h.bf16 %v13456_v25 }
 0x80a   : > { %5003 = vmatpush.msrb.mxu3 %v15141_v28  ;;  %v13526_v58 = vpop.permute.xlu1 %8679  ;;  %6132 = vmatpush.msrb.mxu0 %v8662_v9  ;;  %v15146_v19 = vld [vmem:[#allocation51_spill] sm:$0xff]  ;;  %v15147_v9 = vld [vmem:[#allocation40_spill] sm:$0xff] }
 0x80b   : > { %5638 = vmatpush.msrb.mxu2 %v8196_v38  ;;  %15142 = vst [vmem:[#allocation61_spill] sm:$0xff] %v13526_v58  ;;  %v13528_v38 = vpop.permute.xlu2 %8714  ;;  %4959 = vmatmul.f32.gmra.mxu3 %v4776_v3  ;;  %v8356_v3 = vunpack.i.l.bf16 %v13136_v63 }
 0x80c   : > { %15143 = vst [vmem:[#allocation66_spill] sm:$0xff] %v13528_v38  ;;  %5482 = vmatmul.f32.gmra.mxu2 %v5360_v32  ;;  %6133 = vmatpush.msrb.mxu0 %v8661_v59  ;;  %v5362_v59 = vld [vmem:[#allocation4 + $0x130] sm:$0xff] }
 0x80d   : > { %5639 = vmatpush.msrb.mxu2 %v8162_v33  ;;  %v15145_v33 = vld [vmem:[#allocation50_spill] sm:$0xff] }
 0x80e   : > { %5004 = vmatpush.msrb.mxu3 %v15145_v33  ;;  %6134 = vmatpush.msrb.mxu0 %v8657_v54 }
 0x80f   : > { %5640 = vmatpush.msrb.mxu2 %v8161_v53  ;;  %v8656_v53 = vunpack.i.l.bf16 %v13456_v25  ;;  %8904 = vrot.lane.b32.xlu0 %v12720_v47, %s9391_s26  ;;  %v4761_v47 = vld [vmem:[#allocation4 + $0x8] sm:$0xff] }
 0x810   : > { %5005 = vmatpush.msrb.mxu3 %v15146_v19  ;;  %v13540_v32 = vpop.permute.xlu0 %8689  ;;  %8894 = vrot.lane.b32.xlu1 %v12618_v8, %s9391_s26  ;;  %v8928_v8 = vpack.i.bf16 %v15133_v48, %v15132_v35 }
 0x811   : > { %5641 = vmatpush.msrb.mxu2 %v8127_v42  ;;  %15148 = vst [vmem:[#allocation65_spill] sm:$0xff] %v13540_v32  ;;  %6135 = vmatpush.msrb.mxu0 %v8656_v53  ;;  %v15149_v42 = vld [vmem:[#allocation52_spill] sm:$0xff] }
 0x812   : > { %5006 = vmatpush.msrb.mxu3 %v15147_v9  ;;  %8899 = vrot.lane.b32.xlu2 %v12667_v29, %s9391_s26  ;;  %v8695_v25 = vpop.permute.xlu1 %8694  ;;  %v8327_v54 = vunpack.i.h.bf16 %v15149_v42  ;;  %v8326_v53 = vunpack.i.l.bf16 %v15149_v42  ;;  %v8647_v29 = vunpack.i.h.bf16 %v13484_v13 }
 0x813   : > { %5642 = vmatpush.msrb.mxu2 %v8126_v24  ;;  %v15150_v24 = vld [vmem:[#allocation39_spill] sm:$0xff]  ;;  %v13550_v58 = vpop.permute.xlu2 %8729  ;;  %v8697_v63 = vunpack.i.h.bf16 %v8695_v25  ;;  %6136 = vmatpush.msrb.mxu0 %v8652_v51  ;;  %v8696_v32 = vunpack.i.l.bf16 %v8695_v25  ;;  %v8547_v51 = vunpack.i.h.bf16 %v13357_v55  ;;  %v8642_v25 = vunpack.i.h.bf16 %v13436_v10 }
 0x814   : > { %5007 = vmatpush.msrb.mxu3 %v15150_v24  ;;  %5485 = vmatmul.f32.gmra.mxu2 %v5362_v59 }
 0x815   : > { %5794 = vmatpush.msra.mxu2 %v8357_v49  ;;  %v8651_v49 = vunpack.i.l.bf16 %v13490_v31  ;;  %5008 = vmatmul.f32.vlgmr.msrb.gmra.mxu3 %v4761_v47  ;;  %v8646_v31 = vunpack.i.l.bf16 %v13484_v13  ;;  %v8546_v13 = vunpack.i.l.bf16 %v13357_v55 }
 0x816   : > { %5155 = vmatpush.msra.mxu3 %v8697_v63 }
 0x817   : > { %5795 = vmatpush.msra.mxu2 %v8356_v3  ;;  %6137 = vmatpush.msrb.mxu0 %v8651_v49  ;;  %v15151_v3 = vld [vmem:[#allocation64_spill] sm:$0xff]  ;;  %v8641_v49 = vunpack.i.l.bf16 %v13436_v10  ;;  %v15153_v10 = vld [vmem:[#allocation46_spill] sm:$0xff] }
 0x818   : > { %v8297_v38 = vunpack.i.h.bf16 %v15151_v3  ;;  %8929 = vrot.lane.b32.xlu0 %v8928_v8, %s9391_s26  ;;  %5156 = vmatpush.msra.mxu3 %v8696_v32  ;;  %v13560_v59 = vpop.permute.xlu0 %8709  ;;  %v8296_v47 = vunpack.i.l.bf16 %v15151_v3  ;;  %v8517_v8 = vunpack.i.h.bf16 %v13301_v17  ;;  %v8516_v3 = vunpack.i.l.bf16 %v13301_v17 }
 0x819   : > { %5796 = vmatpush.msra.mxu2 %v8327_v54  ;;  %6138 = vmatpush.msrb.mxu0 %v8647_v29  ;;  %v5523_v54 = vld [vmem:[#allocation4 + $0x140] sm:$0xff]  ;;  %v8237_v29 = vunpack.i.h.bf16 %v15153_v10  ;;  %v8236_v17 = vunpack.i.l.bf16 %v15153_v10 }
 0x81a   : > { %8914 = vrot.lane.b32.xlu2 %v12838_v39, %s9391_s26  ;;  %v13567_v42 = vpop.permute.xlu1 %8699  ;;  %8909 = vrot.lane.b32.xlu1 %v12771_v36, %s9391_s26  ;;  %v8948_v39 = vpack.i.bf16 %v15146_v19, %v15145_v33  ;;  %v8637_v36 = vunpack.i.h.bf16 %v13472_v56 }
 0x81b   : > { %5797 = vmatpush.msra.mxu2 %v8326_v53  ;;  %6139 = vmatpush.msrb.mxu0 %v8646_v31  ;;  %v13572_v32 = vpop.permute.xlu2 %8744  ;;  %v4763_v53 = vld [vmem:[#allocation4 + $0x18] sm:$0xff] }
 0x81c   : > { %5157 = vmatpush.msra.mxu3 %v8547_v51  ;;  %5643 = vmatmul.f32.vlgmr.msrb.gmra.mxu2 %v5523_v54  ;;  %v8636_v51 = vunpack.i.l.bf16 %v13472_v56  ;;  %v8918_v54 = vpack.i.bf16 %v15126_v0, %v15125_v21  ;;  %v5525_v56 = vld [vmem:[#allocation4 + $0x150] sm:$0xff] }
 0x81d   : > { %5798 = vmatpush.msra.mxu2 %v8297_v38  ;;  %v15152_v38 = vld [vmem:[#allocation45_spill] sm:$0xff]  ;;  %6140 = vmatpush.msrb.mxu0 %v8642_v25  ;;  %v8487_v25 = vunpack.i.h.bf16 %v13299_v4 }
 0x81e   : > { %v8267_v63 = vunpack.i.h.bf16 %v15152_v38  ;;  %5158 = vmatpush.msra.mxu3 %v8546_v13  ;;  %v8266_v55 = vunpack.i.l.bf16 %v15152_v38 }
 0x81f   : > { %5799 = vmatpush.msra.mxu2 %v8296_v47  ;;  %6141 = vmatpush.msrb.mxu0 %v8641_v49  ;;  %v8923_v47 = vpack.i.bf16 %v15130_v62, %v15129_v12  ;;  %v4765_v49 = vld [vmem:[#allocation4 + $0x28] sm:$0xff] }
 0x820   : > { %5011 = vmatmul.f32.gmra.mxu3 %v4763_v53  ;;  %8949 = vrot.lane.b32.xlu0 %v8948_v39, %s9391_s26  ;;  %v13584_v31 = vpop.permute.xlu0 %8719  ;;  %v15154_v53 = vld [vmem:[#allocation43_spill] sm:$0xff] }
 0x821   : > { %5800 = vmatpush.msra.mxu2 %v8267_v63  ;;  %5159 = vmatpush.msra.mxu3 %v8517_v8  ;;  %v8486_v63 = vunpack.i.l.bf16 %v13299_v4  ;;  %v8202_v39 = vunpack.i.h.bf16 %v15154_v53  ;;  %v13604_v8 = vpack.i.bf16 %v13141_v61, %v12829_v57  ;;  %v8456_v4 = vunpack.i.l.bf16 %v13255_v44 }
 0x822   : > { %6142 = vmatpush.msrb.mxu0 %v8637_v36  ;;  %v13592_v13 = vpop.permute.xlu1 %8724  ;;  %8924 = vrot.lane.b32.xlu2 %v8923_v47, %s9391_s26  ;;  %v8201_v36 = vunpack.i.l.bf16 %v15154_v53  ;;  %v8427_v57 = vunpack.i.h.bf16 %v13204_v26  ;;  %v8397_v53 = vunpack.i.h.bf16 %v13202_v37 }
 0x823   : > { %5801 = vmatpush.msra.mxu2 %v8266_v55  ;;  %5160 = vmatpush.msra.mxu3 %v8516_v3  ;;  %v13596_v38 = vpop.permute.xlu2 %8759  ;;  %v8457_v55 = vunpack.i.h.bf16 %v13255_v44 }
 0x824   : > { %6143 = vmatpush.msrb.mxu0 %v8636_v51  ;;  %8919 = vrot.lane.b32.xlu1 %v8918_v54, %s9391_s26  ;;  %v8933_v51 = vpack.i.bf16 %v15137_v16, %v15136_v30  ;;  %v5527_v54 = vld [vmem:[#allocation4 + $0x160] sm:$0xff] }
 0x825   : > { %5802 = vmatpush.msra.mxu2 %v8237_v29  ;;  %5161 = vmatpush.msra.mxu3 %v8487_v25  ;;  %v15155_v29 = vld [vmem:[#allocation25_spill] sm:$0xff] }
 0x826   : > { %5646 = vmatmul.f32.gmra.mxu2 %v5525_v56  ;;  %v8167_v3 = vunpack.i.h.bf16 %v15155_v29  ;;  %v8166_v44 = vunpack.i.l.bf16 %v15155_v29  ;;  %v4767_v56 = vld [vmem:[#allocation4 + $0x38] sm:$0xff]  ;;  %v8596_v29 = vunpack.i.l.bf16 %v13413_v40 }
 0x827   : > { %5803 = vmatpush.msra.mxu2 %v8236_v17  ;;  %5162 = vmatpush.msra.mxu3 %v8486_v63  ;;  %v8426_v17 = vunpack.i.l.bf16 %v13204_v26  ;;  %v15156_v63 = vld [vmem:[#allocation20_spill] sm:$0xff] }
 0x828   : > { %5014 = vmatmul.f32.gmra.mxu3 %v4765_v49  ;;  %8959 = vrot.lane.b32.xlu0 %v13604_v8, %s9392_s27  ;;  %v13610_v10 = vpop.permute.xlu0 %8734  ;;  %v8132_v49 = vunpack.i.h.bf16 %v15156_v63 }
 0x829   : > { %5804 = vmatpush.msra.mxu2 %v8202_v39  ;;  %5163 = vmatpush.msra.mxu3 %v8457_v55  ;;  %v8131_v39 = vunpack.i.l.bf16 %v15156_v63  ;;  %v8396_v55 = vunpack.i.l.bf16 %v13202_v37  ;;  %v8953_v37 = vpack.i.bf16 %v15150_v24, %v15147_v9  ;;  %v8762_v63 = vunpack.i.h.bf16 %v13596_v38 }
 0x82a   : > { %v13616_v47 = vpop.permute.xlu1 %8739  ;;  %8939 = vrot.lane.b32.xlu2 %v13157_v41, %s9388_s16 }
 0x82b   : > { %5805 = vmatpush.msra.mxu2 %v8201_v36  ;;  %5164 = vmatpush.msra.mxu3 %v8456_v4  ;;  %v13621_v25 = vpop.permute.xlu2 %8764  ;;  %v8597_v36 = vunpack.i.h.bf16 %v13413_v40  ;;  %v8943_v4 = vpack.i.bf16 %v15141_v28, %v15139_v45  ;;  %v8366_v40 = vunpack.i.l.bf16 %v13160_v52 }
 0x82c   : > { %8934 = vrot.lane.b32.xlu1 %v8933_v51, %s9391_s26 }
 0x82d   : > { %5806 = vmatpush.msra.mxu2 %v8167_v3  ;;  %5165 = vmatpush.msra.mxu3 %v8427_v57  ;;  %v8367_v57 = vunpack.i.h.bf16 %v13160_v52  ;;  %v8761_v52 = vunpack.i.l.bf16 %v13596_v38  ;;  %v8552_v38 = vunpack.i.h.bf16 %v13364_v15 }
 0x82e   : > { %5649 = vmatmul.f32.gmra.mxu2 %v5527_v54  ;;  %v5529_v54 = vld [vmem:[#allocation4 + $0x170] sm:$0xff] }
 0x82f   : > { %5807 = vmatpush.msra.mxu2 %v8166_v44  ;;  %5166 = vmatpush.msra.mxu3 %v8426_v17  ;;  %v8592_v44 = vunpack.i.h.bf16 %v13427_v34  ;;  %v5023_v17 = vld [vmem:[#allocation4 + $0x88] sm:$0xff] }
 0x830   : > { %5017 = vmatmul.f32.gmra.mxu3 %v4767_v56  ;;  %8969 = vrot.lane.b32.xlu0 %v13604_v8, %s9393_s28  ;;  %v13632_v26 = vpop.permute.xlu0 %8749  ;;  %v8591_v56 = vunpack.i.l.bf16 %v13427_v34  ;;  %v13662_v34 = vpack.i.bf16 %v15125_v21, %v12762_v46  ;;  %v8582_v46 = vunpack.i.h.bf16 %v13394_v43  ;;  %v5025_v21 = vld [vmem:[#allocation4 + $0x98] sm:$0xff] }
 0x831   : > { %5808 = vmatpush.msra.mxu2 %v8132_v49  ;;  %5167 = vmatpush.msra.mxu3 %v8397_v53  ;;  %v13652_v49 = vpack.i.bf16 %v15129_v12, %v12702_v23  ;;  %v8587_v53 = vunpack.i.h.bf16 %v13366_v27  ;;  %v8586_v23 = vunpack.i.l.bf16 %v13366_v27  ;;  %v13667_v12 = vpack.i.bf16 %v15126_v0, %v12755_v7  ;;  %v5690_v7 = vld [vmem:[#allocation4 + $0x180] sm:$0xff] }
 0x832   : > { %v13639_v3 = vpop.permute.xlu1 %8754  ;;  %8944 = vrot.lane.b32.xlu2 %v8943_v4, %s9391_s26  ;;  %v8551_v27 = vunpack.i.l.bf16 %v13364_v15  ;;  %v8581_v0 = vunpack.i.l.bf16 %v13394_v43  ;;  %v8576_v15 = vunpack.i.l.bf16 %v13407_v22 }
 0x833   : > { %5809 = vmatpush.msra.mxu2 %v8131_v39  ;;  %5168 = vmatpush.msra.mxu3 %v8396_v55  ;;  %v13643_v51 = vpop.permute.xlu2 %8779 }
 0x834   : > { %8954 = vrot.lane.b32.xlu1 %v8953_v37, %s9391_s26  ;;  %v8577_v37 = vunpack.i.h.bf16 %v13407_v22  ;;  %v5692_v22 = vld [vmem:[#allocation4 + $0x190] sm:$0xff] }
 0x835   : > { %5961 = vmatpush.msrb.mxu2 %v8597_v36  ;;  %5169 = vmatpush.msra.mxu3 %v8367_v57  ;;  %v13671_v36 = vpop.f32.mrf.mxu2 }
 0x836   : > { %5652 = vmatmul.f32.gmra.mxu2 %v5529_v54 }
 0x837   : > { %5962 = vmatpush.msrb.mxu2 %v8596_v29  ;;  %5170 = vmatpush.msra.mxu3 %v8366_v40  ;;  %v8522_v29 = vunpack.i.h.bf16 %v13321_v60  ;;  %v8492_v40 = vunpack.i.h.bf16 %v13269_v11 }
 0x838   : > { %5171 = vmatmul.f32.vlgmr.msra.gmra.mxu3 %v5023_v17  ;;  %v13655_v39 = vpop.permute.xlu0 %8769  ;;  %8984 = vrot.lane.b32.xlu0 %v13652_v49, %s9392_s27 }
 0x839   : > { %5963 = vmatpush.msrb.mxu2 %v8592_v44  ;;  %5322 = vmatpush.msrb.mxu3 %v8762_v63  ;;  %v8521_v44 = vunpack.i.l.bf16 %v13321_v60  ;;  %v15157_v60 = vld [vmem:[#allocation33_spill] sm:$0xff]  ;;  %v8491_v63 = vunpack.i.l.bf16 %v13269_v11  ;;  %v13714_v11 = vpack.i.bf16 %v15130_v62, %v12710_v18 }
 0x83a   : > { %v13669_v55 = vpop.permute.xlu1 %8774  ;;  %8964 = vrot.lane.b32.xlu2 %v13662_v34, %s9392_s27 }
 0x83b   : > { %5964 = vmatpush.msrb.mxu2 %v8591_v56  ;;  %5323 = vmatpush.msrb.mxu3 %v8761_v52  ;;  %v13676_v4 = vpop.permute.xlu2 %8804  ;;  %v8207_v56 = vunpack.i.h.bf16 %v15157_v60  ;;  %v8206_v52 = vunpack.i.l.bf16 %v15157_v60  ;;  %v8402_v60 = vunpack.i.h.bf16 %v13172_v14 }
 0x83c   : > { %8974 = vrot.lane.b32.xlu1 %v13667_v12, %s9392_s27 }
 0x83d   : > { %5965 = vmatpush.msrb.mxu2 %v8587_v53  ;;  %5324 = vmatpush.msrb.mxu3 %v8552_v38  ;;  %v13693_v54 = vpop.f32.mrf.mxu2  ;;  %v5027_v53 = vld [vmem:[#allocation4 + $0xa8] sm:$0xff]  ;;  %v15158_v38 = vld [vmem:[#allocation42_spill] sm:$0xff] }
 0x83e   : > { %5810 = vmatmul.f32.vlgmr.msra.gmra.mxu2 %v5690_v7 }
 0x83f   : > { %5966 = vmatpush.msrb.mxu2 %v8586_v23  ;;  %5325 = vmatpush.msrb.mxu3 %v8551_v27  ;;  %v8462_v23 = vunpack.i.h.bf16 %v13266_v20  ;;  %v8461_v27 = vunpack.i.l.bf16 %v13266_v20 }
 0x840   : > { %5174 = vmatmul.f32.gmra.mxu3 %v5025_v21  ;;  %v13685_v57 = vpop.permute.xlu0 %8784  ;;  %8999 = vrot.lane.b32.xlu0 %v13157_v41, %s9387_s15  ;;  %v8171_v21 = vunpack.i.l.bf16 %v15158_v38 }
 0x841   : > { %5967 = vmatpush.msrb.mxu2 %v8582_v46  ;;  %5326 = vmatpush.msrb.mxu3 %v8522_v29  ;;  %v8172_v46 = vunpack.i.h.bf16 %v15158_v38  ;;  %v8747_v38 = vunpack.i.h.bf16 %v13572_v32 }
 0x842   : > { %v13691_v43 = vpop.permute.xlu1 %8789  ;;  %8979 = vrot.lane.b32.xlu2 %v13662_v34, %s9393_s28 }
 0x843   : > { %5968 = vmatpush.msrb.mxu2 %v8581_v0  ;;  %5327 = vmatpush.msrb.mxu3 %v8521_v44  ;;  %v13698_v17 = vpop.permute.xlu2 %8824  ;;  %v13719_v0 = vpack.i.bf16 %v15132_v35, %v12653_v2  ;;  %v15159_v44 = vld [vmem:[#allocation31_spill] sm:$0xff]  ;;  %v8431_v35 = vunpack.i.l.bf16 %v13223_v5 }
 0x844   : > { %8989 = vrot.lane.b32.xlu1 %v13667_v12, %s9393_s28  ;;  %v8137_v18 = vunpack.i.h.bf16 %v15159_v44  ;;  %v5694_v2 = vld [vmem:[#allocation4 + $0x1a0] sm:$0xff] }
 0x845   : > { %5969 = vmatpush.msrb.mxu2 %v8577_v37  ;;  %5328 = vmatpush.msrb.mxu3 %v8492_v40  ;;  %v8432_v37 = vunpack.i.h.bf16 %v13223_v5  ;;  %v13731_v62 = vpop.f32.mrf.mxu2  ;;  %v8136_v40 = vunpack.i.l.bf16 %v15159_v44  ;;  %v8401_v5 = vunpack.i.l.bf16 %v13172_v14 }
 0x846   : > { %5813 = vmatmul.f32.gmra.mxu2 %v5692_v22  ;;  %v13739_v22 = vpack.i.bf16 %v15133_v48, %v12658_v1  ;;  %v8371_v48 = vunpack.i.l.bf16 %v13170_v50 }
 0x847   : > { %5970 = vmatpush.msrb.mxu2 %v8576_v15  ;;  %5329 = vmatpush.msrb.mxu3 %v8491_v63  ;;  %v5029_v15 = vld [vmem:[#allocation4 + $0xb8] sm:$0xff] }
 0x848   : > { %5177 = vmatmul.f32.gmra.mxu3 %v5027_v53  ;;  %v13707_v7 = vpop.permute.xlu0 %8794  ;;  %9004 = vrot.lane.b32.xlu0 %v13652_v49, %s9393_s28  ;;  %v8751_v53 = vunpack.i.l.bf16 %v13632_v26 }
 0x849   : > { %5971 = vmatpush.msrb.mxu2 %v8207_v56  ;;  %5330 = vmatpush.msrb.mxu3 %v8462_v23  ;;  %v8752_v56 = vunpack.i.h.bf16 %v13632_v26  ;;  %v8372_v23 = vunpack.i.h.bf16 %v13170_v50  ;;  %v8746_v26 = vunpack.i.l.bf16 %v13572_v32  ;;  %v8557_v50 = vunpack.i.h.bf16 %v13350_v6  ;;  %v15160_v32 = vld [vmem:[#allocation8_spill] sm:$0xff] }
 0x84a   : > { %v13721_v29 = vpop.permute.xlu1 %8799  ;;  %8994 = vrot.lane.b32.xlu2 %v13714_v11, %s9392_s27 }
 0x84b   : > { %5972 = vmatpush.msrb.mxu2 %v8206_v52  ;;  %5331 = vmatpush.msrb.mxu3 %v8461_v27  ;;  %v13726_v20 = vpop.permute.xlu2 %8839  ;;  %v5190_v27 = vld [vmem:[#allocation4 + $0xc8] sm:$0xff] }
 0x84c   : > { %9009 = vrot.lane.b32.xlu1 %v13719_v0, %s9392_s27 }
 0x84d   : > { %5973 = vmatpush.msrb.mxu2 %v8172_v46  ;;  %5332 = vmatpush.msrb.mxu3 %v8432_v37  ;;  %v5696_v46 = vld [vmem:[#allocation4 + $0x1b0] sm:$0xff]  ;;  %v8742_v37 = vunpack.i.h.bf16 %v13616_v47 }
 0x84e   : > { %5816 = vmatmul.f32.gmra.mxu2 %v5694_v2  ;;  %v8741_v2 = vunpack.i.l.bf16 %v13616_v47 }
 0x84f   : > { %5974 = vmatpush.msrb.mxu2 %v8171_v21  ;;  %5333 = vmatpush.msrb.mxu3 %v8431_v35  ;;  %v13757_v21 = vpop.f32.mrf.mxu2  ;;  %v13768_v35 = vpack.i.bf16 %v15136_v30, %v15160_v32  ;;  %v8736_v30 = vunpack.i.l.bf16 %v13610_v10 }
 0x850   : > { %5180 = vmatmul.f32.gmra.mxu3 %v5029_v15  ;;  %v8810_v63 = vpop.permute.xlu0 %8809  ;;  %9019 = vrot.lane.b32.xlu0 %v13739_v22, %s9392_s27 }
 0x851   : > { %5975 = vmatpush.msrb.mxu2 %v8137_v18  ;;  %5334 = vmatpush.msrb.mxu3 %v8402_v60  ;;  %v8812_v14 = vunpack.i.h.bf16 %v8810_v63  ;;  %v8811_v44 = vunpack.i.l.bf16 %v8810_v63  ;;  %v15161_v60 = vld [vmem:[#allocation11_spill] sm:$0xff] }
 0x852   : > { %v13745_v52 = vpop.permute.xlu1 %8819  ;;  %9014 = vrot.lane.b32.xlu2 %v13714_v11, %s9393_s28 }
 0x853   : > { %5976 = vmatpush.msrb.mxu2 %v8136_v40  ;;  %5335 = vmatpush.msrb.mxu3 %v8401_v5  ;;  %v13749_v1 = vpop.permute.xlu2 %8854  ;;  %v8737_v40 = vunpack.i.h.bf16 %v13610_v10  ;;  %v8556_v5 = vunpack.i.l.bf16 %v13350_v6 }
 0x854   : > { %9024 = vrot.lane.b32.xlu1 %v13719_v0, %s9393_s28 }
 0x855   : > { %6295 = vmatpush.msra.mxu2 %v8752_v56  ;;  %5336 = vmatpush.msrb.mxu3 %v8372_v23  ;;  %v13773_v56 = vpack.i.bf16 %v15137_v16, %v15161_v60 }
 0x856   : > { %5819 = vmatmul.f32.gmra.mxu2 %v5696_v46  ;;  %v8731_v46 = vunpack.i.l.bf16 %v13550_v58 }
 0x857   : > { %6296 = vmatpush.msra.mxu2 %v8751_v53  ;;  %5337 = vmatpush.msrb.mxu3 %v8371_v48  ;;  %v15162_v53 = vld [vmem:[#allocation75_spill] sm:$0xff]  ;;  %v15163_v48 = vld [vmem:[#allocation14_spill] sm:$0xff] }
 0x858   : > { %v13760_v18 = vpop.permute.xlu0 %8814  ;;  %5338 = vmatmul.f32.vlgmr.msrb.gmra.mxu3 %v5190_v27  ;;  %9034 = vrot.lane.b32.xlu0 %v13739_v22, %s9393_s28  ;;  %v8527_v23 = vunpack.i.h.bf16 %v15162_v53  ;;  %v8526_v6 = vunpack.i.l.bf16 %v15162_v53 }
 0x859   : > { %6297 = vmatpush.msra.mxu2 %v8747_v38  ;;  %5489 = vmatpush.msra.mxu3 %v8812_v14  ;;  %v5192_v38 = vld [vmem:[#allocation4 + $0xd8] sm:$0xff]  ;;  %v8732_v14 = vunpack.i.h.bf16 %v13550_v58 }
 0x85a   : > { %v8835_v15 = vpop.permute.xlu1 %8834  ;;  %9029 = vrot.lane.b32.xlu2 %v13768_v35, %s9392_s27 }
 0x85b   : > { %6298 = vmatpush.msra.mxu2 %v8746_v26  ;;  %5490 = vmatpush.msra.mxu3 %v8811_v44  ;;  %v13775_v47 = vpop.permute.xlu2 %8869  ;;  %v8837_v63 = vunpack.i.h.bf16 %v8835_v15  ;;  %v8836_v16 = vunpack.i.l.bf16 %v8835_v15  ;;  %v13788_v26 = vpack.i.bf16 %v15139_v45, %v15163_v48  ;;  %v8726_v15 = vunpack.i.l.bf16 %v13592_v13  ;;  %v15167_v48 = vld [vmem:[#allocation66_spill] sm:$0xff] }
 0x85c   : > { %9039 = vrot.lane.b32.xlu1 %v13773_v56, %s9392_s27 }
 0x85d   : > { %6299 = vmatpush.msra.mxu2 %v8742_v37  ;;  %5491 = vmatpush.msra.mxu3 %v8557_v50  ;;  %v15164_v37 = vld [vmem:[#allocation7_spill] sm:$0xff]  ;;  %v8727_v50 = vunpack.i.h.bf16 %v13592_v13  ;;  %v8721_v13 = vunpack.i.l.bf16 %v13584_v31 }
 0x85e   : > { %6462 = vmatpush.msra.mxu0 %v8837_v63  ;;  %v8497_v44 = vunpack.i.h.bf16 %v15164_v37  ;;  %v8496_v32 = vunpack.i.l.bf16 %v15164_v37  ;;  %v8827_v63 = vunpack.i.h.bf16 %v13698_v17  ;;  %v15168_v37 = vld [vmem:[#allocation71_spill] sm:$0xff] }
 0x85f   : > { %6300 = vmatpush.msra.mxu2 %v8741_v2  ;;  %5492 = vmatpush.msra.mxu3 %v8556_v5  ;;  %v5194_v5 = vld [vmem:[#allocation4 + $0xe8] sm:$0xff] }
 0x860   : > { %6463 = vmatpush.msra.mxu0 %v8836_v16  ;;  %v8830_v10 = vpop.permute.xlu0 %8829  ;;  %5341 = vmatmul.f32.gmra.mxu3 %v5192_v38  ;;  %v8826_v16 = vunpack.i.l.bf16 %v13698_v17  ;;  %v15166_v38 = vld [vmem:[#allocation72_spill] sm:$0xff] }
 0x861   : > { %6301 = vmatpush.msra.mxu2 %v8737_v40  ;;  %5493 = vmatpush.msra.mxu3 %v8527_v23  ;;  %v8832_v27 = vunpack.i.h.bf16 %v8830_v10  ;;  %v8831_v58 = vunpack.i.l.bf16 %v8830_v10  ;;  %v15165_v40 = vld [vmem:[#allocation9_spill] sm:$0xff]  ;;  %v8717_v10 = vunpack.i.h.bf16 %v15167_v48 }
 0x862   : > { %9049 = vrot.lane.b32.xlu0 %v13788_v26, %s9392_s27  ;;  %v13794_v2 = vpop.permute.xlu1 %8849  ;;  %9044 = vrot.lane.b32.xlu2 %v13768_v35, %s9393_s28  ;;  %v8467_v60 = vunpack.i.h.bf16 %v15165_v40  ;;  %v8466_v53 = vunpack.i.l.bf16 %v15165_v40  ;;  %v8406_v40 = vunpack.i.l.bf16 %v15168_v37 }
 0x863   : > { %6302 = vmatpush.msra.mxu2 %v8736_v30  ;;  %5494 = vmatpush.msra.mxu3 %v8526_v6  ;;  %v13797_v45 = vpop.permute.xlu2 %8884  ;;  %v8722_v30 = vunpack.i.h.bf16 %v13584_v31  ;;  %v8822_v31 = vunpack.i.h.bf16 %v13745_v52 }
 0x864   : > { %6464 = vmatpush.msra.mxu0 %v8832_v27  ;;  %9054 = vrot.lane.b32.xlu1 %v13157_v41, %s9379_s24  ;;  %v8716_v27 = vunpack.i.l.bf16 %v15167_v48  ;;  %s9394_s24 = smov 113  }
 0x865   : > { %6303 = vmatpush.msra.mxu2 %v8732_v14  ;;  %5495 = vmatpush.msra.mxu3 %v8497_v44  ;;  %v8437_v14 = vunpack.i.h.bf16 %v15166_v38  ;;  %v8407_v44 = vunpack.i.h.bf16 %v15168_v37 }
 0x866   : > { %6465 = vmatpush.msra.mxu0 %v8831_v58  ;;  %v5857_v58 = vld [vmem:[#allocation4 + $0x1c0] sm:$0xff] }
 0x867   : > { %6304 = vmatpush.msra.mxu2 %v8731_v46  ;;  %5496 = vmatpush.msra.mxu3 %v8496_v32  ;;  %v8436_v46 = vunpack.i.l.bf16 %v15166_v38  ;;  %v5196_v32 = vld [vmem:[#allocation4 + $0xf8] sm:$0xff] }
 0x868   : > { %6466 = vmatpush.msra.mxu0 %v8827_v63  ;;  %v13809_v23 = vpop.permute.xlu0 %8844  ;;  %5344 = vmatmul.f32.gmra.mxu3 %v5194_v5 }
 0x869   : > { %6305 = vmatpush.msra.mxu2 %v8727_v50  ;;  %5497 = vmatpush.msra.mxu3 %v8467_v60  ;;  %v8821_v50 = vunpack.i.l.bf16 %v13745_v52  ;;  %v15169_v60 = vld [vmem:[#allocation23_spill] sm:$0xff] }
 0x86a   : > { %9074 = vrot.lane.b32.xlu0 %v13788_v26, %s9393_s28  ;;  %v13816_v6 = vpop.permute.xlu1 %8864  ;;  %6467 = vmatpush.msra.mxu0 %v8826_v16  ;;  %v13833_v63 = vpack.i.bf16 %v15146_v19, %v15169_v60  ;;  %v15170_v52 = vld [vmem:[#allocation67_spill] sm:$0xff]  ;;  %v8816_v19 = vunpack.i.l.bf16 %v13760_v18 }
 0x86b   : > { %6306 = vmatpush.msra.mxu2 %v8726_v15  ;;  %5498 = vmatpush.msra.mxu3 %v8466_v53  ;;  %v4980_v15 = vpop.f32.mrf.mxu2  ;;  %v8377_v53 = vunpack.i.h.bf16 %v15170_v52  ;;  %v15173_v60 = vld [vmem:[#allocation27_spill] sm:$0xff] }
 0x86c   : > { %9064 = vrot.lane.b32.xlu2 %v13157_v41, %s9389_s23  ;;  %v13823_v17 = vpop.permute.xlu2 %8899  ;;  %9059 = vrot.lane.b32.xlu1 %v13773_v56, %s9393_s28 }
 0x86d   : > { %6307 = vmatpush.msra.mxu2 %v8722_v30  ;;  %5499 = vmatpush.msra.mxu3 %v8437_v14  ;;  %v8817_v30 = vunpack.i.h.bf16 %v13760_v18  ;;  %v15172_v14 = vld [vmem:[#allocation13_spill] sm:$0xff]  ;;  %v5357_v18 = vld [vmem:[#allocation4 + $0x108] sm:$0xff] }
 0x86e   : > { %6468 = vmatpush.msra.mxu0 %v8822_v31  ;;  %5977 = vmatmul.f32.vlgmr.msrb.gmra.mxu2 %v5857_v58  ;;  %v13848_v48 = vpack.i.bf16 %v15145_v33, %v15172_v14  ;;  %v8806_v33 = vunpack.i.l.bf16 %v13676_v4  ;;  %v8796_v14 = vunpack.i.l.bf16 %v13707_v7 }
 0x86f   : > { %6308 = vmatpush.msra.mxu2 %v8721_v13  ;;  %5500 = vmatpush.msra.mxu3 %v8436_v46  ;;  %v15171_v13 = vld [vmem:[#allocation12_spill] sm:$0xff]  ;;  %v8376_v46 = vunpack.i.l.bf16 %v15170_v52  ;;  %v8801_v52 = vunpack.i.l.bf16 %v13721_v29 }
 0x870   : > { %6469 = vmatpush.msra.mxu0 %v8821_v50  ;;  %v13835_v5 = vpop.permute.xlu0 %8859  ;;  %5347 = vmatmul.f32.gmra.mxu3 %v5196_v32  ;;  %v13843_v16 = vpack.i.bf16 %v15141_v28, %v15171_v13  ;;  %v8802_v32 = vunpack.i.h.bf16 %v13721_v29  ;;  %v15174_v29 = vld [vmem:[#allocation35_spill] sm:$0xff] }
 0x871   : > { %6309 = vmatpush.msra.mxu2 %v8717_v10  ;;  %5501 = vmatpush.msra.mxu3 %v8407_v44 }
 0x872   : > { %9089 = vrot.lane.b32.xlu0 %v13833_v63, %s9392_s27  ;;  %v8875_v38 = vpop.permute.xlu1 %8874  ;;  %6470 = vmatpush.msra.mxu0 %v8817_v30  ;;  %v8562_v30 = vunpack.i.h.bf16 %v15173_v60 }
 0x873   : > { %6310 = vmatpush.msra.mxu2 %v8716_v27  ;;  %5502 = vmatpush.msra.mxu3 %v8406_v40  ;;  %v8877_v10 = vunpack.i.h.bf16 %v8875_v38  ;;  %v8807_v27 = vunpack.i.h.bf16 %v13676_v4  ;;  %v8876_v44 = vunpack.i.l.bf16 %v8875_v38  ;;  %v13872_v13 = vpop.f32.mrf.mxu2  ;;  %v8797_v38 = vunpack.i.h.bf16 %v13707_v7  ;;  %v15177_v7 = vld [vmem:[#allocation74_spill] sm:$0xff] }
 0x874   : > { %9069 = vrot.lane.b32.xlu2 %v13843_v16, %s9392_s27  ;;  %v8915_v31 = vpop.permute.xlu2 %8914  ;;  %9079 = vrot.lane.b32.xlu1 %v13848_v48, %s9392_s27 }
 0x875   : > { %5503 = vmatpush.msra.mxu3 %v8377_v53  ;;  %6471 = vmatpush.msra.mxu0 %v8816_v19  ;;  %v8917_v28 = vunpack.i.h.bf16 %v8915_v31  ;;  %v4951_v37 = vpop.f32.mrf.mxu3  ;;  %v8916_v58 = vunpack.i.l.bf16 %v8915_v31  ;;  %v5359_v19 = vld [vmem:[#allocation4 + $0x118] sm:$0xff] }
 0x876   : > { %v4952_v50 = vadd.f32 %v4951_v37, %v13671_v36  ;;  %v8561_v36 = vunpack.i.l.bf16 %v15173_v60  ;;  %v15179_v60 = vld [vmem:[#allocation10_spill] sm:$0xff] }
 0x877   : > { %5504 = vmatpush.msra.mxu3 %v8376_v46  ;;  %6472 = vmatpush.msra.mxu0 %v8807_v27  ;;  %v15175_v46 = vld [vmem:[#allocation21_spill] sm:$0xff] }
 0x878   : > { %6629 = vmatpush.msrb.mxu2 %v8917_v28  ;;  %5505 = vmatmul.f32.vlgmr.msra.gmra.mxu3 %v5357_v18  ;;  %v13859_v40 = vpop.permute.xlu0 %8889  ;;  %v13864_v4 = vadd.f32 %v4980_v15, %v4952_v50  ;;  %v8532_v15 = vunpack.i.h.bf16 %v15174_v29  ;;  %v9108_v31 = vpack.i.bf16 %v13141_v61, %v15175_v46  ;;  %v15178_v50 = vld [vmem:[#allocation22_spill] sm:$0xff] }
 0x879   : > { %5656 = vmatpush.msrb.mxu3 %v8877_v10  ;;  %6473 = vmatpush.msra.mxu0 %v8806_v33  ;;  %v8531_v10 = vunpack.i.l.bf16 %v15174_v29  ;;  %v15176_v33 = vld [vmem:[#allocation15_spill] sm:$0xff]  ;;  %v13897_v61 = vpack.i.bf16 %v15150_v24, %v15178_v50  ;;  %v8471_v24 = vunpack.i.l.bf16 %v15179_v60 }
 0x87a   : > { %9104 = vrot.lane.b32.xlu0 %v13157_v41, %s9390_s25  ;;  %6630 = vmatpush.msrb.mxu2 %v8916_v58  ;;  %v13870_v53 = vpop.permute.xlu1 %8879  ;;  %v8502_v37 = vunpack.i.h.bf16 %v15176_v33 }
 0x87b   : > { %5657 = vmatpush.msrb.mxu3 %v8876_v44  ;;  %6474 = vmatpush.msra.mxu0 %v8802_v32  ;;  %v13893_v44 = vpack.i.bf16 %v15147_v9, %v15177_v7  ;;  %v8501_v32 = vunpack.i.l.bf16 %v15176_v33  ;;  %v8472_v9 = vunpack.i.h.bf16 %v15179_v60 }
 0x87c   : > { %9084 = vrot.lane.b32.xlu2 %v13843_v16, %s9393_s28  ;;  %9094 = vrot.lane.b32.xlu1 %v13848_v48, %s9393_s28  ;;  %v13877_v41 = vpop.permute.xlu2 %8924 }
 0x87d   : > { %5658 = vmatpush.msrb.mxu3 %v8562_v30  ;;  %6475 = vmatpush.msra.mxu0 %v8801_v52  ;;  %v5361_v30 = vld [vmem:[#allocation4 + $0x128] sm:$0xff]  ;;  %v13909_v52 = vpop.f32.mrf.mxu2 }
 0x87e   : > { %v4954_v27 = vpop.f32.mrf.mxu3 }
 0x87f   : > { %5659 = vmatpush.msrb.mxu3 %v8561_v36  ;;  %6476 = vmatpush.msra.mxu0 %v8797_v38  ;;  %v13885_v28 = vadd.f32 %v4954_v27, %v13693_v54 }
 0x880   : > { %5508 = vmatmul.f32.gmra.mxu3 %v5359_v19 }
 0x881   : > { %5660 = vmatpush.msrb.mxu3 %v8532_v15  ;;  %6477 = vmatpush.msra.mxu0 %v8796_v14  ;;  %v13887_v18 = vpop.permute.xlu0 %8904  ;;  %v15180_v15 = vld [vmem:[#allocation16_spill] sm:$0xff] }
 0x882   : > { %9109 = vrot.lane.b32.xlu0 %v9108_v31, %s9391_s26  ;;  %v13902_v54 = vpop.permute.xlu1 %8894  ;;  %v8442_v19 = vunpack.i.h.bf16 %v15180_v15  ;;  %v8441_v14 = vunpack.i.l.bf16 %v15180_v15  ;;  %v15181_v31 = vld [vmem:[#allocation19_spill] sm:$0xff]  ;;  %v8907_v15 = vunpack.i.h.bf16 %v13887_v18 }
 0x883   : > { %5661 = vmatpush.msrb.mxu3 %v8531_v10  ;;  %v8412_v27 = vunpack.i.h.bf16 %v15181_v31  ;;  %v8411_v7 = vunpack.i.l.bf16 %v15181_v31 }
 0x884   : > { %9099 = vrot.lane.b32.xlu2 %v13893_v44, %s9392_s27  ;;  %9119 = vrot.lane.b32.xlu1 %v13897_v61, %s9392_s27  ;;  %v13906_v58 = vpop.permute.xlu2 %8939 }
 0x885   : > { %5662 = vmatpush.msrb.mxu3 %v8502_v37  ;;  %v5363_v37 = vld [vmem:[#allocation4 + $0x138] sm:$0xff] }
 0x886   : > { %v4957_v36 = vpop.f32.mrf.mxu3 }
 0x887   : > { %5663 = vmatpush.msrb.mxu3 %v8501_v32  ;;  %v13913_v38 = vadd.f32 %v4957_v36, %v13731_v62  ;;  %v4989_v32 = vpop.f32.mrf.mxu2 }
 0x888   : > { %5511 = vmatmul.f32.gmra.mxu3 %v5361_v30 }
 0x889   : > { %5664 = vmatpush.msrb.mxu3 %v8472_v9 }
 0x88a   : > { %v13915_v29 = vpop.permute.xlu0 %8929  ;;  %9114 = vrot.lane.b32.xlu0 %v13833_v63, %s9393_s28 }
 0x88b   : > { %5665 = vmatpush.msrb.mxu3 %v8471_v24  ;;  %v15182_v24 = vld [vmem:[#allocation18_spill] sm:$0xff] }
 0x88c   : > { %9124 = vrot.lane.b32.xlu2 %v13893_v44, %s9393_s28  ;;  %9129 = vrot.lane.b32.xlu1 %v13897_v61, %s9393_s28  ;;  %v13925_v10 = vpop.permute.xlu2 %8944  ;;  %v8910_v62 = vpop.permute.xlu1 %8909  ;;  %v8382_v36 = vunpack.i.h.bf16 %v15182_v24 }
 0x88d   : > { %5666 = vmatpush.msrb.mxu3 %v8442_v19  ;;  %v8912_v33 = vunpack.i.h.bf16 %v8910_v62  ;;  %v8911_v60 = vunpack.i.l.bf16 %v8910_v62  ;;  %v8942_v62 = vunpack.i.h.bf16 %v13906_v58 }
 0x88e   : > { %v4960_v50 = vpop.f32.mrf.mxu3 }
 0x88f   : > { %5667 = vmatpush.msrb.mxu3 %v8441_v14  ;;  %6631 = vmatpush.msrb.mxu2 %v8912_v33  ;;  %v4961_v9 = vadd.f32 %v4960_v50, %v13757_v21  ;;  %v8381_v14 = vunpack.i.l.bf16 %v15182_v24  ;;  %v8906_v21 = vunpack.i.l.bf16 %v13887_v18  ;;  %v5524_v33 = vld [vmem:[#allocation4 + $0x148] sm:$0xff]  ;;  %v8901_v18 = vunpack.i.l.bf16 %v13823_v17 }
 0x890   : > { %5514 = vmatmul.f32.gmra.mxu3 %v5363_v37  ;;  %v8902_v37 = vunpack.i.h.bf16 %v13823_v17 }
 0x891   : > { %5668 = vmatpush.msrb.mxu3 %v8412_v27  ;;  %6632 = vmatpush.msrb.mxu2 %v8911_v60  ;;  %v13936_v19 = vadd.f32 %v4989_v32, %v4961_v9  ;;  %v15183_v60 = vld [vmem:[#allocation76_spill] sm:$0xff] }
 0x892   : > { %v13930_v30 = vpop.permute.xlu0 %8949  ;;  %9149 = vrot.lane.b32.xlu0 %v13667_v12, %s9394_s24  ;;  %v8567_v9 = vunpack.i.h.bf16 %v15183_v60  ;;  %v8566_v17 = vunpack.i.l.bf16 %v15183_v60 }
 0x893   : > { %5669 = vmatpush.msrb.mxu3 %v8411_v7  ;;  %6633 = vmatpush.msrb.mxu2 %v8907_v15  ;;  %v8941_v7 = vunpack.i.l.bf16 %v13906_v58  ;;  %v8897_v58 = vunpack.i.h.bf16 %v13902_v54  ;;  %v15184_v15 = vld [vmem:[#allocation28_spill] sm:$0xff] }
 0x894   : > { %9134 = vrot.lane.b32.xlu2 %v13604_v8, %s9394_s24  ;;  %9139 = vrot.lane.b32.xlu1 %v13662_v34, %s9394_s24  ;;  %v13945_v31 = vpop.permute.xlu2 %8964 }
 0x895   : > { %5670 = vmatpush.msrb.mxu3 %v8382_v36  ;;  %6634 = vmatpush.msrb.mxu2 %v8906_v21  ;;  %v13960_v36 = vpop.f32.mrf.mxu2 }
 0x896   : > { %v13947_v27 = vpop.permute.xlu1 %8919 }
 0x897   : > { %5671 = vmatpush.msrb.mxu3 %v8381_v14  ;;  %6635 = vmatpush.msrb.mxu2 %v8902_v37  ;;  %v8537_v14 = vunpack.i.h.bf16 %v15184_v15  ;;  %v15185_v37 = vld [vmem:[#allocation73_spill] sm:$0xff] }
 0x898   : > { %v5009_v50 = vpop.f32.mrf.mxu3  ;;  %5672 = vmatmul.f32.vlgmr.msrb.gmra.mxu3 %v5524_v33  ;;  %v8892_v33 = vunpack.i.h.bf16 %v13859_v40 }
 0x899   : > { %5823 = vmatpush.msra.mxu3 %v8942_v62  ;;  %v13953_v32 = vadd.f32 %v5009_v50, %v13864_v4  ;;  %6636 = vmatpush.msrb.mxu2 %v8901_v18  ;;  %v8896_v4 = vunpack.i.l.bf16 %v13902_v54  ;;  %v5526_v62 = vld [vmem:[#allocation4 + $0x158] sm:$0xff]  ;;  %v8891_v54 = vunpack.i.l.bf16 %v13859_v40  ;;  %v15186_v18 = vld [vmem:[#allocation32_spill] sm:$0xff]  ;;  %v8887_v40 = vunpack.i.h.bf16 %v13797_v45 }
 0x89a   : > { %9169 = vrot.lane.b32.xlu0 %v13667_v12, %s9395_s29  ;;  %v13958_v24 = vpop.permute.xlu0 %8959  ;;  %v13984_v60 = vpack.i.bf16 %v15175_v46, %v15186_v18 }
 0x89b   : > { %5824 = vmatpush.msra.mxu3 %v8941_v7  ;;  %6637 = vmatpush.msrb.mxu2 %v8897_v58  ;;  %v8507_v7 = vunpack.i.h.bf16 %v15185_v37 }
 0x89c   : > { %9144 = vrot.lane.b32.xlu2 %v13604_v8, %s9395_s29  ;;  %9154 = vrot.lane.b32.xlu1 %v13662_v34, %s9395_s29  ;;  %v13969_v12 = vpop.permute.xlu2 %8979  ;;  %v8536_v8 = vunpack.i.l.bf16 %v15184_v15  ;;  %v4984_v34 = vadd.f32 %v13872_v13, %v13885_v28  ;;  %v8506_v13 = vunpack.i.l.bf16 %v15185_v37  ;;  %v8886_v28 = vunpack.i.l.bf16 %v13797_v45 }
 0x89d   : > { %5825 = vmatpush.msra.mxu3 %v8567_v9  ;;  %6638 = vmatpush.msrb.mxu2 %v8896_v4  ;;  %v15187_v4 = vld [vmem:[#allocation70_spill] sm:$0xff]  ;;  %v8881_v45 = vunpack.i.l.bf16 %v13870_v53 }
 0x89e   : > { %v13972_v21 = vpop.permute.xlu1 %8934  ;;  %v8477_v15 = vunpack.i.h.bf16 %v15187_v4 }
 0x89f   : > { %5826 = vmatpush.msra.mxu3 %v8566_v17  ;;  %6639 = vmatpush.msrb.mxu2 %v8892_v33  ;;  %v13991_v17 = vpop.f32.mrf.mxu2  ;;  %v8882_v33 = vunpack.i.h.bf16 %v13870_v53 }
 0x8a0   : > { %5675 = vmatmul.f32.gmra.mxu3 %v5526_v62  ;;  %v5528_v62 = vld [vmem:[#allocation4 + $0x168] sm:$0xff] }
 0x8a1   : > { %5827 = vmatpush.msra.mxu3 %v8537_v14  ;;  %6640 = vmatpush.msrb.mxu2 %v8891_v54  ;;  %v4987_v54 = vadd.f32 %v13909_v52, %v13913_v38  ;;  %v15189_v52 = vld [vmem:[#allocation17_spill] sm:$0xff] }
 0x8a2   : > { %9189 = vrot.lane.b32.xlu0 %v13719_v0, %s9394_s24  ;;  %v13986_v9 = vpop.permute.xlu0 %8969 }
 0x8a3   : > { %5828 = vmatpush.msra.mxu3 %v8536_v8  ;;  %v5012_v50 = vpop.f32.mrf.mxu3  ;;  %6641 = vmatpush.msrb.mxu2 %v8887_v40  ;;  %v8476_v8 = vunpack.i.l.bf16 %v15187_v4  ;;  %v8416_v4 = vunpack.i.l.bf16 %v15189_v52 }
 0x8a4   : > { %v13989_v58 = vadd.f32 %v5012_v50, %v4984_v34  ;;  %9159 = vrot.lane.b32.xlu2 %v13984_v60, %s9392_s27  ;;  %9174 = vrot.lane.b32.xlu1 %v13984_v60, %s9393_s28  ;;  %v13999_v46 = vpop.permute.xlu2 %8994  ;;  %v15188_v34 = vld [vmem:[#allocation69_spill] sm:$0xff]  ;;  %s347_s27 = scalar_lea.vmem %s14525_s9, %s7473_s21 }
 0x8a5   : > { %5829 = vmatpush.msra.mxu3 %v8507_v7  ;;  %6642 = vmatpush.msrb.mxu2 %v8886_v28  ;;  %v8447_v37 = vunpack.i.h.bf16 %v15188_v34  ;;  %v8446_v53 = vunpack.i.l.bf16 %v15188_v34  ;;  %v5530_v28 = vld [vmem:[#allocation4 + $0x178] sm:$0xff] }
 0x8a6   : > { %v14002_v14 = vpop.permute.xlu1 %8954 }
 0x8a7   : > { %5830 = vmatpush.msra.mxu3 %v8506_v13  ;;  %6643 = vmatpush.msrb.mxu2 %v8882_v33  ;;  %v14016_v40 = vpop.f32.mrf.mxu2 }
 0x8a8   : > { %5678 = vmatmul.f32.gmra.mxu3 %v5528_v62 }
 0x8a9   : > { %5831 = vmatpush.msra.mxu3 %v8477_v15  ;;  %6644 = vmatpush.msrb.mxu2 %v8881_v45  ;;  %v15191_v15 = vld [vmem:[#allocation68_spill] sm:$0xff] }
 0x8aa   : > { %9204 = vrot.lane.b32.xlu0 %v13719_v0, %s9395_s29  ;;  %v14014_v18 = vpop.permute.xlu0 %8984  ;;  %v8417_v0 = vunpack.i.h.bf16 %v15189_v52  ;;  %v8387_v62 = vunpack.i.h.bf16 %v15191_v15  ;;  %v8386_v34 = vunpack.i.l.bf16 %v15191_v15 }
 0x8ab   : > { %5832 = vmatpush.msra.mxu3 %v8476_v8  ;;  %v5015_v7 = vpop.f32.mrf.mxu3 }
 0x8ac   : > { %v14012_v50 = vadd.f32 %v5015_v7, %v4987_v54  ;;  %9164 = vrot.lane.b32.xlu2 %v13652_v49, %s9394_s24  ;;  %9179 = vrot.lane.b32.xlu1 %v13714_v11, %s9394_s24  ;;  %v14024_v38 = vpop.permute.xlu2 %9014 }
 0x8ad   : > { %5833 = vmatpush.msra.mxu3 %v8447_v37  ;;  %15190 = vst [vmem:[#allocation57_spill] sm:$0xff] %v14024_v38  ;;  %v8792_v38 = vunpack.i.h.bf16 %v13691_v43 }
 0x8ae   : > { %v14026_v13 = vpop.permute.xlu1 %8974 }
 0x8af   : > { %5834 = vmatpush.msra.mxu3 %v8446_v53  ;;  %v14035_v54 = vpop.f32.mrf.mxu2 }
 0x8b0   : > { %5681 = vmatmul.f32.gmra.mxu3 %v5530_v28 }
 0x8b1   : > { %5835 = vmatpush.msra.mxu3 %v8417_v0  ;;  %v15192_v0 = vld [vmem:[#allocation56_spill] sm:$0xff] }
 0x8b2   : > { %9219 = vrot.lane.b32.xlu0 %v13773_v56, %s9394_s24  ;;  %v9000_v45 = vpop.permute.xlu0 %8999  ;;  %v8632_v28 = vunpack.i.h.bf16 %v15192_v0 }
 0x8b3   : > { %5836 = vmatpush.msra.mxu3 %v8416_v4  ;;  %v5018_v33 = vpop.f32.mrf.mxu3  ;;  %v9002_v37 = vunpack.i.h.bf16 %v9000_v45  ;;  %v9001_v52 = vunpack.i.l.bf16 %v9000_v45 }
 0x8b4   : > { %v14033_v8 = vadd.f32 %v5018_v33, %v13936_v19  ;;  %9184 = vrot.lane.b32.xlu2 %v13652_v49, %s9395_s29  ;;  %9194 = vrot.lane.b32.xlu1 %v13714_v11, %s9395_s29  ;;  %v14042_v7 = vpop.permute.xlu2 %9029  ;;  %v5691_v19 = vld [vmem:[#allocation4 + $0x188] sm:$0xff]  ;;  %v8631_v11 = vunpack.i.l.bf16 %v15192_v0  ;;  %v5859_v0 = vld [vmem:[#allocation4 + $0x1d0] sm:$0xff] }
 0x8b5   : > { %5837 = vmatpush.msra.mxu3 %v8387_v62  ;;  %v15194_v33 = vld [vmem:[#allocation36_spill] sm:$0xff]  ;;  %5980 = vmatmul.f32.gmra.mxu2 %v5859_v0 }
 0x8b6   : > { %v14044_v53 = vpop.permute.xlu1 %8989  ;;  %v8627_v45 = vunpack.i.h.bf16 %v15194_v33 }
 0x8b7   : > { %5838 = vmatpush.msra.mxu3 %v8386_v34  ;;  %v14055_v62 = vpop.f32.mrf.mxu2 }
 0x8b8   : > { %5839 = vmatmul.f32.vlgmr.msra.gmra.mxu3 %v5691_v19 }
 0x8b9   : > { %5990 = vmatpush.msrb.mxu3 %v9002_v37 }
 0x8ba   : > { %9234 = vrot.lane.b32.xlu0 %v13984_v60, %s9394_s24  ;;  %v14049_v4 = vpop.permute.xlu0 %9004 }
 0x8bb   : > { %5991 = vmatpush.msrb.mxu3 %v9001_v52  ;;  %v5172_v49 = vpop.f32.mrf.mxu3  ;;  %15193 = vst [vmem:[#allocation48_spill] sm:$0xff] %v14049_v4  ;;  %v8626_v52 = vunpack.i.l.bf16 %v15194_v33 }
 0x8bc   : > { %v5173_v15 = vadd.f32 %v5172_v49, %v13960_v36  ;;  %9199 = vrot.lane.b32.xlu2 %v13739_v22, %s9394_s24  ;;  %9209 = vrot.lane.b32.xlu1 %v13768_v35, %s9394_s24  ;;  %v14063_v37 = vpop.permute.xlu2 %9044  ;;  %v5693_v36 = vld [vmem:[#allocation4 + $0x198] sm:$0xff] }
 0x8bd   : > { %5992 = vmatpush.msrb.mxu3 %v8632_v28  ;;  %15195 = vst [vmem:[#allocation58_spill] sm:$0xff] %v14063_v37  ;;  %v15196_v28 = vld [vmem:[#allocation29_spill] sm:$0xff] }
 0x8be   : > { %v14061_v34 = vadd.f32 %v5173_v15, %v13953_v32  ;;  %v14065_v19 = vpop.permute.xlu1 %9009  ;;  %v8622_v49 = vunpack.i.h.bf16 %v15196_v28 }
 0x8bf   : > { %5993 = vmatpush.msrb.mxu3 %v8631_v11  ;;  %v8621_v11 = vunpack.i.l.bf16 %v15196_v28 }
 0x8c0   : > { %5842 = vmatmul.f32.gmra.mxu3 %v5693_v36  ;;  %v15197_v36 = vld [vmem:[#allocation26_spill] sm:$0xff] }
 0x8c1   : > { %5994 = vmatpush.msrb.mxu3 %v8627_v45  ;;  %v14077_v45 = vpop.f32.mrf.mxu2 }
 0x8c2   : > { %9239 = vrot.lane.b32.xlu0 %v13984_v60, %s9395_s29  ;;  %v14075_v33 = vpop.permute.xlu0 %9019 }
 0x8c3   : > { %5995 = vmatpush.msrb.mxu3 %v8626_v52  ;;  %v5175_v32 = vpop.f32.mrf.mxu3  ;;  %v8617_v52 = vunpack.i.h.bf16 %v15197_v36 }
 0x8c4   : > { %v5176_v15 = vadd.f32 %v5175_v32, %v13991_v17  ;;  %9214 = vrot.lane.b32.xlu2 %v13739_v22, %s9395_s29  ;;  %9224 = vrot.lane.b32.xlu1 %v13768_v35, %s9395_s29  ;;  %v5695_v17 = vld [vmem:[#allocation4 + $0x1a8] sm:$0xff]  ;;  %v5861_v22 = vld [vmem:[#allocation4 + $0x1e0] sm:$0xff]  ;;  %v15199_v32 = vld [vmem:[#allocation62_spill] sm:$0xff] }
 0x8c5   : > { %5996 = vmatpush.msrb.mxu3 %v8622_v49  ;;  %v8616_v49 = vunpack.i.l.bf16 %v15197_v36  ;;  %5983 = vmatmul.f32.gmra.mxu2 %v5861_v22  ;;  %v8612_v37 = vunpack.i.h.bf16 %v15199_v32 }
 0x8c6   : > { %v14083_v60 = vadd.f32 %v5176_v15, %v13989_v58  ;;  %v9065_v0 = vpop.permute.xlu2 %9064  ;;  %v14085_v28 = vpop.permute.xlu1 %9024  ;;  %v8611_v58 = vunpack.i.l.bf16 %v15199_v32  ;;  %v5863_v32 = vld [vmem:[#allocation4 + $0x1f0] sm:$0xff] }
 0x8c7   : > { %5997 = vmatpush.msrb.mxu3 %v8621_v11  ;;  %15198 = vst [vmem:[#allocation60_spill] sm:$0xff] %v14085_v28  ;;  %v6191_v28 = vld [vmem:[#allocation4 + $0x240] sm:$0xff] }
 0x8c8   : > { %5845 = vmatmul.f32.gmra.mxu3 %v5695_v17 }
 0x8c9   : > { %5998 = vmatpush.msrb.mxu3 %v8617_v52  ;;  %v14097_v36 = vpop.f32.mrf.mxu2  ;;  %v15201_v52 = vld [vmem:[#allocation63_spill] sm:$0xff] }
 0x8ca   : > { %9244 = vrot.lane.b32.xlu0 %v13773_v56, %s9395_s29  ;;  %v14095_v15 = vpop.permute.xlu0 %9034  ;;  %v8607_v17 = vunpack.i.h.bf16 %v15201_v52  ;;  %v8606_v22 = vunpack.i.l.bf16 %v15201_v52 }
 0x8cb   : > { %5999 = vmatpush.msrb.mxu3 %v8616_v49  ;;  %v5178_v35 = vpop.f32.mrf.mxu3  ;;  %15200 = vst [vmem:[#allocation41_spill] sm:$0xff] %v14095_v15 }
 0x8cc   : > { %v5179_v11 = vadd.f32 %v5178_v35, %v14016_v40  ;;  %9229 = vrot.lane.b32.xlu2 %v13788_v26, %s9394_s24  ;;  %9249 = vrot.lane.b32.xlu1 %v13843_v16, %s9394_s24  ;;  %v5697_v40 = vld [vmem:[#allocation4 + $0x1b8] sm:$0xff]  ;;  %v15202_v35 = vld [vmem:[#allocation77_spill] sm:$0xff] }
 0x8cd   : > { %6000 = vmatpush.msrb.mxu3 %v8612_v37  ;;  %5986 = vmatmul.f32.gmra.mxu2 %v5863_v32  ;;  %v8602_v15 = vunpack.i.h.bf16 %v15202_v35 }
 0x8ce   : > { %v14103_v56 = vadd.f32 %v5179_v11, %v14012_v50  ;;  %v14105_v49 = vpop.permute.xlu2 %9069  ;;  %v14107_v37 = vpop.permute.xlu1 %9039 }
 0x8cf   : > { %6001 = vmatpush.msrb.mxu3 %v8611_v58  ;;  %v8601_v58 = vunpack.i.l.bf16 %v15202_v35  ;;  %v5858_v35 = vld [vmem:[#allocation4 + $0x1c8] sm:$0xff] }
 0x8d0   : > { %5848 = vmatmul.f32.gmra.mxu3 %v5697_v40  ;;  %v9067_v40 = vunpack.i.h.bf16 %v9065_v0 }
 0x8d1   : > { %6002 = vmatpush.msrb.mxu3 %v8607_v17  ;;  %v14119_v17 = vpop.f32.mrf.mxu2 }
 0x8d2   : > { %9259 = vrot.lane.b32.xlu0 %v13848_v48, %s9394_s24 }
 0x8d3   : > { %6003 = vmatpush.msrb.mxu3 %v8606_v22  ;;  %v5181_v50 = vpop.f32.mrf.mxu3 }
 0x8d4   : > { %v5182_v11 = vadd.f32 %v5181_v50, %v14035_v54  ;;  %9254 = vrot.lane.b32.xlu2 %v13788_v26, %s9395_s29  ;;  %v14117_v52 = vpop.permute.xlu0 %9049  ;;  %9264 = vrot.lane.b32.xlu1 %v13843_v16, %s9395_s29  ;;  %v6024_v26 = vld [vmem:[#allocation4 + $0x200] sm:$0xff]  ;;  %v8712_v16 = vunpack.i.h.bf16 %v13560_v59 }
 0x8d5   : > { %6004 = vmatpush.msrb.mxu3 %v8602_v15  ;;  %v9066_v15 = vunpack.i.l.bf16 %v9065_v0  ;;  %6144 = vmatmul.f32.vlgmr.msrb.gmra.mxu0 %v6024_v26 }
 0x8d6   : > { %v14124_v22 = vadd.f32 %v5182_v11, %v14033_v8  ;;  %v14126_v32 = vpop.permute.xlu2 %9084  ;;  %v9055_v54 = vpop.permute.xlu1 %9054  ;;  %6311 = vmatmul.f32.vlgmr.msra.gmra.mxu2 %v6191_v28  ;;  %v8791_v8 = vunpack.i.l.bf16 %v13691_v43  ;;  %v8787_v28 = vunpack.i.h.bf16 %v13685_v57 }
 0x8d7   : > { %6005 = vmatpush.msrb.mxu3 %v8601_v58  ;;  %v9057_v50 = vunpack.i.h.bf16 %v9055_v54  ;;  %v9056_v4 = vunpack.i.l.bf16 %v9055_v54 }
 0x8d8   : > { %6006 = vmatmul.f32.vlgmr.msrb.gmra.mxu3 %v5858_v35  ;;  %v15203_v35 = vld [vmem:[#allocation24_spill] sm:$0xff] }
 0x8d9   : > { %6324 = vmatpush.msra.mxu3 %v9067_v40  ;;  %6157 = vmatpush.msrb.mxu1 %v9057_v50  ;;  %v14140_v40 = vpop.f32.mrf.mxu2  ;;  %v8707_v54 = vunpack.i.h.bf16 %v15203_v35  ;;  %v6026_v50 = vld [vmem:[#allocation4 + $0x210] sm:$0xff]  ;;  %v8706_v26 = vunpack.i.l.bf16 %v15203_v35  ;;  %v5862_v35 = vld [vmem:[#allocation4 + $0x1e8] sm:$0xff] }
 0x8da   : > { %9274 = vrot.lane.b32.xlu0 %v13848_v48, %s9395_s29  ;;  %v8711_v48 = vunpack.i.l.bf16 %v13560_v59  ;;  %v6193_v59 = vld [vmem:[#allocation4 + $0x250] sm:$0xff] }
 0x8db   : > { %6325 = vmatpush.msra.mxu3 %v9066_v15  ;;  %v5339_v0 = vpop.f32.mrf.mxu3  ;;  %6158 = vmatpush.msrb.mxu1 %v9056_v4  ;;  %v8786_v15 = vunpack.i.l.bf16 %v13685_v57  ;;  %v8781_v57 = vunpack.i.l.bf16 %v13643_v51 }
 0x8dc   : > { %v14133_v58 = vpop.permute.xlu0 %9074  ;;  %v5340_v11 = vadd.f32 %v5339_v0, %v14055_v62  ;;  %9269 = vrot.lane.b32.xlu2 %v13833_v63, %s9394_s24  ;;  %9279 = vrot.lane.b32.xlu1 %v13893_v44, %s9394_s24 }
 0x8dd   : > { %6326 = vmatpush.msra.mxu3 %v8792_v38  ;;  %6159 = vmatpush.msrb.mxu1 %v8712_v16  ;;  %v5860_v38 = vld [vmem:[#allocation4 + $0x1d8] sm:$0xff]  ;;  %v8782_v16 = vunpack.i.h.bf16 %v13643_v51 }
 0x8de   : > { %v14144_v43 = vpop.permute.xlu2 %9099  ;;  %v14147_v4 = vadd.f32 %v5340_v11, %v14061_v34  ;;  %v14149_v62 = vpop.permute.xlu1 %9059  ;;  %6147 = vmatmul.f32.gmra.mxu0 %v6026_v50  ;;  %6314 = vmatmul.f32.gmra.mxu2 %v6193_v59  ;;  %v8702_v34 = vunpack.i.h.bf16 %v13567_v42  ;;  %v6195_v50 = vld [vmem:[#allocation4 + $0x260] sm:$0xff] }
 0x8df   : > { %6327 = vmatpush.msra.mxu3 %v8791_v8  ;;  %6160 = vmatpush.msrb.mxu1 %v8711_v48 }
 0x8e0   : > { %6009 = vmatmul.f32.gmra.mxu3 %v5860_v38  ;;  %v8777_v38 = vunpack.i.h.bf16 %v13669_v55 }
 0x8e1   : > { %6328 = vmatpush.msra.mxu3 %v8787_v28  ;;  %6161 = vmatpush.msrb.mxu1 %v8707_v54  ;;  %v14166_v48 = vpop.f32.mrf.mxu2  ;;  %v8701_v28 = vunpack.i.l.bf16 %v13567_v42  ;;  %v6028_v42 = vld [vmem:[#allocation4 + $0x220] sm:$0xff] }
 0x8e2   : > { %9289 = vrot.lane.b32.xlu0 %v13897_v61, %s9394_s24 }
 0x8e3   : > { %6329 = vmatpush.msra.mxu3 %v8786_v15  ;;  %v5342_v8 = vpop.f32.mrf.mxu3  ;;  %6162 = vmatpush.msrb.mxu1 %v8706_v26  ;;  %v8772_v26 = vunpack.i.h.bf16 %v13655_v39 }
 0x8e4   : > { %v14159_v0 = vpop.permute.xlu0 %9089  ;;  %v5343_v11 = vadd.f32 %v5342_v8, %v14077_v45  ;;  %9284 = vrot.lane.b32.xlu2 %v13833_v63, %s9395_s29  ;;  %9294 = vrot.lane.b32.xlu1 %v13893_v44, %s9395_s29  ;;  %v15204_v63 = vld [vmem:[#allocation65_spill] sm:$0xff]  ;;  %v8776_v44 = vunpack.i.l.bf16 %v13669_v55 }
 0x8e5   : > { %6330 = vmatpush.msra.mxu3 %v8782_v16  ;;  %6163 = vmatpush.msrb.mxu1 %v8702_v34  ;;  %v8692_v15 = vunpack.i.h.bf16 %v15204_v63  ;;  %v8691_v59 = vunpack.i.l.bf16 %v15204_v63  ;;  %v8771_v34 = vunpack.i.l.bf16 %v13655_v39  ;;  %v5864_v39 = vld [vmem:[#allocation4 + $0x1f8] sm:$0xff] }
 0x8e6   : > { %v14170_v51 = vpop.permute.xlu2 %9124  ;;  %v14173_v54 = vadd.f32 %v5343_v11, %v14083_v60  ;;  %v14175_v45 = vpop.permute.xlu1 %9079  ;;  %6150 = vmatmul.f32.gmra.mxu0 %v6028_v42  ;;  %6317 = vmatmul.f32.gmra.mxu2 %v6195_v50  ;;  %v15205_v60 = vld [vmem:[#allocation38_spill] sm:$0xff]  ;;  %v6030_v42 = vld [vmem:[#allocation4 + $0x230] sm:$0xff] }
 0x8e7   : > { %6331 = vmatpush.msra.mxu3 %v8781_v57  ;;  %6164 = vmatpush.msrb.mxu1 %v8701_v28  ;;  %v8687_v16 = vunpack.i.h.bf16 %v15205_v60  ;;  %v8686_v28 = vunpack.i.l.bf16 %v15205_v60 }
 0x8e8   : > { %6012 = vmatmul.f32.gmra.mxu3 %v5862_v35 }
 0x8e9   : > { %6332 = vmatpush.msra.mxu3 %v8777_v38  ;;  %6165 = vmatpush.msrb.mxu1 %v8692_v15  ;;  %v14186_v11 = vpop.f32.mrf.mxu2  ;;  %v8767_v38 = vunpack.i.h.bf16 %v13621_v25 }
 0x8eb   : > { %6333 = vmatpush.msra.mxu3 %v8776_v44  ;;  %v5345_v57 = vpop.f32.mrf.mxu3  ;;  %6166 = vmatpush.msrb.mxu1 %v8691_v59  ;;  %v8757_v59 = vunpack.i.h.bf16 %v13639_v3 }
 0x8ec   : > { %v9105_v55 = vpop.permute.xlu0 %9104  ;;  %v5346_v8 = vadd.f32 %v5345_v57, %v14097_v36  ;;  %9299 = vrot.lane.b32.xlu2 %v13897_v61, %s9395_s29  ;;  %v15206_v36 = vld [vmem:[#allocation61_spill] sm:$0xff]  ;;  %v8766_v61 = vunpack.i.l.bf16 %v13621_v25 }
 0x8ed   : > { %6334 = vmatpush.msra.mxu3 %v8772_v26  ;;  %6167 = vmatpush.msrb.mxu1 %v8687_v16  ;;  %v8682_v44 = vunpack.i.h.bf16 %v15206_v36  ;;  %v8681_v50 = vunpack.i.l.bf16 %v15206_v36  ;;  %v6197_v26 = vld [vmem:[#allocation4 + $0x270] sm:$0xff]  ;;  %v8756_v16 = vunpack.i.l.bf16 %v13639_v3  ;;  %v6025_v36 = vld [vmem:[#allocation4 + $0x208] sm:$0xff] }
 0x8ee   : > { %v14190_v35 = vpop.permute.xlu2 %9134  ;;  %v14193_v63 = vadd.f32 %v5346_v8, %v14103_v56  ;;  %v14195_v15 = vpop.permute.xlu1 %9094  ;;  %6153 = vmatmul.f32.gmra.mxu0 %v6030_v42  ;;  %6320 = vmatmul.f32.gmra.mxu2 %v6197_v26  ;;  %v15207_v56 = vld [vmem:[#allocation49_spill] sm:$0xff]  ;;  %v9107_v42 = vunpack.i.h.bf16 %v9105_v55  ;;  %v6358_v26 = vld [vmem:[#allocation4 + $0x280] sm:$0xff] }
 0x8ef   : > { %6335 = vmatpush.msra.mxu3 %v8771_v34  ;;  %6168 = vmatpush.msrb.mxu1 %v8686_v28  ;;  %v8677_v60 = vunpack.i.h.bf16 %v15207_v56 }
 0x8f0   : > { %6015 = vmatmul.f32.gmra.mxu3 %v5864_v39 }
 0x8f1   : > { %6336 = vmatpush.msra.mxu3 %v8767_v38  ;;  %6169 = vmatpush.msrb.mxu1 %v8682_v44  ;;  %v14204_v28 = vpop.f32.mrf.mxu2  ;;  %v8676_v38 = vunpack.i.l.bf16 %v15207_v56  ;;  %v6192_v44 = vld [vmem:[#allocation4 + $0x248] sm:$0xff]  ;;  %v6525_v56 = vld [vmem:[#allocation4 + $0x2c0] sm:$0xff] }
 0x8f3   : > { %6337 = vmatpush.msra.mxu3 %v8766_v61  ;;  %v5348_v34 = vpop.f32.mrf.mxu3  ;;  %6170 = vmatpush.msrb.mxu1 %v8681_v50 }
 0x8f4   : > { %v9110_v25 = vpop.permute.xlu0 %9109  ;;  %v5349_v57 = vadd.f32 %v5348_v34, %v14119_v17  ;;  %v8921_v17 = vunpack.i.l.bf16 %v13947_v27 }
 0x8f5   : > { %6338 = vmatpush.msra.mxu3 %v8757_v59  ;;  %v9111_v8 = vunpack.i.l.bf16 %v9110_v25  ;;  %6171 = vmatpush.msrb.mxu1 %v8677_v60  ;;  %v9112_v50 = vunpack.i.h.bf16 %v9110_v25  ;;  %v9106_v59 = vunpack.i.l.bf16 %v9105_v55  ;;  %v8922_v60 = vunpack.i.h.bf16 %v13947_v27 }
 0x8f6   : > { %v14207_v39 = vpop.permute.xlu2 %9144  ;;  %v14210_v61 = vadd.f32 %v5349_v57, %v14124_v22  ;;  %v14212_v3 = vpop.permute.xlu1 %9119  ;;  %6478 = vmatmul.f32.vlgmr.msra.gmra.mxu0 %v6358_v26  ;;  %6645 = vmatmul.f32.vlgmr.msrb.gmra.mxu2 %v6525_v56  ;;  %v8872_v22 = vunpack.i.h.bf16 %v13775_v47  ;;  %v8871_v25 = vunpack.i.l.bf16 %v13775_v47  ;;  %v8926_v55 = vunpack.i.l.bf16 %v13877_v41  ;;  %v6360_v26 = vld [vmem:[#allocation4 + $0x290] sm:$0xff] }
 0x8f7   : > { %6339 = vmatpush.msra.mxu3 %v8756_v16  ;;  %6172 = vmatpush.msrb.mxu1 %v8676_v38  ;;  %v6194_v38 = vld [vmem:[#allocation4 + $0x258] sm:$0xff]  ;;  %v8866_v47 = vunpack.i.l.bf16 %v13816_v6  ;;  %v8862_v56 = vunpack.i.h.bf16 %v13835_v5 }
 0x8f8   : > { %15208 = vst [vmem:[#allocation59_spill] sm:$0xff] %v14210_v61  ;;  %6173 = vmatmul.f32.vlgmr.msrb.gmra.mxu1 %v6025_v36  ;;  %6340 = vmatmul.f32.vlgmr.msra.gmra.mxu3 %v6192_v44 }
 0x8f9   : > { %6658 = vmatpush.msrb.mxu3 %v9111_v8  ;;  %6491 = vmatpush.msra.mxu1 %v9107_v42  ;;  %v6027_v8 = vld [vmem:[#allocation4 + $0x218] sm:$0xff]  ;;  %v14225_v36 = vpop.f32.mrf.mxu2  ;;  %v8867_v42 = vunpack.i.h.bf16 %v13816_v6  ;;  %v8966_v6 = vunpack.i.l.bf16 %v13945_v31 }
 0x8fb   : > { %6659 = vmatpush.msrb.mxu3 %v9112_v50  ;;  %6492 = vmatpush.msra.mxu1 %v9106_v59  ;;  %v14217_v16 = vpop.f32.mrf.mxu3  ;;  %v8927_v50 = vunpack.i.h.bf16 %v13877_v41  ;;  %v8961_v59 = vunpack.i.l.bf16 %v13958_v24 }
 0x8fc   : > { %v14219_v34 = vpop.permute.xlu0 %9114 }
 0x8fd   : > { %6660 = vmatpush.msrb.mxu3 %v8921_v17  ;;  %6493 = vmatpush.msra.mxu1 %v8872_v22  ;;  %v8931_v17 = vunpack.i.l.bf16 %v13915_v29  ;;  %v8932_v22 = vunpack.i.h.bf16 %v13915_v29 }
 0x8fe   : > { %v14223_v57 = vpop.permute.xlu2 %9159  ;;  %v14228_v44 = vpop.permute.xlu1 %9129  ;;  %6481 = vmatmul.f32.gmra.mxu0 %v6360_v26  ;;  %v8946_v26 = vunpack.i.l.bf16 %v13925_v10 }
 0x8ff   : > { %6661 = vmatpush.msrb.mxu3 %v8922_v60  ;;  %v9161_v27 = vunpack.i.l.bf16 %v14223_v57  ;;  %6494 = vmatpush.msra.mxu1 %v8871_v25  ;;  %v8861_v25 = vunpack.i.l.bf16 %v13835_v5  ;;  %v8986_v5 = vunpack.i.l.bf16 %v14014_v18 }
 0x900   : > { %6176 = vmatmul.f32.gmra.mxu1 %v6027_v8  ;;  %6343 = vmatmul.f32.gmra.mxu3 %v6194_v38  ;;  %v6029_v8 = vld [vmem:[#allocation4 + $0x228] sm:$0xff]  ;;  %v8976_v38 = vunpack.i.l.bf16 %v14026_v13 }
 0x901   : > { %6662 = vmatpush.msrb.mxu3 %v8926_v55  ;;  %6495 = vmatpush.msra.mxu1 %v8867_v42  ;;  %v8936_v55 = vunpack.i.l.bf16 %v13972_v21  ;;  %v14247_v42 = vpop.f32.mrf.mxu2 }
 0x902   : > { %6963 = vmatpush.msra.mxu2 %v9161_v27  ;;  %v6196_v27 = vld [vmem:[#allocation4 + $0x268] sm:$0xff] }
 0x903   : > { %6663 = vmatpush.msrb.mxu3 %v8927_v50  ;;  %6496 = vmatpush.msra.mxu1 %v8866_v47  ;;  %v14237_v41 = vpop.f32.mrf.mxu3  ;;  %v8857_v50 = vunpack.i.h.bf16 %v13749_v1  ;;  %v8937_v47 = vunpack.i.h.bf16 %v13972_v21  ;;  %v8852_v21 = vunpack.i.h.bf16 %v13794_v2 }
 0x904   : > { %v14239_v60 = vpop.permute.xlu0 %9149  ;;  %6964 = vmatpush.msra.mxu2 %v8961_v59  ;;  %v8856_v59 = vunpack.i.l.bf16 %v13749_v1  ;;  %v8947_v1 = vunpack.i.h.bf16 %v13925_v10  ;;  %v8847_v10 = vunpack.i.h.bf16 %v13809_v23 }
 0x905   : > { %6664 = vmatpush.msrb.mxu3 %v8931_v17  ;;  %6497 = vmatpush.msra.mxu1 %v8862_v56  ;;  %v6527_v17 = vld [vmem:[#allocation4 + $0x2d0] sm:$0xff]  ;;  %v8996_v56 = vunpack.i.l.bf16 %v13999_v46 }
 0x906   : > { %6965 = vmatpush.msra.mxu2 %v8966_v6  ;;  %v14245_v29 = vpop.permute.xlu1 %9139  ;;  %v6362_v6 = vld [vmem:[#allocation4 + $0x2a0] sm:$0xff] }
 0x907   : > { %6665 = vmatpush.msrb.mxu3 %v8932_v22  ;;  %6498 = vmatpush.msra.mxu1 %v8861_v25  ;;  %v14255_v22 = vpop.permute.xlu2 %9164 }
 0x908   : > { %6966 = vmatpush.msra.mxu2 %v8976_v38  ;;  %6179 = vmatmul.f32.gmra.mxu1 %v6029_v8  ;;  %v9011_v8 = vunpack.i.l.bf16 %v14065_v19  ;;  %v8851_v38 = vunpack.i.l.bf16 %v13794_v2  ;;  %v9031_v2 = vunpack.i.l.bf16 %v14042_v7 }
 0x909   : > { %6666 = vmatpush.msrb.mxu3 %v8936_v55  ;;  %6499 = vmatpush.msra.mxu1 %v8857_v50  ;;  %v9021_v50 = vunpack.i.l.bf16 %v14075_v33 }
 0x90a   : > { %6346 = vmatmul.f32.gmra.mxu3 %v6196_v27  ;;  %6967 = vmatpush.msra.mxu2 %v8986_v5  ;;  %v8951_v27 = vunpack.i.l.bf16 %v13930_v30  ;;  %v6031_v5 = vld [vmem:[#allocation4 + $0x238] sm:$0xff] }
 0x90b   : > { %6667 = vmatpush.msrb.mxu3 %v8937_v47  ;;  %6500 = vmatpush.msra.mxu1 %v8856_v59  ;;  %v14258_v25 = vpop.f32.mrf.mxu3  ;;  %v14269_v59 = vpop.f32.mrf.mxu2 }
 0x90c   : > { %v14260_v55 = vpop.permute.xlu0 %9169  ;;  %6648 = vmatmul.f32.gmra.mxu2 %v6527_v17  ;;  %6484 = vmatmul.f32.gmra.mxu0 %v6362_v6  ;;  %v6198_v17 = vld [vmem:[#allocation4 + $0x278] sm:$0xff]  ;;  %v8956_v6 = vunpack.i.l.bf16 %v14002_v14 }
 0x90d   : > { %6668 = vmatpush.msrb.mxu3 %v8946_v26  ;;  %6968 = vmatpush.msra.mxu2 %v8996_v56  ;;  %v8952_v26 = vunpack.i.h.bf16 %v13930_v30  ;;  %v8846_v56 = vunpack.i.l.bf16 %v13809_v23  ;;  %v6364_v30 = vld [vmem:[#allocation4 + $0x2b0] sm:$0xff]  ;;  %v9051_v23 = vunpack.i.l.bf16 %v14117_v52 }
 0x90e   : > { %6501 = vmatpush.msra.mxu1 %v8852_v21  ;;  %v14267_v47 = vpop.permute.xlu1 %9154  ;;  %v9041_v21 = vunpack.i.l.bf16 %v14107_v37 }
 0x90f   : > { %6669 = vmatpush.msrb.mxu3 %v8947_v1  ;;  %6969 = vmatpush.msra.mxu2 %v9011_v8 }
 0x910   : > { %6502 = vmatpush.msra.mxu1 %v8851_v38  ;;  %v8842_v38 = vunpack.i.h.bf16 %v13726_v20 }
 0x911   : > { %6670 = vmatpush.msrb.mxu3 %v8951_v27  ;;  %6970 = vmatpush.msra.mxu2 %v9021_v50  ;;  %v8957_v27 = vunpack.i.h.bf16 %v14002_v14  ;;  %v9162_v50 = vunpack.i.h.bf16 %v14223_v57  ;;  %v9071_v14 = vunpack.i.l.bf16 %v14105_v49  ;;  %v6526_v57 = vld [vmem:[#allocation4 + $0x2c8] sm:$0xff] }
 0x912   : > { %6182 = vmatmul.f32.gmra.mxu1 %v6031_v5  ;;  %6349 = vmatmul.f32.gmra.mxu3 %v6198_v17  ;;  %v14285_v5 = vpop.permute.xlu2 %9184  ;;  %v6529_v17 = vld [vmem:[#allocation4 + $0x2e0] sm:$0xff] }
 0x913   : > { %6503 = vmatpush.msra.mxu1 %v8847_v10  ;;  %6671 = vmatpush.msrb.mxu3 %v8952_v26  ;;  %v14277_v1 = vpop.f32.mrf.mxu3  ;;  %v8841_v10 = vunpack.i.l.bf16 %v13726_v20  ;;  %v14288_v61 = vpop.f32.mrf.mxu2  ;;  %v8971_v20 = vunpack.i.l.bf16 %v13986_v9 }
 0x914   : > { %6971 = vmatpush.msra.mxu2 %v9031_v2  ;;  %v14279_v8 = vpop.permute.xlu0 %9189  ;;  %6487 = vmatmul.f32.gmra.mxu0 %v6364_v30  ;;  %v6359_v2 = vld [vmem:[#allocation4 + $0x288] sm:$0xff]  ;;  %v9081_v30 = vunpack.i.l.bf16 %v14175_v45 }
 0x915   : > { %6504 = vmatpush.msra.mxu1 %v8846_v56  ;;  %6672 = vmatpush.msrb.mxu3 %v8956_v6 }
 0x916   : > { %6972 = vmatpush.msra.mxu2 %v9041_v21  ;;  %v9175_v26 = vpop.permute.xlu1 %9174  ;;  %v8962_v21 = vunpack.i.h.bf16 %v13958_v24  ;;  %v8981_v24 = vunpack.i.l.bf16 %v13969_v12 }
 0x917   : > { %6505 = vmatpush.msra.mxu1 %v8842_v38  ;;  %6673 = vmatpush.msrb.mxu3 %v8957_v27  ;;  %v9177_v56 = vunpack.i.h.bf16 %v9175_v26  ;;  %v9176_v6 = vunpack.i.l.bf16 %v9175_v26  ;;  %v8967_v38 = vunpack.i.h.bf16 %v13945_v31  ;;  %v8972_v27 = vunpack.i.h.bf16 %v13986_v9 }
 0x918   : > { %6973 = vmatpush.msra.mxu2 %v9051_v23  ;;  %v8977_v26 = vunpack.i.h.bf16 %v14026_v13  ;;  %v8991_v31 = vunpack.i.l.bf16 %v14044_v53  ;;  %v9101_v9 = vunpack.i.l.bf16 %v14144_v43 }
 0x919   : > { %6992 = vmatpush.msra.mxu3 %v9162_v50  ;;  %6506 = vmatpush.msra.mxu1 %v8841_v10  ;;  %v8982_v10 = vunpack.i.h.bf16 %v13969_v12  ;;  %v9121_v12 = vunpack.i.l.bf16 %v14212_v3 }
 0x91a   : > { %6651 = vmatmul.f32.gmra.mxu2 %v6529_v17  ;;  %6507 = vmatmul.f32.vlgmr.msra.gmra.mxu1 %v6359_v2  ;;  %v9091_v17 = vunpack.i.l.bf16 %v14159_v0  ;;  %v14311_v13 = vpop.permute.xlu2 %9199 }
 0x91b   : > { %6974 = vmatpush.msra.mxu2 %v9071_v14  ;;  %6674 = vmatmul.f32.vlgmr.msrb.gmra.mxu3 %v6526_v57  ;;  %v14296_v23 = vpop.f32.mrf.mxu3  ;;  %v8987_v14 = vunpack.i.h.bf16 %v14014_v18  ;;  %v6528_v57 = vld [vmem:[#allocation4 + $0x2d8] sm:$0xff]  ;;  %v8997_v18 = vunpack.i.h.bf16 %v13999_v46  ;;  %v15211_v46 = vld [vmem:[#allocation60_spill] sm:$0xff] }
 0x91c   : > { %6796 = vmatpush.msrb.mxu0 %v9176_v6  ;;  %6993 = vmatpush.msra.mxu3 %v8962_v21  ;;  %v14298_v50 = vpop.permute.xlu0 %9204  ;;  %v6361_v6 = vld [vmem:[#allocation4 + $0x298] sm:$0xff]  ;;  %v14313_v21 = vpop.f32.mrf.mxu2 }
 0x91d   : > { %6825 = vmatpush.msrb.mxu1 %v9177_v56  ;;  %6975 = vmatpush.msra.mxu2 %v9081_v30  ;;  %v8992_v56 = vunpack.i.h.bf16 %v14044_v53 }
 0x91e   : > { %6797 = vmatpush.msrb.mxu0 %v8971_v20  ;;  %6994 = vmatpush.msra.mxu3 %v8967_v38  ;;  %v14306_v2 = vpop.permute.xlu1 %9179  ;;  %v15209_v20 = vld [vmem:[#allocation48_spill] sm:$0xff]  ;;  %v6531_v38 = vld [vmem:[#allocation4 + $0x2f0] sm:$0xff] }
 0x91f   : > { %6826 = vmatpush.msrb.mxu1 %v8972_v27  ;;  %6976 = vmatpush.msra.mxu2 %v9091_v17  ;;  %v9006_v30 = vunpack.i.l.bf16 %v15209_v20  ;;  %v9007_v53 = vunpack.i.h.bf16 %v15209_v20  ;;  %v15210_v27 = vld [vmem:[#allocation57_spill] sm:$0xff]  ;;  %v9032_v20 = vunpack.i.h.bf16 %v14042_v7 }
 0x920   : > { %6798 = vmatpush.msrb.mxu0 %v8981_v24  ;;  %6995 = vmatpush.msra.mxu3 %v8977_v26  ;;  %v9016_v24 = vunpack.i.l.bf16 %v15210_v27  ;;  %v9017_v26 = vunpack.i.h.bf16 %v15210_v27 }
 0x921   : > { %6827 = vmatpush.msrb.mxu1 %v8982_v10  ;;  %6977 = vmatpush.msra.mxu2 %v9101_v9  ;;  %v9026_v9 = vunpack.i.l.bf16 %v15211_v46 }
 0x922   : > { %6799 = vmatpush.msrb.mxu0 %v8991_v31  ;;  %6996 = vmatpush.msra.mxu3 %v8987_v14  ;;  %v9012_v31 = vunpack.i.h.bf16 %v14065_v19  ;;  %v9022_v14 = vunpack.i.h.bf16 %v14075_v33  ;;  %v14335_v27 = vpop.permute.xlu2 %9214 }
 0x923   : > { %6828 = vmatpush.msrb.mxu1 %v8992_v56  ;;  %6978 = vmatpush.msra.mxu2 %v9121_v12  ;;  %v14319_v17 = vpop.f32.mrf.mxu3  ;;  %v9027_v56 = vunpack.i.h.bf16 %v15211_v46  ;;  %v15212_v12 = vld [vmem:[#allocation41_spill] sm:$0xff] }
 0x924   : > { %6510 = vmatmul.f32.gmra.mxu1 %v6361_v6  ;;  %6677 = vmatmul.f32.gmra.mxu3 %v6528_v57  ;;  %v14321_v10 = vpop.permute.xlu0 %9219  ;;  %v9036_v57 = vunpack.i.l.bf16 %v15212_v12  ;;  %v9037_v19 = vunpack.i.h.bf16 %v15212_v12  ;;  %v9072_v12 = vunpack.i.h.bf16 %v14105_v49  ;;  %v9087_v49 = vunpack.i.h.bf16 %v14126_v32 }
 0x925   : > { %6800 = vmatpush.msrb.mxu0 %v9006_v30  ;;  %6997 = vmatpush.msra.mxu3 %v8997_v18  ;;  %v6363_v30 = vld [vmem:[#allocation4 + $0x2a8] sm:$0xff] }
 0x926   : > { %6829 = vmatpush.msrb.mxu1 %v9007_v53  ;;  %6654 = vmatmul.f32.gmra.mxu2 %v6531_v38  ;;  %v14328_v6 = vpop.permute.xlu1 %9194  ;;  %v6530_v18 = vld [vmem:[#allocation4 + $0x2e8] sm:$0xff]  ;;  %v15213_v53 = vld [vmem:[#allocation58_spill] sm:$0xff]  ;;  %v9042_v38 = vunpack.i.h.bf16 %v14107_v37 }
 0x927   : > { %6801 = vmatpush.msrb.mxu0 %v9016_v24  ;;  %6998 = vmatpush.msra.mxu3 %v9012_v31  ;;  %v9046_v33 = vunpack.i.l.bf16 %v15213_v53  ;;  %v6859_v24 = vld [vmem:[#allocation4 + $0x340] sm:$0xff]  ;;  %v9047_v7 = vunpack.i.h.bf16 %v15213_v53  ;;  %v6365_v53 = vld [vmem:[#allocation4 + $0x2b8] sm:$0xff] }
 0x928   : > { %6830 = vmatpush.msrb.mxu1 %v9017_v26  ;;  %v14337_v26 = vpop.f32.mrf.mxu2 }
 0x929   : > { %6802 = vmatpush.msrb.mxu0 %v9026_v9  ;;  %6999 = vmatpush.msra.mxu3 %v9022_v14  ;;  %v9052_v9 = vunpack.i.h.bf16 %v14117_v52  ;;  %v9061_v14 = vunpack.i.l.bf16 %v14149_v62  ;;  %v9077_v52 = vunpack.i.h.bf16 %v14133_v58 }
 0x92a   : > { %6831 = vmatpush.msrb.mxu1 %v9027_v56  ;;  %v9062_v56 = vunpack.i.h.bf16 %v14149_v62  ;;  %v9082_v62 = vunpack.i.h.bf16 %v14175_v45 }
 0x92b   : > { %6803 = vmatpush.msrb.mxu0 %v9036_v57  ;;  %7000 = vmatpush.msra.mxu3 %v9032_v20  ;;  %v14340_v31 = vpop.f32.mrf.mxu3  ;;  %v9076_v57 = vunpack.i.l.bf16 %v14133_v58  ;;  %v9097_v58 = vunpack.i.h.bf16 %v14195_v15 }
 0x92c   : > { %6832 = vmatpush.msrb.mxu1 %v9037_v19  ;;  %6680 = vmatmul.f32.gmra.mxu3 %v6530_v18  ;;  %v14342_v46 = vpop.permute.xlu0 %9234  ;;  %v9136_v19 = vunpack.i.l.bf16 %v14190_v35  ;;  %v6532_v18 = vld [vmem:[#allocation4 + $0x2f8] sm:$0xff] }
 0x92d   : > { %6513 = vmatmul.f32.gmra.mxu1 %v6363_v30  ;;  %7001 = vmatpush.msra.mxu3 %v9042_v38  ;;  %v9236_v37 = vunpack.i.l.bf16 %v14342_v46  ;;  %v9086_v30 = vunpack.i.l.bf16 %v14126_v32  ;;  %v9096_v38 = vunpack.i.l.bf16 %v14195_v15  ;;  %v9141_v32 = vunpack.i.l.bf16 %v14245_v29 }
 0x92e   : > { %6804 = vmatpush.msrb.mxu0 %v9046_v33  ;;  %6833 = vmatpush.msrb.mxu1 %v9047_v7  ;;  %v14350_v20 = vpop.permute.xlu1 %9209  ;;  %v9092_v33 = vunpack.i.h.bf16 %v14159_v0  ;;  %v9102_v7 = vunpack.i.h.bf16 %v14144_v43  ;;  %v9117_v0 = vunpack.i.h.bf16 %v14219_v34  ;;  %v9151_v43 = vunpack.i.l.bf16 %v14239_v60 }
 0x92f   : > { %6979 = vmatmul.f32.vlgmr.msra.gmra.mxu2 %v6859_v24  ;;  %7002 = vmatpush.msra.mxu3 %v9052_v9  ;;  %v14364_v9 = vpop.permute.xlu2 %9229 }
 0x930   : > { %6805 = vmatpush.msrb.mxu0 %v9061_v14  ;;  %6834 = vmatpush.msrb.mxu1 %v9062_v56  ;;  %v9116_v14 = vunpack.i.l.bf16 %v14219_v34  ;;  %v14368_v15 = vpop.f32.mrf.mxu2  ;;  %v5507_v56 = vadd.f32 %v14217_v16, %v14140_v40  ;;  %v9166_v34 = vunpack.i.l.bf16 %v14255_v22  ;;  %v9132_v40 = vunpack.i.h.bf16 %v14228_v44 }
 0x931   : > { %7297 = vmatpush.msrb.mxu2 %v9236_v37  ;;  %7003 = vmatpush.msra.mxu3 %v9072_v12  ;;  %v9122_v37 = vunpack.i.h.bf16 %v14212_v3  ;;  %v5674_v3 = vadd.f32 %v14296_v23, %v14225_v36  ;;  %v9131_v16 = vunpack.i.l.bf16 %v14228_v44  ;;  %v6693_v36 = vld [vmem:[#allocation4 + $0x308] sm:$0xff] }
 0x932   : > { %6806 = vmatpush.msrb.mxu0 %v9076_v57  ;;  %6835 = vmatpush.msrb.mxu1 %v9077_v52  ;;  %v9127_v57 = vunpack.i.h.bf16 %v14170_v51  ;;  %v9126_v52 = vunpack.i.l.bf16 %v14170_v51  ;;  %v9137_v51 = vunpack.i.h.bf16 %v14190_v35  ;;  %v6860_v23 = vld [vmem:[#allocation4 + $0x348] sm:$0xff]  ;;  %v9142_v35 = vunpack.i.h.bf16 %v14245_v29 }
 0x933   : > { %7298 = vmatpush.msrb.mxu2 %v9136_v19  ;;  %7004 = vmatpush.msra.mxu3 %v9082_v62  ;;  %v14360_v24 = vpop.f32.mrf.mxu3  ;;  %v9237_v19 = vunpack.i.h.bf16 %v14342_v46  ;;  %v5518_v62 = vadd.f32 %v5507_v56, %v14147_v4  ;;  %v9181_v4 = vunpack.i.l.bf16 %v14306_v2  ;;  %v9152_v29 = vunpack.i.h.bf16 %v14239_v60 }
 0x934   : > { %6807 = vmatpush.msrb.mxu0 %v9086_v30  ;;  %6836 = vmatpush.msrb.mxu1 %v9087_v49  ;;  %v9240_v45 = vpop.permute.xlu0 %9239  ;;  %v6692_v30 = vld [vmem:[#allocation4 + $0x300] sm:$0xff]  ;;  %v9201_v56 = vunpack.i.l.bf16 %v14311_v13 }
 0x935   : > { %6683 = vmatmul.f32.gmra.mxu3 %v6532_v18  ;;  %6516 = vmatmul.f32.gmra.mxu1 %v6365_v53  ;;  %v9242_v18 = vunpack.i.h.bf16 %v9240_v45  ;;  %v9241_v49 = vunpack.i.l.bf16 %v9240_v45  ;;  %v5510_v45 = vadd.f32 %v14237_v41, %v14166_v48  ;;  %v9156_v48 = vunpack.i.l.bf16 %v14267_v47 }
 0x936   : > { %7005 = vmatpush.msra.mxu3 %v9092_v33  ;;  %6808 = vmatpush.msrb.mxu0 %v9096_v38  ;;  %v14374_v12 = vpop.permute.xlu1 %9224  ;;  %v5685_v33 = vadd.f32 %v5674_v3, %v5518_v62  ;;  %v9146_v38 = vunpack.i.l.bf16 %v14207_v39  ;;  %v5677_v41 = vadd.f32 %v14319_v17, %v14247_v42  ;;  %v9211_v42 = vunpack.i.l.bf16 %v14350_v20  ;;  %v6694_v17 = vld [vmem:[#allocation4 + $0x310] sm:$0xff] }
 0x937   : > { %6837 = vmatpush.msrb.mxu1 %v9097_v58  ;;  %7299 = vmatpush.msrb.mxu2 %v9141_v32  ;;  %v9147_v58 = vunpack.i.h.bf16 %v14207_v39  ;;  %v9157_v39 = vunpack.i.h.bf16 %v14267_v47  ;;  %v5519_v60 = vadd.f32 %v5510_v45, %v14173_v54  ;;  %v9182_v47 = vunpack.i.h.bf16 %v14306_v2  ;;  %v6861_v54 = vld [vmem:[#allocation4 + $0x350] sm:$0xff] }
 0x938   : > { %7006 = vmatpush.msra.mxu3 %v9102_v7  ;;  %6809 = vmatpush.msrb.mxu0 %v9116_v14  ;;  %v14395_v7 = vpop.permute.xlu2 %9254  ;;  %v14403_v14 = vpop.f32.mrf.mxu2  ;;  %v5513_v2 = vadd.f32 %v14258_v25, %v14186_v11  ;;  %v9192_v62 = vunpack.i.h.bf16 %v14279_v8  ;;  %v9196_v11 = vunpack.i.l.bf16 %v14328_v6  ;;  %v5680_v25 = vadd.f32 %v14340_v31, %v14269_v59 }
 0x939   : > { %6838 = vmatpush.msrb.mxu1 %v9117_v0  ;;  %7300 = vmatpush.msrb.mxu2 %v9151_v43  ;;  %v9191_v0 = vunpack.i.l.bf16 %v14279_v8  ;;  %v9172_v43 = vunpack.i.h.bf16 %v14260_v55  ;;  %v5686_v3 = vadd.f32 %v5677_v41, %v5519_v60  ;;  %v9231_v8 = vunpack.i.l.bf16 %v14364_v9 }
 0x93a   : > { %7007 = vmatpush.msra.mxu3 %v9122_v37  ;;  %6810 = vmatpush.msrb.mxu0 %v9126_v52  ;;  %v9167_v37 = vunpack.i.h.bf16 %v14255_v22  ;;  %v6695_v22 = vld [vmem:[#allocation4 + $0x318] sm:$0xff]  ;;  %v9212_v59 = vunpack.i.h.bf16 %v14350_v20  ;;  %v9222_v20 = vunpack.i.h.bf16 %v14321_v10  ;;  %v5516_v45 = vadd.f32 %v14277_v1, %v14204_v28 }
 0x93b   : > { %6839 = vmatpush.msrb.mxu1 %v9127_v57  ;;  %7301 = vmatpush.msrb.mxu2 %v9166_v34  ;;  %v5840_v46 = vpop.f32.mrf.mxu3  ;;  %v9171_v57 = vunpack.i.l.bf16 %v14260_v55  ;;  %v9232_v28 = vunpack.i.h.bf16 %v14364_v9 }
 0x93c   : > { %7326 = vmatpush.msrb.mxu3 %v9237_v19  ;;  %6811 = vmatpush.msrb.mxu0 %v9131_v16  ;;  %v14386_v53 = vpop.permute.xlu0 %9244  ;;  %v5841_v44 = vadd.f32 %v5840_v46, %v14313_v21  ;;  %v6862_v19 = vld [vmem:[#allocation4 + $0x358] sm:$0xff]  ;;  %v9186_v16 = vunpack.i.l.bf16 %v14285_v5  ;;  %v9207_v46 = vunpack.i.h.bf16 %v14298_v50 }
 0x93d   : > { %6840 = vmatpush.msrb.mxu1 %v9132_v40  ;;  %6812 = vmatmul.f32.vlgmr.msrb.gmra.mxu0 %v6692_v30  ;;  %v9187_v40 = vunpack.i.h.bf16 %v14285_v5  ;;  %v9247_v60 = vunpack.i.h.bf16 %v14386_v53 }
 0x93e   : > { %7327 = vmatpush.msrb.mxu3 %v9137_v51  ;;  %6841 = vmatmul.f32.vlgmr.msrb.gmra.mxu1 %v6693_v36  ;;  %v14397_v32 = vadd.f32 %v5841_v44, %v5685_v33  ;;  %v14399_v21 = vpop.permute.xlu1 %9249  ;;  %v9202_v36 = vunpack.i.h.bf16 %v14311_v13  ;;  %v9217_v44 = vunpack.i.h.bf16 %v14335_v27 }
 0x93f   : > { %7008 = vmatmul.f32.vlgmr.msra.gmra.mxu3 %v6860_v23  ;;  %7130 = vmatpush.msra.mxu0 %v9241_v49  ;;  %v5520_v23 = vadd.f32 %v5513_v2, %v14193_v63  ;;  %v9251_v31 = vunpack.i.l.bf16 %v14399_v21  ;;  %v6865_v2 = vld [vmem:[#allocation4 + $0x370] sm:$0xff] }
 0x940   : > { %7159 = vmatpush.msra.mxu1 %v9242_v18  ;;  %7302 = vmatpush.msrb.mxu2 %v9181_v4  ;;  %v9221_v18 = vunpack.i.l.bf16 %v14321_v10  ;;  %v14433_v5 = vpop.permute.xlu2 %9269  ;;  %v14435_v49 = vpop.f32.mrf.mxu2  ;;  %v5683_v10 = vadd.f32 %v14360_v24, %v14288_v61  ;;  %v9246_v61 = vunpack.i.l.bf16 %v14386_v53 }
 0x941   : > { %7328 = vmatpush.msrb.mxu3 %v9142_v35  ;;  %7131 = vmatpush.msra.mxu0 %v9146_v38  ;;  %v9216_v35 = vunpack.i.l.bf16 %v14335_v27  ;;  %v5687_v63 = vadd.f32 %v5680_v25, %v5520_v23  ;;  %v6697_v38 = vld [vmem:[#allocation4 + $0x328] sm:$0xff]  ;;  %v9271_v1 = vunpack.i.l.bf16 %v14433_v5 }
 0x942   : > { %7160 = vmatpush.msra.mxu1 %v9147_v58  ;;  %7303 = vmatpush.msrb.mxu2 %v9191_v0  ;;  %v6696_v58 = vld [vmem:[#allocation4 + $0x320] sm:$0xff]  ;;  %v6864_v27 = vld [vmem:[#allocation4 + $0x368] sm:$0xff] }
 0x943   : > { %7329 = vmatpush.msrb.mxu3 %v9152_v29  ;;  %7132 = vmatpush.msra.mxu0 %v9156_v48  ;;  %v5843_v52 = vpop.f32.mrf.mxu3  ;;  %v6863_v29 = vld [vmem:[#allocation4 + $0x360] sm:$0xff]  ;;  %v9226_v48 = vunpack.i.l.bf16 %v14374_v12 }
 0x944   : > { %7161 = vmatpush.msra.mxu1 %v9157_v39  ;;  %7304 = vmatpush.msrb.mxu2 %v9201_v56  ;;  %v14416_v34 = vpop.permute.xlu0 %9259  ;;  %v5844_v55 = vadd.f32 %v5843_v52, %v14337_v26  ;;  %v9197_v26 = vunpack.i.h.bf16 %v14328_v6  ;;  %v9206_v6 = vunpack.i.l.bf16 %v14298_v50 }
 0x945   : > { %7330 = vmatpush.msrb.mxu3 %v9167_v37  ;;  %7133 = vmatpush.msra.mxu0 %v9171_v57  ;;  %v9261_v13 = vunpack.i.l.bf16 %v14416_v34  ;;  %v15214_v37 = vld [vmem:[#allocation59_spill] sm:$0xff]  ;;  %v9257_v57 = vunpack.i.h.bf16 %v14395_v7 }
 0x946   : > { %7162 = vmatpush.msra.mxu1 %v9172_v43  ;;  %7305 = vmatpush.msrb.mxu2 %v9211_v42  ;;  %v14423_v30 = vadd.f32 %v5844_v55, %v5686_v3  ;;  %v14425_v51 = vpop.permute.xlu1 %9264  ;;  %v5521_v56 = vadd.f32 %v5516_v45, %v15214_v37  ;;  %v9252_v43 = vunpack.i.h.bf16 %v14399_v21 }
 0x947   : > { %7331 = vmatpush.msrb.mxu3 %v9182_v47  ;;  %6815 = vmatmul.f32.gmra.mxu0 %v6694_v17  ;;  %v9256_v47 = vunpack.i.l.bf16 %v14395_v7  ;;  %v9267_v21 = vunpack.i.h.bf16 %v14425_v51  ;;  %v9266_v3 = vunpack.i.l.bf16 %v14425_v51  ;;  %v9272_v7 = vunpack.i.h.bf16 %v14433_v5 }
 0x948   : > { %6844 = vmatmul.f32.gmra.mxu1 %v6695_v22  ;;  %6982 = vmatmul.f32.gmra.mxu2 %v6861_v54  ;;  %v9285_v24 = vpop.permute.xlu2 %9284  ;;  %v5688_v42 = vadd.f32 %v5683_v10, %v5521_v56  ;;  %v9262_v22 = vunpack.i.h.bf16 %v14416_v34  ;;  %v6698_v54 = vld [vmem:[#allocation4 + $0x330] sm:$0xff]  ;;  %v7198_v10 = vld [vmem:[#allocation4 + $0x3e8] sm:$0xff] }
 0x949   : > { %7011 = vmatmul.f32.gmra.mxu3 %v6862_v19  ;;  %7134 = vmatpush.msra.mxu0 %v9186_v16  ;;  %v6866_v16 = vld [vmem:[#allocation4 + $0x378] sm:$0xff]  ;;  %v9287_v25 = vunpack.i.h.bf16 %v9285_v24 }
 0x94a   : > { %7163 = vmatpush.msra.mxu1 %v9187_v40  ;;  %7306 = vmatpush.msrb.mxu2 %v9221_v18  ;;  %v9286_v18 = vunpack.i.l.bf16 %v9285_v24  ;;  %v7200_v24 = vld [vmem:[#allocation4 + $0x3f8] sm:$0xff] }
 0x94b   : > { %7332 = vmatpush.msrb.mxu3 %v9192_v62  ;;  %7135 = vmatpush.msra.mxu0 %v9196_v11  ;;  %v5846_v33 = vpop.f32.mrf.mxu3 }
 0x94c   : > { %7164 = vmatpush.msra.mxu1 %v9197_v26  ;;  %7307 = vmatpush.msrb.mxu2 %v9231_v8  ;;  %v5847_v50 = vadd.f32 %v5846_v33, %v14368_v15  ;;  %v14448_v4 = vpop.permute.xlu0 %9274  ;;  %v9227_v15 = vunpack.i.h.bf16 %v14374_v12  ;;  %v14467_v12 = vpop.f32.mrf.mxu2  ;;  %v7026_v33 = vld [vmem:[#allocation4 + $0x380] sm:$0xff] }
 0x94d   : > { %7333 = vmatpush.msrb.mxu3 %v9202_v36  ;;  %7136 = vmatpush.msra.mxu0 %v9206_v6  ;;  %v9276_v55 = vunpack.i.l.bf16 %v14448_v4  ;;  %v9277_v34 = vunpack.i.h.bf16 %v14448_v4  ;;  %v7196_v4 = vld [vmem:[#allocation4 + $0x3d8] sm:$0xff] }
 0x94e   : > { %7165 = vmatpush.msra.mxu1 %v9207_v46  ;;  %7308 = vmatpush.msrb.mxu2 %v9251_v31  ;;  %v14453_v0 = vadd.f32 %v5847_v50, %v5687_v63  ;;  %v14455_v39 = vpop.permute.xlu1 %9279  ;;  %v7195_v50 = vld [vmem:[#allocation4 + $0x3d0] sm:$0xff] }
 0x94f   : > { %7334 = vmatpush.msrb.mxu3 %v9212_v59  ;;  %7137 = vmatpush.msra.mxu0 %v9216_v35  ;;  %v9281_v41 = vunpack.i.l.bf16 %v14455_v39  ;;  %v9282_v40 = vunpack.i.h.bf16 %v14455_v39  ;;  %v7193_v59 = vld [vmem:[#allocation4 + $0x3c0] sm:$0xff] }
 0x950   : > { %7166 = vmatpush.msra.mxu1 %v9217_v44  ;;  %7309 = vmatpush.msrb.mxu2 %v9261_v13  ;;  %v9300_v5 = vpop.permute.xlu2 %9299  ;;  %v7194_v13 = vld [vmem:[#allocation4 + $0x3c8] sm:$0xff]  ;;  %v7197_v39 = vld [vmem:[#allocation4 + $0x3e0] sm:$0xff] }
 0x951   : > { %7335 = vmatpush.msrb.mxu3 %v9222_v20  ;;  %6818 = vmatmul.f32.gmra.mxu0 %v6696_v58  ;;  %v9301_v6 = vunpack.i.l.bf16 %v9300_v5  ;;  %v9302_v31 = vunpack.i.h.bf16 %v9300_v5  ;;  %v7027_v44 = vld [vmem:[#allocation4 + $0x388] sm:$0xff]  ;;  %v7028_v20 = vld [vmem:[#allocation4 + $0x390] sm:$0xff]  ;;  %v7029_v58 = vld [vmem:[#allocation4 + $0x398] sm:$0xff] }
 0x952   : > { %6847 = vmatmul.f32.gmra.mxu1 %v6697_v38  ;;  %6985 = vmatmul.f32.gmra.mxu2 %v6863_v29  ;;  %v6145_v38 = vpop.f32.mrf.mxu0 }
 0x953   : > { %7014 = vmatmul.f32.gmra.mxu3 %v6864_v27  ;;  %7138 = vmatpush.msra.mxu0 %v9226_v48  ;;  %v5849_v9 = vpop.f32.mrf.mxu3 }
 0x954   : > { %7167 = vmatpush.msra.mxu1 %v9227_v15  ;;  %7310 = vmatpush.msrb.mxu2 %v9271_v1  ;;  %v5850_v17 = vadd.f32 %v5849_v9, %v14403_v14  ;;  %v9290_v53 = vpop.permute.xlu0 %9289  ;;  %v6699_v14 = vld [vmem:[#allocation4 + $0x338] sm:$0xff]  ;;  %v5984_v23 = vpop.f32.mrf.mxu2  ;;  %v7030_v15 = vld [vmem:[#allocation4 + $0x3a0] sm:$0xff] }
 0x955   : > { %7336 = vmatpush.msrb.mxu3 %v9232_v28  ;;  %7139 = vmatpush.msra.mxu0 %v9246_v61  ;;  %v9291_v52 = vunpack.i.l.bf16 %v9290_v53  ;;  %v9292_v62 = vunpack.i.h.bf16 %v9290_v53  ;;  %v7031_v28 = vld [vmem:[#allocation4 + $0x3a8] sm:$0xff]  ;;  %v7199_v61 = vld [vmem:[#allocation4 + $0x3f0] sm:$0xff] }
 0x956   : > { %7168 = vmatpush.msra.mxu1 %v9247_v60  ;;  %7311 = vmatpush.msrb.mxu2 %v9281_v41  ;;  %v14476_v19 = vadd.f32 %v5850_v17, %v5688_v42  ;;  %v9295_v51 = vpop.permute.xlu1 %9294 }
 0x957   : > { %7337 = vmatpush.msrb.mxu3 %v9252_v43  ;;  %7140 = vmatpush.msra.mxu0 %v9256_v47  ;;  %v9296_v26 = vunpack.i.l.bf16 %v9295_v51  ;;  %v9297_v36 = vunpack.i.h.bf16 %v9295_v51  ;;  %v7033_v43 = vld [vmem:[#allocation4 + $0x3b8] sm:$0xff] }
 0x958   : > { %7169 = vmatpush.msra.mxu1 %v9257_v57  ;;  %7312 = vmatpush.msrb.mxu2 %v9291_v52 }
 0x959   : > { %7338 = vmatpush.msrb.mxu3 %v9262_v22  ;;  %7141 = vmatpush.msra.mxu0 %v9266_v3 }
 0x95a   : > { %7170 = vmatpush.msra.mxu1 %v9267_v21  ;;  %6821 = vmatmul.f32.gmra.mxu0 %v6698_v54 }
 0x95b   : > { %7339 = vmatpush.msrb.mxu3 %v9272_v7  ;;  %6850 = vmatmul.f32.gmra.mxu1 %v6699_v14  ;;  %v6007_v11 = vpop.f32.mrf.mxu3  ;;  %v6148_v41 = vpop.f32.mrf.mxu0 }
 0x95c   : > { %6988 = vmatmul.f32.gmra.mxu2 %v6865_v2  ;;  %7017 = vmatmul.f32.gmra.mxu3 %v6866_v16  ;;  %v6008_v8 = vadd.f32 %v6007_v11, %v14435_v49 }
 0x95d   : > { %7142 = vmatpush.msra.mxu0 %v9276_v55  ;;  %7171 = vmatpush.msra.mxu1 %v9277_v34 }
 0x95e   : > { %7340 = vmatpush.msrb.mxu3 %v9282_v40  ;;  %v6019_v46 = vadd.f32 %v6008_v8, %v14397_v32  ;;  %v5987_v32 = vpop.f32.mrf.mxu2 }
 0x95f   : > { %7143 = vmatpush.msra.mxu0 %v9286_v18  ;;  %7172 = vmatpush.msra.mxu1 %v9287_v25 }
 0x960   : > { %7341 = vmatpush.msrb.mxu3 %v9292_v62 }
 0x961   : > { %7144 = vmatpush.msra.mxu0 %v9296_v26  ;;  %7173 = vmatpush.msra.mxu1 %v9297_v36 }
 0x963   : > { %7145 = vmatpush.msra.mxu0 %v9301_v6  ;;  %7174 = vmatpush.msra.mxu1 %v9302_v31  ;;  %v6010_v49 = vpop.f32.mrf.mxu3  ;;  %v6151_v22 = vpop.f32.mrf.mxu0 }
 0x964   : > { %7313 = vmatmul.f32.vlgmr.msrb.gmra.mxu2 %v7193_v59  ;;  %7342 = vmatmul.f32.vlgmr.msrb.gmra.mxu3 %v7194_v13  ;;  %v6011_v35 = vadd.f32 %v6010_v49, %v14467_v12  ;;  %v7032_v12 = vld [vmem:[#allocation4 + $0x3b0] sm:$0xff] }
 0x965   : > { %7146 = vmatmul.f32.vlgmr.msra.gmra.mxu0 %v7026_v33  ;;  %7175 = vmatmul.f32.vlgmr.msra.gmra.mxu1 %v7027_v44 }
 0x966   : > { %v6020_v63 = vadd.f32 %v6011_v35, %v14423_v30  ;;  %v6312_v48 = vpop.f32.mrf.mxu2 }
 0x96b   : > { %v6013_v45 = vpop.f32.mrf.mxu3  ;;  %v6154_v2 = vpop.f32.mrf.mxu0 }
 0x96c   : > { %7316 = vmatmul.f32.gmra.mxu2 %v7195_v50  ;;  %7345 = vmatmul.f32.gmra.mxu3 %v7196_v4  ;;  %v6014_v29 = vadd.f32 %v6013_v45, %v5984_v23 }
 0x96d   : > { %7149 = vmatmul.f32.gmra.mxu0 %v7028_v20  ;;  %7178 = vmatmul.f32.gmra.mxu1 %v7029_v58 }
 0x96e   : > { %v6021_v27 = vadd.f32 %v6014_v29, %v14453_v0  ;;  %v6315_v9 = vpop.f32.mrf.mxu2 }
 0x973   : > { %v6016_v30 = vpop.f32.mrf.mxu3  ;;  %v6479_v11 = vpop.f32.mrf.mxu0 }
 0x974   : > { %7319 = vmatmul.f32.gmra.mxu2 %v7197_v39  ;;  %7348 = vmatmul.f32.gmra.mxu3 %v7198_v10  ;;  %v6017_v1 = vadd.f32 %v6016_v30, %v5987_v32 }
 0x975   : > { %7152 = vmatmul.f32.gmra.mxu0 %v7030_v15  ;;  %7181 = vmatmul.f32.gmra.mxu1 %v7031_v28  ;;  %v6174_v37 = vpop.f32.mrf.mxu1 }
 0x976   : > { %v6022_v56 = vadd.f32 %v6017_v1, %v14476_v19  ;;  %v6175_v60 = vadd.f32 %v6174_v37, %v6145_v38  ;;  %v6318_v54 = vpop.f32.mrf.mxu2 }
 0x978   : > { %v6186_v0 = vadd.f32 %v6175_v60, %v6019_v46 }
 0x97b   : > { %v6341_v57 = vpop.f32.mrf.mxu3  ;;  %v6482_v59 = vpop.f32.mrf.mxu0 }
 0x97c   : > { %7322 = vmatmul.f32.gmra.mxu2 %v7199_v61  ;;  %7351 = vmatmul.f32.gmra.mxu3 %v7200_v24  ;;  %v6342_v47 = vadd.f32 %v6341_v57, %v6312_v48 }
 0x97d   : > { %7155 = vmatmul.f32.gmra.mxu0 %v7032_v12  ;;  %7184 = vmatmul.f32.gmra.mxu1 %v7033_v43  ;;  %v6177_v42 = vpop.f32.mrf.mxu1 }
 0x97e   : > { %v6353_v17 = vadd.f32 %v6342_v47, %v6186_v0  ;;  %v6178_v53 = vadd.f32 %v6177_v42, %v6148_v41  ;;  %v6321_v51 = vpop.f32.mrf.mxu2 }
 0x980   : > { %v6187_v52 = vadd.f32 %v6178_v53, %v6020_v63 }
 0x983   : > { %v6344_v21 = vpop.f32.mrf.mxu3 }
 0x984   : > { %v6345_v3 = vadd.f32 %v6344_v21, %v6315_v9 }
 0x985   : > { %v6180_v19 = vpop.f32.mrf.mxu1 }
 0x986   : > { %v6354_v7 = vadd.f32 %v6345_v3, %v6187_v52  ;;  %v6181_v55 = vadd.f32 %v6180_v19, %v6151_v22  ;;  %v6646_v46 = vpop.f32.mrf.mxu2 }
 0x988   : > { %v6188_v14 = vadd.f32 %v6181_v55, %v6021_v27 }
 0x989   : > { %v6485_v50 = vpop.f32.mrf.mxu0 }
 0x98d   : > { %v6347_v34 = vpop.f32.mrf.mxu3 }
 0x98e   : > { %v6348_v40 = vadd.f32 %v6347_v34, %v6318_v54 }
 0x98f   : > { %v6183_v16 = vpop.f32.mrf.mxu1  ;;  %v6649_v63 = vpop.f32.mrf.mxu2 }
 0x990   : > { %v6355_v62 = vadd.f32 %v6348_v40, %v6188_v14  ;;  %v6184_v18 = vadd.f32 %v6183_v16, %v6154_v2 }
 0x991   : > { %v6488_v10 = vpop.f32.mrf.mxu0 }
 0x992   : > { %v6189_v26 = vadd.f32 %v6184_v18, %v6022_v56 }
 0x995   : > { %v6350_v25 = vpop.f32.mrf.mxu3 }
 0x996   : > { %v6351_v5 = vadd.f32 %v6350_v25, %v6321_v51 }
 0x997   : > { %v6508_v36 = vpop.f32.mrf.mxu1 }
 0x998   : > { %v6356_v8 = vadd.f32 %v6351_v5, %v6189_v26  ;;  %v6509_v23 = vadd.f32 %v6508_v36, %v6479_v11 }
 0x99a   : > { %v6520_v6 = vadd.f32 %v6509_v23, %v6353_v17 }
 0x99d   : > { %v6652_v29 = vpop.f32.mrf.mxu2 }
 0x99e   : > { %v6675_v31 = vpop.f32.mrf.mxu3 }
 0x99f   : > { %v6676_v13 = vadd.f32 %v6675_v31, %v6646_v46 }
 0x9a1   : > { %v6511_v33 = vpop.f32.mrf.mxu1  ;;  %v14488_v44 = vadd.f32 %v6676_v13, %v6520_v6 }
 0x9a2   : > { %v6512_v49 = vadd.f32 %v6511_v33, %v6482_v59 }
 0x9a4   : > { %v6521_v35 = vadd.f32 %v6512_v49, %v6354_v7 }
 0x9a7   : > { %v6678_v32 = vpop.f32.mrf.mxu3 }
 0x9a8   : > { %v6679_v4 = vadd.f32 %v6678_v32, %v6649_v63 }
 0x9a9   : > { %v6655_v28 = vpop.f32.mrf.mxu2 }
 0x9aa   : > { %v6514_v20 = vpop.f32.mrf.mxu1  ;;  %v6688_v58 = vadd.f32 %v6679_v4, %v6521_v35 }
 0x9ab   : > { %v6515_v38 = vadd.f32 %v6514_v20, %v6485_v50 }
 0x9ad   : > { %v6522_v45 = vadd.f32 %v6515_v38, %v6355_v62 }
 0x9af   : > { %v6681_v27 = vpop.f32.mrf.mxu3 }
 0x9b0   : > { %v6682_v39 = vadd.f32 %v6681_v27, %v6652_v29 }
 0x9b2   : > { %v6689_v15 = vadd.f32 %v6682_v39, %v6522_v45  ;;  %v6517_v48 = vpop.f32.mrf.mxu1  ;;  %v6980_v37 = vpop.f32.mrf.mxu2 }
 0x9b3   : > { %v6518_v2 = vadd.f32 %v6517_v48, %v6488_v10 }
 0x9b5   : > { %v6523_v62 = vadd.f32 %v6518_v2, %v6356_v8 }
 0x9b8   : > { %v6684_v30 = vpop.f32.mrf.mxu3 }
 0x9b9   : > { %v6685_v40 = vadd.f32 %v6684_v30, %v6655_v28 }
 0x9ba   : > { %v6813_v1 = vpop.f32.mrf.mxu0 }
 0x9bb   : > { %v6842_v41 = vpop.f32.mrf.mxu1  ;;  %v6690_v23 = vadd.f32 %v6685_v40, %v6523_v62 }
 0x9bc   : > { %v6843_v25 = vadd.f32 %v6842_v41, %v6813_v1 }
 0x9be   : > { %v6854_v50 = vadd.f32 %v6843_v25, %v14488_v44  ;;  %v7362_v44 = vld [vmem:[%s14522_s6 + $0x18] sm:$0xff] }
 0x9c2   : > { %v7009_v56 = vpop.f32.mrf.mxu3 }
 0x9c3   : > { %v7010_v33 = vadd.f32 %v7009_v56, %v6980_v37  ;;  %v7361_v37 = vld [vmem:[%s14522_s6 + $0x10] sm:$0xff] }
 0x9c4   : > { %v6816_v60 = vpop.f32.mrf.mxu0 }
 0x9c5   : > { %v6845_v61 = vpop.f32.mrf.mxu1  ;;  %v7021_v27 = vadd.f32 %v7010_v33, %v6854_v50 }
 0x9c6   : > { %v6846_v51 = vadd.f32 %v6845_v61, %v6816_v60  ;;  %v7360_v61 = vld [vmem:[%s14522_s6 + $0x8] sm:$0xff] }
 0x9c8   : > { %v6855_v31 = vadd.f32 %v6846_v51, %v6688_v58 }
 0x9cb   : > { %v6983_v24 = vpop.f32.mrf.mxu2 }
 0x9cc   : > { %v7012_v12 = vpop.f32.mrf.mxu3 }
 0x9cd   : > { %v7013_v5 = vadd.f32 %v7012_v12, %v6983_v24 }
 0x9ce   : > { %v6819_v0 = vpop.f32.mrf.mxu0 }
 0x9cf   : > { %v6848_v43 = vpop.f32.mrf.mxu1  ;;  %v7022_v8 = vadd.f32 %v7013_v5, %v6855_v31 }
 0x9d0   : > { %v6849_v16 = vadd.f32 %v6848_v43, %v6819_v0  ;;  %v7359_v43 = vld [vmem:[%s14522_s6] sm:$0xff] }
 0x9d2   : > { %v6856_v46 = vadd.f32 %v6849_v16, %v6689_v15 }
 0x9d5   : > { %v6986_v9 = vpop.f32.mrf.mxu2 }
 0x9d6   : > { %v7015_v57 = vpop.f32.mrf.mxu3 }
 0x9d7   : > { %v6822_v47 = vpop.f32.mrf.mxu0  ;;  %v7016_v18 = vadd.f32 %v7015_v57, %v6986_v9 }
 0x9d8   : > { %v6851_v42 = vpop.f32.mrf.mxu1 }
 0x9d9   : > { %v6852_v26 = vadd.f32 %v6851_v42, %v6822_v47  ;;  %v7023_v49 = vadd.f32 %v7016_v18, %v6856_v46 }
 0x9db   : > { %v6857_v35 = vadd.f32 %v6852_v26, %v6690_v23 }
 0x9df   : > { %v6989_v17 = vpop.f32.mrf.mxu2  ;;  %v7018_v53 = vpop.f32.mrf.mxu3 }
 0x9e0   : > { %v7019_v6 = vadd.f32 %v7018_v53, %v6989_v17 }
 0x9e2   : > { %v7147_v22 = vpop.f32.mrf.mxu0  ;;  %v7176_v52 = vpop.f32.mrf.mxu1  ;;  %v7024_v20 = vadd.f32 %v7019_v6, %v6857_v35 }
 0x9e3   : > { %v7177_v38 = vadd.f32 %v7176_v52, %v7147_v22  ;;  %v7371_v22 = vld [vmem:[%s14523_s7] sm:$0x7] }
 0x9e4   : > { %v7372_v52 = vld [vmem:[%s14524_s8] sm:$0x7] }
 0x9e5   : > { %v7188_v28 = vadd.f32 %v7177_v38, %v7021_v27 }
 0x9e7   : > { %v7314_v21 = vpop.f32.mrf.mxu2  ;;  %v7343_v3 = vpop.f32.mrf.mxu3 }
 0x9e8   : > { %v7344_v30 = vadd.f32 %v7343_v3, %v7314_v21 }
 0x9ea   : > { %v7150_v54 = vpop.f32.mrf.mxu0  ;;  %v7179_v19 = vpop.f32.mrf.mxu1  ;;  %v7355_v24 = vadd.f32 %v7344_v30, %v7188_v28 }
 0x9eb   : > { %v7180_v63 = vadd.f32 %v7179_v19, %v7150_v54 }
 0x9ec   : > { %v7363_v42 = vadd.f32 %v7359_v43, %v7355_v24 }
 0x9ed   : > { %v7189_v39 = vadd.f32 %v7180_v63, %v7022_v8 }
 0x9ee   : > { %v7367_v53 = vmax.f32 %v7363_v42, 0.0 }
 0x9ef   : > { %v7317_v7 = vpop.f32.mrf.mxu2  ;;  %v7346_v55 = vpop.f32.mrf.mxu3 }
 0x9f0   : > { %v7347_v10 = vadd.f32 %v7346_v55, %v7317_v7 }
 0x9f2   : > { %v7153_v14 = vpop.f32.mrf.mxu0  ;;  %v7182_v34 = vpop.f32.mrf.mxu1  ;;  %v7356_v56 = vadd.f32 %v7347_v10, %v7189_v39 }
 0x9f3   : > { %v7183_v59 = vadd.f32 %v7182_v34, %v7153_v14 }
 0x9f4   : > { %v7364_v57 = vadd.f32 %v7360_v61, %v7356_v56 }
 0x9f5   : > { %v7190_v45 = vadd.f32 %v7183_v59, %v7023_v49 }
 0x9f6   : > { %v7368_v17 = vmax.f32 %v7364_v57, 0.0 }
 0x9f7   : > { %v7320_v11 = vpop.f32.mrf.mxu2  ;;  %v7349_v36 = vpop.f32.mrf.mxu3 }
 0x9f8   : > { %v7350_v29 = vadd.f32 %v7349_v36, %v7320_v11 }
 0x9fa   : > { %v7156_v13 = vpop.f32.mrf.mxu0  ;;  %v7185_v32 = vpop.f32.mrf.mxu1  ;;  %v7357_v1 = vadd.f32 %v7350_v29, %v7190_v45 }
 0x9fb   : > { %v7186_v4 = vadd.f32 %v7185_v32, %v7156_v13 }
 0x9fc   : > { %v7365_v0 = vadd.f32 %v7361_v37, %v7357_v1 }
 0x9fd   : > { %v7191_v15 = vadd.f32 %v7186_v4, %v7024_v20 }
 0x9fe   : > { %v7369_v47 = vmax.f32 %v7365_v0, 0.0 }
 0x9ff   : > { %v7323_v48 = vpop.f32.mrf.mxu2  ;;  %v7352_v58 = vpop.f32.mrf.mxu3 }
 0xa00   : > { %v7353_v41 = vadd.f32 %v7352_v58, %v7323_v48 }
 0xa02   : > { %v7358_v60 = vadd.f32 %v7353_v41, %v7191_v15 }
 0xa04   : > { %v7366_v12 = vadd.f32 %v7362_v44, %v7358_v60 }
 0xa06   : > { %v7370_v9 = vmax.f32 %v7366_v12, 0.0 }
 0xa08   : > { %7389 = vmatpush.msrb.mxu0 %v7370_v9 }
 0xa0a   : > { %7390 = vmatpush.msrb.mxu0 %v7369_v47 }
 0xa0c   : > { %7391 = vmatpush.msrb.mxu0 %v7368_v17 }
 0xa0e   : > { %7392 = vmatpush.msrb.mxu0 %v7367_v53 }
 0xa0f   : > { %8059 = vmatmul.msk.f32.vlgmr.msrb.gmra.mxu0 %vm7373_vm7, %v7371_v22 }
 0xa8c   : > { %v7394_v21 = vpop.f32.mrf.mxu0 }
 0xa8d   : > { %v7395_v3 = vadd.f32 %v7394_v21, %v7372_v52 }
 0xa8f   : > { %7398 = vst.msk [vmem:[%s347_s27] sm:$0x7] %vm7397_vm8, %v7395_v3 }
 0xa90 PF: > { %s20_s30 = sadd.s32 1, %s9372_s30  }
 0xa91   : > { %p17_p7 = scmp.ge.s32.totalorder %s20_s30, 4  }
 0xa93   :  { %19 = sbr.rel (!%p17_p7) target bundleno = 1 (0x1), region = 108 }
 0xa98   :  { %7418 = vsyncpa [#allocation5], 1 }
 0xa99   :  { %7420 = vsyncpa [#allocation5 + $0x1], 1 }

</bundles_post_ra>
